<compile_context>
chip_gen: v7x
topology: tpu7x:2x2x1
jax: 0.10.0
libtpu: 0.0.40
codegen_flags: <defaults>
</compile_context>

<pallas_src>
import functools

import jax
import jax.numpy as jnp
from jax.experimental import pallas as pl
from jax.experimental.pallas import tpu as pltpu

LANE = 128


def _round_up(x, m):
    return (x + m - 1) // m * m


# --------------------------------------------------------------------------
# In-kernel helper: 3x3 conv (stride 1) + folded BN + ReLU from a zero-padded
# (H+2, W+2, Cin) value, as a single im2col matmul on the MXU.
# --------------------------------------------------------------------------
def _conv3x3_bn_relu(xpad, w_ref, scale, bias, H, W):
    # xpad  : (H+2, W+2, Cin) f32 value with zero border
    # w_ref : (9*Cin, Cout)   weights flattened in (dy, dx, cin) row order
    # scale : (1, Cout)       folded BN scale
    # bias  : (1, Cout)       folded BN bias (conv bias included)
    # returns (H*W, Cout) float32, post-ReLU
    Cin = xpad.shape[-1]
    taps = [xpad[dy:dy + H, dx:dx + W, :].reshape(H * W, Cin)
            for dy in range(3) for dx in range(3)]
    patches = jnp.concatenate(taps, axis=-1)                    # (H*W, 9*Cin)
    acc = jnp.dot(patches, w_ref[...], preferred_element_type=jnp.float32)
    return jnp.maximum(acc * scale + bias, 0.0)


# --------------------------------------------------------------------------
# Fused kernel: conv1 -> conv2 -> conv3 -> 2x2 maxpool with argmax
# --------------------------------------------------------------------------
def _down3_kernel(x_ref, w1_ref, w2_ref, w3_ref,
                  s1_ref, b1_ref, s2_ref, b2_ref, s3_ref, b3_ref,
                  o_ref, idx_ref, ypad_ref):
    Hp2, Wp2 = x_ref.shape[1], x_ref.shape[2]
    H, W = Hp2 - 2, Wp2 - 2
    _, Hh, Wh, Cp = o_ref.shape

    # Zero the padded scratch every grid step (border must stay zero; interior
    # is fully overwritten).  Done per step so "parallel" batch sharding across
    # TensorCores stays correct.
    ypad_ref[...] = jnp.zeros_like(ypad_ref)

    # conv1 reads straight from the (already spatially padded) input block.
    y1 = _conv3x3_bn_relu(x_ref[0].astype(jnp.float32), w1_ref,
                          s1_ref[...], b1_ref[...], H, W)
    ypad_ref[1:H + 1, 1:W + 1, :] = y1.reshape(H, W, Cp)

    # conv2 re-uses the same padded scratch for its output (border stays zero).
    y2 = _conv3x3_bn_relu(ypad_ref[...], w2_ref, s2_ref[...], b2_ref[...], H, W)
    ypad_ref[1:H + 1, 1:W + 1, :] = y2.reshape(H, W, Cp)

    # conv3 output never needs spatial padding -> kept as a value.
    y3 = _conv3x3_bn_relu(ypad_ref[...], w3_ref, s3_ref[...], b3_ref[...], H, W)

    # ---- 2x2 max-pool (stride 2) with flat argmax (h*W + w per (n,c) plane) --
    # Static (non-strided) indexing only: split the row axis as (Hh, 2, Wh, 2).
    y5 = y3.reshape(Hh, 2, Wh, 2, Cp)
    a = y5[:, 0, :, 0, :]          # (2i,   2j)
    b = y5[:, 0, :, 1, :]          # (2i,   2j+1)
    c = y5[:, 1, :, 0, :]          # (2i+1, 2j)
    d = y5[:, 1, :, 1, :]          # (2i+1, 2j+1)

    row = jax.lax.broadcasted_iota(jnp.int32, (Hh, Wh, Cp), 0)
    col = jax.lax.broadcasted_iota(jnp.int32, (Hh, Wh, Cp), 1)
    ia = (2 * row) * W + 2 * col
    ib = ia + 1
    ic = ia + W
    idd = ia + W + 1

    best, bidx = a, ia
    for cand, cidx in ((b, ib), (c, ic), (d, idd)):
        take = cand > best         # strict >: first occurrence wins ties (PyTorch)
        best = jnp.where(take, cand, best)
        bidx = jnp.where(take, cidx, bidx)

    o_ref[0] = best.astype(o_ref.dtype)
    idx_ref[0] = bidx


# --------------------------------------------------------------------------
# Parameter folding / padding (wrapper side, pure JAX glue)
# --------------------------------------------------------------------------
def _prep_layer(p, cin, cout, cin_p, cout_p, eps=1e-5):
    # pad channels to lane width and fold conv bias + BN into (scale, bias)
    w = jnp.zeros((3, 3, cin_p, cout_p), jnp.float32)
    w = w.at[:, :, :cin, :cout].set(p["w"].astype(jnp.float32))
    w = w.reshape(9 * cin_p, cout_p)                      # (dy, dx, cin) row order
    inv = p["gamma"] / jnp.sqrt(p["var"] + eps)
    scale = inv
    bias = p["beta"] + (p["b"] - p["mean"]) * inv
    scale_p = jnp.zeros((1, cout_p), jnp.float32).at[0, :cout].set(scale)
    bias_p = jnp.zeros((1, cout_p), jnp.float32).at[0, :cout].set(bias)
    return w, scale_p, bias_p


@functools.partial(jax.jit, static_argnames=("cin", "cout"))
def _down3_forward(x_nchw, p1, p2, p3, *, cin, cout):
    N, _, H, W = x_nchw.shape
    Hh, Wh = H // 2, W // 2
    cin_p = _round_up(cin, LANE)
    cout_p = _round_up(cout, LANE)

    # NHWC, spatial zero-pad of 1 (conv padding) and lane-pad of channels.
    x = jnp.transpose(x_nchw, (0, 2, 3, 1)).astype(jnp.float32)
    x = jnp.pad(x, ((0, 0), (1, 1), (1, 1), (0, cin_p - cin)))

    w1, s1, b1 = _prep_layer(p1, cin, cout, cin_p, cout_p)
    w2, s2, b2 = _prep_layer(p2, cout, cout, cout_p, cout_p)
    w3, s3, b3 = _prep_layer(p3, cout, cout, cout_p, cout_p)

    pooled, idx = pl.pallas_call(
        _down3_kernel,
        out_shape=(jax.ShapeDtypeStruct((N, Hh, Wh, cout_p), jnp.float32),
                   jax.ShapeDtypeStruct((N, Hh, Wh, cout_p), jnp.int32)),
        grid_spec=pltpu.PrefetchScalarGridSpec(
            num_scalar_prefetch=0,
            grid=(N,),
            in_specs=[
                pl.BlockSpec((1, H + 2, W + 2, cin_p), lambda n: (n, 0, 0, 0)),
                pl.BlockSpec((9 * cin_p, cout_p), lambda n: (0, 0)),
                pl.BlockSpec((9 * cout_p, cout_p), lambda n: (0, 0)),
                pl.BlockSpec((9 * cout_p, cout_p), lambda n: (0, 0)),
                pl.BlockSpec((1, cout_p), lambda n: (0, 0)),
                pl.BlockSpec((1, cout_p), lambda n: (0, 0)),
                pl.BlockSpec((1, cout_p), lambda n: (0, 0)),
                pl.BlockSpec((1, cout_p), lambda n: (0, 0)),
                pl.BlockSpec((1, cout_p), lambda n: (0, 0)),
                pl.BlockSpec((1, cout_p), lambda n: (0, 0)),
            ],
            out_specs=(pl.BlockSpec((1, Hh, Wh, cout_p), lambda n: (n, 0, 0, 0)),
                       pl.BlockSpec((1, Hh, Wh, cout_p), lambda n: (n, 0, 0, 0))),
            scratch_shapes=[
                pltpu.VMEM((H + 2, W + 2, cout_p), jnp.float32),
            ],
        ),
        compiler_params=pltpu.CompilerParams(
            dimension_semantics=("parallel",)),
    )(x, w1, w2, w3, s1, b1, s2, b2, s3, b3)

    pooled_nchw = jnp.transpose(pooled[..., :cout], (0, 3, 1, 2)).astype(x_nchw.dtype)
    idx_nchw = jnp.transpose(idx[..., :cout], (0, 3, 1, 2))
    return pooled_nchw, idx_nchw


def segnet_down3(x_nchw, p1, p2, p3):
    """Forward pass of segnetDown3. Input NCHW; outputs NCHW (like PyTorch)."""
    N, Cin, H, W = x_nchw.shape
    Cout = p1["w"].shape[-1]
    assert H % 2 == 0 and W % 2 == 0
    pooled, idx = _down3_forward(x_nchw, p1, p2, p3, cin=Cin, cout=Cout)
    unpooled_shape = (N, Cout, H, W)
    return pooled, idx, unpooled_shape


# --------------------------------------------------------------------------
# Pure-JAX reference (for numerical validation only)
# --------------------------------------------------------------------------
def _reference_prepool(x_nchw, params, eps=1e-5):
    y = x_nchw.astype(jnp.float32)
    for p in params:
        y = jax.lax.conv_general_dilated(
            y, p["w"].astype(jnp.float32), window_strides=(1, 1), padding="SAME",
            dimension_numbers=("NCHW", "HWIO", "NCHW"))
        y = y + p["b"][None, :, None, None]
        inv = p["gamma"] / jnp.sqrt(p["var"] + eps)
        y = (y - p["mean"][None, :, None, None]) * inv[None, :, None, None]
        y = y + p["beta"][None, :, None, None]
        y = jnp.maximum(y, 0.0)
    return y


# --------------------------------------------------------------------------
# Parameters
# --------------------------------------------------------------------------
def init_params(key, in_size, out_size):
    def layer(k, cin, cout):
        ks = jax.random.split(k, 6)
        return dict(
            w=0.1 * jax.random.normal(ks[0], (3, 3, cin, cout), jnp.float32),
            b=0.1 * jax.random.normal(ks[1], (cout,), jnp.float32),
            gamma=1.0 + 0.1 * jax.random.normal(ks[2], (cout,), jnp.float32),
            beta=0.1 * jax.random.normal(ks[3], (cout,), jnp.float32),
            mean=0.1 * jax.random.normal(ks[4], (cout,), jnp.float32),
            var=jax.random.uniform(ks[5], (cout,), jnp.float32, 0.5, 1.5),
        )

    k1, k2, k3 = jax.random.split(key, 3)
    return (layer(k1, in_size, out_size),
            layer(k2, out_size, out_size),
            layer(k3, out_size, out_size))


if __name__ == "__main__":
    N, IN_SIZE, OUT_SIZE, H, W = 2, 4, 8, 16, 16

    key = jax.random.PRNGKey(0)
    k_x, k_p = jax.random.split(key)
    x = jax.random.normal(k_x, (N, IN_SIZE, H, W), jnp.float32)
    p1, p2, p3 = init_params(k_p, IN_SIZE, OUT_SIZE)

    outputs, indices, unpooled_shape = segnet_down3(x, p1, p2, p3)
    jax.block_until_ready(outputs)
    jax.block_until_ready(indices)

    assert outputs.shape == (N, OUT_SIZE, H // 2, W // 2)
    assert indices.shape == (N, OUT_SIZE, H // 2, W // 2)
    assert unpooled_shape == (N, OUT_SIZE, H, W)
    assert bool(jnp.all(outputs >= 0.0))                       # post-ReLU -> pooled >= 0
    assert bool(jnp.all((indices >= 0) & (indices < H * W)))   # flat h*W + w range

    # Numerical check against a pure-JAX reference.
    y_ref = _reference_prepool(x, (p1, p2, p3))                # (N, C, H, W) pre-pool
    pooled_ref = jax.lax.reduce_window(
        y_ref, -jnp.inf, jax.lax.max,
        window_dimensions=(1, 1, 2, 2), window_strides=(1, 1, 2, 2),
        padding="VALID")
    assert jnp.allclose(outputs, pooled_ref, rtol=1e-3, atol=1e-3)
    # Indices must point at (near-)maximal values of the reference feature map.
    gathered = jnp.take_along_axis(
        y_ref.reshape(N, OUT_SIZE, H * W),
        indices.reshape(N, OUT_SIZE, -1).astype(jnp.int32), axis=-1
    ).reshape(N, OUT_SIZE, H // 2, W // 2)
    assert jnp.allclose(gathered, pooled_ref, rtol=1e-3, atol=1e-3)

    print("KERNEL_OK")
</pallas_src>

<mosaic_0001>
module attributes {stable_mosaic.version = 11 : i64} {
  func.func @_down3_kernel(%arg0: i32, %arg1: memref<1x18x18x128xf32, #tpu.memory_space<vmem>>, %arg2: memref<1152x128xf32, #tpu.memory_space<vmem>>, %arg3: memref<1152x128xf32, #tpu.memory_space<vmem>>, %arg4: memref<1152x128xf32, #tpu.memory_space<vmem>>, %arg5: memref<1x128xf32, #tpu.memory_space<vmem>>, %arg6: memref<1x128xf32, #tpu.memory_space<vmem>>, %arg7: memref<1x128xf32, #tpu.memory_space<vmem>>, %arg8: memref<1x128xf32, #tpu.memory_space<vmem>>, %arg9: memref<1x128xf32, #tpu.memory_space<vmem>>, %arg10: memref<1x128xf32, #tpu.memory_space<vmem>>, %arg11: memref<1x8x8x128xf32, #tpu.memory_space<vmem>>, %arg12: memref<1x8x8x128xi32, #tpu.memory_space<vmem>>, %arg13: memref<18x18x128xf32, #tpu.memory_space<vmem>>) attributes {dimension_semantics = [#tpu.dimension_semantics<parallel>], iteration_bounds = array<i64: 2>, scalar_prefetch = 0 : i64, scratch_operands = 1 : i64, tpu.core_type = #tpu.core_type<tc>, window_params = [{transform_indices = @transform_0, window_bounds = array<i64: 1, 18, 18, 128>}, {pipeline_mode = #tpu.pipeline_mode<synchronous>, transform_indices = @transform_1, window_bounds = array<i64: 1152, 128>}, {pipeline_mode = #tpu.pipeline_mode<synchronous>, transform_indices = @transform_2, window_bounds = array<i64: 1152, 128>}, {pipeline_mode = #tpu.pipeline_mode<synchronous>, transform_indices = @transform_3, window_bounds = array<i64: 1152, 128>}, {pipeline_mode = #tpu.pipeline_mode<synchronous>, transform_indices = @transform_4, window_bounds = array<i64: 1, 128>}, {pipeline_mode = #tpu.pipeline_mode<synchronous>, transform_indices = @transform_5, window_bounds = array<i64: 1, 128>}, {pipeline_mode = #tpu.pipeline_mode<synchronous>, transform_indices = @transform_6, window_bounds = array<i64: 1, 128>}, {pipeline_mode = #tpu.pipeline_mode<synchronous>, transform_indices = @transform_7, window_bounds = array<i64: 1, 128>}, {pipeline_mode = #tpu.pipeline_mode<synchronous>, transform_indices = @transform_8, window_bounds = array<i64: 1, 128>}, {pipeline_mode = #tpu.pipeline_mode<synchronous>, transform_indices = @transform_9, window_bounds = array<i64: 1, 128>}, {transform_indices = @transform_10, window_bounds = array<i64: 1, 8, 8, 128>}, {transform_indices = @transform_11, window_bounds = array<i64: 1, 8, 8, 128>}]} {
    %cst = arith.constant 0.000000e+00 : f32
    %0 = vector.broadcast %cst : f32 to vector<18x18x128xf32>
    %c0 = arith.constant 0 : index
    %c0_0 = arith.constant 0 : index
    %c0_1 = arith.constant 0 : index
    %1 = vector.load %arg13[%c0, %c0_0, %c0_1] : memref<18x18x128xf32, #tpu.memory_space<vmem>>, vector<18x18x128xf32>
    tpu.vector_store %arg13[%c0, %c0_0, %c0_1], %0 {strides = array<i32>} : memref<18x18x128xf32, #tpu.memory_space<vmem>>, vector<18x18x128xf32>,
    %c0_2 = arith.constant 0 : index
    %c0_3 = arith.constant 0 : index
    %c0_4 = arith.constant 0 : index
    %c0_5 = arith.constant 0 : index
    %2 = vector.load %arg1[%c0_2, %c0_3, %c0_4, %c0_5] : memref<1x18x18x128xf32, #tpu.memory_space<vmem>>, vector<1x18x18x128xf32>
    %3 = vector.shape_cast %2 : vector<1x18x18x128xf32> to vector<18x18x128xf32>
    %c0_6 = arith.constant 0 : index
    %c0_7 = arith.constant 0 : index
    %4 = vector.load %arg5[%c0_6, %c0_7] : memref<1x128xf32, #tpu.memory_space<vmem>>, vector<1x128xf32>
    %c0_8 = arith.constant 0 : index
    %c0_9 = arith.constant 0 : index
    %5 = vector.load %arg6[%c0_8, %c0_9] : memref<1x128xf32, #tpu.memory_space<vmem>>, vector<1x128xf32>
    %6 = vector.extract_strided_slice %3 {offsets = [0, 0, 0], sizes = [16, 16, 128], strides = [1, 1, 1]} : vector<18x18x128xf32> to vector<16x16x128xf32>
    %7 = vector.shape_cast %6 : vector<16x16x128xf32> to vector<256x128xf32>
    %8 = vector.extract_strided_slice %3 {offsets = [0, 1, 0], sizes = [16, 16, 128], strides = [1, 1, 1]} : vector<18x18x128xf32> to vector<16x16x128xf32>
    %9 = vector.shape_cast %8 : vector<16x16x128xf32> to vector<256x128xf32>
    %10 = vector.extract_strided_slice %3 {offsets = [0, 2, 0], sizes = [16, 16, 128], strides = [1, 1, 1]} : vector<18x18x128xf32> to vector<16x16x128xf32>
    %11 = vector.shape_cast %10 : vector<16x16x128xf32> to vector<256x128xf32>
    %12 = vector.extract_strided_slice %3 {offsets = [1, 0, 0], sizes = [16, 16, 128], strides = [1, 1, 1]} : vector<18x18x128xf32> to vector<16x16x128xf32>
    %13 = vector.shape_cast %12 : vector<16x16x128xf32> to vector<256x128xf32>
    %14 = vector.extract_strided_slice %3 {offsets = [1, 1, 0], sizes = [16, 16, 128], strides = [1, 1, 1]} : vector<18x18x128xf32> to vector<16x16x128xf32>
    %15 = vector.shape_cast %14 : vector<16x16x128xf32> to vector<256x128xf32>
    %16 = vector.extract_strided_slice %3 {offsets = [1, 2, 0], sizes = [16, 16, 128], strides = [1, 1, 1]} : vector<18x18x128xf32> to vector<16x16x128xf32>
    %17 = vector.shape_cast %16 : vector<16x16x128xf32> to vector<256x128xf32>
    %18 = vector.extract_strided_slice %3 {offsets = [2, 0, 0], sizes = [16, 16, 128], strides = [1, 1, 1]} : vector<18x18x128xf32> to vector<16x16x128xf32>
    %19 = vector.shape_cast %18 : vector<16x16x128xf32> to vector<256x128xf32>
    %20 = vector.extract_strided_slice %3 {offsets = [2, 1, 0], sizes = [16, 16, 128], strides = [1, 1, 1]} : vector<18x18x128xf32> to vector<16x16x128xf32>
    %21 = vector.shape_cast %20 : vector<16x16x128xf32> to vector<256x128xf32>
    %22 = vector.extract_strided_slice %3 {offsets = [2, 2, 0], sizes = [16, 16, 128], strides = [1, 1, 1]} : vector<18x18x128xf32> to vector<16x16x128xf32>
    %23 = vector.shape_cast %22 : vector<16x16x128xf32> to vector<256x128xf32>
    %24 = tpu.concatenate %7, %9, %11, %13, %15, %17, %19, %21, %23 in 1 : vector<256x128xf32>, vector<256x128xf32>, vector<256x128xf32>, vector<256x128xf32>, vector<256x128xf32>, vector<256x128xf32>, vector<256x128xf32>, vector<256x128xf32>, vector<256x128xf32> -> vector<256x1152xf32>
    %c0_10 = arith.constant 0 : index
    %c0_11 = arith.constant 0 : index
    %25 = vector.load %arg2[%c0_10, %c0_11] : memref<1152x128xf32, #tpu.memory_space<vmem>>, vector<1152x128xf32>
    %cst_12 = arith.constant dense<0.000000e+00> : vector<256x128xf32>
    %26 = tpu.matmul %24, %25, %cst_12 {dimension_numbers = #tpu.dot_dimension_numbers<[1], [0], [0], [1], [0, 0, 1, 1], [], []>} : vector<256x1152xf32>, vector<1152x128xf32>, vector<256x128xf32> -> vector<256x128xf32>
    %27 = vector.broadcast %4 : vector<1x128xf32> to vector<256x128xf32>
    %28 = arith.mulf %26, %27 : vector<256x128xf32>
    %29 = vector.broadcast %5 : vector<1x128xf32> to vector<256x128xf32>
    %30 = arith.addf %28, %29 : vector<256x128xf32>
    %cst_13 = arith.constant 0.000000e+00 : f32
    %31 = vector.broadcast %cst_13 : f32 to vector<256x128xf32>
    %32 = arith.maximumf %30, %31 : vector<256x128xf32>
    %33 = vector.shape_cast %32 : vector<256x128xf32> to vector<16x16x128xf32>
    %c1 = arith.constant 1 : index
    %c1_14 = arith.constant 1 : index
    %c0_15 = arith.constant 0 : index
    %34 = vector.load %arg13[%c1, %c1_14, %c0_15] : memref<18x18x128xf32, #tpu.memory_space<vmem>>, vector<16x16x128xf32>
    tpu.vector_store %arg13[%c1, %c1_14, %c0_15], %33 {strides = array<i32>} : memref<18x18x128xf32, #tpu.memory_space<vmem>>, vector<16x16x128xf32>,
    %c0_16 = arith.constant 0 : index
    %c0_17 = arith.constant 0 : index
    %c0_18 = arith.constant 0 : index
    %35 = vector.load %arg13[%c0_16, %c0_17, %c0_18] : memref<18x18x128xf32, #tpu.memory_space<vmem>>, vector<18x18x128xf32>
    %c0_19 = arith.constant 0 : index
    %c0_20 = arith.constant 0 : index
    %36 = vector.load %arg7[%c0_19, %c0_20] : memref<1x128xf32, #tpu.memory_space<vmem>>, vector<1x128xf32>
    %c0_21 = arith.constant 0 : index
    %c0_22 = arith.constant 0 : index
    %37 = vector.load %arg8[%c0_21, %c0_22] : memref<1x128xf32, #tpu.memory_space<vmem>>, vector<1x128xf32>
    %38 = vector.extract_strided_slice %35 {offsets = [0, 0, 0], sizes = [16, 16, 128], strides = [1, 1, 1]} : vector<18x18x128xf32> to vector<16x16x128xf32>
    %39 = vector.shape_cast %38 : vector<16x16x128xf32> to vector<256x128xf32>
    %40 = vector.extract_strided_slice %35 {offsets = [0, 1, 0], sizes = [16, 16, 128], strides = [1, 1, 1]} : vector<18x18x128xf32> to vector<16x16x128xf32>
    %41 = vector.shape_cast %40 : vector<16x16x128xf32> to vector<256x128xf32>
    %42 = vector.extract_strided_slice %35 {offsets = [0, 2, 0], sizes = [16, 16, 128], strides = [1, 1, 1]} : vector<18x18x128xf32> to vector<16x16x128xf32>
    %43 = vector.shape_cast %42 : vector<16x16x128xf32> to vector<256x128xf32>
    %44 = vector.extract_strided_slice %35 {offsets = [1, 0, 0], sizes = [16, 16, 128], strides = [1, 1, 1]} : vector<18x18x128xf32> to vector<16x16x128xf32>
    %45 = vector.shape_cast %44 : vector<16x16x128xf32> to vector<256x128xf32>
    %46 = vector.extract_strided_slice %35 {offsets = [1, 1, 0], sizes = [16, 16, 128], strides = [1, 1, 1]} : vector<18x18x128xf32> to vector<16x16x128xf32>
    %47 = vector.shape_cast %46 : vector<16x16x128xf32> to vector<256x128xf32>
    %48 = vector.extract_strided_slice %35 {offsets = [1, 2, 0], sizes = [16, 16, 128], strides = [1, 1, 1]} : vector<18x18x128xf32> to vector<16x16x128xf32>
    %49 = vector.shape_cast %48 : vector<16x16x128xf32> to vector<256x128xf32>
    %50 = vector.extract_strided_slice %35 {offsets = [2, 0, 0], sizes = [16, 16, 128], strides = [1, 1, 1]} : vector<18x18x128xf32> to vector<16x16x128xf32>
    %51 = vector.shape_cast %50 : vector<16x16x128xf32> to vector<256x128xf32>
    %52 = vector.extract_strided_slice %35 {offsets = [2, 1, 0], sizes = [16, 16, 128], strides = [1, 1, 1]} : vector<18x18x128xf32> to vector<16x16x128xf32>
    %53 = vector.shape_cast %52 : vector<16x16x128xf32> to vector<256x128xf32>
    %54 = vector.extract_strided_slice %35 {offsets = [2, 2, 0], sizes = [16, 16, 128], strides = [1, 1, 1]} : vector<18x18x128xf32> to vector<16x16x128xf32>
    %55 = vector.shape_cast %54 : vector<16x16x128xf32> to vector<256x128xf32>
    %56 = tpu.concatenate %39, %41, %43, %45, %47, %49, %51, %53, %55 in 1 : vector<256x128xf32>, vector<256x128xf32>, vector<256x128xf32>, vector<256x128xf32>, vector<256x128xf32>, vector<256x128xf32>, vector<256x128xf32>, vector<256x128xf32>, vector<256x128xf32> -> vector<256x1152xf32>
    %c0_23 = arith.constant 0 : index
    %c0_24 = arith.constant 0 : index
    %57 = vector.load %arg3[%c0_23, %c0_24] : memref<1152x128xf32, #tpu.memory_space<vmem>>, vector<1152x128xf32>
    %cst_25 = arith.constant dense<0.000000e+00> : vector<256x128xf32>
    %58 = tpu.matmul %56, %57, %cst_25 {dimension_numbers = #tpu.dot_dimension_numbers<[1], [0], [0], [1], [0, 0, 1, 1], [], []>} : vector<256x1152xf32>, vector<1152x128xf32>, vector<256x128xf32> -> vector<256x128xf32>
    %59 = vector.broadcast %36 : vector<1x128xf32> to vector<256x128xf32>
    %60 = arith.mulf %58, %59 : vector<256x128xf32>
    %61 = vector.broadcast %37 : vector<1x128xf32> to vector<256x128xf32>
    %62 = arith.addf %60, %61 : vector<256x128xf32>
    %cst_26 = arith.constant 0.000000e+00 : f32
    %63 = vector.broadcast %cst_26 : f32 to vector<256x128xf32>
    %64 = arith.maximumf %62, %63 : vector<256x128xf32>
    %65 = vector.shape_cast %64 : vector<256x128xf32> to vector<16x16x128xf32>
    %c1_27 = arith.constant 1 : index
    %c1_28 = arith.constant 1 : index
    %c0_29 = arith.constant 0 : index
    %66 = vector.load %arg13[%c1_27, %c1_28, %c0_29] : memref<18x18x128xf32, #tpu.memory_space<vmem>>, vector<16x16x128xf32>
    tpu.vector_store %arg13[%c1_27, %c1_28, %c0_29], %65 {strides = array<i32>} : memref<18x18x128xf32, #tpu.memory_space<vmem>>, vector<16x16x128xf32>,
    %c0_30 = arith.constant 0 : index
    %c0_31 = arith.constant 0 : index
    %c0_32 = arith.constant 0 : index
    %67 = vector.load %arg13[%c0_30, %c0_31, %c0_32] : memref<18x18x128xf32, #tpu.memory_space<vmem>>, vector<18x18x128xf32>
    %c0_33 = arith.constant 0 : index
    %c0_34 = arith.constant 0 : index
    %68 = vector.load %arg9[%c0_33, %c0_34] : memref<1x128xf32, #tpu.memory_space<vmem>>, vector<1x128xf32>
    %c0_35 = arith.constant 0 : index
    %c0_36 = arith.constant 0 : index
    %69 = vector.load %arg10[%c0_35, %c0_36] : memref<1x128xf32, #tpu.memory_space<vmem>>, vector<1x128xf32>
    %70 = vector.extract_strided_slice %67 {offsets = [0, 0, 0], sizes = [16, 16, 128], strides = [1, 1, 1]} : vector<18x18x128xf32> to vector<16x16x128xf32>
    %71 = vector.shape_cast %70 : vector<16x16x128xf32> to vector<256x128xf32>
    %72 = vector.extract_strided_slice %67 {offsets = [0, 1, 0], sizes = [16, 16, 128], strides = [1, 1, 1]} : vector<18x18x128xf32> to vector<16x16x128xf32>
    %73 = vector.shape_cast %72 : vector<16x16x128xf32> to vector<256x128xf32>
    %74 = vector.extract_strided_slice %67 {offsets = [0, 2, 0], sizes = [16, 16, 128], strides = [1, 1, 1]} : vector<18x18x128xf32> to vector<16x16x128xf32>
    %75 = vector.shape_cast %74 : vector<16x16x128xf32> to vector<256x128xf32>
    %76 = vector.extract_strided_slice %67 {offsets = [1, 0, 0], sizes = [16, 16, 128], strides = [1, 1, 1]} : vector<18x18x128xf32> to vector<16x16x128xf32>
    %77 = vector.shape_cast %76 : vector<16x16x128xf32> to vector<256x128xf32>
    %78 = vector.extract_strided_slice %67 {offsets = [1, 1, 0], sizes = [16, 16, 128], strides = [1, 1, 1]} : vector<18x18x128xf32> to vector<16x16x128xf32>
    %79 = vector.shape_cast %78 : vector<16x16x128xf32> to vector<256x128xf32>
    %80 = vector.extract_strided_slice %67 {offsets = [1, 2, 0], sizes = [16, 16, 128], strides = [1, 1, 1]} : vector<18x18x128xf32> to vector<16x16x128xf32>
    %81 = vector.shape_cast %80 : vector<16x16x128xf32> to vector<256x128xf32>
    %82 = vector.extract_strided_slice %67 {offsets = [2, 0, 0], sizes = [16, 16, 128], strides = [1, 1, 1]} : vector<18x18x128xf32> to vector<16x16x128xf32>
    %83 = vector.shape_cast %82 : vector<16x16x128xf32> to vector<256x128xf32>
    %84 = vector.extract_strided_slice %67 {offsets = [2, 1, 0], sizes = [16, 16, 128], strides = [1, 1, 1]} : vector<18x18x128xf32> to vector<16x16x128xf32>
    %85 = vector.shape_cast %84 : vector<16x16x128xf32> to vector<256x128xf32>
    %86 = vector.extract_strided_slice %67 {offsets = [2, 2, 0], sizes = [16, 16, 128], strides = [1, 1, 1]} : vector<18x18x128xf32> to vector<16x16x128xf32>
    %87 = vector.shape_cast %86 : vector<16x16x128xf32> to vector<256x128xf32>
    %88 = tpu.concatenate %71, %73, %75, %77, %79, %81, %83, %85, %87 in 1 : vector<256x128xf32>, vector<256x128xf32>, vector<256x128xf32>, vector<256x128xf32>, vector<256x128xf32>, vector<256x128xf32>, vector<256x128xf32>, vector<256x128xf32>, vector<256x128xf32> -> vector<256x1152xf32>
    %c0_37 = arith.constant 0 : index
    %c0_38 = arith.constant 0 : index
    %89 = vector.load %arg4[%c0_37, %c0_38] : memref<1152x128xf32, #tpu.memory_space<vmem>>, vector<1152x128xf32>
    %cst_39 = arith.constant dense<0.000000e+00> : vector<256x128xf32>
    %90 = tpu.matmul %88, %89, %cst_39 {dimension_numbers = #tpu.dot_dimension_numbers<[1], [0], [0], [1], [0, 0, 1, 1], [], []>} : vector<256x1152xf32>, vector<1152x128xf32>, vector<256x128xf32> -> vector<256x128xf32>
    %91 = vector.broadcast %68 : vector<1x128xf32> to vector<256x128xf32>
    %92 = arith.mulf %90, %91 : vector<256x128xf32>
    %93 = vector.broadcast %69 : vector<1x128xf32> to vector<256x128xf32>
    %94 = arith.addf %92, %93 : vector<256x128xf32>
    %cst_40 = arith.constant 0.000000e+00 : f32
    %95 = vector.broadcast %cst_40 : f32 to vector<256x128xf32>
    %96 = arith.maximumf %94, %95 : vector<256x128xf32>
    %97 = vector.shape_cast %96 : vector<256x128xf32> to vector<8x2x8x2x128xf32>
    %98 = vector.extract_strided_slice %97 {offsets = [0, 0, 0, 0, 0], sizes = [8, 1, 8, 1, 128], strides = [1, 1, 1, 1, 1]} : vector<8x2x8x2x128xf32> to vector<8x1x8x1x128xf32>
    %99 = vector.shape_cast %98 : vector<8x1x8x1x128xf32> to vector<8x8x128xf32>
    %100 = vector.extract_strided_slice %97 {offsets = [0, 0, 0, 1, 0], sizes = [8, 1, 8, 1, 128], strides = [1, 1, 1, 1, 1]} : vector<8x2x8x2x128xf32> to vector<8x1x8x1x128xf32>
    %101 = vector.shape_cast %100 : vector<8x1x8x1x128xf32> to vector<8x8x128xf32>
    %102 = vector.extract_strided_slice %97 {offsets = [0, 1, 0, 0, 0], sizes = [8, 1, 8, 1, 128], strides = [1, 1, 1, 1, 1]} : vector<8x2x8x2x128xf32> to vector<8x1x8x1x128xf32>
    %103 = vector.shape_cast %102 : vector<8x1x8x1x128xf32> to vector<8x8x128xf32>
    %104 = vector.extract_strided_slice %97 {offsets = [0, 1, 0, 1, 0], sizes = [8, 1, 8, 1, 128], strides = [1, 1, 1, 1, 1]} : vector<8x2x8x2x128xf32> to vector<8x1x8x1x128xf32>
    %105 = vector.shape_cast %104 : vector<8x1x8x1x128xf32> to vector<8x8x128xf32>
    %106 = tpu.iota {dimensions = array<i32: 0>} : vector<8x8x128xi32>
    %107 = tpu.iota {dimensions = array<i32: 1>} : vector<8x8x128xi32>
    %c2_i32 = arith.constant 2 : i32
    %108 = vector.broadcast %c2_i32 : i32 to vector<8x8x128xi32>
    %109 = arith.muli %108, %106 : vector<8x8x128xi32>
    %c16_i32 = arith.constant 16 : i32
    %110 = vector.broadcast %c16_i32 : i32 to vector<8x8x128xi32>
    %111 = arith.muli %109, %110 : vector<8x8x128xi32>
    %c2_i32_41 = arith.constant 2 : i32
    %112 = vector.broadcast %c2_i32_41 : i32 to vector<8x8x128xi32>
    %113 = arith.muli %112, %107 : vector<8x8x128xi32>
    %114 = arith.addi %111, %113 : vector<8x8x128xi32>
    %c1_i32 = arith.constant 1 : i32
    %115 = vector.broadcast %c1_i32 : i32 to vector<8x8x128xi32>
    %116 = arith.addi %114, %115 : vector<8x8x128xi32>
    %c16_i32_42 = arith.constant 16 : i32
    %117 = vector.broadcast %c16_i32_42 : i32 to vector<8x8x128xi32>
    %118 = arith.addi %114, %117 : vector<8x8x128xi32>
    %c16_i32_43 = arith.constant 16 : i32
    %119 = vector.broadcast %c16_i32_43 : i32 to vector<8x8x128xi32>
    %120 = arith.addi %114, %119 : vector<8x8x128xi32>
    %c1_i32_44 = arith.constant 1 : i32
    %121 = vector.broadcast %c1_i32_44 : i32 to vector<8x8x128xi32>
    %122 = arith.addi %120, %121 : vector<8x8x128xi32>
    %123 = arith.cmpf ogt, %101, %99 : vector<8x8x128xf32>
    %124 = arith.select %123, %101, %99 : vector<8x8x128xi1>, vector<8x8x128xf32>
    %125 = arith.select %123, %116, %114 : vector<8x8x128xi1>, vector<8x8x128xi32>
    %126 = arith.cmpf ogt, %103, %124 : vector<8x8x128xf32>
    %127 = arith.select %126, %103, %124 : vector<8x8x128xi1>, vector<8x8x128xf32>
    %128 = arith.select %126, %118, %125 : vector<8x8x128xi1>, vector<8x8x128xi32>
    %129 = arith.cmpf ogt, %105, %127 : vector<8x8x128xf32>
    %130 = arith.select %129, %105, %127 : vector<8x8x128xi1>, vector<8x8x128xf32>
    %131 = arith.select %129, %122, %128 : vector<8x8x128xi1>, vector<8x8x128xi32>
    %c0_45 = arith.constant 0 : index
    %c0_46 = arith.constant 0 : index
    %c0_47 = arith.constant 0 : index
    %c0_48 = arith.constant 0 : index
    %132 = vector.load %arg11[%c0_45, %c0_46, %c0_47, %c0_48] : memref<1x8x8x128xf32, #tpu.memory_space<vmem>>, vector<1x8x8x128xf32>
    %133 = vector.shape_cast %132 : vector<1x8x8x128xf32> to vector<8x8x128xf32>
    %134 = vector.shape_cast %130 : vector<8x8x128xf32> to vector<1x8x8x128xf32>
    tpu.vector_store %arg11[%c0_45, %c0_46, %c0_47, %c0_48], %134 {strides = array<i32>} : memref<1x8x8x128xf32, #tpu.memory_space<vmem>>, vector<1x8x8x128xf32>,
    %c0_49 = arith.constant 0 : index
    %c0_50 = arith.constant 0 : index
    %c0_51 = arith.constant 0 : index
    %c0_52 = arith.constant 0 : index
    %135 = vector.load %arg12[%c0_49, %c0_50, %c0_51, %c0_52] : memref<1x8x8x128xi32, #tpu.memory_space<vmem>>, vector<1x8x8x128xi32>
    %136 = vector.shape_cast %135 : vector<1x8x8x128xi32> to vector<8x8x128xi32>
    %137 = vector.shape_cast %131 : vector<8x8x128xi32> to vector<1x8x8x128xi32>
    tpu.vector_store %arg12[%c0_49, %c0_50, %c0_51, %c0_52], %137 {strides = array<i32>} : memref<1x8x8x128xi32, #tpu.memory_space<vmem>>, vector<1x8x8x128xi32>,
    return
  }
  func.func @transform_0(%arg0: i32) -> (i32, i32, i32, i32) {
    %c0_i32 = arith.constant 0 : i32
    %c0_i32_0 = arith.constant 0 : i32
    %c0_i32_1 = arith.constant 0 : i32
    %c0_i32_2 = arith.constant 0 : i32
    return %arg0, %c0_i32, %c0_i32_0, %c0_i32_1 : i32, i32, i32, i32
  }
  func.func @transform_1(%arg0: i32) -> (i32, i32) {
    %c0_i32 = arith.constant 0 : i32
    %c0_i32_0 = arith.constant 0 : i32
    %c0_i32_1 = arith.constant 0 : i32
    return %c0_i32, %c0_i32_0 : i32, i32
  }
  func.func @transform_2(%arg0: i32) -> (i32, i32) {
    %c0_i32 = arith.constant 0 : i32
    %c0_i32_0 = arith.constant 0 : i32
    %c0_i32_1 = arith.constant 0 : i32
    return %c0_i32, %c0_i32_0 : i32, i32
  }
  func.func @transform_3(%arg0: i32) -> (i32, i32) {
    %c0_i32 = arith.constant 0 : i32
    %c0_i32_0 = arith.constant 0 : i32
    %c0_i32_1 = arith.constant 0 : i32
    return %c0_i32, %c0_i32_0 : i32, i32
  }
  func.func @transform_4(%arg0: i32) -> (i32, i32) {
    %c0_i32 = arith.constant 0 : i32
    %c0_i32_0 = arith.constant 0 : i32
    %c0_i32_1 = arith.constant 0 : i32
    return %c0_i32, %c0_i32_0 : i32, i32
  }
  func.func @transform_5(%arg0: i32) -> (i32, i32) {
    %c0_i32 = arith.constant 0 : i32
    %c0_i32_0 = arith.constant 0 : i32
    %c0_i32_1 = arith.constant 0 : i32
    return %c0_i32, %c0_i32_0 : i32, i32
  }
  func.func @transform_6(%arg0: i32) -> (i32, i32) {
    %c0_i32 = arith.constant 0 : i32
    %c0_i32_0 = arith.constant 0 : i32
    %c0_i32_1 = arith.constant 0 : i32
    return %c0_i32, %c0_i32_0 : i32, i32
  }
  func.func @transform_7(%arg0: i32) -> (i32, i32) {
    %c0_i32 = arith.constant 0 : i32
    %c0_i32_0 = arith.constant 0 : i32
    %c0_i32_1 = arith.constant 0 : i32
    return %c0_i32, %c0_i32_0 : i32, i32
  }
  func.func @transform_8(%arg0: i32) -> (i32, i32) {
    %c0_i32 = arith.constant 0 : i32
    %c0_i32_0 = arith.constant 0 : i32
    %c0_i32_1 = arith.constant 0 : i32
    return %c0_i32, %c0_i32_0 : i32, i32
  }
  func.func @transform_9(%arg0: i32) -> (i32, i32) {
    %c0_i32 = arith.constant 0 : i32
    %c0_i32_0 = arith.constant 0 : i32
    %c0_i32_1 = arith.constant 0 : i32
    return %c0_i32, %c0_i32_0 : i32, i32
  }
  func.func @transform_10(%arg0: i32) -> (i32, i32, i32, i32) {
    %c0_i32 = arith.constant 0 : i32
    %c0_i32_0 = arith.constant 0 : i32
    %c0_i32_1 = arith.constant 0 : i32
    %c0_i32_2 = arith.constant 0 : i32
    return %arg0, %c0_i32, %c0_i32_0, %c0_i32_1 : i32, i32, i32, i32
  }
  func.func @transform_11(%arg0: i32) -> (i32, i32, i32, i32) {
    %c0_i32 = arith.constant 0 : i32
    %c0_i32_0 = arith.constant 0 : i32
    %c0_i32_1 = arith.constant 0 : i32
    %c0_i32_2 = arith.constant 0 : i32
    return %arg0, %c0_i32, %c0_i32_0, %c0_i32_1 : i32, i32, i32, i32
  }
}

</mosaic_0001>

<bundles_post_ra>
// kernel: _down3_forward.1
= control target key start
LH: loop header
LB: loop body
LE: loop exit
PB: predicated region body
PF: predicated region fallthrough
CT: control target
= control target key end

     0   :  { %s11522_s17 = smov 0   ;;  %s17489_s0 = inlined_call_operand.vmem [shape: f32[2,18,18,128], index: 0, kind: input, shape index: {}]   ;;  %s17490_s1 = inlined_call_operand.vmem [shape: f32[1152,128], index: 1, kind: input, shape index: {}]   ;;  %s17491_s2 = inlined_call_operand.vmem [shape: f32[1152,128], index: 2, kind: input, shape index: {}]   ;;  %s17492_s3 = inlined_call_operand.vmem [shape: f32[1152,128], index: 3, kind: input, shape index: {}]   ;;  %s17493_s4 = inlined_call_operand.vmem [shape: f32[1,128], index: 4, kind: input, shape index: {}]   ;;  %s17494_s5 = inlined_call_operand.vmem [shape: f32[1,128], index: 5, kind: input, shape index: {}]   ;;  %s17495_s6 = inlined_call_operand.vmem [shape: f32[1,128], index: 6, kind: input, shape index: {}]   ;;  %s17496_s7 = inlined_call_operand.vmem [shape: f32[1,128], index: 7, kind: input, shape index: {}]   ;;  %s17497_s8 = inlined_call_operand.vmem [shape: f32[1,128], index: 8, kind: input, shape index: {}]   ;;  %s17498_s9 = inlined_call_operand.vmem [shape: f32[1,128], index: 9, kind: input, shape index: {}]   ;;  %s17499_s10 = inlined_call_operand.vmem [shape: f32[2,8,8,128], index: 10, kind: output, shape index: {0}]   ;;  %s17500_s11 = inlined_call_operand.vmem [shape: s32[2,8,8,128], index: 11, kind: output, shape index: {1}]  }
   0x1 LB: > { %s9658_s18 = sadd.s32 4294967295, %s11453_s17   ;;  %p9662_p0 = scmp.ge.s32.totalorder %s11453_s17, 1  ;;  %s11453_s17 = sphi %s11522_s17, %s22_s17  }
   0x2   : > { %p340_p1 = scmp.lt.s32.totalorder %s11453_s17, 3 }
   0x4   : > { %p341_p2 = pnand %p9662_p0, %p340_p1 }
   0x6   : > { %344 = sbr.rel (%p341_p2) target bundleno = 2093 (0x82d), region = 60 }
   0xd   : > { %v818_v0 = vld [vmem:[%s17490_s1] sm:$0xff]  ;;  %v819_v1 = vld [vmem:[%s17490_s1 + $0x8] sm:$0xff]  ;;  %v820_v2 = vld [vmem:[%s17490_s1 + $0x10] sm:$0xff]  ;;  %p385_p3 = scmp.lt.s32.totalorder %s9658_s18, 1  ;;  %v17502_v3 = vmov 0.0|0.0   ;;  %vm558_vm0 = vcmask 1046528  }
   0xe   : > { %10126 = vmatprep.subr.bf16.mxu0 %v17502_v3  ;;  %v10127_v4 = vpack.c.bf16 %v819_v1, %v818_v0  ;;  %v821_v5 = vld [vmem:[%s17490_s1 + $0x18] sm:$0xff]  ;;  %v822_v7 = vld [vmem:[%s17490_s1 + $0x20] sm:$0xff]  ;;  %v823_v8 = vld [vmem:[%s17490_s1 + $0x28] sm:$0xff]  ;;  %vm671_vm1 = vcmask 1045504   ;;  %vm9164_vm11 = vcmask 1042434   ;;  %vm9166_vm12 = vcmask 1043459  }
   0xf   : > { %s18085_s18 = smov (!%p385_p3, %s9658_s18), 1  ;;  %v10130_v6 = vpack.c.bf16 %v821_v5, %v820_v2  ;;  %v10133_v9 = vpack.c.bf16 %v823_v8, %v822_v7  ;;  %v824_v10 = vld [vmem:[%s17490_s1 + $0x30] sm:$0xff]  ;;  %v825_v11 = vld [vmem:[%s17490_s1 + $0x38] sm:$0xff]  ;;  %v826_v16 = vld [vmem:[%s17490_s1 + $0x40] sm:$0xff]  ;;  %vm9168_vm15 = vcmask 1044484  }
  0x10   : > { %10128 = vmatpush1.bf16.msra.mxu0 %v10127_v4  ;;  %s11354_s12 = smul.u32 432, %s18085_s18  ;;  %v10136_v13 = vpack.c.bf16 %v825_v11, %v824_v10  ;;  %v827_v17 = vld [vmem:[%s17490_s1 + $0x48] sm:$0xff]  ;;  %v828_v21 = vld [vmem:[%s17490_s1 + $0x50] sm:$0xff]  ;;  %v829_v22 = vld [vmem:[%s17490_s1 + $0x58] sm:$0xff]  ;;  %s9740_s30 = sshll.u32 %s18085_s18, 6 }
  0x11   : > { %10129 = vmatprep.subr.bf16.mxu0 %v17502_v3  ;;  %v10139_v20 = vpack.c.bf16 %v827_v17, %v826_v16  ;;  %v10142_v23 = vpack.c.bf16 %v829_v22, %v828_v21  ;;  %v830_v24 = vld [vmem:[%s17490_s1 + $0x60] sm:$0xff]  ;;  %v831_v25 = vld [vmem:[%s17490_s1 + $0x68] sm:$0xff]  ;;  %v832_v27 = vld [vmem:[%s17490_s1 + $0x70] sm:$0xff]  ;;  %s15966_s13 = scalar_lea.vmem %s17499_s10, %s9740_s30  ;;  %s15983_s19 = scalar_lea.vmem %s17500_s11, %s9740_s30 }
  0x12   : > { %s11556_s15 = scalar_lea.vmem %s17489_s0, %s11354_s12  ;;  %v10145_v26 = vpack.c.bf16 %v831_v25, %v830_v24  ;;  %v833_v28 = vld [vmem:[%s17490_s1 + $0x78] sm:$0xff]  ;;  %v834_v30 = vld [vmem:[%s17490_s1 + $0x80] sm:$0xff]  ;;  %v835_v31 = vld [vmem:[%s17490_s1 + $0x88] sm:$0xff] }
  0x13   : > { %v11566_v12 = vld [vmem:[%s11556_s15] sm:$0xff]  ;;  %v11569_v14 = vld [vmem:[%s11556_s15 + $0x8] sm:$0xff]  ;;  %v10148_v29 = vpack.c.bf16 %v833_v28, %v832_v27  ;;  %v10151_v32 = vpack.c.bf16 %v835_v31, %v834_v30  ;;  %v836_v33 = vld [vmem:[%s17490_s1 + $0x90] sm:$0xff] }
  0x14   : > { %10131 = vmatpush1.bf16.msra.mxu0 %v10130_v6  ;;  %v559_v15 = vrot.slane %v11566_v12, 1  ;;  %v560_v18 = vrot.slane %v11569_v14, 1  ;;  %v837_v34 = vld [vmem:[%s17490_s1 + $0x98] sm:$0xff]  ;;  %v838_v36 = vld [vmem:[%s17490_s1 + $0xa0] sm:$0xff]  ;;  %v839_v37 = vld [vmem:[%s17490_s1 + $0xa8] sm:$0xff]  ;;  %v672_v55 = vrot.slane %v11566_v12, 2 }
  0x15   : > { %10132 = vmatprep.subr.bf16.mxu0 %v17502_v3  ;;  %v10154_v35 = vpack.c.bf16 %v837_v34, %v836_v33  ;;  %v10157_v38 = vpack.c.bf16 %v839_v37, %v838_v36  ;;  %v840_v39 = vld [vmem:[%s17490_s1 + $0xb0] sm:$0xff]  ;;  %v841_v40 = vld [vmem:[%s17490_s1 + $0xb8] sm:$0xff]  ;;  %v842_v42 = vld [vmem:[%s17490_s1 + $0xc0] sm:$0xff]  ;;  %v673_v56 = vrot.slane %v11569_v14, 2 }
  0x16   : > { %v561_v19 = vsel %vm558_vm0, %v559_v15, %v560_v18  ;;  %v10160_v41 = vpack.c.bf16 %v841_v40, %v840_v39  ;;  %v843_v43 = vld [vmem:[%s17490_s1 + $0xc8] sm:$0xff]  ;;  %v844_v45 = vld [vmem:[%s17490_s1 + $0xd0] sm:$0xff]  ;;  %v845_v46 = vld [vmem:[%s17490_s1 + $0xd8] sm:$0xff] }
  0x17   : > { %1026 = vmatprep.mubr.f32.mxu0 %v561_v19  ;;  %v10163_v44 = vpack.c.bf16 %v843_v43, %v842_v42  ;;  %v10166_v47 = vpack.c.bf16 %v845_v46, %v844_v45  ;;  %v846_v48 = vld [vmem:[%s17490_s1 + $0xe0] sm:$0xff]  ;;  %v847_v49 = vld [vmem:[%s17490_s1 + $0xe8] sm:$0xff]  ;;  %v848_v51 = vld [vmem:[%s17490_s1 + $0xf0] sm:$0xff]  ;;  %v11689_v5 = vsel %vm671_vm1, %v672_v55, %v673_v56 }
  0x18   : > { %10134 = vmatpush1.bf16.msra.mxu0 %v10133_v9  ;;  %v10169_v50 = vpack.c.bf16 %v847_v49, %v846_v48  ;;  %v849_v52 = vld [vmem:[%s17490_s1 + $0xf8] sm:$0xff]  ;;  %v456_v53 = vld [vmem:[%s11556_s15 + $0x10] sm:$0x3]  ;;  %v850_v57 = vld [vmem:[%s17490_s1 + $0x100] sm:$0xff] }
  0x19   : > { %10135 = vmatprep.subr.bf16.mxu0 %v17502_v3  ;;  %v10172_v54 = vpack.c.bf16 %v849_v52, %v848_v51  ;;  %v851_v58 = vld [vmem:[%s17490_s1 + $0x108] sm:$0xff]  ;;  %v562_v59 = vrot.slane %v456_v53, 1  ;;  %v11671_v60 = vld [vmem:[%s11556_s15 + $0x18] sm:$0xff]  ;;  %v11674_v61 = vld [vmem:[%s11556_s15 + $0x20] sm:$0xff]  ;;  %v675_v8 = vrot.slane %v456_v53, 2 }
  0x1a   : > { %v10175_v62 = vpack.c.bf16 %v851_v58, %v850_v57  ;;  %v564_v0 = vrot.slane %v11671_v60, 1  ;;  %v565_v1 = vrot.slane %v11674_v61, 1  ;;  %v852_v2 = vld [vmem:[%s17490_s1 + $0x110] sm:$0xff]  ;;  %v853_v4 = vld [vmem:[%s17490_s1 + $0x118] sm:$0xff]  ;;  %v11692_v6 = vld [vmem:[%s11556_s15 + $0x28] sm:$0x3] }
  0x1b   : > { %v563_v63 = vsel %vm558_vm0, %v560_v18, %v562_v59  ;;  %v10178_v7 = vpack.c.bf16 %v853_v4, %v852_v2  ;;  %v567_v10 = vrot.slane %v11692_v6, 1  ;;  %v854_v11 = vld [vmem:[%s17490_s1 + $0x120] sm:$0xff]  ;;  %v11710_v15 = vld [vmem:[%s11556_s15 + $0x38] sm:$0xff]  ;;  %v11713_v16 = vsel %vm671_vm1, %v673_v56, %v675_v8  ;;  %v856_v21 = vld [vmem:[%s17490_s1 + $0x130] sm:$0xff] }
  0x1c   : > { %10137 = vmatpush1.bf16.msra.mxu0 %v10136_v13  ;;  %v11696_v9 = vsel %vm558_vm0, %v564_v0, %v565_v1  ;;  %v11707_v13 = vld [vmem:[%s11556_s15 + $0x30] sm:$0xff]  ;;  %v11730_v22 = vld [vmem:[%s11556_s15 + $0x40] sm:$0x3]  ;;  %v859_v27 = vld [vmem:[%s17490_s1 + $0x148] sm:$0xff] }
  0x1d   : > { %10138 = vmatprep.subr.bf16.mxu0 %v17502_v3  ;;  %v11718_v18 = vsel %vm558_vm0, %v565_v1, %v567_v10  ;;  %v569_v19 = vrot.slane %v11707_v13, 1  ;;  %v572_v25 = vrot.slane %v11730_v22, 1  ;;  %v11746_v28 = vld [vmem:[%s11556_s15 + $0x48] sm:$0xff]  ;;  %v682_v31 = vrot.slane %v11707_v13, 2  ;;  %v860_v36 = vld [vmem:[%s17490_s1 + $0x150] sm:$0xff]  ;;  %v861_v37 = vld [vmem:[%s17490_s1 + $0x158] sm:$0xff] }
  0x1e   : > { %v574_v34 = vrot.slane %v11746_v28, 1  ;;  %v10190_v40 = vpack.c.bf16 %v861_v37, %v860_v36  ;;  %v862_v43 = vld [vmem:[%s17490_s1 + $0x160] sm:$0xff]  ;;  %v11793_v46 = vld [vmem:[%s11556_s15 + $0x68] sm:$0xff]  ;;  %v864_v51 = vld [vmem:[%s17490_s1 + $0x170] sm:$0xff] }
  0x1f   : > { %v11790_v45 = vld [vmem:[%s11556_s15 + $0x60] sm:$0xff]  ;;  %v865_v52 = vld [vmem:[%s17490_s1 + $0x178] sm:$0xff]  ;;  %v11810_v53 = vld [vmem:[%s11556_s15 + $0x70] sm:$0x3] }
  0x20   : > { %10140 = vmatpush1.bf16.msra.mxu0 %v10139_v20  ;;  %v570_v20 = vrot.slane %v11710_v15, 1  ;;  %v579_v49 = vrot.slane %v11790_v45, 1  ;;  %v582_v56 = vrot.slane %v11810_v53, 1  ;;  %v866_v57 = vld [vmem:[%s17490_s1 + $0x180] sm:$0xff]  ;;  %v867_v58 = vld [vmem:[%s17490_s1 + $0x188] sm:$0xff]  ;;  %v11826_v59 = vld [vmem:[%s11556_s15 + $0x78] sm:$0xff] }
  0x21   : > { %10141 = vmatprep.subr.bf16.mxu0 %v17502_v3  ;;  %v584_v1 = vrot.slane %v11826_v59, 1  ;;  %v868_v4 = vld [vmem:[%s17490_s1 + $0x190] sm:$0xff]  ;;  %v11846_v8 = vld [vmem:[%s11556_s15 + $0x88] sm:$0x3]  ;;  %v874_v37 = vld [vmem:[%s17490_s1 + $0x1c0] sm:$0xff] }
  0x22   : > { %v11735_v24 = vsel %vm558_vm0, %v569_v19, %v570_v20  ;;  %v11756_v33 = vsel %vm558_vm0, %v570_v20, %v572_v25  ;;  %v871_v19 = vld [vmem:[%s17490_s1 + $0x1a8] sm:$0xff]  ;;  %v11862_v20 = vld [vmem:[%s11556_s15 + $0x90] sm:$0xff] }
  0x23   : > { %v589_v25 = vrot.slane %v11862_v20, 1 }
  0x24   : > { %10143 = vmatpush1.bf16.msra.mxu0 %v10142_v23 }
  0x25   : > { %10144 = vmatprep.subr.bf16.mxu0 %v17502_v3 }
  0x28   : > { %10146 = vmatpush1.bf16.msra.mxu0 %v10145_v26  ;;  %v858_v26 = vld [vmem:[%s17490_s1 + $0x140] sm:$0xff] }
  0x29   : > { %10147 = vmatprep.subr.bf16.mxu0 %v17502_v3  ;;  %v10187_v30 = vpack.c.bf16 %v859_v27, %v858_v26  ;;  %v872_v27 = vld [vmem:[%s17490_s1 + $0x1b0] sm:$0xff] }
  0x2c   : > { %10149 = vmatpush1.bf16.msra.mxu0 %v10148_v29  ;;  %v11749_v29 = vld [vmem:[%s11556_s15 + $0x50] sm:$0xff] }
  0x2d   : > { %10150 = vmatprep.subr.bf16.mxu0 %v17502_v3 }
  0x30   : > { %10152 = vmatpush1.bf16.msra.mxu0 %v10151_v32  ;;  %v17501_v32 = vrot.slane %v11710_v15, 2 }
  0x31   : > { %10153 = vmatprep.subr.bf16.mxu0 %v17502_v3 }
  0x32   : > { %v11773_v39 = vsel %vm671_vm1, %v682_v31, %v17501_v32  ;;  %v11882_v31 = vld [vmem:[%s11556_s15 + $0xa0] sm:$0x3] }
  0x33   : > { %9918 = vmatprep.mubr.f32.mxu1 %v11773_v39  ;;  %v592_v36 = vrot.slane %v11882_v31, 1  ;;  %v12031_v32 = vld [vmem:[%s11556_s15 + $0x120] sm:$0xff] }
  0x34   : > { %10155 = vmatpush1.bf16.msra.mxu0 %v10154_v35  ;;  %v575_v35 = vrot.slane %v11749_v29, 1 }
  0x35   : > { %10156 = vmatprep.subr.bf16.mxu0 %v17502_v3 }
  0x38   : > { %10158 = vmatpush1.bf16.msra.mxu0 %v10157_v38  ;;  %v11768_v38 = vld [vmem:[%s11556_s15 + $0x58] sm:$0x3] }
  0x39   : > { %10159 = vmatprep.subr.bf16.mxu0 %v17502_v3  ;;  %v577_v42 = vrot.slane %v11768_v38, 1 }
  0x3b   : > { %v11798_v48 = vsel %vm558_vm0, %v575_v35, %v577_v42  ;;  %v11898_v42 = vld [vmem:[%s11556_s15 + $0xa8] sm:$0xff] }
  0x3c   : > { %10161 = vmatpush1.bf16.msra.mxu0 %v10160_v41  ;;  %v11779_v41 = vsel %vm558_vm0, %v574_v34, %v575_v35 }
  0x3d   : > { %10162 = vmatprep.subr.bf16.mxu0 %v17502_v3 }
  0x40   : > { %10164 = vmatpush1.bf16.msra.mxu0 %v10163_v44  ;;  %v863_v44 = vld [vmem:[%s17490_s1 + $0x168] sm:$0xff] }
  0x41   : > { %10165 = vmatprep.subr.bf16.mxu0 %v17502_v3 }
  0x44   : > { %10167 = vmatpush1.bf16.msra.mxu0 %v10166_v47  ;;  %v10193_v47 = vpack.c.bf16 %v863_v44, %v862_v43  ;;  %v11901_v43 = vld [vmem:[%s11556_s15 + $0xb0] sm:$0xff] }
  0x45   : > { %10168 = vmatprep.subr.bf16.mxu0 %v17502_v3 }
  0x48   : > { %10170 = vmatpush1.bf16.msra.mxu0 %v10169_v50  ;;  %v580_v50 = vrot.slane %v11793_v46, 1 }
  0x49   : > { %10171 = vmatprep.subr.bf16.mxu0 %v17502_v3 }
  0x4a   : > { %v11815_v55 = vsel %vm558_vm0, %v579_v49, %v580_v50  ;;  %v11834_v0 = vsel %vm558_vm0, %v580_v50, %v582_v56  ;;  %v594_v49 = vrot.slane %v11898_v42, 1  ;;  %v595_v50 = vrot.slane %v11901_v43, 1 }
  0x4b   : > { %17681 = vst [vmem:[#allocation3_spill] sm:$0xff] %v11834_v0 }
  0x4c   : > { %10173 = vmatpush1.bf16.msra.mxu0 %v10172_v54  ;;  %v10196_v54 = vpack.c.bf16 %v865_v52, %v864_v51  ;;  %v876_v51 = vld [vmem:[%s17490_s1 + $0x1d0] sm:$0xff]  ;;  %v877_v52 = vld [vmem:[%s17490_s1 + $0x1d8] sm:$0xff] }
  0x4d   : > { %10174 = vmatprep.subr.bf16.mxu0 %v17502_v3  ;;  %v10214_v56 = vpack.c.bf16 %v877_v52, %v876_v51  ;;  %v11987_v52 = vld [vmem:[%s11556_s15 + $0xf0] sm:$0xff] }
  0x4f   : > { %1027 = vmatmul.mubr.f32.vlgmr.msra.gmra.mrb[0].mxu0 %v11566_v12  ;;  %v855_v12 = vld [vmem:[%s17490_s1 + $0x128] sm:$0xff] }
  0x50   : > { %10176 = vmatpush1.bf16.msra.mxu0 %v10175_v62  ;;  %1031 = vmatprep.mubr.f32.mxu0 %v563_v63  ;;  %v10181_v17 = vpack.c.bf16 %v855_v12, %v854_v11  ;;  %v11829_v62 = vld [vmem:[%s11556_s15 + $0x80] sm:$0xff]  ;;  %v10199_v63 = vpack.c.bf16 %v867_v58, %v866_v57  ;;  %v587_v12 = vrot.slane %v11846_v8, 1  ;;  %v11923_v57 = vsel %vm558_vm0, %v594_v49, %v595_v50  ;;  %v11978_v49 = vld [vmem:[%s11556_s15 + $0xe8] sm:$0x3] }
  0x51   : > { %10177 = vmatprep.subr.bf16.mxu0 %v17502_v3  ;;  %v585_v2 = vrot.slane %v11829_v62, 1  ;;  %17686 = vst [vmem:[#allocation8_spill] sm:$0xff] %v11923_v57  ;;  %v607_v51 = vrot.slane %v11978_v49, 1 }
  0x53   : > { %1032 = vmatmul.mubr.f32.gmra.mrb[2].mxu0 %v11569_v14  ;;  %v857_v14 = vld [vmem:[%s17490_s1 + $0x138] sm:$0xff]  ;;  %v11851_v11 = vsel %vm558_vm0, %v584_v1, %v585_v2  ;;  %v879_v1 = vld [vmem:[%s17490_s1 + $0x1e8] sm:$0xff] }
  0x54   : > { %1036 = vmatprep.mubr.f32.mxu0 %v11696_v9  ;;  %10179 = vmatpush1.bf16.msra.mxu0 %v10178_v7  ;;  %v10184_v23 = vpack.c.bf16 %v857_v14, %v856_v21  ;;  %v869_v7 = vld [vmem:[%s17490_s1 + $0x198] sm:$0xff]  ;;  %17682 = vst [vmem:[#allocation4_spill] sm:$0xff] %v11851_v11 }
  0x55   : > { %10180 = vmatprep.subr.bf16.mxu0 %v17502_v3  ;;  %v10202_v10 = vpack.c.bf16 %v869_v7, %v868_v4  ;;  %v11865_v21 = vld [vmem:[%s11556_s15 + $0x98] sm:$0xff]  ;;  %v11937_v4 = vld [vmem:[%s11556_s15 + $0xc8] sm:$0xff] }
  0x56   : > { %v590_v26 = vrot.slane %v11865_v21, 1 }
  0x57   : > { %1037 = vmatmul.mubr.f32.gmra.mrb[4].mxu0 %v11671_v60 }
  0x58   : > { %1041 = vmatprep.mubr.f32.mxu0 %v11718_v18  ;;  %10182 = vmatpush1.bf16.msra.mxu0 %v10181_v17  ;;  %v870_v17 = vld [vmem:[%s17490_s1 + $0x1a0] sm:$0xff]  ;;  %v11887_v35 = vsel %vm558_vm0, %v589_v25, %v590_v26  ;;  %v11954_v25 = vld [vmem:[%s11556_s15 + $0xd0] sm:$0x3] }
  0x59   : > { %10183 = vmatprep.subr.bf16.mxu0 %v17502_v3  ;;  %v10205_v14 = vpack.c.bf16 %v871_v19, %v870_v17  ;;  %17684 = vst [vmem:[#allocation6_spill] sm:$0xff] %v11887_v35  ;;  %v600_v17 = vrot.slane %v11937_v4, 1  ;;  %v880_v19 = vld [vmem:[%s17490_s1 + $0x1f0] sm:$0xff] }
  0x5b   : > { %1042 = vmatmul.mubr.f32.gmra.mrb[6].mxu0 %v11674_v61 }
  0x5c   : > { %1046 = vmatprep.mubr.f32.mxu0 %v11735_v24  ;;  %10185 = vmatpush1.bf16.msra.mxu0 %v10184_v23  ;;  %v11870_v23 = vsel %vm558_vm0, %v585_v2, %v587_v12  ;;  %v11934_v2 = vld [vmem:[%s11556_s15 + $0xc0] sm:$0xff] }
  0x5d   : > { %10186 = vmatprep.subr.bf16.mxu0 %v17502_v3  ;;  %17683 = vst [vmem:[#allocation5_spill] sm:$0xff] %v11870_v23  ;;  %v599_v12 = vrot.slane %v11934_v2, 1 }
  0x5f   : > { %1047 = vmatmul.mubr.f32.gmra.mrb[8].mxu0 %v11707_v13 }
  0x60   : > { %1051 = vmatprep.mubr.f32.mxu0 %v11756_v33  ;;  %10188 = vmatpush1.bf16.msra.mxu0 %v10187_v30  ;;  %v873_v30 = vld [vmem:[%s17490_s1 + $0x1b8] sm:$0xff] }
  0x61   : > { %10189 = vmatprep.subr.bf16.mxu0 %v17502_v3  ;;  %v10208_v34 = vpack.c.bf16 %v873_v30, %v872_v27  ;;  %v11959_v27 = vsel %vm558_vm0, %v599_v12, %v600_v17  ;;  %v602_v30 = vrot.slane %v11954_v25, 1 }
  0x62   : > { %17688 = vst [vmem:[#allocation10_spill] sm:$0xff] %v11959_v27 }
  0x63   : > { %1052 = vmatmul.mubr.f32.gmra.mrb[10].mxu0 %v11710_v15 }
  0x64   : > { %1056 = vmatprep.mubr.f32.mxu0 %v11779_v41  ;;  %10191 = vmatpush1.bf16.msra.mxu0 %v10190_v40  ;;  %v875_v40 = vld [vmem:[%s17490_s1 + $0x1c8] sm:$0xff] }
  0x65   : > { %10192 = vmatprep.subr.bf16.mxu0 %v17502_v3  ;;  %v10211_v44 = vpack.c.bf16 %v875_v40, %v874_v37  ;;  %v11972_v37 = vsel %vm558_vm0, %v600_v17, %v602_v30 }
  0x66   : > { %17689 = vst [vmem:[#allocation11_spill] sm:$0xff] %v11972_v37 }
  0x67   : > { %1057 = vmatmul.mubr.f32.gmra.mrb[12].mxu0 %v11746_v28 }
  0x68   : > { %1061 = vmatprep.mubr.f32.mxu0 %v11798_v48  ;;  %10194 = vmatpush1.bf16.msra.mxu0 %v10193_v47  ;;  %v11906_v47 = vsel %vm558_vm0, %v590_v26, %v592_v36  ;;  %v11967_v36 = vld [vmem:[%s11556_s15 + $0xe0] sm:$0xff] }
  0x69   : > { %10195 = vmatprep.subr.bf16.mxu0 %v17502_v3  ;;  %17685 = vst [vmem:[#allocation7_spill] sm:$0xff] %v11906_v47 }
  0x6b   : > { %1062 = vmatmul.mubr.f32.gmra.mrb[14].mxu0 %v11749_v29 }
  0x6c   : > { %1066 = vmatprep.mubr.f32.mxu0 %v11815_v55  ;;  %10197 = vmatpush1.bf16.msra.mxu0 %v10196_v54  ;;  %v11918_v54 = vld [vmem:[%s11556_s15 + $0xb8] sm:$0x3] }
  0x6d   : > { %10198 = vmatprep.subr.bf16.mxu0 %v17502_v3  ;;  %v597_v58 = vrot.slane %v11918_v54, 1 }
  0x6f   : > { %1067 = vmatmul.mubr.f32.gmra.mrb[16].mxu0 %v11790_v45 }
  0x70   : > { %1071 = vmatprep.mubr.f32.mxu0 %v11834_v0  ;;  %10200 = vmatpush1.bf16.msra.mxu0 %v10199_v63  ;;  %v878_v63 = vld [vmem:[%s17490_s1 + $0x1e0] sm:$0xff]  ;;  %v17704_v0 = vmov 0.0|0.0  }
  0x71   : > { %10201 = vmatprep.subr.bf16.mxu0 %v17502_v3  ;;  %v10217_v7 = vpack.c.bf16 %v879_v1, %v878_v63  ;;  %v609_v63 = vrot.slane %v11987_v52, 1 }
  0x73   : > { %1072 = vmatmul.mubr.f32.gmra.mrb[18].mxu0 %v11793_v46 }
  0x74   : > { %1076 = vmatprep.mubr.f32.mxu0 %v11851_v11  ;;  %10203 = vmatpush1.bf16.msra.mxu0 %v10202_v10  ;;  %v11942_v10 = vsel %vm558_vm0, %v595_v50, %v597_v58 }
  0x75   : > { %10204 = vmatprep.subr.bf16.mxu0 %v17502_v3  ;;  %17687 = vst [vmem:[#allocation9_spill] sm:$0xff] %v11942_v10 }
  0x77   : > { %1077 = vmatmul.mubr.f32.gmra.mrb[20].mxu0 %v11826_v59 }
  0x78   : > { %1081 = vmatprep.mubr.f32.mxu0 %v11870_v23  ;;  %10206 = vmatpush1.bf16.msra.mxu0 %v10205_v14  ;;  %v881_v14 = vld [vmem:[%s17490_s1 + $0x1f8] sm:$0xff] }
  0x79   : > { %10207 = vmatprep.subr.bf16.mxu0 %v17502_v3  ;;  %v10220_v26 = vpack.c.bf16 %v881_v14, %v880_v19  ;;  %v12009_v19 = vld [vmem:[%s11556_s15 + $0x108] sm:$0xff]  ;;  %v12012_v14 = vld [vmem:[%s11556_s15 + $0x110] sm:$0xff]  ;;  %v12110_v23 = vld [vmem:[%s11556_s15 + $0x178] sm:$0x3] }
  0x7a   : > { %v614_v30 = vrot.slane %v12009_v19, 1  ;;  %v637_v11 = vrot.slane %v12110_v23, 1 }
  0x7b   : > { %1082 = vmatmul.mubr.f32.gmra.mrb[22].mxu0 %v11829_v62 }
  0x7c   : > { %1086 = vmatprep.mubr.f32.mxu0 %v11887_v35  ;;  %10209 = vmatpush1.bf16.msra.mxu0 %v10208_v34  ;;  %v11964_v34 = vld [vmem:[%s11556_s15 + $0xd8] sm:$0xff]  ;;  %v12100_v35 = vld [vmem:[%s11556_s15 + $0x170] sm:$0xff] }
  0x7d   : > { %10210 = vmatprep.subr.bf16.mxu0 %v17502_v3  ;;  %v604_v40 = vrot.slane %v11964_v34, 1 }
  0x7f   : > { %1087 = vmatmul.mubr.f32.gmra.mrb[24].mxu0 %v11862_v20 }
  0x80   : > { %1091 = vmatprep.mubr.f32.mxu0 %v11906_v47  ;;  %10212 = vmatpush1.bf16.msra.mxu0 %v10211_v44  ;;  %v605_v44 = vrot.slane %v11967_v36, 1 }
  0x81   : > { %10213 = vmatprep.subr.bf16.mxu0 %v17502_v3 }
  0x82   : > { %v11983_v50 = vsel %vm558_vm0, %v604_v40, %v605_v44  ;;  %v11995_v58 = vsel %vm558_vm0, %v605_v44, %v607_v51  ;;  %v615_v40 = vrot.slane %v12012_v14, 1  ;;  %v12022_v44 = vld [vmem:[%s11556_s15 + $0x118] sm:$0x3] }
  0x83   : > { %1092 = vmatmul.mubr.f32.gmra.mrb[26].mxu0 %v11865_v21  ;;  %17690 = vst [vmem:[#allocation12_spill] sm:$0xff] %v11983_v50  ;;  %17691 = vst [vmem:[#allocation13_spill] sm:$0xff] %v11995_v58 }
  0x84   : > { %1096 = vmatprep.mubr.f32.mxu0 %v11923_v57  ;;  %10215 = vmatpush1.bf16.msra.mxu0 %v10214_v56  ;;  %v11990_v56 = vld [vmem:[%s11556_s15 + $0xf8] sm:$0xff]  ;;  %v12027_v51 = vsel %vm558_vm0, %v614_v30, %v615_v40  ;;  %v12044_v30 = vld [vmem:[%s11556_s15 + $0x130] sm:$0x3] }
  0x85   : > { %10216 = vmatprep.subr.bf16.mxu0 %v17502_v3  ;;  %v610_v1 = vrot.slane %v11990_v56, 1  ;;  %17694 = vst [vmem:[#allocation16_spill] sm:$0xff] %v12027_v51 }
  0x87   : > { %1097 = vmatmul.mubr.f32.gmra.mrb[28].mxu0 %v11898_v42  ;;  %v12005_v12 = vsel %vm558_vm0, %v609_v63, %v610_v1  ;;  %v617_v63 = vrot.slane %v12022_v44, 1 }
  0x88   : > { %1101 = vmatprep.mubr.f32.mxu0 %v11942_v10  ;;  %10218 = vmatpush1.bf16.msra.mxu0 %v10217_v7  ;;  %v12000_v7 = vld [vmem:[%s11556_s15 + $0x100] sm:$0x3]  ;;  %17692 = vst [vmem:[#allocation14_spill] sm:$0xff] %v12005_v12 }
  0x89   : > { %10219 = vmatprep.subr.bf16.mxu0 %v17502_v3  ;;  %v612_v17 = vrot.slane %v12000_v7, 1 }
  0x8b   : > { %1102 = vmatmul.mubr.f32.gmra.mrb[30].mxu0 %v11901_v43 }
  0x8c   : > { %1106 = vmatprep.mubr.f32.mxu0 %v11959_v27  ;;  %10221 = vmatpush1.bf16.msra.mxu0 %v10220_v26  ;;  %v12017_v26 = vsel %vm558_vm0, %v610_v1, %v612_v17  ;;  %v12034_v1 = vld [vmem:[%s11556_s15 + $0x128] sm:$0xff]  ;;  %v12039_v17 = vsel %vm558_vm0, %v615_v40, %v617_v63  ;;  %v12056_v40 = vld [vmem:[%s11556_s15 + $0x140] sm:$0xff]  ;;  %v12075_v27 = vld [vmem:[%s11556_s15 + $0x150] sm:$0xff] }
  0x8d   : > { %10222 = vmatprep.subr.bf16.mxu0 %v17502_v3  ;;  %17693 = vst [vmem:[#allocation15_spill] sm:$0xff] %v12017_v26  ;;  %17695 = vst [vmem:[#allocation17_spill] sm:$0xff] %v12039_v17  ;;  %v619_v3 = vrot.slane %v12031_v32, 1 }
  0x8f   : > { %1107 = vmatmul.mubr.f32.gmra.mrb[32].mxu0 %v11934_v2 }
  0x90   : > { %1111 = vmatprep.mubr.f32.mxu0 %v11972_v37 }
  0x93   : > { %1112 = vmatmul.mubr.f32.gmra.mrb[34].mxu0 %v11937_v4 }
  0x94   : > { %1116 = vmatprep.mubr.f32.mxu0 %v11983_v50  ;;  %v625_v50 = vrot.slane %v12056_v40, 1 }
  0x97   : > { %1117 = vmatmul.mubr.f32.gmra.mrb[36].mxu0 %v11964_v34 }
  0x98   : > { %1121 = vmatprep.mubr.f32.mxu0 %v11995_v58  ;;  %v12053_v58 = vld [vmem:[%s11556_s15 + $0x138] sm:$0xff] }
  0x9b   : > { %1122 = vmatmul.mubr.f32.gmra.mrb[38].mxu0 %v11967_v36 }
  0x9c   : > { %1126 = vmatprep.mubr.f32.mxu0 %v12005_v12 }
  0x9f   : > { %1127 = vmatmul.mubr.f32.gmra.mrb[40].mxu0 %v11987_v52 }
  0xa0   : > { %1131 = vmatprep.mubr.f32.mxu0 %v12017_v26  ;;  %v620_v26 = vrot.slane %v12034_v1, 1 }
  0xa2   : > { %v12049_v12 = vsel %vm558_vm0, %v619_v3, %v620_v26  ;;  %v12066_v3 = vld [vmem:[%s11556_s15 + $0x148] sm:$0x3] }
  0xa3   : > { %1132 = vmatmul.mubr.f32.gmra.mrb[42].mxu0 %v11990_v56  ;;  %17696 = vst [vmem:[#allocation18_spill] sm:$0xff] %v12049_v12 }
  0xa4   : > { %1136 = vmatprep.mubr.f32.mxu0 %v12027_v51  ;;  %v622_v51 = vrot.slane %v12044_v30, 1 }
  0xa6   : > { %v12061_v63 = vsel %vm558_vm0, %v620_v26, %v622_v51  ;;  %v12078_v26 = vld [vmem:[%s11556_s15 + $0x158] sm:$0xff] }
  0xa7   : > { %1137 = vmatmul.mubr.f32.gmra.mrb[44].mxu0 %v12009_v19  ;;  %17697 = vst [vmem:[#allocation19_spill] sm:$0xff] %v12061_v63  ;;  %v630_v10 = vrot.slane %v12078_v26, 1 }
  0xa8   : > { %1141 = vmatprep.mubr.f32.mxu0 %v12039_v17  ;;  %v624_v17 = vrot.slane %v12053_v58, 1 }
  0xaa   : > { %v12071_v37 = vsel %vm558_vm0, %v624_v17, %v625_v50  ;;  %v12088_v17 = vld [vmem:[%s11556_s15 + $0x160] sm:$0x3] }
  0xab   : > { %1142 = vmatmul.mubr.f32.gmra.mrb[46].mxu0 %v12012_v14  ;;  %17698 = vst [vmem:[#allocation20_spill] sm:$0xff] %v12071_v37  ;;  %v632_v47 = vrot.slane %v12088_v17, 1 }
  0xac   : > { %1146 = vmatprep.mubr.f32.mxu0 %v12049_v12  ;;  %v627_v12 = vrot.slane %v12066_v3, 1 }
  0xae   : > { %v12083_v51 = vsel %vm558_vm0, %v625_v50, %v627_v12  ;;  %v12105_v50 = vsel %vm558_vm0, %v630_v10, %v632_v47 }
  0xaf   : > { %1147 = vmatmul.mubr.f32.gmra.mrb[48].mxu0 %v12031_v32  ;;  %17699 = vst [vmem:[#allocation21_spill] sm:$0xff] %v12083_v51  ;;  %17701 = vst [vmem:[#allocation23_spill] sm:$0xff] %v12105_v50 }
  0xb0   : > { %1151 = vmatprep.mubr.f32.mxu0 %v12061_v63  ;;  %v629_v63 = vrot.slane %v12075_v27, 1 }
  0xb2   : > { %v12093_v57 = vsel %vm558_vm0, %v629_v63, %v630_v10  ;;  %v882_v10 = vld [vmem:[%s17490_s1 + $0x200] sm:$0xff] }
  0xb3   : > { %1152 = vmatmul.mubr.f32.gmra.mrb[50].mxu0 %v12034_v1  ;;  %17700 = vst [vmem:[#allocation22_spill] sm:$0xff] %v12093_v57 }
  0xb4   : > { %1156 = vmatprep.mubr.f32.mxu0 %v12071_v37  ;;  %v12097_v37 = vld [vmem:[%s11556_s15 + $0x168] sm:$0xff] }
  0xb5   : > { %v634_v12 = vrot.slane %v12097_v37, 1 }
  0xb7   : > { %1157 = vmatmul.mubr.f32.gmra.mrb[52].mxu0 %v12053_v58 }
  0xb8   : > { %1161 = vmatprep.mubr.f32.mxu0 %v12083_v51  ;;  %v635_v51 = vrot.slane %v12100_v35, 1 }
  0xba   : > { %v12115_v63 = vsel %vm558_vm0, %v634_v12, %v635_v51  ;;  %v12121_v47 = vsel %vm558_vm0, %v635_v51, %v637_v11  ;;  %v883_v12 = vld [vmem:[%s17490_s1 + $0x208] sm:$0xff]  ;;  %v884_v11 = vld [vmem:[%s17490_s1 + $0x210] sm:$0xff]  ;;  %v885_v51 = vld [vmem:[%s17490_s1 + $0x218] sm:$0xff] }
  0xbb   : > { %1162 = vmatmul.mubr.f32.gmra.mrb[54].mxu0 %v12056_v40  ;;  %17702 = vst [vmem:[#allocation24_spill] sm:$0xff] %v12115_v63  ;;  %17703 = vst [vmem:[#allocation25_spill] sm:$0xff] %v12121_v47 }
  0xbc   : > { %1166 = vmatprep.mubr.f32.mxu0 %v12093_v57  ;;  %v10226_v57 = vpack.c.bf16 %v885_v51, %v884_v11  ;;  %v889_v11 = vld [vmem:[%s17490_s1 + $0x238] sm:$0xff]  ;;  %v892_v51 = vld [vmem:[%s17490_s1 + $0x250] sm:$0xff] }
  0xbf   : > { %1167 = vmatmul.mubr.f32.gmra.mrb[56].mxu0 %v12075_v27 }
  0xc0   : > { %1171 = vmatprep.mubr.f32.mxu0 %v12105_v50  ;;  %v678_v50 = vrot.slane %v11674_v61, 2 }
  0xc3   : > { %1172 = vmatmul.mubr.f32.gmra.mrb[58].mxu0 %v12078_v26 }
  0xc4   : > { %1176 = vmatprep.mubr.f32.mxu0 %v12115_v63  ;;  %v10223_v63 = vpack.c.bf16 %v883_v12, %v882_v10  ;;  %v886_v10 = vld [vmem:[%s17490_s1 + $0x220] sm:$0xff]  ;;  %v887_v12 = vld [vmem:[%s17490_s1 + $0x228] sm:$0xff] }
  0xc7   : > { %1177 = vmatmul.mubr.f32.gmra.mrb[60].mxu0 %v12097_v37 }
  0xc8   : > { %1181 = vmatprep.mubr.f32.mxu0 %v12121_v47  ;;  %v677_v47 = vrot.slane %v11671_v60, 2 }
  0xcb   : > { %1182 = vmatmul.mubr.f32.gmra.mrb[62].mxu0 %v12100_v35 }
  0xcc   : > { %1251 = vmatprep.mubr.f32.mxu0 %v11671_v60  ;;  %v680_v60 = vrot.slane %v11692_v6, 2 }
  0xcf   : > { %1252 = vmatmul.mubr.f32.vlgmr.msra.gmra.mrb[0].mxu0 %v11689_v5  ;;  %v12153_v5 = vsel %vm671_vm1, %v677_v47, %v678_v50  ;;  %v685_v47 = vrot.slane %v11730_v22, 2 }
  0xd0   : > { %10224 = vmatpush1.bf16.msra.mxu0 %v10223_v63  ;;  %1256 = vmatprep.mubr.f32.mxu0 %v11674_v61  ;;  %v10229_v61 = vpack.c.bf16 %v887_v12, %v886_v10  ;;  %v888_v63 = vld [vmem:[%s17490_s1 + $0x230] sm:$0xff]  ;;  %v893_v10 = vld [vmem:[%s17490_s1 + $0x258] sm:$0xff]  ;;  %v17705_v12 = vrot.slane %v11710_v15, 2 }
  0xd1   : > { %10225 = vmatprep.subr.bf16.mxu0 %v17704_v0  ;;  %v10232_v6 = vpack.c.bf16 %v889_v11, %v888_v63  ;;  %v10238_v63 = vpack.c.bf16 %v893_v10, %v892_v51  ;;  %v894_v11 = vld [vmem:[%s17490_s1 + $0x260] sm:$0xff] }
  0xd2   : > { %v12190_v22 = vsel %vm671_vm1, %v17705_v12, %v685_v47  ;;  %v898_v10 = vld [vmem:[%s17490_s1 + $0x280] sm:$0xff]  ;;  %v899_v12 = vld [vmem:[%s17490_s1 + $0x288] sm:$0xff] }
  0xd3   : > { %1257 = vmatmul.mubr.f32.gmra.mrb[2].mxu0 %v11713_v16  ;;  %v890_v16 = vld [vmem:[%s17490_s1 + $0x240] sm:$0xff] }
  0xd4   : > { %1261 = vmatprep.mubr.f32.mxu0 %v11707_v13  ;;  %10227 = vmatpush1.bf16.msra.mxu0 %v10226_v57  ;;  %v12166_v13 = vsel %vm671_vm1, %v678_v50, %v680_v60  ;;  %v891_v57 = vld [vmem:[%s17490_s1 + $0x248] sm:$0xff]  ;;  %v687_v60 = vrot.slane %v11746_v28, 2 }
  0xd5   : > { %10228 = vmatprep.subr.bf16.mxu0 %v17704_v0  ;;  %v10235_v50 = vpack.c.bf16 %v891_v57, %v890_v16  ;;  %v896_v16 = vld [vmem:[%s17490_s1 + $0x270] sm:$0xff]  ;;  %v897_v57 = vld [vmem:[%s17490_s1 + $0x278] sm:$0xff] }
  0xd6   : > { %v10244_v51 = vpack.c.bf16 %v897_v57, %v896_v16  ;;  %v903_v16 = vld [vmem:[%s17490_s1 + $0x2a8] sm:$0xff] }
  0xd7   : > { %1262 = vmatmul.mubr.f32.gmra.mrb[4].mxu0 %v12153_v5 }
  0xd8   : > { %1266 = vmatprep.mubr.f32.mxu0 %v11710_v15  ;;  %10230 = vmatpush1.bf16.msra.mxu0 %v10229_v61  ;;  %v688_v61 = vrot.slane %v11749_v29, 2 }
  0xd9   : > { %10231 = vmatprep.subr.bf16.mxu0 %v17704_v0 }
  0xda   : > { %v12204_v15 = vsel %vm671_vm1, %v687_v60, %v688_v61  ;;  %v10247_v60 = vpack.c.bf16 %v899_v12, %v898_v10  ;;  %v703_v10 = vrot.slane %v11865_v21, 2 }
  0xdb   : > { %1267 = vmatmul.mubr.f32.gmra.mrb[6].mxu0 %v12166_v13 }
  0xdc   : > { %1271 = vmatprep.mubr.f32.mxu0 %v11746_v28  ;;  %10233 = vmatpush1.bf16.msra.mxu0 %v10232_v6  ;;  %v895_v6 = vld [vmem:[%s17490_s1 + $0x268] sm:$0xff]  ;;  %v690_v28 = vrot.slane %v11768_v38, 2  ;;  %v692_v38 = vrot.slane %v11790_v45, 2 }
  0xdd   : > { %10234 = vmatprep.subr.bf16.mxu0 %v17704_v0 }
  0xde   : > { %v12217_v47 = vsel %vm671_vm1, %v688_v61, %v690_v28  ;;  %v900_v61 = vld [vmem:[%s17490_s1 + $0x290] sm:$0xff] }
  0xdf   : > { %1272 = vmatmul.mubr.f32.gmra.mrb[8].mxu0 %v11773_v39 }
  0xe0   : > { %1276 = vmatprep.mubr.f32.mxu0 %v11749_v29  ;;  %10236 = vmatpush1.bf16.msra.mxu0 %v10235_v50  ;;  %v10241_v29 = vpack.c.bf16 %v895_v6, %v894_v11  ;;  %v693_v50 = vrot.slane %v11793_v46, 2  ;;  %v698_v6 = vrot.slane %v11829_v62, 2 }
  0xe1   : > { %10237 = vmatprep.subr.bf16.mxu0 %v17704_v0 }
  0xe3   : > { %1277 = vmatmul.mubr.f32.gmra.mrb[10].mxu0 %v12190_v22 }
  0xe4   : > { %1281 = vmatprep.mubr.f32.mxu0 %v11790_v45  ;;  %10239 = vmatpush1.bf16.msra.mxu0 %v10238_v63  ;;  %v12231_v45 = vsel %vm671_vm1, %v692_v38, %v693_v50  ;;  %v901_v63 = vld [vmem:[%s17490_s1 + $0x298] sm:$0xff]  ;;  %v904_v38 = vld [vmem:[%s17490_s1 + $0x2b0] sm:$0xff] }
  0xe5   : > { %10240 = vmatprep.subr.bf16.mxu0 %v17704_v0  ;;  %v10250_v28 = vpack.c.bf16 %v901_v63, %v900_v61  ;;  %v908_v63 = vld [vmem:[%s17490_s1 + $0x2d0] sm:$0xff] }
  0xe7   : > { %1282 = vmatmul.mubr.f32.gmra.mrb[12].mxu0 %v12204_v15 }
  0xe8   : > { %1286 = vmatprep.mubr.f32.mxu0 %v11793_v46  ;;  %10242 = vmatpush1.bf16.msra.mxu0 %v10241_v29  ;;  %v695_v46 = vrot.slane %v11810_v53, 2  ;;  %v697_v53 = vrot.slane %v11826_v59, 2  ;;  %v902_v29 = vld [vmem:[%s17490_s1 + $0x2a0] sm:$0xff] }
  0xe9   : > { %10243 = vmatprep.subr.bf16.mxu0 %v17704_v0  ;;  %v10253_v57 = vpack.c.bf16 %v903_v16, %v902_v29  ;;  %v910_v16 = vld [vmem:[%s17490_s1 + $0x2e0] sm:$0xff] }
  0xea   : > { %v12244_v11 = vsel %vm671_vm1, %v693_v50, %v695_v46  ;;  %v905_v50 = vld [vmem:[%s17490_s1 + $0x2b8] sm:$0xff]  ;;  %v906_v46 = vld [vmem:[%s17490_s1 + $0x2c0] sm:$0xff] }
  0xeb   : > { %1287 = vmatmul.mubr.f32.gmra.mrb[14].mxu0 %v12217_v47  ;;  %v10256_v12 = vpack.c.bf16 %v905_v50, %v904_v38  ;;  %v912_v38 = vld [vmem:[%s17490_s1 + $0x2f0] sm:$0xff]  ;;  %v913_v50 = vld [vmem:[%s17490_s1 + $0x2f8] sm:$0xff] }
  0xec   : > { %1291 = vmatprep.mubr.f32.mxu0 %v11826_v59  ;;  %10245 = vmatpush1.bf16.msra.mxu0 %v10244_v51  ;;  %v12258_v59 = vsel %vm671_vm1, %v697_v53, %v698_v6  ;;  %v909_v53 = vld [vmem:[%s17490_s1 + $0x2d8] sm:$0xff] }
  0xed   : > { %10246 = vmatprep.subr.bf16.mxu0 %v17704_v0  ;;  %v10262_v29 = vpack.c.bf16 %v909_v53, %v908_v63 }
  0xef   : > { %1292 = vmatmul.mubr.f32.gmra.mrb[16].mxu0 %v12231_v45 }
  0xf0   : > { %1296 = vmatprep.mubr.f32.mxu0 %v11829_v62  ;;  %10248 = vmatpush1.bf16.msra.mxu0 %v10247_v60  ;;  %v700_v62 = vrot.slane %v11846_v8, 2  ;;  %v702_v8 = vrot.slane %v11862_v20, 2  ;;  %v907_v60 = vld [vmem:[%s17490_s1 + $0x2c8] sm:$0xff] }
  0xf1   : > { %10249 = vmatprep.subr.bf16.mxu0 %v17704_v0  ;;  %v10259_v61 = vpack.c.bf16 %v907_v60, %v906_v46  ;;  %v715_v60 = vrot.slane %v11954_v25, 2 }
  0xf2   : > { %v12271_v51 = vsel %vm671_vm1, %v698_v6, %v700_v62  ;;  %v911_v62 = vld [vmem:[%s17490_s1 + $0x2e8] sm:$0xff] }
  0xf3   : > { %1297 = vmatmul.mubr.f32.gmra.mrb[18].mxu0 %v12244_v11 }
  0xf4   : > { %1301 = vmatprep.mubr.f32.mxu0 %v11862_v20  ;;  %10251 = vmatpush1.bf16.msra.mxu0 %v10250_v28  ;;  %v12285_v20 = vsel %vm671_vm1, %v702_v8, %v703_v10  ;;  %v708_v28 = vrot.slane %v11901_v43, 2 }
  0xf5   : > { %10252 = vmatprep.subr.bf16.mxu0 %v17704_v0 }
  0xf7   : > { %1302 = vmatmul.mubr.f32.gmra.mrb[20].mxu0 %v12258_v59 }
  0xf8   : > { %1306 = vmatprep.mubr.f32.mxu0 %v11865_v21  ;;  %10254 = vmatpush1.bf16.msra.mxu0 %v10253_v57  ;;  %v705_v21 = vrot.slane %v11882_v31, 2  ;;  %v707_v31 = vrot.slane %v11898_v42, 2  ;;  %v10265_v57 = vpack.c.bf16 %v911_v62, %v910_v16  ;;  %v946_v16 = vld [vmem:[%s17490_s1 + $0x400] sm:$0xff]  ;;  %v947_v62 = vld [vmem:[%s17490_s1 + $0x408] sm:$0xff] }
  0xf9   : > { %10255 = vmatprep.subr.bf16.mxu0 %v17704_v0 }
  0xfa   : > { %v12298_v6 = vsel %vm671_vm1, %v703_v10, %v705_v21  ;;  %v713_v10 = vrot.slane %v11937_v4, 2  ;;  %v718_v21 = vrot.slane %v11967_v36, 2 }
  0xfb   : > { %1307 = vmatmul.mubr.f32.gmra.mrb[22].mxu0 %v12271_v51 }
  0xfc   : > { %1311 = vmatprep.mubr.f32.mxu0 %v11898_v42  ;;  %10257 = vmatpush1.bf16.msra.mxu0 %v10256_v12  ;;  %v12312_v42 = vsel %vm671_vm1, %v707_v31, %v708_v28  ;;  %v10268_v12 = vpack.c.bf16 %v913_v50, %v912_v38 }
  0xfd   : > { %10258 = vmatprep.subr.bf16.mxu0 %v17704_v0 }
  0xff   : > { %1312 = vmatmul.mubr.f32.gmra.mrb[24].mxu0 %v12285_v20 }
 0x100   : > { %1316 = vmatprep.mubr.f32.mxu0 %v11901_v43  ;;  %10260 = vmatpush1.bf16.msra.mxu0 %v10259_v61  ;;  %v710_v43 = vrot.slane %v11918_v54, 2  ;;  %v712_v54 = vrot.slane %v11934_v2, 2  ;;  %v720_v61 = vrot.slane %v11978_v49, 2  ;;  %v725_v49 = vrot.slane %v12000_v7, 2 }
 0x101   : > { %10261 = vmatprep.subr.bf16.mxu0 %v17704_v0  ;;  %v730_v7 = vrot.slane %v12022_v44, 2  ;;  %v10318_v44 = vpack.c.bf16 %v947_v62, %v946_v16  ;;  %v748_v62 = vrot.slane %v12100_v35, 2 }
 0x102   : > { %v12325_v8 = vsel %vm671_vm1, %v708_v28, %v710_v43  ;;  %v12333_v46 = vsel %vm671_vm1, %v712_v54, %v713_v10  ;;  %v12353_v63 = vsel %vm671_vm1, %v718_v21, %v720_v61  ;;  %v738_v54 = vrot.slane %v12056_v40, 2 }
 0x103   : > { %1317 = vmatmul.mubr.f32.gmra.mrb[26].mxu0 %v12298_v6  ;;  %10319 = vmatprep.subr.bf16.mxu1 %v10318_v44 }
 0x104   : > { %1321 = vmatprep.mubr.f32.mxu0 %v11934_v2  ;;  %10263 = vmatpush1.bf16.msra.mxu0 %v10262_v29  ;;  %v12340_v2 = vsel %vm671_vm1, %v713_v10, %v715_v60  ;;  %v950_v10 = vld [vmem:[%s17490_s1 + $0x420] sm:$0xff] }
 0x105   : > { %10264 = vmatprep.subr.bf16.mxu0 %v17704_v0  ;;  %10321 = vmatpush3.bf16.msra.mxu1 %v10318_v44  ;;  %v12459_v44 = vld [vmem:[%s11556_s15 + $0x180] sm:$0xff] }
 0x107   : > { %1322 = vmatmul.mubr.f32.gmra.mrb[28].mxu0 %v12312_v42 }
 0x108   : > { %1326 = vmatprep.mubr.f32.mxu0 %v11937_v4  ;;  %10266 = vmatpush1.bf16.msra.mxu0 %v10265_v57  ;;  %v717_v4 = vrot.slane %v11964_v34, 2  ;;  %v949_v57 = vld [vmem:[%s17490_s1 + $0x418] sm:$0xff] }
 0x109   : > { %10267 = vmatprep.subr.bf16.mxu0 %v17704_v0 }
 0x10a   : > { %v12347_v25 = vsel %vm671_vm1, %v717_v4, %v718_v21  ;;  %v953_v21 = vld [vmem:[%s17490_s1 + $0x438] sm:$0xff] }
 0x10b   : > { %1327 = vmatmul.mubr.f32.gmra.mrb[30].mxu0 %v12325_v8 }
 0x10c   : > { %1331 = vmatprep.mubr.f32.mxu0 %v11964_v34  ;;  %10269 = vmatpush1.bf16.msra.mxu0 %v10268_v12  ;;  %v722_v34 = vrot.slane %v11987_v52, 2  ;;  %v951_v12 = vld [vmem:[%s17490_s1 + $0x428] sm:$0xff] }
 0x10d   : > { %10270 = vmatprep.subr.bf16.mxu0 %v17704_v0  ;;  %v10326_v60 = vpack.c.bf16 %v951_v12, %v950_v10 }
 0x10f   : > { %1332 = vmatmul.mubr.f32.gmra.mrb[32].mxu0 %v12333_v46 }
 0x110   : > { %1336 = vmatprep.mubr.f32.mxu0 %v11967_v36  ;;  %v723_v36 = vrot.slane %v11990_v56, 2 }
 0x112   : > { %v12360_v53 = vsel %vm671_vm1, %v722_v34, %v723_v36  ;;  %v12366_v31 = vsel %vm671_vm1, %v723_v36, %v725_v49  ;;  %v743_v36 = vrot.slane %v12078_v26, 2  ;;  %v954_v49 = vld [vmem:[%s17490_s1 + $0x440] sm:$0xff] }
 0x113   : > { %1337 = vmatmul.mubr.f32.gmra.mrb[34].mxu0 %v12340_v2 }
 0x114   : > { %1341 = vmatprep.mubr.f32.mxu0 %v11987_v52  ;;  %v727_v52 = vrot.slane %v12009_v19, 2 }
 0x117   : > { %1342 = vmatmul.mubr.f32.gmra.mrb[36].mxu0 %v12347_v25 }
 0x118   : > { %1346 = vmatprep.mubr.f32.mxu0 %v11990_v56  ;;  %v728_v56 = vrot.slane %v12012_v14, 2 }
 0x11a   : > { %v12373_v28 = vsel %vm671_vm1, %v727_v52, %v728_v56  ;;  %v12379_v29 = vsel %vm671_vm1, %v728_v56, %v730_v7  ;;  %v955_v52 = vld [vmem:[%s17490_s1 + $0x448] sm:$0xff]  ;;  %v956_v7 = vld [vmem:[%s17490_s1 + $0x450] sm:$0xff] }
 0x11b   : > { %1347 = vmatmul.mubr.f32.gmra.mrb[38].mxu0 %v12353_v63  ;;  %v10334_v56 = vpack.c.bf16 %v955_v52, %v954_v49  ;;  %v923_v49 = vld [vmem:[%s17490_s1 + $0x348] sm:$0xff]  ;;  %v924_v52 = vld [vmem:[%s17490_s1 + $0x350] sm:$0xff] }
 0x11c   : > { %1351 = vmatprep.mubr.f32.mxu0 %v12009_v19  ;;  %v732_v19 = vrot.slane %v12031_v32, 2 }
 0x11f   : > { %1352 = vmatmul.mubr.f32.gmra.mrb[40].mxu0 %v12360_v53 }
 0x120   : > { %1356 = vmatprep.mubr.f32.mxu0 %v12012_v14  ;;  %v733_v14 = vrot.slane %v12034_v1, 2 }
 0x122   : > { %v12392_v43 = vsel %vm671_vm1, %v732_v19, %v733_v14  ;;  %v957_v19 = vld [vmem:[%s17490_s1 + $0x458] sm:$0xff] }
 0x123   : > { %1357 = vmatmul.mubr.f32.gmra.mrb[42].mxu0 %v12366_v31 }
 0x124   : > { %1361 = vmatprep.mubr.f32.mxu0 %v12031_v32  ;;  %v735_v32 = vrot.slane %v12044_v30, 2  ;;  %v737_v30 = vrot.slane %v12053_v58, 2 }
 0x126   : > { %v12404_v50 = vsel %vm671_vm1, %v733_v14, %v735_v32  ;;  %v12417_v4 = vsel %vm671_vm1, %v737_v30, %v738_v54  ;;  %v10338_v14 = vpack.c.bf16 %v957_v19, %v956_v7  ;;  %v958_v32 = vld [vmem:[%s17490_s1 + $0x460] sm:$0xff]  ;;  %v960_v30 = vld [vmem:[%s17490_s1 + $0x470] sm:$0xff]  ;;  %v927_v7 = vld [vmem:[%s17490_s1 + $0x368] sm:$0xff] }
 0x127   : > { %1362 = vmatmul.mubr.f32.gmra.mrb[44].mxu0 %v12373_v28  ;;  %v928_v19 = vld [vmem:[%s17490_s1 + $0x370] sm:$0xff] }
 0x128   : > { %1366 = vmatprep.mubr.f32.mxu0 %v12034_v1  ;;  %v948_v1 = vld [vmem:[%s17490_s1 + $0x410] sm:$0xff] }
 0x129   : > { %v10322_v38 = vpack.c.bf16 %v949_v57, %v948_v1  ;;  %v959_v1 = vld [vmem:[%s17490_s1 + $0x468] sm:$0xff] }
 0x12a   : > { %v10342_v57 = vpack.c.bf16 %v959_v1, %v958_v32  ;;  %v17706_v32 = vld [vmem:[#allocation3_spill] sm:$0xff] }
 0x12b   : > { %1367 = vmatmul.mubr.f32.gmra.mrb[46].mxu0 %v12379_v29  ;;  %10323 = vmatprep.subr.bf16.mxu1 %v10322_v38  ;;  %v932_v1 = vld [vmem:[%s17490_s1 + $0x390] sm:$0xff] }
 0x12c   : > { %1371 = vmatprep.mubr.f32.mxu0 %v12053_v58  ;;  %10325 = vmatpush3.bf16.msra.mxu1 %v10322_v38  ;;  %v740_v58 = vrot.slane %v12066_v3, 2  ;;  %v742_v3 = vrot.slane %v12075_v27, 2  ;;  %v12474_v38 = vld [vmem:[%s11556_s15 + $0x188] sm:$0xff] }
 0x12d   : > { %10327 = vmatprep.subr.bf16.mxu1 %v10326_v60 }
 0x12e   : > { %v12429_v34 = vsel %vm671_vm1, %v738_v54, %v740_v58  ;;  %v961_v54 = vld [vmem:[%s17490_s1 + $0x478] sm:$0xff] }
 0x12f   : > { %1372 = vmatmul.mubr.f32.gmra.mrb[48].mxu0 %v12392_v43  ;;  %v10346_v10 = vpack.c.bf16 %v961_v54, %v960_v30  ;;  %v934_v30 = vld [vmem:[%s17490_s1 + $0x3a0] sm:$0xff]  ;;  %v935_v54 = vld [vmem:[%s17490_s1 + $0x3a8] sm:$0xff] }
 0x130   : > { %1376 = vmatprep.mubr.f32.mxu0 %v12056_v40  ;;  %10329 = vmatpush3.bf16.msra.mxu1 %v10326_v60  ;;  %v952_v40 = vld [vmem:[%s17490_s1 + $0x430] sm:$0xff]  ;;  %v915_v60 = vld [vmem:[%s17490_s1 + $0x308] sm:$0xff] }
 0x131   : > { %v10330_v61 = vpack.c.bf16 %v953_v21, %v952_v40  ;;  %v916_v40 = vld [vmem:[%s17490_s1 + $0x310] sm:$0xff]  ;;  %v917_v21 = vld [vmem:[%s17490_s1 + $0x318] sm:$0xff] }
 0x133   : > { %1377 = vmatmul.mubr.f32.gmra.mrb[50].mxu0 %v12404_v50  ;;  %10331 = vmatprep.subr.bf16.mxu1 %v10330_v61 }
 0x134   : > { %1381 = vmatprep.mubr.f32.mxu0 %v12075_v27  ;;  %10333 = vmatpush3.bf16.msra.mxu1 %v10330_v61  ;;  %v12442_v27 = vsel %vm671_vm1, %v742_v3, %v743_v36  ;;  %v10274_v61 = vpack.c.bf16 %v917_v21, %v916_v40  ;;  %v919_v3 = vld [vmem:[%s17490_s1 + $0x328] sm:$0xff]  ;;  %v938_v40 = vld [vmem:[%s17490_s1 + $0x3c0] sm:$0xff] }
 0x135   : > { %10335 = vmatprep.subr.bf16.mxu1 %v10334_v56  ;;  %v939_v21 = vld [vmem:[%s17490_s1 + $0x3c8] sm:$0xff] }
 0x137   : > { %1382 = vmatmul.mubr.f32.gmra.mrb[52].mxu0 %v12417_v4 }
 0x138   : > { %1386 = vmatprep.mubr.f32.mxu0 %v12078_v26  ;;  %v745_v26 = vrot.slane %v12088_v17, 2  ;;  %10337 = vmatpush3.bf16.msra.mxu1 %v10334_v56  ;;  %v747_v17 = vrot.slane %v12097_v37, 2  ;;  %v925_v56 = vld [vmem:[%s17490_s1 + $0x358] sm:$0xff] }
 0x139   : > { %10339 = vmatprep.subr.bf16.mxu1 %v10338_v14 }
 0x13a   : > { %v12454_v16 = vsel %vm671_vm1, %v743_v36, %v745_v26  ;;  %v921_v36 = vld [vmem:[%s17490_s1 + $0x338] sm:$0xff]  ;;  %v926_v26 = vld [vmem:[%s17490_s1 + $0x360] sm:$0xff] }
 0x13b   : > { %1387 = vmatmul.mubr.f32.gmra.mrb[54].mxu0 %v12429_v34 }
 0x13c   : > { %1391 = vmatprep.mubr.f32.mxu0 %v12097_v37  ;;  %10341 = vmatpush3.bf16.msra.mxu1 %v10338_v14  ;;  %v12470_v37 = vsel %vm671_vm1, %v747_v17, %v748_v62  ;;  %v929_v14 = vld [vmem:[%s17490_s1 + $0x378] sm:$0xff]  ;;  %v930_v17 = vld [vmem:[%s17490_s1 + $0x380] sm:$0xff] }
 0x13d   : > { %10343 = vmatprep.subr.bf16.mxu1 %v10342_v57 }
 0x13f   : > { %1392 = vmatmul.mubr.f32.gmra.mrb[56].mxu0 %v12442_v27 }
 0x140   : > { %1396 = vmatprep.mubr.f32.mxu0 %v12100_v35  ;;  %v750_v35 = vrot.slane %v12110_v23, 2  ;;  %10345 = vmatpush3.bf16.msra.mxu1 %v10342_v57  ;;  %v914_v23 = vld [vmem:[%s17490_s1 + $0x300] sm:$0xff]  ;;  %v933_v57 = vld [vmem:[%s17490_s1 + $0x398] sm:$0xff] }
 0x141   : > { %10347 = vmatprep.subr.bf16.mxu1 %v10346_v10  ;;  %v10271_v58 = vpack.c.bf16 %v915_v60, %v914_v23  ;;  %v936_v23 = vld [vmem:[%s17490_s1 + $0x3b0] sm:$0xff]  ;;  %v937_v60 = vld [vmem:[%s17490_s1 + $0x3b8] sm:$0xff] }
 0x142   : > { %v12485_v12 = vsel %vm671_vm1, %v748_v62, %v750_v35  ;;  %v931_v62 = vld [vmem:[%s17490_s1 + $0x388] sm:$0xff]  ;;  %v17707_v35 = vld [vmem:[#allocation4_spill] sm:$0xff] }
 0x143   : > { %1397 = vmatmul.mubr.f32.gmra.mrb[58].mxu0 %v12454_v16 }
 0x144   : > { %1401 = vmatprep.mubr.f32.mxu0 %v12459_v44  ;;  %10349 = vmatpush3.bf16.msra.mxu1 %v10346_v10  ;;  %v17708_v10 = vld [vmem:[#allocation5_spill] sm:$0xff] }
 0x145   : > { %10398 = vmatprep.subr.bf16.mxu1 %v17704_v0 }
 0x147   : > { %1402 = vmatmul.mubr.f32.gmra.mrb[60].mxu0 %v12470_v37  ;;  %9919 = vmatmul.mubr.f32.vlgmr.msra.gmra.mrb[0].mxu1 %v12190_v22 }
 0x148   : > { %1406 = vmatprep.mubr.f32.mxu0 %v12474_v38  ;;  %9921 = vmatprep.mubr.f32.mxu1 %v12204_v15 }
 0x14b   : > { %1407 = vmatmul.mubr.f32.gmra.mrb[62].mxu0 %v12485_v12  ;;  %9922 = vmatmul.mubr.f32.gmra.mrb[2].mxu1 %v12217_v47 }
 0x14c   : > { %1476 = vmatprep.mubr.f32.mxu0 %v12153_v5  ;;  %v918_v5 = vld [vmem:[%s17490_s1 + $0x320] sm:$0xff]  ;;  %9924 = vmatprep.mubr.f32.mxu1 %v12231_v45 }
 0x14f   : > { %1477 = vmatmul.mubr.f32.vlgmr.msra.gmra.mrb[0].mxu0 %v11696_v9  ;;  %v10277_v9 = vpack.c.bf16 %v919_v3, %v918_v5  ;;  %9925 = vmatmul.mubr.f32.gmra.mrb[4].mxu1 %v12244_v11  ;;  %v940_v5 = vld [vmem:[%s17490_s1 + $0x3d0] sm:$0xff]  ;;  %v941_v3 = vld [vmem:[%s17490_s1 + $0x3d8] sm:$0xff] }
 0x150   : > { %10272 = vmatpush1.bf16.msra.mxu0 %v10271_v58  ;;  %1481 = vmatprep.mubr.f32.mxu0 %v12166_v13  ;;  %v920_v13 = vld [vmem:[%s17490_s1 + $0x330] sm:$0xff]  ;;  %v17709_v58 = vld [vmem:[#allocation6_spill] sm:$0xff] }
 0x151   : > { %10273 = vmatprep.subr.bf16.mxu0 %v17704_v0  ;;  %9927 = vmatprep.mubr.f32.mxu1 %v12258_v59 }
 0x153   : > { %1482 = vmatmul.mubr.f32.gmra.mrb[2].mxu0 %v11718_v18  ;;  %v10280_v18 = vpack.c.bf16 %v921_v36, %v920_v13  ;;  %9928 = vmatmul.mubr.f32.gmra.mrb[6].mxu1 %v12271_v51  ;;  %v795_v13 = vrot.slane %v12474_v38, 2  ;;  %v12637_v36 = vld [vmem:[%s11556_s15 + $0x190] sm:$0x3] }
 0x154   : > { %1486 = vmatprep.mubr.f32.mxu0 %v11773_v39  ;;  %10275 = vmatpush1.bf16.msra.mxu0 %v10274_v61  ;;  %v922_v39 = vld [vmem:[%s17490_s1 + $0x340] sm:$0xff]  ;;  %v17710_v61 = vld [vmem:[#allocation7_spill] sm:$0xff] }
 0x155   : > { %10276 = vmatprep.subr.bf16.mxu0 %v17704_v0  ;;  %9930 = vmatprep.mubr.f32.mxu1 %v12285_v20 }
 0x157   : > { %1487 = vmatmul.mubr.f32.gmra.mrb[4].mxu0 %v11735_v24  ;;  %9931 = vmatmul.mubr.f32.gmra.mrb[8].mxu1 %v12298_v6 }
 0x158   : > { %1491 = vmatprep.mubr.f32.mxu0 %v12190_v22  ;;  %10278 = vmatpush1.bf16.msra.mxu0 %v10277_v9  ;;  %v10283_v22 = vpack.c.bf16 %v923_v49, %v922_v39  ;;  %v794_v9 = vrot.slane %v12459_v44, 2  ;;  %v797_v39 = vrot.slane %v12637_v36, 2  ;;  %v942_v49 = vld [vmem:[%s17490_s1 + $0x3e0] sm:$0xff] }
 0x159   : > { %10279 = vmatprep.subr.bf16.mxu0 %v17704_v0  ;;  %9933 = vmatprep.mubr.f32.mxu1 %v12312_v42 }
 0x15b   : > { %1492 = vmatmul.mubr.f32.gmra.mrb[6].mxu0 %v11756_v33  ;;  %9934 = vmatmul.mubr.f32.gmra.mrb[10].mxu1 %v12325_v8 }
 0x15c   : > { %1496 = vmatprep.mubr.f32.mxu0 %v12204_v15  ;;  %10281 = vmatpush1.bf16.msra.mxu0 %v10280_v18  ;;  %v10286_v15 = vpack.c.bf16 %v925_v56, %v924_v52  ;;  %v10310_v18 = vpack.c.bf16 %v941_v3, %v940_v5  ;;  %v796_v52 = vsel %vm671_vm1, %v794_v9, %v795_v13  ;;  %v2592_v5 = vld [vmem:[%s17491_s2 + $0x10] sm:$0xff]  ;;  %v2593_v9 = vld [vmem:[%s17491_s2 + $0x18] sm:$0xff] }
 0x15d   : > { %10282 = vmatprep.subr.bf16.mxu0 %v17704_v0  ;;  %9936 = vmatprep.mubr.f32.mxu1 %v12333_v46 }
 0x15f   : > { %1497 = vmatmul.mubr.f32.gmra.mrb[8].mxu0 %v11779_v41  ;;  %9937 = vmatmul.mubr.f32.gmra.mrb[12].mxu1 %v12340_v2 }
 0x160   : > { %1501 = vmatprep.mubr.f32.mxu0 %v12217_v47  ;;  %10284 = vmatpush1.bf16.msra.mxu0 %v10283_v22  ;;  %v10289_v47 = vpack.c.bf16 %v927_v7, %v926_v26  ;;  %v943_v22 = vld [vmem:[%s17490_s1 + $0x3e8] sm:$0xff]  ;;  %v944_v26 = vld [vmem:[%s17490_s1 + $0x3f0] sm:$0xff]  ;;  %v945_v7 = vld [vmem:[%s17490_s1 + $0x3f8] sm:$0xff] }
 0x161   : > { %10285 = vmatprep.subr.bf16.mxu0 %v17704_v0  ;;  %9939 = vmatprep.mubr.f32.mxu1 %v12347_v25  ;;  %v10313_v56 = vpack.c.bf16 %v943_v22, %v942_v49  ;;  %v2626_v49 = vld [vmem:[%s17491_s2 + $0x120] sm:$0xff]  ;;  %v2627_v22 = vld [vmem:[%s17491_s2 + $0x128] sm:$0xff] }
 0x163   : > { %1502 = vmatmul.mubr.f32.gmra.mrb[10].mxu0 %v11798_v48  ;;  %9940 = vmatmul.mubr.f32.gmra.mrb[14].mxu1 %v12353_v63 }
 0x164   : > { %1506 = vmatprep.mubr.f32.mxu0 %v12231_v45  ;;  %10287 = vmatpush1.bf16.msra.mxu0 %v10286_v15  ;;  %v10292_v45 = vpack.c.bf16 %v929_v14, %v928_v19  ;;  %v798_v15 = vsel %vm671_vm1, %v795_v13, %v797_v39  ;;  %v17714_v19 = vld [vmem:[#allocation11_spill] sm:$0xff]  ;;  %v17715_v14 = vld [vmem:[#allocation12_spill] sm:$0xff]  ;;  %v10354_v39 = vpack.c.bf16 %v2593_v9, %v2592_v5  ;;  %v11374_v5 = vld [vmem:[%s11556_s15 + $0x60] sm:$0xff] }
 0x165   : > { %10288 = vmatprep.subr.bf16.mxu0 %v17704_v0  ;;  %9942 = vmatprep.mubr.f32.mxu1 %v12360_v53  ;;  %v2624_v13 = vld [vmem:[%s17491_s2 + $0x110] sm:$0xff] }
 0x167   : > { %1507 = vmatmul.mubr.f32.gmra.mrb[12].mxu0 %v11815_v55  ;;  %9943 = vmatmul.mubr.f32.gmra.mrb[16].mxu1 %v12366_v31 }
 0x168   : > { %1511 = vmatprep.mubr.f32.mxu0 %v12244_v11  ;;  %10290 = vmatpush1.bf16.msra.mxu0 %v10289_v47  ;;  %v10295_v11 = vpack.c.bf16 %v931_v62, %v930_v17  ;;  %v17713_v47 = vld [vmem:[#allocation10_spill] sm:$0xff]  ;;  %v17718_v17 = vld [vmem:[#allocation15_spill] sm:$0xff]  ;;  %v17720_v62 = vld [vmem:[#allocation17_spill] sm:$0xff] }
 0x169   : > { %10291 = vmatprep.subr.bf16.mxu0 %v17704_v0  ;;  %9945 = vmatprep.mubr.f32.mxu1 %v12373_v28 }
 0x16b   : > { %1512 = vmatmul.mubr.f32.gmra.mrb[14].mxu0 %v17706_v32  ;;  %9946 = vmatmul.mubr.f32.gmra.mrb[18].mxu1 %v12379_v29 }
 0x16c   : > { %1516 = vmatprep.mubr.f32.mxu0 %v12258_v59  ;;  %10293 = vmatpush1.bf16.msra.mxu0 %v10292_v45  ;;  %v10298_v59 = vpack.c.bf16 %v933_v57, %v932_v1  ;;  %v17716_v45 = vld [vmem:[#allocation13_spill] sm:$0xff]  ;;  %v12706_v57 = vld [vmem:[%s11556_s15 + $0x1a8] sm:$0x3] }
 0x16d   : > { %10294 = vmatprep.subr.bf16.mxu0 %v17704_v0  ;;  %9948 = vmatprep.mubr.f32.mxu1 %v12392_v43  ;;  %v12701_v1 = vld [vmem:[%s11556_s15 + $0x1a0] sm:$0xff] }
 0x16f   : > { %1517 = vmatmul.mubr.f32.gmra.mrb[16].mxu0 %v17707_v35  ;;  %9949 = vmatmul.mubr.f32.gmra.mrb[20].mxu1 %v12404_v50 }
 0x170   : > { %1521 = vmatprep.mubr.f32.mxu0 %v12271_v51  ;;  %10296 = vmatpush1.bf16.msra.mxu0 %v10295_v11  ;;  %v10301_v51 = vpack.c.bf16 %v935_v54, %v934_v30  ;;  %v12698_v11 = vld [vmem:[%s11556_s15 + $0x198] sm:$0xff]  ;;  %v790_v54 = vrot.slane %v12637_v36, 1  ;;  %v11370_v36 = vld [vmem:[%s11556_s15 + $0x30] sm:$0xff] }
 0x171   : > { %10297 = vmatprep.subr.bf16.mxu0 %v17704_v0  ;;  %9951 = vmatprep.mubr.f32.mxu1 %v12417_v4 }
 0x173   : > { %1522 = vmatmul.mubr.f32.gmra.mrb[18].mxu0 %v17708_v10  ;;  %9952 = vmatmul.mubr.f32.gmra.mrb[22].mxu1 %v12429_v34 }
 0x174   : > { %1526 = vmatprep.mubr.f32.mxu0 %v12285_v20  ;;  %10299 = vmatpush1.bf16.msra.mxu0 %v10298_v59  ;;  %v10304_v20 = vpack.c.bf16 %v937_v60, %v936_v23  ;;  %v17728_v59 = vld [vmem:[#allocation25_spill] sm:$0xff] }
 0x175   : > { %10300 = vmatprep.subr.bf16.mxu0 %v17704_v0  ;;  %9954 = vmatprep.mubr.f32.mxu1 %v12442_v27  ;;  %v2590_v60 = vld [vmem:[%s17491_s2] sm:$0xff] }
 0x177   : > { %1527 = vmatmul.mubr.f32.gmra.mrb[20].mxu0 %v17709_v58  ;;  %9955 = vmatmul.mubr.f32.gmra.mrb[24].mxu1 %v12454_v16 }
 0x178   : > { %1531 = vmatprep.mubr.f32.mxu0 %v12298_v6  ;;  %10302 = vmatpush1.bf16.msra.mxu0 %v10301_v51  ;;  %v10307_v6 = vpack.c.bf16 %v939_v21, %v938_v40  ;;  %v2622_v40 = vld [vmem:[%s17491_s2 + $0x100] sm:$0xff] }
 0x179   : > { %10303 = vmatprep.subr.bf16.mxu0 %v17704_v0  ;;  %9957 = vmatprep.mubr.f32.mxu1 %v12470_v37 }
 0x17b   : > { %1532 = vmatmul.mubr.f32.gmra.mrb[22].mxu0 %v17710_v61  ;;  %9958 = vmatmul.mubr.f32.gmra.mrb[26].mxu1 %v12485_v12 }
 0x17c   : > { %1536 = vmatprep.mubr.f32.mxu0 %v12312_v42  ;;  %10305 = vmatpush1.bf16.msra.mxu0 %v10304_v20  ;;  %v17711_v42 = vld [vmem:[#allocation8_spill] sm:$0xff]  ;;  %v2591_v20 = vld [vmem:[%s17491_s2 + $0x8] sm:$0xff] }
 0x17d   : > { %10306 = vmatprep.subr.bf16.mxu0 %v17704_v0  ;;  %9960 = vmatprep.mubr.f32.mxu1 %v796_v52  ;;  %v10351_v21 = vpack.c.bf16 %v2591_v20, %v2590_v60 }
 0x17f   : > { %1537 = vmatmul.mubr.f32.gmra.mrb[24].mxu0 %v17711_v42  ;;  %9961 = vmatmul.mubr.f32.gmra.mrb[28].mxu1 %v798_v15 }
 0x180   : > { %1541 = vmatprep.mubr.f32.mxu0 %v12325_v8  ;;  %10308 = vmatpush1.bf16.msra.mxu0 %v10307_v6  ;;  %v17712_v8 = vld [vmem:[#allocation9_spill] sm:$0xff]  ;;  %v2623_v6 = vld [vmem:[%s17491_s2 + $0x108] sm:$0xff] }
 0x181   : > { %10309 = vmatprep.subr.bf16.mxu0 %v17704_v0  ;;  %v10399_v3 = vpack.c.bf16 %v2623_v6, %v2622_v40  ;;  %v2632_v40 = vld [vmem:[%s17491_s2 + $0x150] sm:$0xff] }
 0x182   : > { %v2600_v6 = vld [vmem:[%s17491_s2 + $0x50] sm:$0xff] }
 0x183   : > { %1542 = vmatmul.mubr.f32.gmra.mrb[26].mxu0 %v17712_v8  ;;  %10400 = vmatpush1.bf16.msra.mxu1 %v10399_v3 }
 0x184   : > { %1546 = vmatprep.mubr.f32.mxu0 %v12333_v46  ;;  %10311 = vmatpush1.bf16.msra.mxu0 %v10310_v18  ;;  %v10316_v46 = vpack.c.bf16 %v945_v7, %v944_v26  ;;  %v2628_v7 = vld [vmem:[%s17491_s2 + $0x130] sm:$0xff] }
 0x185   : > { %10312 = vmatprep.subr.bf16.mxu0 %v17704_v0  ;;  %10401 = vmatprep.subr.bf16.mxu1 %v17704_v0 }
 0x187   : > { %1547 = vmatmul.mubr.f32.gmra.mrb[28].mxu0 %v17713_v47 }
 0x188   : > { %1551 = vmatprep.mubr.f32.mxu0 %v12340_v2  ;;  %10314 = vmatpush1.bf16.msra.mxu0 %v10313_v56  ;;  %v17717_v2 = vld [vmem:[#allocation14_spill] sm:$0xff]  ;;  %v11371_v56 = vld [vmem:[%s11556_s15 + $0x38] sm:$0xff] }
 0x189   : > { %10315 = vmatprep.subr.bf16.mxu0 %v17704_v0 }
 0x18b   : > { %1552 = vmatmul.mubr.f32.gmra.mrb[30].mxu0 %v17714_v19 }
 0x18c   : > { %1556 = vmatprep.mubr.f32.mxu0 %v12347_v25  ;;  %10317 = vmatpush1.bf16.msra.mxu0 %v10316_v46  ;;  %v17719_v25 = vld [vmem:[#allocation16_spill] sm:$0xff] }
 0x18d   : > { %10350 = vmatprep.subr.bf16.mxu0 %v17704_v0  ;;  %v2629_v46 = vld [vmem:[%s17491_s2 + $0x138] sm:$0xff] }
 0x18f   : > { %1557 = vmatmul.mubr.f32.gmra.mrb[32].mxu0 %v17715_v14 }
 0x190   : > { %1561 = vmatprep.mubr.f32.mxu0 %v12353_v63  ;;  %v17721_v63 = vld [vmem:[#allocation18_spill] sm:$0xff] }
 0x193   : > { %1562 = vmatmul.mubr.f32.gmra.mrb[34].mxu0 %v17716_v45 }
 0x194   : > { %1566 = vmatprep.mubr.f32.mxu0 %v12360_v53  ;;  %v17722_v53 = vld [vmem:[#allocation19_spill] sm:$0xff] }
 0x197   : > { %1567 = vmatmul.mubr.f32.gmra.mrb[36].mxu0 %v17717_v2 }
 0x198   : > { %1571 = vmatprep.mubr.f32.mxu0 %v12366_v31  ;;  %v17723_v31 = vld [vmem:[#allocation20_spill] sm:$0xff] }
 0x19b   : > { %1572 = vmatmul.mubr.f32.gmra.mrb[38].mxu0 %v17718_v17 }
 0x19c   : > { %1576 = vmatprep.mubr.f32.mxu0 %v12373_v28  ;;  %v17724_v28 = vld [vmem:[#allocation21_spill] sm:$0xff] }
 0x19f   : > { %1577 = vmatmul.mubr.f32.gmra.mrb[40].mxu0 %v17719_v25 }
 0x1a0   : > { %1581 = vmatprep.mubr.f32.mxu0 %v12379_v29  ;;  %v17725_v29 = vld [vmem:[#allocation22_spill] sm:$0xff] }
 0x1a3   : > { %1582 = vmatmul.mubr.f32.gmra.mrb[42].mxu0 %v17720_v62 }
 0x1a4   : > { %1586 = vmatprep.mubr.f32.mxu0 %v12392_v43  ;;  %v17726_v43 = vld [vmem:[#allocation23_spill] sm:$0xff] }
 0x1a7   : > { %1587 = vmatmul.mubr.f32.gmra.mrb[44].mxu0 %v17721_v63 }
 0x1a8   : > { %1591 = vmatprep.mubr.f32.mxu0 %v12404_v50  ;;  %v17727_v50 = vld [vmem:[#allocation24_spill] sm:$0xff] }
 0x1ab   : > { %1592 = vmatmul.mubr.f32.gmra.mrb[46].mxu0 %v17722_v53 }
 0x1ac   : > { %1596 = vmatprep.mubr.f32.mxu0 %v12417_v4  ;;  %v787_v4 = vrot.slane %v12459_v44, 1 }
 0x1af   : > { %1597 = vmatmul.mubr.f32.gmra.mrb[48].mxu0 %v17723_v31 }
 0x1b0   : > { %1601 = vmatprep.mubr.f32.mxu0 %v12429_v34  ;;  %v788_v34 = vrot.slane %v12474_v38, 1 }
 0x1b2   : > { %v12712_v30 = vsel %vm558_vm0, %v787_v4, %v788_v34  ;;  %v12718_v23 = vsel %vm558_vm0, %v788_v34, %v790_v54  ;;  %v2596_v4 = vld [vmem:[%s17491_s2 + $0x30] sm:$0xff]  ;;  %v11372_v34 = vld [vmem:[%s11556_s15 + $0x48] sm:$0xff]  ;;  %v2598_v54 = vld [vmem:[%s17491_s2 + $0x40] sm:$0xff] }
 0x1b3   : > { %1602 = vmatmul.mubr.f32.gmra.mrb[50].mxu0 %v17724_v28 }
 0x1b4   : > { %1606 = vmatprep.mubr.f32.mxu0 %v12442_v27  ;;  %v811_v27 = vrot.slane %v12698_v11, 2 }
 0x1b7   : > { %1607 = vmatmul.mubr.f32.gmra.mrb[52].mxu0 %v17725_v29 }
 0x1b8   : > { %1611 = vmatprep.mubr.f32.mxu0 %v12454_v16  ;;  %v812_v16 = vrot.slane %v12701_v1, 2 }
 0x1bb   : > { %1612 = vmatmul.mubr.f32.gmra.mrb[54].mxu0 %v17726_v43 }
 0x1bc   : > { %1616 = vmatprep.mubr.f32.mxu0 %v12470_v37  ;;  %v814_v37 = vrot.slane %v12706_v57, 2 }
 0x1be   : > { %v815_v51 = vsel %vm671_vm1, %v812_v16, %v814_v37  ;;  %v2630_v37 = vld [vmem:[%s17491_s2 + $0x140] sm:$0xff] }
 0x1bf   : > { %1617 = vmatmul.mubr.f32.gmra.mrb[56].mxu0 %v17727_v50 }
 0x1c0   : > { %1621 = vmatprep.mubr.f32.mxu0 %v12485_v12  ;;  %v813_v12 = vsel %vm671_vm1, %v811_v27, %v812_v16  ;;  %v10408_v27 = vpack.c.bf16 %v2629_v46, %v2628_v7  ;;  %v2638_v7 = vld [vmem:[%s17491_s2 + $0x180] sm:$0xff]  ;;  %v2639_v46 = vld [vmem:[%s17491_s2 + $0x188] sm:$0xff] }
 0x1c1   : > { %9963 = vmatprep.mubr.f32.mxu1 %v813_v12  ;;  %v2631_v12 = vld [vmem:[%s17491_s2 + $0x148] sm:$0xff] }
 0x1c2   : > { %9964 = vmatmul.mubr.f32.gmra.mrb[30].mxu1 %v815_v51  ;;  %v11373_v51 = vld [vmem:[%s11556_s15 + $0x50] sm:$0xff]  ;;  %v10411_v60 = vpack.c.bf16 %v2631_v12, %v2630_v37  ;;  %v2641_v37 = vld [vmem:[%s17491_s2 + $0x198] sm:$0xff] }
 0x1c3   : > { %1622 = vmatmul.mubr.f32.gmra.mrb[58].mxu0 %v17728_v59  ;;  %v2608_v12 = vld [vmem:[%s17491_s2 + $0x90] sm:$0xff] }
 0x1c4   : > { %1626 = vmatprep.mubr.f32.mxu0 %v796_v52  ;;  %v2594_v52 = vld [vmem:[%s17491_s2 + $0x20] sm:$0xff] }
 0x1c7   : > { %1627 = vmatmul.mubr.f32.gmra.mrb[60].mxu0 %v12712_v30 }
 0x1c8   : > { %1631 = vmatprep.mubr.f32.mxu0 %v798_v15  ;;  %v10405_v15 = vpack.c.bf16 %v2627_v22, %v2626_v49  ;;  %v2636_v22 = vld [vmem:[%s17491_s2 + $0x170] sm:$0xff] }
 0x1cb   : > { %1632 = vmatmul.mubr.f32.gmra.mrb[62].mxu0 %v12718_v23 }
 0x1cc   : > { %1701 = vmatprep.mubr.f32.mxu0 %v11735_v24  ;;  %v2625_v24 = vld [vmem:[%s17491_s2 + $0x118] sm:$0xff] }
 0x1cd   : > { %v10402_v18 = vpack.c.bf16 %v2625_v24, %v2624_v13  ;;  %v2634_v13 = vld [vmem:[%s17491_s2 + $0x160] sm:$0xff]  ;;  %v2635_v24 = vld [vmem:[%s17491_s2 + $0x168] sm:$0xff] }
 0x1cf   : > { %1702 = vmatmul.mubr.f32.vlgmr.msra.gmra.mrb[0].mxu0 %v11370_v36  ;;  %10403 = vmatpush1.bf16.msra.mxu1 %v10402_v18  ;;  %v2602_v36 = vld [vmem:[%s17491_s2 + $0x60] sm:$0xff]  ;;  %v11375_v18 = vld [vmem:[%s11556_s15 + $0x68] sm:$0xff] }
 0x1d0   : > { %1706 = vmatprep.mubr.f32.mxu0 %v11756_v33  ;;  %10352 = vmatpush1.bf16.msra.mxu0 %v10351_v21  ;;  %v2595_v33 = vld [vmem:[%s17491_s2 + $0x28] sm:$0xff]  ;;  %v2633_v21 = vld [vmem:[%s17491_s2 + $0x158] sm:$0xff] }
 0x1d1   : > { %10353 = vmatprep.subr.bf16.mxu0 %v17704_v0  ;;  %v10357_v26 = vpack.c.bf16 %v2595_v33, %v2594_v52  ;;  %10404 = vmatprep.subr.bf16.mxu1 %v17704_v0  ;;  %v10414_v3 = vpack.c.bf16 %v2633_v21, %v2632_v40  ;;  %v2637_v52 = vld [vmem:[%s17491_s2 + $0x178] sm:$0xff]  ;;  %v2604_v33 = vld [vmem:[%s17491_s2 + $0x70] sm:$0xff]  ;;  %v2610_v40 = vld [vmem:[%s17491_s2 + $0xa0] sm:$0xff] }
 0x1d2   : > { %v11379_v21 = vld [vmem:[%s11556_s15 + $0x98] sm:$0xff] }
 0x1d3   : > { %1707 = vmatmul.mubr.f32.gmra.mrb[2].mxu0 %v11371_v56  ;;  %10406 = vmatpush1.bf16.msra.mxu1 %v10405_v15  ;;  %v11376_v56 = vld [vmem:[%s11556_s15 + $0x78] sm:$0xff]  ;;  %v10420_v15 = vpack.c.bf16 %v2637_v52, %v2636_v22  ;;  %v11389_v22 = vld [vmem:[%s11556_s15 + $0x110] sm:$0xff] }
 0x1d4   : > { %1711 = vmatprep.mubr.f32.mxu0 %v11779_v41  ;;  %10355 = vmatpush1.bf16.msra.mxu0 %v10354_v39  ;;  %v2597_v41 = vld [vmem:[%s17491_s2 + $0x38] sm:$0xff]  ;;  %v10417_v39 = vpack.c.bf16 %v2635_v24, %v2634_v13  ;;  %v11380_v13 = vld [vmem:[%s11556_s15 + $0xa8] sm:$0xff] }
 0x1d5   : > { %10356 = vmatprep.subr.bf16.mxu0 %v17704_v0  ;;  %v10360_v16 = vpack.c.bf16 %v2597_v41, %v2596_v4  ;;  %10407 = vmatprep.subr.bf16.mxu1 %v17704_v0  ;;  %v2606_v4 = vld [vmem:[%s17491_s2 + $0x80] sm:$0xff] }
 0x1d6   : > { %v11377_v41 = vld [vmem:[%s11556_s15 + $0x80] sm:$0xff] }
 0x1d7   : > { %1712 = vmatmul.mubr.f32.gmra.mrb[4].mxu0 %v11372_v34  ;;  %10409 = vmatpush1.bf16.msra.mxu1 %v10408_v27  ;;  %v10423_v34 = vpack.c.bf16 %v2639_v46, %v2638_v7  ;;  %v2648_v46 = vld [vmem:[%s17491_s2 + $0x1d0] sm:$0xff] }
 0x1d8   : > { %1716 = vmatprep.mubr.f32.mxu0 %v11798_v48  ;;  %10358 = vmatpush1.bf16.msra.mxu0 %v10357_v26  ;;  %v2599_v48 = vld [vmem:[%s17491_s2 + $0x48] sm:$0xff] }
 0x1d9   : > { %10359 = vmatprep.subr.bf16.mxu0 %v17704_v0  ;;  %v10363_v20 = vpack.c.bf16 %v2599_v48, %v2598_v54  ;;  %10410 = vmatprep.subr.bf16.mxu1 %v17704_v0  ;;  %v11378_v54 = vld [vmem:[%s11556_s15 + $0x90] sm:$0xff] }
 0x1db   : > { %1717 = vmatmul.mubr.f32.gmra.mrb[6].mxu0 %v11373_v51  ;;  %10412 = vmatpush1.bf16.msra.mxu1 %v10411_v60  ;;  %v2642_v60 = vld [vmem:[%s17491_s2 + $0x1a0] sm:$0xff] }
 0x1dc   : > { %1721 = vmatprep.mubr.f32.mxu0 %v11815_v55  ;;  %10361 = vmatpush1.bf16.msra.mxu0 %v10360_v16  ;;  %v2601_v55 = vld [vmem:[%s17491_s2 + $0x58] sm:$0xff]  ;;  %v2640_v16 = vld [vmem:[%s17491_s2 + $0x190] sm:$0xff] }
 0x1dd   : > { %10362 = vmatprep.subr.bf16.mxu0 %v17704_v0  ;;  %v10366_v9 = vpack.c.bf16 %v2601_v55, %v2600_v6  ;;  %10413 = vmatprep.subr.bf16.mxu1 %v17704_v0  ;;  %v10426_v48 = vpack.c.bf16 %v2641_v37, %v2640_v16  ;;  %v2619_v16 = vld [vmem:[%s17491_s2 + $0xe8] sm:$0xff] }
 0x1df   : > { %1722 = vmatmul.mubr.f32.gmra.mrb[8].mxu0 %v11374_v5  ;;  %10415 = vmatpush1.bf16.msra.mxu1 %v10414_v3  ;;  %v2644_v5 = vld [vmem:[%s17491_s2 + $0x1b0] sm:$0xff]  ;;  %v2645_v3 = vld [vmem:[%s17491_s2 + $0x1b8] sm:$0xff] }
 0x1e0   : > { %1726 = vmatprep.mubr.f32.mxu0 %v17706_v32  ;;  %10364 = vmatpush1.bf16.msra.mxu0 %v10363_v20  ;;  %v2603_v32 = vld [vmem:[%s17491_s2 + $0x68] sm:$0xff]  ;;  %v10432_v24 = vpack.c.bf16 %v2645_v3, %v2644_v5 }
 0x1e1   : > { %10365 = vmatprep.subr.bf16.mxu0 %v17704_v0  ;;  %v10369_v49 = vpack.c.bf16 %v2603_v32, %v2602_v36  ;;  %10416 = vmatprep.subr.bf16.mxu1 %v17704_v0  ;;  %v2643_v20 = vld [vmem:[%s17491_s2 + $0x1a8] sm:$0xff]  ;;  %v11381_v32 = vld [vmem:[%s11556_s15 + $0xb0] sm:$0xff] }
 0x1e2   : > { %v10429_v6 = vpack.c.bf16 %v2643_v20, %v2642_v60  ;;  %v2652_v20 = vld [vmem:[%s17491_s2 + $0x1f0] sm:$0xff]  ;;  %v11396_v5 = vld [vmem:[%s11556_s15 + $0x168] sm:$0xff] }
 0x1e3   : > { %1727 = vmatmul.mubr.f32.gmra.mrb[10].mxu0 %v11375_v18  ;;  %10418 = vmatpush1.bf16.msra.mxu1 %v10417_v39  ;;  %v11383_v18 = vld [vmem:[%s11556_s15 + $0xc8] sm:$0xff]  ;;  %v11384_v39 = vld [vmem:[%s11556_s15 + $0xd8] sm:$0xff] }
 0x1e4   : > { %1731 = vmatprep.mubr.f32.mxu0 %v17707_v35  ;;  %10367 = vmatpush1.bf16.msra.mxu0 %v10366_v9  ;;  %v2605_v35 = vld [vmem:[%s17491_s2 + $0x78] sm:$0xff]  ;;  %v2612_v9 = vld [vmem:[%s17491_s2 + $0xb0] sm:$0xff] }
 0x1e5   : > { %10368 = vmatprep.subr.bf16.mxu0 %v17704_v0  ;;  %v10372_v26 = vpack.c.bf16 %v2605_v35, %v2604_v33  ;;  %10419 = vmatprep.subr.bf16.mxu1 %v17704_v0  ;;  %v11391_v33 = vld [vmem:[%s11556_s15 + $0x128] sm:$0xff] }
 0x1e6   : > { %v2647_v35 = vld [vmem:[%s17491_s2 + $0x1c8] sm:$0xff] }
 0x1e7   : > { %1732 = vmatmul.mubr.f32.gmra.mrb[12].mxu0 %v11376_v56  ;;  %10421 = vmatpush1.bf16.msra.mxu1 %v10420_v15  ;;  %v2616_v15 = vld [vmem:[%s17491_s2 + $0xd0] sm:$0xff] }
 0x1e8   : > { %1736 = vmatprep.mubr.f32.mxu0 %v17708_v10  ;;  %10370 = vmatpush1.bf16.msra.mxu0 %v10369_v49  ;;  %v2607_v10 = vld [vmem:[%s17491_s2 + $0x88] sm:$0xff]  ;;  %v11386_v49 = vld [vmem:[%s11556_s15 + $0xf0] sm:$0xff] }
 0x1e9   : > { %10371 = vmatprep.subr.bf16.mxu0 %v17704_v0  ;;  %v10375_v27 = vpack.c.bf16 %v2607_v10, %v2606_v4  ;;  %10422 = vmatprep.subr.bf16.mxu1 %v17704_v0  ;;  %v11392_v4 = vld [vmem:[%s11556_s15 + $0x138] sm:$0xff] }
 0x1eb   : > { %1737 = vmatmul.mubr.f32.gmra.mrb[14].mxu0 %v11377_v41  ;;  %10424 = vmatpush1.bf16.msra.mxu1 %v10423_v34 }
 0x1ec   : > { %1741 = vmatprep.mubr.f32.mxu0 %v17709_v58  ;;  %10373 = vmatpush1.bf16.msra.mxu0 %v10372_v26  ;;  %v2609_v58 = vld [vmem:[%s17491_s2 + $0x98] sm:$0xff] }
 0x1ed   : > { %10374 = vmatprep.subr.bf16.mxu0 %v17704_v0  ;;  %v10378_v51 = vpack.c.bf16 %v2609_v58, %v2608_v12  ;;  %10425 = vmatprep.subr.bf16.mxu1 %v17704_v0  ;;  %v2617_v26 = vld [vmem:[%s17491_s2 + $0xd8] sm:$0xff]  ;;  %v2651_v12 = vld [vmem:[%s17491_s2 + $0x1e8] sm:$0xff]  ;;  %v11393_v58 = vld [vmem:[%s11556_s15 + $0x140] sm:$0xff] }
 0x1ee   : > { %v10390_v7 = vpack.c.bf16 %v2617_v26, %v2616_v15  ;;  %v2718_v15 = vld [vmem:[%s17491_s2 + $0x400] sm:$0xff]  ;;  %v2719_v26 = vld [vmem:[%s17491_s2 + $0x408] sm:$0xff] }
 0x1ef   : > { %1742 = vmatmul.mubr.f32.gmra.mrb[16].mxu0 %v11378_v54  ;;  %10427 = vmatpush1.bf16.msra.mxu1 %v10426_v48  ;;  %v2620_v48 = vld [vmem:[%s17491_s2 + $0xf0] sm:$0xff] }
 0x1f0   : > { %1746 = vmatprep.mubr.f32.mxu0 %v17710_v61  ;;  %10376 = vmatpush1.bf16.msra.mxu0 %v10375_v27  ;;  %v2611_v61 = vld [vmem:[%s17491_s2 + $0xa8] sm:$0xff]  ;;  %v2618_v27 = vld [vmem:[%s17491_s2 + $0xe0] sm:$0xff] }
 0x1f1   : > { %10377 = vmatprep.subr.bf16.mxu0 %v17704_v0  ;;  %v10381_v55 = vpack.c.bf16 %v2611_v61, %v2610_v40  ;;  %10428 = vmatprep.subr.bf16.mxu1 %v17704_v0  ;;  %v10393_v37 = vpack.c.bf16 %v2619_v16, %v2618_v27  ;;  %v11394_v40 = vld [vmem:[%s11556_s15 + $0x150] sm:$0xff]  ;;  %v2722_v16 = vld [vmem:[%s17491_s2 + $0x420] sm:$0xff] }
 0x1f3   : > { %1747 = vmatmul.mubr.f32.gmra.mrb[18].mxu0 %v11379_v21  ;;  %10430 = vmatpush1.bf16.msra.mxu1 %v10429_v6 }
 0x1f4   : > { %1751 = vmatprep.mubr.f32.mxu0 %v17711_v42  ;;  %10379 = vmatpush1.bf16.msra.mxu0 %v10378_v51  ;;  %v2613_v42 = vld [vmem:[%s17491_s2 + $0xb8] sm:$0xff] }
 0x1f5   : > { %10380 = vmatprep.subr.bf16.mxu0 %v17704_v0  ;;  %v10384_v36 = vpack.c.bf16 %v2613_v42, %v2612_v9  ;;  %10431 = vmatprep.subr.bf16.mxu1 %v17704_v0  ;;  %v2621_v51 = vld [vmem:[%s17491_s2 + $0xf8] sm:$0xff]  ;;  %v804_v42 = vrot.slane %v12698_v11, 1 }
 0x1f6   : > { %v10396_v60 = vpack.c.bf16 %v2621_v51, %v2620_v48  ;;  %v2726_v51 = vld [vmem:[%s17491_s2 + $0x440] sm:$0xff] }
 0x1f7   : > { %1752 = vmatmul.mubr.f32.gmra.mrb[20].mxu0 %v11380_v13  ;;  %10433 = vmatpush1.bf16.msra.mxu1 %v10432_v24  ;;  %v805_v13 = vrot.slane %v12701_v1, 1 }
 0x1f8   : > { %1756 = vmatprep.mubr.f32.mxu0 %v17712_v8  ;;  %10382 = vmatpush1.bf16.msra.mxu0 %v10381_v55  ;;  %v11382_v8 = vld [vmem:[%s11556_s15 + $0xc0] sm:$0xff]  ;;  %v11395_v55 = vld [vmem:[%s11556_s15 + $0x158] sm:$0xff] }
 0x1f9   : > { %10383 = vmatprep.subr.bf16.mxu0 %v17704_v0  ;;  %10434 = vmatprep.subr.bf16.mxu1 %v17704_v0 }
 0x1fb   : > { %1757 = vmatmul.mubr.f32.gmra.mrb[22].mxu0 %v11381_v32 }
 0x1fc   : > { %1761 = vmatprep.mubr.f32.mxu0 %v17713_v47  ;;  %10385 = vmatpush1.bf16.msra.mxu0 %v10384_v36  ;;  %v11385_v47 = vld [vmem:[%s11556_s15 + $0xe0] sm:$0xff] }
 0x1fd   : > { %10386 = vmatprep.subr.bf16.mxu0 %v17704_v0 }
 0x1ff   : > { %1762 = vmatmul.mubr.f32.gmra.mrb[24].mxu0 %v11382_v8 }
 0x200   : > { %1766 = vmatprep.mubr.f32.mxu0 %v17714_v19  ;;  %v11387_v19 = vld [vmem:[%s11556_s15 + $0xf8] sm:$0xff] }
 0x203   : > { %1767 = vmatmul.mubr.f32.gmra.mrb[26].mxu0 %v11383_v18 }
 0x204   : > { %1771 = vmatprep.mubr.f32.mxu0 %v17715_v14  ;;  %v11388_v14 = vld [vmem:[%s11556_s15 + $0x108] sm:$0xff] }
 0x207   : > { %1772 = vmatmul.mubr.f32.gmra.mrb[28].mxu0 %v11384_v39 }
 0x208   : > { %1776 = vmatprep.mubr.f32.mxu0 %v17716_v45  ;;  %v11390_v45 = vld [vmem:[%s11556_s15 + $0x120] sm:$0xff] }
 0x20b   : > { %1777 = vmatmul.mubr.f32.gmra.mrb[30].mxu0 %v11385_v47 }
 0x20c   : > { %1781 = vmatprep.mubr.f32.mxu0 %v17717_v2 }
 0x20f   : > { %1782 = vmatmul.mubr.f32.gmra.mrb[32].mxu0 %v11386_v49 }
 0x210   : > { %1786 = vmatprep.mubr.f32.mxu0 %v17718_v17 }
 0x213   : > { %1787 = vmatmul.mubr.f32.gmra.mrb[34].mxu0 %v11387_v19 }
 0x214   : > { %1791 = vmatprep.mubr.f32.mxu0 %v17719_v25  ;;  %v2614_v25 = vld [vmem:[%s17491_s2 + $0xc0] sm:$0xff] }
 0x217   : > { %1792 = vmatmul.mubr.f32.gmra.mrb[36].mxu0 %v11388_v14 }
 0x218   : > { %1796 = vmatprep.mubr.f32.mxu0 %v17720_v62  ;;  %v2615_v62 = vld [vmem:[%s17491_s2 + $0xc8] sm:$0xff] }
 0x219   : > { %v10387_v52 = vpack.c.bf16 %v2615_v62, %v2614_v25 }
 0x21a   : > { %v12932_v2 = vpop.f32.mrb[0].mxu1 }
 0x21b   : > { %1797 = vmatmul.mubr.f32.gmra.mrb[38].mxu0 %v11389_v22  ;;  %v12934_v17 = vpop.f32.mrb[1].mxu1 }
 0x21c   : > { %1801 = vmatprep.mubr.f32.mxu0 %v17721_v63  ;;  %v2646_v63 = vld [vmem:[%s17491_s2 + $0x1c0] sm:$0xff]  ;;  %10388 = vmatpush1.bf16.msra.mxu0 %v10387_v52 }
 0x21d   : > { %v10435_v56 = vpack.c.bf16 %v2647_v35, %v2646_v63  ;;  %10389 = vmatprep.subr.bf16.mxu0 %v17704_v0 }
 0x21e   : > { %v13017_v41 = vpop.f32.mrb[2].mxu1 }
 0x21f   : > { %1802 = vmatmul.mubr.f32.gmra.mrb[40].mxu0 %v11390_v45  ;;  %10436 = vmatpush1.bf16.msra.mxu1 %v10435_v56  ;;  %v13019_v34 = vpop.f32.mrb[3].mxu1 }
 0x220   : > { %1806 = vmatprep.mubr.f32.mxu0 %v17722_v53  ;;  %v11456_v53 = vmov 0.0   ;;  %10437 = vmatprep.subr.bf16.mxu1 %v17704_v0 }
 0x221   : > { %403 = vst [vmem:[#allocation2 + $0x18] sm:$0xff] %v11456_v53  ;;  %404 = vst [vmem:[#allocation2 + $0x20] sm:$0xff] %v11456_v53  ;;  %10391 = vmatpush1.bf16.msra.mxu0 %v10390_v7  ;;  %v2332_v32 = vrot.slane %v11456_v53, 1 }
 0x222   : > { %400 = vst [vmem:[#allocation2] sm:$0xff] %v11456_v53  ;;  %402 = vst [vmem:[#allocation2 + $0x10] sm:$0x3] %v11456_v53  ;;  %10392 = vmatprep.subr.bf16.mxu0 %v17704_v0  ;;  %v13053_v21 = vpop.f32.mrb[4].mxu1 }
 0x223   : > { %1807 = vmatmul.mubr.f32.gmra.mrb[42].mxu0 %v11391_v33  ;;  %405 = vst [vmem:[#allocation2 + $0x28] sm:$0x3] %v11456_v53  ;;  %406 = vst [vmem:[#allocation2 + $0x30] sm:$0xff] %v11456_v53  ;;  %v13055_v6 = vpop.f32.mrb[5].mxu1 }
 0x224   : > { %407 = vst [vmem:[#allocation2 + $0x38] sm:$0xff] %v11456_v53  ;;  %408 = vst [vmem:[#allocation2 + $0x40] sm:$0x3] %v11456_v53  ;;  %1811 = vmatprep.mubr.f32.mxu0 %v17723_v31  ;;  %v2649_v31 = vld [vmem:[%s17491_s2 + $0x1d8] sm:$0xff] }
 0x225   : > { %409 = vst [vmem:[#allocation2 + $0x48] sm:$0xff] %v11456_v53  ;;  %410 = vst [vmem:[#allocation2 + $0x50] sm:$0xff] %v11456_v53  ;;  %v10438_v10 = vpack.c.bf16 %v2649_v31, %v2648_v46  ;;  %10394 = vmatpush1.bf16.msra.mxu0 %v10393_v37  ;;  %v10542_v46 = vpack.c.bf16 %v2719_v26, %v2718_v15  ;;  %v2720_v31 = vld [vmem:[%s17491_s2 + $0x410] sm:$0xff]  ;;  %v2723_v37 = vld [vmem:[%s17491_s2 + $0x428] sm:$0xff] }
 0x226   : > { %411 = vst [vmem:[#allocation2 + $0x58] sm:$0x3] %v11456_v53  ;;  %412 = vst [vmem:[#allocation2 + $0x60] sm:$0xff] %v11456_v53  ;;  %10395 = vmatprep.subr.bf16.mxu0 %v17704_v0  ;;  %v13062_v3 = vpop.f32.mrb[6].mxu1  ;;  %v2730_v15 = vld [vmem:[%s17491_s2 + $0x460] sm:$0xff]  ;;  %v2731_v26 = vld [vmem:[%s17491_s2 + $0x468] sm:$0xff] }
 0x227   : > { %413 = vst [vmem:[#allocation2 + $0x68] sm:$0xff] %v11456_v53  ;;  %414 = vst [vmem:[#allocation2 + $0x70] sm:$0x3] %v11456_v53  ;;  %1812 = vmatmul.mubr.f32.gmra.mrb[44].mxu0 %v11392_v4  ;;  %10439 = vmatpush1.bf16.msra.mxu1 %v10438_v10  ;;  %v13064_v9 = vpop.f32.mrb[7].mxu1  ;;  %v2721_v4 = vld [vmem:[%s17491_s2 + $0x418] sm:$0xff] }
 0x228   : > { %415 = vst [vmem:[#allocation2 + $0x78] sm:$0xff] %v11456_v53  ;;  %416 = vst [vmem:[#allocation2 + $0x80] sm:$0xff] %v11456_v53  ;;  %1816 = vmatprep.mubr.f32.mxu0 %v17724_v28  ;;  %v2650_v28 = vld [vmem:[%s17491_s2 + $0x1e0] sm:$0xff]  ;;  %10440 = vmatprep.subr.bf16.mxu1 %v17704_v0  ;;  %v10546_v10 = vpack.c.bf16 %v2721_v4, %v2720_v31  ;;  %v10566_v31 = vpack.c.bf16 %v2731_v26, %v2730_v15 }
 0x229   : > { %417 = vst [vmem:[#allocation2 + $0x88] sm:$0x3] %v11456_v53  ;;  %418 = vst [vmem:[#allocation2 + $0x90] sm:$0xff] %v11456_v53  ;;  %v10441_v54 = vpack.c.bf16 %v2651_v12, %v2650_v28  ;;  %10397 = vmatpush1.bf16.msra.mxu0 %v10396_v60  ;;  %v13081_v8 = vld [vmem:[#allocation2 + $0x10] sm:$0x3]  ;;  %v10550_v12 = vpack.c.bf16 %v2723_v37, %v2722_v16  ;;  %v2727_v60 = vld [vmem:[%s17491_s2 + $0x448] sm:$0xff] }
 0x22a   : > { %419 = vst [vmem:[#allocation2 + $0x98] sm:$0xff] %v11456_v53  ;;  %420 = vst [vmem:[#allocation2 + $0xa0] sm:$0x3] %v11456_v53  ;;  %v13074_v24 = vpop.f32.mrb[8].mxu1  ;;  %10543 = vmatprep.subr.bf16.mxu0 %v10542_v46  ;;  %v2444_v16 = vrot.slane %v11456_v53, 2  ;;  %v2658_v26 = vld [vmem:[%s17491_s2 + $0x220] sm:$0xff] }
 0x22b   : > { %421 = vst [vmem:[#allocation2 + $0xa8] sm:$0xff] %v11456_v53  ;;  %422 = vst [vmem:[#allocation2 + $0xb0] sm:$0xff] %v11456_v53  ;;  %1817 = vmatmul.mubr.f32.gmra.mrb[46].mxu0 %v11393_v58  ;;  %10442 = vmatpush1.bf16.msra.mxu1 %v10441_v54  ;;  %v13076_v36 = vpop.f32.mrb[9].mxu1  ;;  %v2724_v58 = vld [vmem:[%s17491_s2 + $0x430] sm:$0xff]  ;;  %v2725_v54 = vld [vmem:[%s17491_s2 + $0x438] sm:$0xff] }
 0x22c   : > { %423 = vst [vmem:[#allocation2 + $0xb8] sm:$0x3] %v11456_v53  ;;  %424 = vst [vmem:[#allocation2 + $0xc0] sm:$0xff] %v11456_v53  ;;  %1821 = vmatprep.mubr.f32.mxu0 %v17725_v29  ;;  %v2653_v29 = vld [vmem:[%s17491_s2 + $0x1f8] sm:$0xff]  ;;  %10443 = vmatprep.subr.bf16.mxu1 %v17704_v0  ;;  %v10554_v48 = vpack.c.bf16 %v2725_v54, %v2724_v58  ;;  %v2732_v58 = vld [vmem:[%s17491_s2 + $0x470] sm:$0xff] }
 0x22d   : > { %425 = vst [vmem:[#allocation2 + $0xc8] sm:$0xff] %v11456_v53  ;;  %426 = vst [vmem:[#allocation2 + $0xd0] sm:$0x3] %v11456_v53  ;;  %v10444_v61 = vpack.c.bf16 %v2653_v29, %v2652_v20  ;;  %v13166_v29 = vld [vmem:[%s17493_s4] ss:$0 sm:$0xff]  ;;  %v2733_v54 = vld [vmem:[%s17491_s2 + $0x478] sm:$0xff] }
 0x22e   : > { %427 = vst [vmem:[#allocation2 + $0xd8] sm:$0xff] %v11456_v53  ;;  %428 = vst [vmem:[#allocation2 + $0xe0] sm:$0xff] %v11456_v53 }
 0x22f   : > { %429 = vst [vmem:[#allocation2 + $0xe8] sm:$0x3] %v11456_v53  ;;  %430 = vst [vmem:[#allocation2 + $0xf0] sm:$0xff] %v11456_v53  ;;  %1822 = vmatmul.mubr.f32.gmra.mrb[48].mxu0 %v11394_v40  ;;  %10445 = vmatpush1.bf16.msra.mxu1 %v10444_v61  ;;  %v10558_v40 = vpack.c.bf16 %v2727_v60, %v2726_v51  ;;  %v10570_v51 = vpack.c.bf16 %v2733_v54, %v2732_v58 }
 0x230   : > { %431 = vst [vmem:[#allocation2 + $0xf8] sm:$0xff] %v11456_v53  ;;  %432 = vst [vmem:[#allocation2 + $0x100] sm:$0x3] %v11456_v53  ;;  %1826 = vmatprep.mubr.f32.mxu0 %v17726_v43  ;;  %10446 = vmatprep.subr.bf16.mxu1 %v17704_v0  ;;  %v11397_v43 = vld [vmem:[%s11556_s15 + $0x170] sm:$0xff] }
 0x231   : > { %433 = vst [vmem:[#allocation2 + $0x108] sm:$0xff] %v11456_v53  ;;  %434 = vst [vmem:[#allocation2 + $0x110] sm:$0xff] %v11456_v53 }
 0x232   : > { %435 = vst [vmem:[#allocation2 + $0x118] sm:$0x3] %v11456_v53  ;;  %436 = vst [vmem:[#allocation2 + $0x120] sm:$0xff] %v11456_v53 }
 0x233   : > { %437 = vst [vmem:[#allocation2 + $0x128] sm:$0xff] %v11456_v53  ;;  %438 = vst [vmem:[#allocation2 + $0x130] sm:$0x3] %v11456_v53  ;;  %1827 = vmatmul.mubr.f32.gmra.mrb[50].mxu0 %v11395_v55 }
 0x234   : > { %439 = vst [vmem:[#allocation2 + $0x138] sm:$0xff] %v11456_v53  ;;  %440 = vst [vmem:[#allocation2 + $0x140] sm:$0xff] %v11456_v53  ;;  %1831 = vmatprep.mubr.f32.mxu0 %v17727_v50  ;;  %v806_v50 = vsel %vm558_vm0, %v804_v42, %v805_v13  ;;  %v2728_v42 = vld [vmem:[%s17491_s2 + $0x450] sm:$0xff] }
 0x235   : > { %441 = vst [vmem:[#allocation2 + $0x148] sm:$0x3] %v11456_v53  ;;  %442 = vst [vmem:[#allocation2 + $0x150] sm:$0xff] %v11456_v53 }
 0x236   : > { %443 = vst [vmem:[#allocation2 + $0x158] sm:$0xff] %v11456_v53  ;;  %444 = vst [vmem:[#allocation2 + $0x160] sm:$0x3] %v11456_v53 }
 0x237   : > { %445 = vst [vmem:[#allocation2 + $0x168] sm:$0xff] %v11456_v53  ;;  %446 = vst [vmem:[#allocation2 + $0x170] sm:$0xff] %v11456_v53  ;;  %1832 = vmatmul.mubr.f32.gmra.mrb[52].mxu0 %v11396_v5  ;;  %v13172_v5 = vld [vmem:[%s17494_s5] ss:$0 sm:$0xff] }
 0x238   : > { %447 = vst [vmem:[#allocation2 + $0x178] sm:$0x3] %v11456_v53  ;;  %448 = vst [vmem:[#allocation2 + $0x180] sm:$0xff] %v11456_v53  ;;  %1836 = vmatprep.mubr.f32.mxu0 %v17728_v59  ;;  %v807_v59 = vrot.slane %v12706_v57, 1 }
 0x239   : > { %449 = vst [vmem:[#allocation2 + $0x188] sm:$0xff] %v11456_v53  ;;  %450 = vst [vmem:[#allocation2 + $0x190] sm:$0x3] %v11456_v53 }
 0x23a   : > { %453 = vst [vmem:[#allocation2 + $0x1a8] sm:$0x3] %v11456_v53 }
 0x23b   : > { %1837 = vmatmul.mubr.f32.gmra.mrb[54].mxu0 %v11397_v43 }
 0x23c   : > { %1841 = vmatprep.mubr.f32.mxu0 %v12712_v30  ;;  %v808_v30 = vsel %vm558_vm0, %v805_v13, %v807_v59  ;;  %v2729_v13 = vld [vmem:[%s17491_s2 + $0x458] sm:$0xff] }
 0x23f   : > { %1842 = vmatmul.mubr.f32.gmra.mrb[56].mxu0 %v12459_v44  ;;  %v2335_v44 = vrot.slane %v13081_v8, 1 }
 0x240   : > { %1846 = vmatprep.mubr.f32.mxu0 %v12718_v23  ;;  %v13085_v23 = vpop.f32.mrb[10].mxu1 }
 0x241   : > { %v13087_v57 = vpop.f32.mrb[11].mxu1 }
 0x242   : > { %v13092_v18 = vpop.f32.mrb[12].mxu1 }
 0x243   : > { %1847 = vmatmul.mubr.f32.gmra.mrb[58].mxu0 %v12474_v38  ;;  %v2336_v38 = vsel %vm558_vm0, %v2332_v32, %v2335_v44  ;;  %v13094_v39 = vpop.f32.mrb[13].mxu1 }
 0x244   : > { %1851 = vmatprep.mubr.f32.mxu0 %v806_v50 }
 0x247   : > { %1852 = vmatmul.mubr.f32.gmra.mrb[60].mxu0 %v12698_v11  ;;  %v13097_v11 = vpop.f32.mrb[14].mxu1 }
 0x248   : > { %1856 = vmatprep.mubr.f32.mxu0 %v808_v30  ;;  %v13099_v47 = vpop.f32.mrb[15].mxu1 }
 0x249   : > { %v13101_v49 = vpop.f32.mrb[16].mxu1 }
 0x24a   : > { %v13103_v19 = vpop.f32.mrb[17].mxu1 }
 0x24b   : > { %1857 = vmatmul.mubr.f32.gmra.mrb[62].mxu0 %v12701_v1  ;;  %v13105_v1 = vpop.f32.mrb[18].mxu1 }
 0x24c   : > { %2798 = vmatprep.mubr.f32.mxu0 %v2332_v32  ;;  %v13107_v14 = vpop.f32.mrb[19].mxu1 }
 0x24d   : > { %v13109_v22 = vpop.f32.mrb[20].mxu1 }
 0x24e   : > { %v13111_v45 = vpop.f32.mrb[21].mxu1 }
 0x24f   : > { %2799 = vmatmul.mubr.f32.vlgmr.msra.gmra.mrb[64].mxu0 %v11456_v53  ;;  %v13113_v25 = vpop.f32.mrb[22].mxu1 }
 0x250   : > { %2803 = vmatprep.mubr.f32.mxu0 %v2336_v38  ;;  %v13115_v62 = vpop.f32.mrb[23].mxu1  ;;  %10545 = vmatpush3.bf16.msra.mxu0 %v10542_v46 }
 0x251   : > { %v13117_v52 = vpop.f32.mrb[24].mxu1  ;;  %10547 = vmatprep.subr.bf16.mxu0 %v10546_v10 }
 0x252   : > { %v13119_v63 = vpop.f32.mrb[25].mxu1 }
 0x253   : > { %2804 = vmatmul.mubr.f32.gmra.mrb[66].mxu0 %v11456_v53  ;;  %v13121_v33 = vpop.f32.mrb[26].mxu1  ;;  %v2655_v53 = vld [vmem:[%s17491_s2 + $0x208] sm:$0xff] }
 0x254   : > { %v13123_v35 = vpop.f32.mrb[27].mxu1  ;;  %10549 = vmatpush3.bf16.msra.mxu0 %v10546_v10 }
 0x255   : > { %v13125_v56 = vpop.f32.mrb[28].mxu1  ;;  %10551 = vmatprep.subr.bf16.mxu0 %v10550_v12 }
 0x256   : > { %v13133_v7 = vpop.f32.mrb[29].mxu1 }
 0x258   : > { %10553 = vmatpush3.bf16.msra.mxu0 %v10550_v12 }
 0x259   : > { %10555 = vmatprep.subr.bf16.mxu0 %v10554_v48 }
 0x25c   : > { %10557 = vmatpush3.bf16.msra.mxu0 %v10554_v48 }
 0x25d   : > { %10559 = vmatprep.subr.bf16.mxu0 %v10558_v40 }
 0x260   : > { %10561 = vmatpush3.bf16.msra.mxu0 %v10558_v40 }
 0x295   : > { %v13141_v27 = vpop.f32.mrb[30].mxu1 }
 0x296   : > { %v13149_v28 = vpop.f32.mrb[31].mxu1 }
 0x2a2   : > { %v1703_v20 = vpop.f32.mrb[0].mxu0 }
 0x2a3   : > { %v1929_v61 = vadd.f32 %v12934_v17, %v1703_v20  ;;  %v1705_v55 = vpop.f32.mrb[1].mxu0  ;;  %v10562_v17 = vpack.c.bf16 %v2729_v13, %v2728_v42  ;;  %v2447_v42 = vrot.slane %v13081_v8, 2 }
 0x2a5   : > { %v2093_v43 = vmul.f32 %v13166_v29, %v1929_v61  ;;  %10563 = vmatprep.subr.bf16.mxu0 %v10562_v17 }
 0x2a6   : > { %v1708_v50 = vpop.f32.mrb[2].mxu0  ;;  %10565 = vmatpush3.bf16.msra.mxu0 %v10562_v17  ;;  %v2656_v17 = vld [vmem:[%s17491_s2 + $0x210] sm:$0xff] }
 0x2a7   : > { %v2131_v59 = vadd.f32 %v13172_v5, %v2093_v43  ;;  %v1934_v30 = vadd.f32 %v12932_v2, %v1708_v50  ;;  %v1710_v32 = vpop.f32.mrb[3].mxu0  ;;  %10567 = vmatprep.subr.bf16.mxu0 %v10566_v31 }
 0x2a9   : > { %v2163_v44 = vmax.f32 %v2131_v59, 0.0  ;;  %v2094_v38 = vmul.f32 %v13166_v29, %v1934_v30  ;;  %v2657_v59 = vld [vmem:[%s17491_s2 + $0x218] sm:$0xff] }
 0x2aa   : > { %v1713_v46 = vpop.f32.mrb[4].mxu0  ;;  %10569 = vmatpush3.bf16.msra.mxu0 %v10566_v31  ;;  %v10450_v15 = vpack.c.bf16 %v2657_v59, %v2656_v17 }
 0x2ab   : > { %2196 = vst [vmem:[#allocation2 + $0x19] sm:$0xff] %v2163_v44  ;;  %v2132_v4 = vadd.f32 %v13172_v5, %v2094_v38  ;;  %v1939_v2 = vadd.f32 %v13019_v34, %v1713_v46  ;;  %v1715_v10 = vpop.f32.mrb[5].mxu0  ;;  %v2654_v34 = vld [vmem:[%s17491_s2 + $0x200] sm:$0xff]  ;;  %10571 = vmatprep.subr.bf16.mxu0 %v10570_v51  ;;  %v2448_v38 = vsel %vm671_vm1, %v2444_v16, %v2447_v42  ;;  %v2659_v46 = vld [vmem:[%s17491_s2 + $0x228] sm:$0xff] }
 0x2ac   : > { %v10447_v43 = vpack.c.bf16 %v2655_v53, %v2654_v34 }
 0x2ad   : > { %v2164_v37 = vmax.f32 %v2132_v4, 0.0  ;;  %v2095_v12 = vmul.f32 %v13166_v29, %v1939_v2 }
 0x2ae   : > { %v1718_v48 = vpop.f32.mrb[6].mxu0  ;;  %10573 = vmatpush3.bf16.msra.mxu0 %v10570_v51 }
 0x2af   : > { %2197 = vst [vmem:[#allocation2 + $0x21] sm:$0xff] %v2164_v37  ;;  %v2133_v60 = vadd.f32 %v13172_v5, %v2095_v12  ;;  %v1944_v20 = vadd.f32 %v13017_v41, %v1718_v48  ;;  %v1720_v40 = vpop.f32.mrb[7].mxu0  ;;  %10718 = vmatprep.subr.bf16.mxu0 %v17704_v0  ;;  %v10453_v48 = vpack.c.bf16 %v2659_v46, %v2658_v26 }
 0x2b1   : > { %v2165_v61 = vmax.f32 %v2133_v60, 0.0  ;;  %v2096_v55 = vmul.f32 %v13166_v29, %v1944_v20 }
 0x2b2   : > { %v1723_v13 = vpop.f32.mrb[8].mxu0  ;;  %v2231_v50 = vld [vmem:[#allocation2 + $0x18] sm:$0xff] }
 0x2b3   : > { %2198 = vst [vmem:[#allocation2 + $0x31] sm:$0xff] %v2165_v61  ;;  %v2134_v41 = vadd.f32 %v13172_v5, %v2096_v55  ;;  %v1949_v30 = vadd.f32 %v13055_v6, %v1723_v13  ;;  %v1725_v32 = vpop.f32.mrb[9].mxu0  ;;  %3023 = vmatprep.mubr.f32.mxu1 %v2231_v50  ;;  %v2337_v4 = vrot.slane %v2231_v50, 1  ;;  %v2449_v60 = vrot.slane %v2231_v50, 2  ;;  %v2660_v55 = vld [vmem:[%s17491_s2 + $0x230] sm:$0xff] }
 0x2b4   : > { %3024 = vmatmul.mubr.f32.vlgmr.msra.gmra.mrb[32].mxu1 %v2444_v16 }
 0x2b5   : > { %v2166_v8 = vmax.f32 %v2134_v41, 0.0  ;;  %v2097_v44 = vmul.f32 %v13166_v29, %v1949_v30  ;;  %10448 = vmatpush1.bf16.msra.mxu1 %v10447_v43  ;;  %v2661_v43 = vld [vmem:[%s17491_s2 + $0x238] sm:$0xff] }
 0x2b6   : > { %v1728_v31 = vpop.f32.mrb[10].mxu0  ;;  %v2232_v6 = vld [vmem:[#allocation2 + $0x20] sm:$0xff]  ;;  %v2233_v2 = vld [vmem:[#allocation2 + $0x28] sm:$0x3]  ;;  %10449 = vmatprep.subr.bf16.mxu1 %v17704_v0  ;;  %v10456_v32 = vpack.c.bf16 %v2661_v43, %v2660_v55 }
 0x2b7   : > { %2199 = vst [vmem:[#allocation2 + $0x39] sm:$0xff] %v2166_v8  ;;  %v2135_v10 = vadd.f32 %v13172_v5, %v2097_v44  ;;  %v1954_v16 = vadd.f32 %v13053_v21, %v1728_v31  ;;  %v1730_v37 = vpop.f32.mrb[11].mxu0  ;;  %3028 = vmatprep.mubr.f32.mxu1 %v2232_v6  ;;  %v2338_v12 = vrot.slane %v2232_v6, 1  ;;  %v2340_v58 = vrot.slane %v2233_v2, 1  ;;  %v2662_v8 = vld [vmem:[%s17491_s2 + $0x240] sm:$0xff] }
 0x2b8   : > { %3029 = vmatmul.mubr.f32.gmra.mrb[34].mxu1 %v2448_v38  ;;  %v2450_v54 = vrot.slane %v2232_v6, 2  ;;  %v2452_v61 = vrot.slane %v2233_v2, 2 }
 0x2b9   : > { %v2167_v34 = vmax.f32 %v2135_v10, 0.0  ;;  %v2098_v53 = vmul.f32 %v13166_v29, %v1954_v16  ;;  %v13232_v51 = vsel %vm558_vm0, %v2337_v4, %v2338_v12  ;;  %10451 = vmatpush1.bf16.msra.mxu1 %v10450_v15  ;;  %v13236_v21 = vsel %vm558_vm0, %v2338_v12, %v2340_v58 }
 0x2ba   : > { %v1733_v20 = vpop.f32.mrb[12].mxu0  ;;  %2808 = vmatprep.mubr.f32.mxu0 %v13232_v51  ;;  %v2234_v40 = vld [vmem:[#allocation2 + $0x30] sm:$0xff]  ;;  %10452 = vmatprep.subr.bf16.mxu1 %v17704_v0  ;;  %v13248_v59 = vsel %vm671_vm1, %v2449_v60, %v2450_v54  ;;  %v13260_v38 = vsel %vm671_vm1, %v2450_v54, %v2452_v61 }
 0x2bb   : > { %2200 = vst [vmem:[#allocation2 + $0x49] sm:$0xff] %v2167_v34  ;;  %v2136_v42 = vadd.f32 %v13172_v5, %v2098_v53  ;;  %v1959_v13 = vadd.f32 %v13064_v9, %v1733_v20  ;;  %v1735_v17 = vpop.f32.mrb[13].mxu0  ;;  %2809 = vmatmul.mubr.f32.gmra.mrb[68].mxu0 %v2231_v50  ;;  %3033 = vmatprep.mubr.f32.mxu1 %v2234_v40  ;;  %v2663_v9 = vld [vmem:[%s17491_s2 + $0x248] sm:$0xff]  ;;  %v2342_v15 = vrot.slane %v2234_v40, 1  ;;  %v2664_v60 = vld [vmem:[%s17491_s2 + $0x250] sm:$0xff]  ;;  %v2665_v20 = vld [vmem:[%s17491_s2 + $0x258] sm:$0xff] }
 0x2bc   : > { %2813 = vmatprep.mubr.f32.mxu0 %v13236_v21  ;;  %3034 = vmatmul.mubr.f32.gmra.mrb[36].mxu1 %v13248_v59  ;;  %v10459_v37 = vpack.c.bf16 %v2663_v9, %v2662_v8 }
 0x2bd   : > { %v2168_v41 = vmax.f32 %v2136_v42, 0.0  ;;  %v2099_v30 = vmul.f32 %v13166_v29, %v1959_v13  ;;  %10454 = vmatpush1.bf16.msra.mxu1 %v10453_v48  ;;  %v2454_v48 = vrot.slane %v2234_v40, 2 }
 0x2be   : > { %v1738_v50 = vpop.f32.mrb[14].mxu0  ;;  %v2235_v44 = vld [vmem:[#allocation2 + $0x38] sm:$0xff]  ;;  %v2236_v26 = vld [vmem:[#allocation2 + $0x40] sm:$0x3]  ;;  %10455 = vmatprep.subr.bf16.mxu1 %v17704_v0 }
 0x2bf   : > { %2201 = vst [vmem:[#allocation2 + $0x51] sm:$0xff] %v2168_v41  ;;  %v2137_v46 = vadd.f32 %v13172_v5, %v2099_v30  ;;  %v1964_v31 = vadd.f32 %v13062_v3, %v1738_v50  ;;  %v1740_v4 = vpop.f32.mrb[15].mxu0  ;;  %2814 = vmatmul.mubr.f32.gmra.mrb[70].mxu0 %v2232_v6  ;;  %3038 = vmatprep.mubr.f32.mxu1 %v2235_v44  ;;  %v2343_v2 = vrot.slane %v2235_v44, 1  ;;  %v2345_v10 = vrot.slane %v2236_v26, 1  ;;  %v2666_v30 = vld [vmem:[%s17491_s2 + $0x260] sm:$0xff] }
 0x2c0   : > { %3039 = vmatmul.mubr.f32.gmra.mrb[38].mxu1 %v13260_v38  ;;  %v2455_v16 = vrot.slane %v2235_v44, 2  ;;  %v2457_v53 = vrot.slane %v2236_v26, 2  ;;  %v10462_v41 = vpack.c.bf16 %v2665_v20, %v2664_v60  ;;  %v2669_v60 = vld [vmem:[%s17491_s2 + $0x278] sm:$0xff] }
 0x2c1   : > { %v2169_v12 = vmax.f32 %v2137_v46, 0.0  ;;  %v2100_v58 = vmul.f32 %v13166_v29, %v1964_v31  ;;  %v13268_v54 = vsel %vm558_vm0, %v2342_v15, %v2343_v2  ;;  %10457 = vmatpush1.bf16.msra.mxu1 %v10456_v32  ;;  %v13272_v6 = vsel %vm558_vm0, %v2343_v2, %v2345_v10 }
 0x2c2   : > { %v1743_v34 = vpop.f32.mrb[16].mxu0  ;;  %2818 = vmatprep.mubr.f32.mxu0 %v13268_v54  ;;  %v2237_v3 = vld [vmem:[#allocation2 + $0x48] sm:$0xff]  ;;  %10458 = vmatprep.subr.bf16.mxu1 %v17704_v0  ;;  %v13284_v42 = vsel %vm671_vm1, %v2454_v48, %v2455_v16  ;;  %v13296_v8 = vsel %vm671_vm1, %v2455_v16, %v2457_v53  ;;  %v2668_v53 = vld [vmem:[%s17491_s2 + $0x270] sm:$0xff] }
 0x2c3   : > { %2202 = vst [vmem:[#allocation2 + $0x61] sm:$0xff] %v2169_v12  ;;  %v2138_v61 = vadd.f32 %v13172_v5, %v2100_v58  ;;  %v1969_v55 = vadd.f32 %v13076_v36, %v1743_v34  ;;  %v1745_v43 = vpop.f32.mrb[17].mxu0  ;;  %2819 = vmatmul.mubr.f32.gmra.mrb[72].mxu0 %v2234_v40  ;;  %3043 = vmatprep.mubr.f32.mxu1 %v2237_v3  ;;  %v2667_v36 = vld [vmem:[%s17491_s2 + $0x268] sm:$0xff]  ;;  %v2347_v9 = vrot.slane %v2237_v3, 1  ;;  %v2459_v58 = vrot.slane %v2237_v3, 2 }
 0x2c4   : > { %2823 = vmatprep.mubr.f32.mxu0 %v13272_v6  ;;  %3044 = vmatmul.mubr.f32.gmra.mrb[40].mxu1 %v13284_v42  ;;  %v10465_v10 = vpack.c.bf16 %v2667_v36, %v2666_v30  ;;  %v2670_v30 = vld [vmem:[%s17491_s2 + $0x280] sm:$0xff] }
 0x2c5   : > { %v2170_v13 = vmax.f32 %v2138_v61, 0.0  ;;  %v2101_v17 = vmul.f32 %v13166_v29, %v1969_v55  ;;  %10460 = vmatpush1.bf16.msra.mxu1 %v10459_v37 }
 0x2c6   : > { %v1748_v40 = vpop.f32.mrb[18].mxu0  ;;  %v2238_v32 = vld [vmem:[#allocation2 + $0x50] sm:$0xff]  ;;  %v2239_v50 = vld [vmem:[#allocation2 + $0x58] sm:$0x3]  ;;  %10461 = vmatprep.subr.bf16.mxu1 %v17704_v0 }
 0x2c7   : > { %2203 = vst [vmem:[#allocation2 + $0x69] sm:$0xff] %v2170_v13  ;;  %v2139_v15 = vadd.f32 %v13172_v5, %v2101_v17  ;;  %v1974_v26 = vadd.f32 %v13074_v24, %v1748_v40  ;;  %v1750_v46 = vpop.f32.mrb[19].mxu0  ;;  %2824 = vmatmul.mubr.f32.gmra.mrb[74].mxu0 %v2235_v44  ;;  %3048 = vmatprep.mubr.f32.mxu1 %v2238_v32  ;;  %v2348_v31 = vrot.slane %v2238_v32, 1  ;;  %v2350_v4 = vrot.slane %v2239_v50, 1 }
 0x2c8   : > { %3049 = vmatmul.mubr.f32.gmra.mrb[42].mxu1 %v13296_v8  ;;  %v2460_v2 = vrot.slane %v2238_v32, 2  ;;  %v2462_v34 = vrot.slane %v2239_v50, 2 }
 0x2c9   : > { %v2171_v16 = vmax.f32 %v2139_v15, 0.0  ;;  %v2102_v37 = vmul.f32 %v13166_v29, %v1974_v26  ;;  %v13304_v12 = vsel %vm558_vm0, %v2347_v9, %v2348_v31  ;;  %10463 = vmatpush1.bf16.msra.mxu1 %v10462_v41  ;;  %v13308_v44 = vsel %vm558_vm0, %v2348_v31, %v2350_v4 }
 0x2ca   : > { %v1753_v48 = vpop.f32.mrb[20].mxu0  ;;  %2828 = vmatprep.mubr.f32.mxu0 %v13304_v12  ;;  %v2240_v24 = vld [vmem:[#allocation2 + $0x60] sm:$0xff]  ;;  %10464 = vmatprep.subr.bf16.mxu1 %v17704_v0  ;;  %v13320_v43 = vsel %vm671_vm1, %v2459_v58, %v2460_v2  ;;  %v10468_v41 = vpack.c.bf16 %v2669_v60, %v2668_v53  ;;  %v13332_v40 = vsel %vm671_vm1, %v2460_v2, %v2462_v34  ;;  %v2672_v60 = vld [vmem:[%s17491_s2 + $0x290] sm:$0xff] }
 0x2cb   : > { %2204 = vst [vmem:[#allocation2 + $0x79] sm:$0xff] %v2171_v16  ;;  %v2140_v20 = vadd.f32 %v13172_v5, %v2102_v37  ;;  %v1979_v61 = vadd.f32 %v13087_v57, %v1753_v48  ;;  %v1755_v55 = vpop.f32.mrb[21].mxu0  ;;  %2829 = vmatmul.mubr.f32.gmra.mrb[76].mxu0 %v2237_v3  ;;  %3053 = vmatprep.mubr.f32.mxu1 %v2240_v24  ;;  %v2671_v57 = vld [vmem:[%s17491_s2 + $0x288] sm:$0xff]  ;;  %v2352_v9 = vrot.slane %v2240_v24, 1  ;;  %v2464_v48 = vrot.slane %v2240_v24, 2 }
 0x2cc   : > { %2833 = vmatprep.mubr.f32.mxu0 %v13308_v44  ;;  %3054 = vmatmul.mubr.f32.gmra.mrb[44].mxu1 %v13320_v43  ;;  %v10471_v16 = vpack.c.bf16 %v2671_v57, %v2670_v30 }
 0x2cd   : > { %v2172_v13 = vmax.f32 %v2140_v20, 0.0  ;;  %v2103_v17 = vmul.f32 %v13166_v29, %v1979_v61  ;;  %10466 = vmatpush1.bf16.msra.mxu1 %v10465_v10  ;;  %v2673_v20 = vld [vmem:[%s17491_s2 + $0x298] sm:$0xff] }
 0x2ce   : > { %v1758_v3 = vpop.f32.mrb[22].mxu0  ;;  %v2241_v36 = vld [vmem:[#allocation2 + $0x68] sm:$0xff]  ;;  %v2242_v50 = vld [vmem:[#allocation2 + $0x70] sm:$0x3]  ;;  %10467 = vmatprep.subr.bf16.mxu1 %v17704_v0  ;;  %v10474_v57 = vpack.c.bf16 %v2673_v20, %v2672_v60 }
 0x2cf   : > { %2205 = vst [vmem:[#allocation2 + $0x81] sm:$0xff] %v2172_v13  ;;  %v2141_v15 = vadd.f32 %v13172_v5, %v2103_v17  ;;  %v1984_v26 = vadd.f32 %v13085_v23, %v1758_v3  ;;  %v1760_v46 = vpop.f32.mrb[23].mxu0  ;;  %2834 = vmatmul.mubr.f32.gmra.mrb[78].mxu0 %v2238_v32  ;;  %3058 = vmatprep.mubr.f32.mxu1 %v2241_v36  ;;  %v2353_v31 = vrot.slane %v2241_v36, 1  ;;  %v2355_v4 = vrot.slane %v2242_v50, 1  ;;  %v2674_v3 = vld [vmem:[%s17491_s2 + $0x2a0] sm:$0xff] }
 0x2d0   : > { %3059 = vmatmul.mubr.f32.gmra.mrb[46].mxu1 %v13332_v40  ;;  %v2465_v10 = vrot.slane %v2241_v36, 2  ;;  %v2467_v53 = vrot.slane %v2242_v50, 2 }
 0x2d1   : > { %v2173_v2 = vmax.f32 %v2141_v15, 0.0  ;;  %v2104_v37 = vmul.f32 %v13166_v29, %v1984_v26  ;;  %v13340_v58 = vsel %vm558_vm0, %v2352_v9, %v2353_v31  ;;  %10469 = vmatpush1.bf16.msra.mxu1 %v10468_v41  ;;  %v13344_v32 = vsel %vm558_vm0, %v2353_v31, %v2355_v4 }
 0x2d2   : > { %v1763_v34 = vpop.f32.mrb[24].mxu0  ;;  %2838 = vmatprep.mubr.f32.mxu0 %v13340_v58  ;;  %v2243_v23 = vld [vmem:[#allocation2 + $0x78] sm:$0xff]  ;;  %10470 = vmatprep.subr.bf16.mxu1 %v17704_v0  ;;  %v13356_v17 = vsel %vm671_vm1, %v2464_v48, %v2465_v10  ;;  %v13368_v50 = vsel %vm671_vm1, %v2465_v10, %v2467_v53 }
 0x2d3   : > { %2206 = vst [vmem:[#allocation2 + $0x91] sm:$0xff] %v2173_v2  ;;  %v2142_v61 = vadd.f32 %v13172_v5, %v2104_v37  ;;  %v1989_v55 = vadd.f32 %v13094_v39, %v1763_v34  ;;  %v1765_v13 = vpop.f32.mrb[25].mxu0  ;;  %2839 = vmatmul.mubr.f32.gmra.mrb[80].mxu0 %v2240_v24  ;;  %3063 = vmatprep.mubr.f32.mxu1 %v2243_v23  ;;  %v2675_v39 = vld [vmem:[%s17491_s2 + $0x2a8] sm:$0xff]  ;;  %v2357_v15 = vrot.slane %v2243_v23, 1  ;;  %v2469_v60 = vrot.slane %v2243_v23, 2 }
 0x2d4   : > { %2843 = vmatprep.mubr.f32.mxu0 %v13344_v32  ;;  %3064 = vmatmul.mubr.f32.gmra.mrb[48].mxu1 %v13356_v17  ;;  %v10477_v48 = vpack.c.bf16 %v2675_v39, %v2674_v3  ;;  %v2677_v13 = vld [vmem:[%s17491_s2 + $0x2b8] sm:$0xff] }
 0x2d5   : > { %v2174_v41 = vmax.f32 %v2142_v61, 0.0  ;;  %v2105_v30 = vmul.f32 %v13166_v29, %v1989_v55  ;;  %10472 = vmatpush1.bf16.msra.mxu1 %v10471_v16  ;;  %v2676_v55 = vld [vmem:[%s17491_s2 + $0x2b0] sm:$0xff] }
 0x2d6   : > { %v1768_v24 = vpop.f32.mrb[26].mxu0  ;;  %v2244_v9 = vld [vmem:[#allocation2 + $0x80] sm:$0xff]  ;;  %v2245_v26 = vld [vmem:[#allocation2 + $0x88] sm:$0x3]  ;;  %10473 = vmatprep.subr.bf16.mxu1 %v17704_v0 }
 0x2d7   : > { %2207 = vst [vmem:[#allocation2 + $0x99] sm:$0xff] %v2174_v41  ;;  %v2143_v46 = vadd.f32 %v13172_v5, %v2105_v30  ;;  %v1994_v31 = vadd.f32 %v13092_v18, %v1768_v24  ;;  %v1770_v4 = vpop.f32.mrb[27].mxu0  ;;  %2844 = vmatmul.mubr.f32.gmra.mrb[82].mxu0 %v2241_v36  ;;  %3068 = vmatprep.mubr.f32.mxu1 %v2244_v9  ;;  %v2358_v16 = vrot.slane %v2244_v9, 1  ;;  %v2360_v2 = vrot.slane %v2245_v26, 1 }
 0x2d8   : > { %3069 = vmatmul.mubr.f32.gmra.mrb[50].mxu1 %v13368_v50  ;;  %v2470_v37 = vrot.slane %v2244_v9, 2  ;;  %v2472_v61 = vrot.slane %v2245_v26, 2  ;;  %v2678_v26 = vld [vmem:[%s17491_s2 + $0x2c0] sm:$0xff] }
 0x2d9   : > { %v2175_v10 = vmax.f32 %v2143_v46, 0.0  ;;  %v2106_v34 = vmul.f32 %v13166_v29, %v1994_v31  ;;  %v13376_v53 = vsel %vm558_vm0, %v2357_v15, %v2358_v16  ;;  %10475 = vmatpush1.bf16.msra.mxu1 %v10474_v57  ;;  %v13380_v36 = vsel %vm558_vm0, %v2358_v16, %v2360_v2 }
 0x2da   : > { %v1773_v20 = vpop.f32.mrb[28].mxu0  ;;  %2848 = vmatprep.mubr.f32.mxu0 %v13376_v53  ;;  %v2246_v18 = vld [vmem:[#allocation2 + $0x90] sm:$0xff]  ;;  %10476 = vmatprep.subr.bf16.mxu1 %v17704_v0  ;;  %v13392_v3 = vsel %vm671_vm1, %v2469_v60, %v2470_v37  ;;  %v10480_v15 = vpack.c.bf16 %v2677_v13, %v2676_v55  ;;  %v13404_v31 = vsel %vm671_vm1, %v2470_v37, %v2472_v61 }
 0x2db   : > { %2208 = vst [vmem:[#allocation2 + $0xa9] sm:$0xff] %v2175_v10  ;;  %v2144_v41 = vadd.f32 %v13172_v5, %v2106_v34  ;;  %v1999_v30 = vadd.f32 %v13099_v47, %v1773_v20  ;;  %v1775_v57 = vpop.f32.mrb[29].mxu0  ;;  %2849 = vmatmul.mubr.f32.gmra.mrb[84].mxu0 %v2243_v23  ;;  %3073 = vmatprep.mubr.f32.mxu1 %v2246_v18  ;;  %v2679_v47 = vld [vmem:[%s17491_s2 + $0x2c8] sm:$0xff]  ;;  %v2362_v4 = vrot.slane %v2246_v18, 1 }
 0x2dc   : > { %2853 = vmatprep.mubr.f32.mxu0 %v13380_v36  ;;  %3074 = vmatmul.mubr.f32.gmra.mrb[52].mxu1 %v13392_v3  ;;  %v10483_v55 = vpack.c.bf16 %v2679_v47, %v2678_v26 }
 0x2dd   : > { %v2176_v39 = vmax.f32 %v2144_v41, 0.0  ;;  %v2107_v24 = vmul.f32 %v13166_v29, %v1999_v30  ;;  %10478 = vmatpush1.bf16.msra.mxu1 %v10477_v48  ;;  %v2474_v41 = vrot.slane %v2246_v18, 2 }
 0x2de   : > { %v1778_v23 = vpop.f32.mrb[30].mxu0  ;;  %v2247_v46 = vld [vmem:[#allocation2 + $0x98] sm:$0xff]  ;;  %v2248_v16 = vld [vmem:[#allocation2 + $0xa0] sm:$0x3]  ;;  %10479 = vmatprep.subr.bf16.mxu1 %v17704_v0 }
 0x2df   : > { %2209 = vst [vmem:[#allocation2 + $0xb1] sm:$0xff] %v2176_v39  ;;  %v2145_v2 = vadd.f32 %v13172_v5, %v2107_v24  ;;  %v2004_v48 = vadd.f32 %v13097_v11, %v1778_v23  ;;  %v1780_v10 = vpop.f32.mrb[31].mxu0  ;;  %2854 = vmatmul.mubr.f32.gmra.mrb[86].mxu0 %v2244_v9  ;;  %3078 = vmatprep.mubr.f32.mxu1 %v2247_v46  ;;  %v2363_v34 = vrot.slane %v2247_v46, 1  ;;  %v2365_v60 = vrot.slane %v2248_v16, 1  ;;  %v2680_v39 = vld [vmem:[%s17491_s2 + $0x2d0] sm:$0xff]  ;;  %v2681_v24 = vld [vmem:[%s17491_s2 + $0x2d8] sm:$0xff] }
 0x2e0   : > { %3079 = vmatmul.mubr.f32.gmra.mrb[54].mxu1 %v13404_v31  ;;  %v2475_v20 = vrot.slane %v2247_v46, 2  ;;  %v2477_v57 = vrot.slane %v2248_v16, 2 }
 0x2e1   : > { %v2177_v37 = vmax.f32 %v2145_v2, 0.0  ;;  %v2108_v61 = vmul.f32 %v13166_v29, %v2004_v48  ;;  %v13412_v13 = vsel %vm558_vm0, %v2362_v4, %v2363_v34  ;;  %10481 = vmatpush1.bf16.msra.mxu1 %v10480_v15  ;;  %v13416_v9 = vsel %vm558_vm0, %v2363_v34, %v2365_v60  ;;  %v2682_v48 = vld [vmem:[%s17491_s2 + $0x2e0] sm:$0xff] }
 0x2e2   : > { %v1783_v30 = vpop.f32.mrb[32].mxu0  ;;  %2858 = vmatprep.mubr.f32.mxu0 %v13412_v13  ;;  %v2249_v11 = vld [vmem:[#allocation2 + $0xa8] sm:$0xff]  ;;  %10482 = vmatprep.subr.bf16.mxu1 %v17704_v0  ;;  %v13428_v23 = vsel %vm671_vm1, %v2474_v41, %v2475_v20  ;;  %v10486_v2 = vpack.c.bf16 %v2681_v24, %v2680_v39  ;;  %v13440_v34 = vsel %vm671_vm1, %v2475_v20, %v2477_v57 }
 0x2e3   : > { %2210 = vst [vmem:[#allocation2 + $0xc1] sm:$0xff] %v2177_v37  ;;  %v2146_v15 = vadd.f32 %v13172_v5, %v2108_v61  ;;  %v2009_v26 = vadd.f32 %v13103_v19, %v1783_v30  ;;  %v1785_v47 = vpop.f32.mrb[33].mxu0  ;;  %2859 = vmatmul.mubr.f32.gmra.mrb[88].mxu0 %v2246_v18  ;;  %3083 = vmatprep.mubr.f32.mxu1 %v2249_v11  ;;  %v2683_v19 = vld [vmem:[%s17491_s2 + $0x2e8] sm:$0xff]  ;;  %v2367_v60 = vrot.slane %v2249_v11, 1 }
 0x2e4   : > { %2863 = vmatprep.mubr.f32.mxu0 %v13416_v9  ;;  %3084 = vmatmul.mubr.f32.gmra.mrb[56].mxu1 %v13428_v23  ;;  %v2479_v47 = vrot.slane %v2249_v11, 2 }
 0x2e5   : > { %v2178_v4 = vmax.f32 %v2146_v15, 0.0  ;;  %v2109_v16 = vmul.f32 %v13166_v29, %v2009_v26  ;;  %10484 = vmatpush1.bf16.msra.mxu1 %v10483_v55  ;;  %v10489_v15 = vpack.c.bf16 %v2683_v19, %v2682_v48  ;;  %v2684_v48 = vld [vmem:[%s17491_s2 + $0x2f0] sm:$0xff]  ;;  %v2685_v19 = vld [vmem:[%s17491_s2 + $0x2f8] sm:$0xff] }
 0x2e6   : > { %v1788_v18 = vpop.f32.mrb[34].mxu0  ;;  %v2250_v10 = vld [vmem:[#allocation2 + $0xb0] sm:$0xff]  ;;  %v2251_v37 = vld [vmem:[#allocation2 + $0xb8] sm:$0x3]  ;;  %10485 = vmatprep.subr.bf16.mxu1 %v17704_v0 }
 0x2e7   : > { %2211 = vst [vmem:[#allocation2 + $0xc9] sm:$0xff] %v2178_v4  ;;  %v2147_v55 = vadd.f32 %v13172_v5, %v2109_v16  ;;  %v2014_v61 = vadd.f32 %v13101_v49, %v1788_v18  ;;  %v1790_v41 = vpop.f32.mrb[35].mxu0  ;;  %2864 = vmatmul.mubr.f32.gmra.mrb[90].mxu0 %v2247_v46  ;;  %3088 = vmatprep.mubr.f32.mxu1 %v2250_v10  ;;  %v2368_v30 = vrot.slane %v2250_v10, 1  ;;  %v2370_v39 = vrot.slane %v2251_v37, 1 }
 0x2e8   : > { %3089 = vmatmul.mubr.f32.gmra.mrb[58].mxu1 %v13440_v34  ;;  %v2480_v24 = vrot.slane %v2250_v10, 2  ;;  %v2482_v16 = vrot.slane %v2251_v37, 2  ;;  %v10492_v41 = vpack.c.bf16 %v2685_v19, %v2684_v48 }
 0x2e9   : > { %v2179_v20 = vmax.f32 %v2147_v55, 0.0  ;;  %v2110_v57 = vmul.f32 %v13166_v29, %v2014_v61  ;;  %v13448_v26 = vsel %vm558_vm0, %v2367_v60, %v2368_v30  ;;  %10487 = vmatpush1.bf16.msra.mxu1 %v10486_v2  ;;  %v13452_v46 = vsel %vm558_vm0, %v2368_v30, %v2370_v39 }
 0x2ea   : > { %v1793_v4 = vpop.f32.mrb[36].mxu0  ;;  %2868 = vmatprep.mubr.f32.mxu0 %v13448_v26  ;;  %v2252_v49 = vld [vmem:[#allocation2 + $0xc0] sm:$0xff]  ;;  %10488 = vmatprep.subr.bf16.mxu1 %v17704_v0  ;;  %v13464_v37 = vsel %vm671_vm1, %v2479_v47, %v2480_v24 }
 0x2eb   : > { %2212 = vst [vmem:[#allocation2 + $0xd9] sm:$0xff] %v2179_v20  ;;  %v2148_v2 = vadd.f32 %v13172_v5, %v2110_v57  ;;  %v2019_v18 = vadd.f32 %v13107_v14, %v1793_v4  ;;  %v1795_v60 = vpop.f32.mrb[37].mxu0  ;;  %2869 = vmatmul.mubr.f32.gmra.mrb[92].mxu0 %v2249_v11  ;;  %3093 = vmatprep.mubr.f32.mxu1 %v2252_v49  ;;  %v2372_v14 = vrot.slane %v2252_v49, 1 }
 0x2ec   : > { %2873 = vmatprep.mubr.f32.mxu0 %v13452_v46  ;;  %3094 = vmatmul.mubr.f32.gmra.mrb[60].mxu1 %v13464_v37  ;;  %v13470_v20 = vsel %vm671_vm1, %v2480_v24, %v2482_v16 }
 0x2ed   : > { %v2180_v55 = vmax.f32 %v2148_v2, 0.0  ;;  %v2111_v61 = vmul.f32 %v13166_v29, %v2019_v18  ;;  %10490 = vmatpush1.bf16.msra.mxu1 %v10489_v15  ;;  %v2484_v18 = vrot.slane %v2252_v49, 2 }
 0x2ee   : > { %v1798_v30 = vpop.f32.mrb[38].mxu0  ;;  %v2253_v39 = vld [vmem:[#allocation2 + $0xc8] sm:$0xff]  ;;  %v2254_v11 = vld [vmem:[#allocation2 + $0xd0] sm:$0x3]  ;;  %10491 = vmatprep.subr.bf16.mxu1 %v17704_v0 }
 0x2ef   : > { %2213 = vst [vmem:[#allocation2 + $0xe1] sm:$0xff] %v2180_v55  ;;  %v2149_v57 = vadd.f32 %v13172_v5, %v2111_v61  ;;  %v2024_v47 = vadd.f32 %v13105_v1, %v1798_v30  ;;  %v1800_v4 = vpop.f32.mrb[39].mxu0  ;;  %2874 = vmatmul.mubr.f32.gmra.mrb[94].mxu0 %v2250_v10  ;;  %3098 = vmatprep.mubr.f32.mxu1 %v2253_v39  ;;  %v2373_v2 = vrot.slane %v2253_v39, 1  ;;  %v2375_v15 = vrot.slane %v2254_v11, 1 }
 0x2f0   : > { %3099 = vmatmul.mubr.f32.gmra.mrb[62].mxu1 %v13470_v20  ;;  %v2485_v48 = vrot.slane %v2253_v39, 2  ;;  %v2487_v55 = vrot.slane %v2254_v11, 2 }
 0x2f1   : > { %v2181_v19 = vmax.f32 %v2149_v57, 0.0  ;;  %v2112_v24 = vmul.f32 %v13166_v29, %v2024_v47  ;;  %v13478_v16 = vsel %vm558_vm0, %v2372_v14, %v2373_v2  ;;  %10493 = vmatpush1.bf16.msra.mxu1 %v10492_v41  ;;  %v13482_v10 = vsel %vm558_vm0, %v2373_v2, %v2375_v15 }
 0x2f2   : > { %v1803_v60 = vpop.f32.mrb[40].mxu0  ;;  %2878 = vmatprep.mubr.f32.mxu0 %v13478_v16  ;;  %v2255_v1 = vld [vmem:[#allocation2 + $0xd8] sm:$0xff]  ;;  %10494 = vmatprep.subr.bf16.mxu1 %v17704_v0  ;;  %v13488_v41 = vsel %vm671_vm1, %v2484_v18, %v2485_v48  ;;  %v13494_v2 = vsel %vm671_vm1, %v2485_v48, %v2487_v55 }
 0x2f3   : > { %2214 = vst [vmem:[#allocation2 + $0xf1] sm:$0xff] %v2181_v19  ;;  %v2150_v61 = vadd.f32 %v13172_v5, %v2112_v24  ;;  %v2029_v30 = vadd.f32 %v13111_v45, %v1803_v60  ;;  %v1805_v57 = vpop.f32.mrb[41].mxu0  ;;  %2879 = vmatmul.mubr.f32.gmra.mrb[96].mxu0 %v2252_v49  ;;  %3103 = vmatprep.mubr.f32.mxu1 %v2255_v1  ;;  %v2377_v15 = vrot.slane %v2255_v1, 1  ;;  %v2489_v55 = vrot.slane %v2255_v1, 2 }
 0x2f4   : > { %2883 = vmatprep.mubr.f32.mxu0 %v13482_v10  ;;  %3104 = vmatmul.mubr.f32.gmra.mrb[64].mxu1 %v13488_v41 }
 0x2f5   : > { %v2182_v14 = vmax.f32 %v2150_v61, 0.0  ;;  %v2113_v11 = vmul.f32 %v13166_v29, %v2029_v30 }
 0x2f6   : > { %v1808_v47 = vpop.f32.mrb[42].mxu0  ;;  %v2256_v4 = vld [vmem:[#allocation2 + $0xe0] sm:$0xff]  ;;  %v2257_v45 = vld [vmem:[#allocation2 + $0xe8] sm:$0x3] }
 0x2f7   : > { %2215 = vst [vmem:[#allocation2 + $0xf9] sm:$0xff] %v2182_v14  ;;  %v2151_v49 = vadd.f32 %v13172_v5, %v2113_v11  ;;  %v2034_v19 = vadd.f32 %v13109_v22, %v1808_v47  ;;  %v1810_v24 = vpop.f32.mrb[43].mxu0  ;;  %2884 = vmatmul.mubr.f32.gmra.mrb[98].mxu0 %v2253_v39  ;;  %3108 = vmatprep.mubr.f32.mxu1 %v2256_v4  ;;  %v2378_v18 = vrot.slane %v2256_v4, 1  ;;  %v2380_v60 = vrot.slane %v2257_v45, 1 }
 0x2f8   : > { %3109 = vmatmul.mubr.f32.gmra.mrb[66].mxu1 %v13494_v2  ;;  %v2490_v61 = vrot.slane %v2256_v4, 2  ;;  %v2492_v39 = vrot.slane %v2257_v45, 2 }
 0x2f9   : > { %v2183_v30 = vmax.f32 %v2151_v49, 0.0  ;;  %v2114_v57 = vmul.f32 %v13166_v29, %v2034_v19  ;;  %v13501_v48 = vsel %vm558_vm0, %v2377_v15, %v2378_v18  ;;  %v13505_v22 = vsel %vm558_vm0, %v2378_v18, %v2380_v60 }
 0x2fa   : > { %17729 = vst [vmem:[#allocation3_spill] sm:$0xff] %v13501_v48  ;;  %v1813_v14 = vpop.f32.mrb[44].mxu0  ;;  %2888 = vmatprep.mubr.f32.mxu0 %v13501_v48  ;;  %v2258_v11 = vld [vmem:[#allocation2 + $0xf0] sm:$0xff]  ;;  %17730 = vst [vmem:[#allocation4_spill] sm:$0xff] %v13505_v22  ;;  %v13510_v15 = vsel %vm671_vm1, %v2489_v55, %v2490_v61 }
 0x2fb   : > { %2216 = vst [vmem:[#allocation2 + $0x109] sm:$0xff] %v2183_v30  ;;  %v2152_v47 = vadd.f32 %v13172_v5, %v2114_v57  ;;  %v2039_v24 = vadd.f32 %v13115_v62, %v1813_v14  ;;  %v1815_v49 = vpop.f32.mrb[45].mxu0  ;;  %2889 = vmatmul.mubr.f32.gmra.mrb[100].mxu0 %v2255_v1  ;;  %3113 = vmatprep.mubr.f32.mxu1 %v2258_v11  ;;  %v2382_v57 = vrot.slane %v2258_v11, 1 }
 0x2fc   : > { %2893 = vmatprep.mubr.f32.mxu0 %v13505_v22  ;;  %3114 = vmatmul.mubr.f32.gmra.mrb[68].mxu1 %v13510_v15  ;;  %v13516_v30 = vsel %vm671_vm1, %v2490_v61, %v2492_v39  ;;  %v2494_v39 = vrot.slane %v2258_v11, 2 }
 0x2fd   : > { %v2184_v19 = vmax.f32 %v2152_v47, 0.0  ;;  %v2115_v18 = vmul.f32 %v13166_v29, %v2039_v24 }
 0x2fe   : > { %v1818_v60 = vpop.f32.mrb[46].mxu0  ;;  %v2259_v45 = vld [vmem:[#allocation2 + $0xf8] sm:$0xff]  ;;  %v2260_v62 = vld [vmem:[#allocation2 + $0x100] sm:$0x3] }
 0x2ff   : > { %2217 = vst [vmem:[#allocation2 + $0x111] sm:$0xff] %v2184_v19  ;;  %v2153_v1 = vadd.f32 %v13172_v5, %v2115_v18  ;;  %v2044_v55 = vadd.f32 %v13113_v25, %v1818_v60  ;;  %v1820_v14 = vpop.f32.mrb[47].mxu0  ;;  %2894 = vmatmul.mubr.f32.gmra.mrb[102].mxu0 %v2256_v4  ;;  %3118 = vmatprep.mubr.f32.mxu1 %v2259_v45  ;;  %v2383_v49 = vrot.slane %v2259_v45, 1  ;;  %v2385_v22 = vrot.slane %v2260_v62, 1 }
 0x300   : > { %3119 = vmatmul.mubr.f32.gmra.mrb[70].mxu1 %v13516_v30  ;;  %v2495_v47 = vrot.slane %v2259_v45, 2  ;;  %v2497_v4 = vrot.slane %v2260_v62, 2 }
 0x301   : > { %v2185_v24 = vmax.f32 %v2153_v1, 0.0  ;;  %v2116_v48 = vmul.f32 %v13166_v29, %v2044_v55  ;;  %v13523_v61 = vsel %vm558_vm0, %v2382_v57, %v2383_v49  ;;  %v13527_v25 = vsel %vm558_vm0, %v2383_v49, %v2385_v22 }
 0x302   : > { %17731 = vst [vmem:[#allocation5_spill] sm:$0xff] %v13523_v61  ;;  %v1823_v19 = vpop.f32.mrb[48].mxu0  ;;  %2898 = vmatprep.mubr.f32.mxu0 %v13523_v61  ;;  %v2261_v18 = vld [vmem:[#allocation2 + $0x108] sm:$0xff]  ;;  %17732 = vst [vmem:[#allocation6_spill] sm:$0xff] %v13527_v25  ;;  %v13532_v57 = vsel %vm671_vm1, %v2494_v39, %v2495_v47 }
 0x303   : > { %2218 = vst [vmem:[#allocation2 + $0x121] sm:$0xff] %v2185_v24  ;;  %v2154_v60 = vadd.f32 %v13172_v5, %v2116_v48  ;;  %v2049_v14 = vadd.f32 %v13119_v63, %v1823_v19  ;;  %v1825_v1 = vpop.f32.mrb[49].mxu0  ;;  %2899 = vmatmul.mubr.f32.gmra.mrb[104].mxu0 %v2258_v11  ;;  %3123 = vmatprep.mubr.f32.mxu1 %v2261_v18  ;;  %v2387_v48 = vrot.slane %v2261_v18, 1 }
 0x304   : > { %2903 = vmatprep.mubr.f32.mxu0 %v13527_v25  ;;  %3124 = vmatmul.mubr.f32.gmra.mrb[72].mxu1 %v13532_v57  ;;  %v13538_v24 = vsel %vm671_vm1, %v2495_v47, %v2497_v4  ;;  %v2499_v4 = vrot.slane %v2261_v18, 2 }
 0x305   : > { %v2186_v55 = vmax.f32 %v2154_v60, 0.0  ;;  %v2117_v22 = vmul.f32 %v13166_v29, %v2049_v14 }
 0x306   : > { %v1828_v49 = vpop.f32.mrb[50].mxu0  ;;  %v2262_v62 = vld [vmem:[#allocation2 + $0x110] sm:$0xff]  ;;  %v2263_v63 = vld [vmem:[#allocation2 + $0x118] sm:$0x3] }
 0x307   : > { %2219 = vst [vmem:[#allocation2 + $0x129] sm:$0xff] %v2186_v55  ;;  %v2155_v11 = vadd.f32 %v13172_v5, %v2117_v22  ;;  %v2054_v39 = vadd.f32 %v13117_v52, %v1828_v49  ;;  %v1830_v19 = vpop.f32.mrb[51].mxu0  ;;  %2904 = vmatmul.mubr.f32.gmra.mrb[106].mxu0 %v2259_v45  ;;  %3128 = vmatprep.mubr.f32.mxu1 %v2262_v62  ;;  %v2388_v1 = vrot.slane %v2262_v62, 1  ;;  %v2390_v25 = vrot.slane %v2263_v63, 1 }
 0x308   : > { %3129 = vmatmul.mubr.f32.gmra.mrb[74].mxu1 %v13538_v24  ;;  %v2500_v60 = vrot.slane %v2262_v62, 2  ;;  %v2502_v45 = vrot.slane %v2263_v63, 2 }
 0x309   : > { %v2187_v14 = vmax.f32 %v2155_v11, 0.0  ;;  %v2118_v61 = vmul.f32 %v13166_v29, %v2054_v39  ;;  %v13545_v47 = vsel %vm558_vm0, %v2387_v48, %v2388_v1  ;;  %v13549_v52 = vsel %vm558_vm0, %v2388_v1, %v2390_v25  ;;  %v13561_v25 = vld [vmem:[%s17493_s4] ss:$0 sm:$0xff] }
 0x30a   : > { %17733 = vst [vmem:[#allocation7_spill] sm:$0xff] %v13545_v47  ;;  %v1833_v55 = vpop.f32.mrb[52].mxu0  ;;  %2908 = vmatprep.mubr.f32.mxu0 %v13545_v47  ;;  %v2264_v22 = vld [vmem:[#allocation2 + $0x120] sm:$0xff]  ;;  %17734 = vst [vmem:[#allocation8_spill] sm:$0xff] %v13549_v52  ;;  %v13554_v29 = vsel %vm671_vm1, %v2499_v4, %v2500_v60 }
 0x30b   : > { %2220 = vst [vmem:[#allocation2 + $0x139] sm:$0xff] %v2187_v14  ;;  %v2156_v49 = vadd.f32 %v13172_v5, %v2118_v61  ;;  %v2059_v19 = vadd.f32 %v13123_v35, %v1833_v55  ;;  %v1835_v11 = vpop.f32.mrb[53].mxu0  ;;  %2909 = vmatmul.mubr.f32.gmra.mrb[108].mxu0 %v2261_v18  ;;  %3133 = vmatprep.mubr.f32.mxu1 %v2264_v22  ;;  %v2392_v63 = vrot.slane %v2264_v22, 1  ;;  %v13570_v1 = vld [vmem:[%s17494_s5] ss:$0 sm:$0xff] }
 0x30c   : > { %2913 = vmatprep.mubr.f32.mxu0 %v13549_v52  ;;  %3134 = vmatmul.mubr.f32.gmra.mrb[76].mxu1 %v13554_v29  ;;  %v13565_v18 = vsel %vm671_vm1, %v2500_v60, %v2502_v45  ;;  %v2504_v52 = vrot.slane %v2264_v22, 2 }
 0x30d   : > { %v2188_v48 = vmax.f32 %v2156_v49, 0.0  ;;  %v2119_v5 = vmul.f32 %v13561_v25, %v2059_v19 }
 0x30e   : > { %v1838_v61 = vpop.f32.mrb[54].mxu0  ;;  %v2265_v35 = vld [vmem:[#allocation2 + $0x128] sm:$0xff]  ;;  %v2266_v39 = vld [vmem:[#allocation2 + $0x130] sm:$0x3] }
 0x30f   : > { %2221 = vst [vmem:[#allocation2 + $0x141] sm:$0xff] %v2188_v48  ;;  %v2157_v14 = vadd.f32 %v13570_v1, %v2119_v5  ;;  %v2064_v4 = vadd.f32 %v13121_v33, %v1838_v61  ;;  %v1840_v55 = vpop.f32.mrb[55].mxu0  ;;  %2914 = vmatmul.mubr.f32.gmra.mrb[110].mxu0 %v2262_v62  ;;  %3138 = vmatprep.mubr.f32.mxu1 %v2265_v35  ;;  %v2393_v49 = vrot.slane %v2265_v35, 1  ;;  %v2395_v19 = vrot.slane %v2266_v39, 1 }
 0x310   : > { %3139 = vmatmul.mubr.f32.gmra.mrb[78].mxu1 %v13565_v18  ;;  %v2505_v60 = vrot.slane %v2265_v35, 2  ;;  %v2507_v62 = vrot.slane %v2266_v39, 2 }
 0x311   : > { %v2189_v45 = vmax.f32 %v2157_v14, 0.0  ;;  %v2120_v11 = vmul.f32 %v13561_v25, %v2064_v4  ;;  %v13577_v48 = vsel %vm558_vm0, %v2392_v63, %v2393_v49  ;;  %v13581_v33 = vsel %vm558_vm0, %v2393_v49, %v2395_v19 }
 0x312   : > { %17735 = vst [vmem:[#allocation9_spill] sm:$0xff] %v13577_v48  ;;  %v1843_v47 = vpop.f32.mrb[56].mxu0  ;;  %2918 = vmatprep.mubr.f32.mxu0 %v13577_v48  ;;  %v2267_v5 = vld [vmem:[#allocation2 + $0x138] sm:$0xff]  ;;  %17736 = vst [vmem:[#allocation10_spill] sm:$0xff] %v13581_v33  ;;  %v13586_v63 = vsel %vm671_vm1, %v2504_v52, %v2505_v60 }
 0x313   : > { %2222 = vst [vmem:[#allocation2 + $0x151] sm:$0xff] %v2189_v45  ;;  %v2158_v61 = vadd.f32 %v13570_v1, %v2120_v11  ;;  %v2069_v55 = vadd.f32 %v13133_v7, %v1843_v47  ;;  %v1845_v14 = vpop.f32.mrb[57].mxu0  ;;  %2919 = vmatmul.mubr.f32.gmra.mrb[112].mxu0 %v2264_v22  ;;  %3143 = vmatprep.mubr.f32.mxu1 %v2267_v5  ;;  %v2397_v11 = vrot.slane %v2267_v5, 1 }
 0x314   : > { %2923 = vmatprep.mubr.f32.mxu0 %v13581_v33  ;;  %3144 = vmatmul.mubr.f32.gmra.mrb[80].mxu1 %v13586_v63  ;;  %v13592_v45 = vsel %vm671_vm1, %v2505_v60, %v2507_v62  ;;  %v2509_v62 = vrot.slane %v2267_v5, 2 }
 0x315   : > { %v2190_v4 = vmax.f32 %v2158_v61, 0.0  ;;  %v2121_v49 = vmul.f32 %v13561_v25, %v2069_v55 }
 0x316   : > { %v1848_v19 = vpop.f32.mrb[58].mxu0  ;;  %v2268_v39 = vld [vmem:[#allocation2 + $0x140] sm:$0xff]  ;;  %v2269_v7 = vld [vmem:[#allocation2 + $0x148] sm:$0x3] }
 0x317   : > { %2223 = vst [vmem:[#allocation2 + $0x159] sm:$0xff] %v2190_v4  ;;  %v2159_v47 = vadd.f32 %v13570_v1, %v2121_v49  ;;  %v2074_v22 = vadd.f32 %v13125_v56, %v1848_v19  ;;  %v1850_v52 = vpop.f32.mrb[59].mxu0  ;;  %2924 = vmatmul.mubr.f32.gmra.mrb[114].mxu0 %v2265_v35  ;;  %3148 = vmatprep.mubr.f32.mxu1 %v2268_v39  ;;  %v2398_v14 = vrot.slane %v2268_v39, 1  ;;  %v2400_v33 = vrot.slane %v2269_v7, 1 }
 0x318   : > { %3149 = vmatmul.mubr.f32.gmra.mrb[82].mxu1 %v13592_v45  ;;  %v2510_v61 = vrot.slane %v2268_v39, 2  ;;  %v2512_v35 = vrot.slane %v2269_v7, 2 }
 0x319   : > { %v2191_v55 = vmax.f32 %v2159_v47, 0.0  ;;  %v2122_v48 = vmul.f32 %v13561_v25, %v2074_v22  ;;  %v13599_v60 = vsel %vm558_vm0, %v2397_v11, %v2398_v14  ;;  %v13605_v56 = vsel %vm558_vm0, %v2398_v14, %v2400_v33 }
 0x31a   : > { %v1853_v4 = vpop.f32.mrb[60].mxu0  ;;  %2928 = vmatprep.mubr.f32.mxu0 %v13599_v60  ;;  %v13602_v49 = vld [vmem:[#allocation2 + $0x150] sm:$0xff]  ;;  %v13611_v11 = vsel %vm671_vm1, %v2509_v62, %v2510_v61 }
 0x31b   : > { %2224 = vst [vmem:[#allocation2 + $0x169] sm:$0xff] %v2191_v55  ;;  %v2160_v19 = vadd.f32 %v13570_v1, %v2122_v48  ;;  %v2079_v47 = vadd.f32 %v13149_v28, %v1853_v4  ;;  %v1855_v52 = vpop.f32.mrb[61].mxu0  ;;  %2929 = vmatmul.mubr.f32.gmra.mrb[116].mxu0 %v2267_v5  ;;  %3153 = vmatprep.mubr.f32.mxu1 %v13602_v49  ;;  %v2402_v28 = vrot.slane %v13602_v49, 1 }
 0x31c   : > { %2933 = vmatprep.mubr.f32.mxu0 %v13605_v56  ;;  %3154 = vmatmul.mubr.f32.gmra.mrb[84].mxu1 %v13611_v11  ;;  %v13619_v48 = vsel %vm671_vm1, %v2510_v61, %v2512_v35 }
 0x31d   : > { %v2192_v22 = vmax.f32 %v2160_v19, 0.0  ;;  %v2123_v33 = vmul.f32 %v13561_v25, %v2079_v47 }
 0x31e   : > { %v1858_v7 = vpop.f32.mrb[62].mxu0  ;;  %v13616_v14 = vld [vmem:[#allocation2 + $0x158] sm:$0xff]  ;;  %v2272_v5 = vld [vmem:[#allocation2 + $0x160] sm:$0x3] }
 0x31f   : > { %17737 = vst [vmem:[#allocation11_spill] sm:$0xff] %v13616_v14  ;;  %2225 = vst [vmem:[#allocation2 + $0x171] sm:$0xff] %v2192_v22  ;;  %v2161_v55 = vadd.f32 %v13570_v1, %v2123_v33  ;;  %v2084_v62 = vadd.f32 %v13141_v27, %v1858_v7  ;;  %v1860_v4 = vpop.f32.mrb[63].mxu0  ;;  %2934 = vmatmul.mubr.f32.gmra.mrb[118].mxu0 %v2268_v39  ;;  %3158 = vmatprep.mubr.f32.mxu1 %v13616_v14  ;;  %v2403_v19 = vrot.slane %v13616_v14, 1 }
 0x320   : > { %v2405_v47 = vrot.slane %v2272_v5, 1  ;;  %3159 = vmatmul.mubr.f32.gmra.mrb[86].mxu1 %v13619_v48  ;;  %v2515_v61 = vrot.slane %v13616_v14, 2  ;;  %v2514_v33 = vrot.slane %v13602_v49, 2  ;;  %v2517_v39 = vrot.slane %v2272_v5, 2 }
 0x321   : > { %v2193_v35 = vmax.f32 %v2161_v55, 0.0  ;;  %v2124_v52 = vmul.f32 %v13561_v25, %v2084_v62  ;;  %v13630_v22 = vsel %vm558_vm0, %v2402_v28, %v2403_v19 }
 0x322   : > { %2938 = vmatprep.mubr.f32.mxu0 %v13630_v22  ;;  %v13634_v27 = vld [vmem:[#allocation2 + $0x168] sm:$0xff]  ;;  %v13636_v7 = vpop.f32.mrb[64].mxu0  ;;  %v13642_v25 = vsel %vm558_vm0, %v2403_v19, %v2405_v47  ;;  %v13645_v28 = vsel %vm671_vm1, %v2514_v33, %v2515_v61 }
 0x323   : > { %17738 = vst [vmem:[#allocation12_spill] sm:$0xff] %v13634_v27  ;;  %17739 = vst [vmem:[#allocation13_spill] sm:$0xff] %v13636_v7  ;;  %v2162_v4 = vadd.f32 %v13570_v1, %v2124_v52  ;;  %2939 = vmatmul.mubr.f32.gmra.mrb[120].mxu0 %v13602_v49  ;;  %3163 = vmatprep.mubr.f32.mxu1 %v13634_v27  ;;  %v2802_v55 = vpop.f32.mrb[65].mxu0  ;;  %v13652_v1 = vsel %vm671_vm1, %v2515_v61, %v2517_v39  ;;  %v2407_v19 = vrot.slane %v13634_v27, 1 }
 0x324   : > { %2226 = vst [vmem:[#allocation2 + $0x181] sm:$0xff] %v2193_v35  ;;  %2943 = vmatprep.mubr.f32.mxu0 %v13642_v25  ;;  %3164 = vmatmul.mubr.f32.gmra.mrb[88].mxu1 %v13645_v28  ;;  %v2519_v39 = vrot.slane %v13634_v27, 2 }
 0x325   : > { %v2194_v5 = vmax.f32 %v2162_v4, 0.0 }
 0x326   : > { %v13649_v62 = vld [vmem:[#allocation2 + $0x170] sm:$0xff]  ;;  %v2275_v35 = vld [vmem:[#allocation2 + $0x178] sm:$0x3]  ;;  %v13654_v52 = vpop.f32.mrb[66].mxu0 }
 0x327   : > { %17740 = vst [vmem:[#allocation14_spill] sm:$0xff] %v13654_v52  ;;  %2227 = vst [vmem:[#allocation2 + $0x189] sm:$0xff] %v2194_v5  ;;  %2944 = vmatmul.mubr.f32.gmra.mrb[122].mxu0 %v13616_v14  ;;  %3168 = vmatprep.mubr.f32.mxu1 %v13649_v62  ;;  %v2408_v47 = vrot.slane %v13649_v62, 1  ;;  %v2410_v33 = vrot.slane %v2275_v35, 1  ;;  %v2520_v4 = vrot.slane %v13649_v62, 2  ;;  %v2807_v55 = vpop.f32.mrb[67].mxu0 }
 0x328   : > { %3169 = vmatmul.mubr.f32.gmra.mrb[90].mxu1 %v13652_v1  ;;  %v2522_v7 = vrot.slane %v2275_v35, 2  ;;  %v2686_v14 = vld [vmem:[%s17491_s2 + $0x300] sm:$0xff] }
 0x329   : > { %v13663_v61 = vsel %vm558_vm0, %v2407_v19, %v2408_v47  ;;  %v13672_v52 = vsel %vm558_vm0, %v2408_v47, %v2410_v33  ;;  %v13675_v55 = vsel %vm671_vm1, %v2519_v39, %v2520_v4  ;;  %v2688_v33 = vld [vmem:[%s17491_s2 + $0x310] sm:$0xff]  ;;  %v2689_v39 = vld [vmem:[%s17491_s2 + $0x318] sm:$0xff] }
 0x32a   : > { %2948 = vmatprep.mubr.f32.mxu0 %v13663_v61  ;;  %v13690_v35 = vsel %vm671_vm1, %v2520_v4, %v2522_v7  ;;  %v10498_v7 = vpack.c.bf16 %v2689_v39, %v2688_v33  ;;  %v2695_v4 = vld [vmem:[%s17491_s2 + $0x348] sm:$0xff]  ;;  %v2697_v33 = vld [vmem:[%s17491_s2 + $0x358] sm:$0xff]  ;;  %v2698_v39 = vld [vmem:[%s17491_s2 + $0x360] sm:$0xff] }
 0x32b   : > { %v13667_v5 = vld [vmem:[#allocation2 + $0x180] sm:$0xff]  ;;  %2949 = vmatmul.mubr.f32.gmra.mrb[124].mxu0 %v13634_v27  ;;  %v2687_v27 = vld [vmem:[%s17491_s2 + $0x308] sm:$0xff] }
 0x32c   : > { %3173 = vmatprep.mubr.f32.mxu1 %v13667_v5  ;;  %2953 = vmatprep.mubr.f32.mxu0 %v13672_v52  ;;  %v10495_v47 = vpack.c.bf16 %v2687_v27, %v2686_v14  ;;  %v2691_v14 = vld [vmem:[%s17491_s2 + $0x328] sm:$0xff]  ;;  %v2693_v27 = vld [vmem:[%s17491_s2 + $0x338] sm:$0xff] }
 0x32d   : > { %3174 = vmatmul.mubr.f32.gmra.mrb[92].mxu1 %v13675_v55 }
 0x32e   : > { %v13679_v19 = vld [vmem:[#allocation2 + $0x188] sm:$0xff] }
 0x32f   : > { %2954 = vmatmul.mubr.f32.gmra.mrb[126].mxu0 %v13649_v62  ;;  %3178 = vmatprep.mubr.f32.mxu1 %v13679_v19 }
 0x330   : > { %9998 = vmatprep.mubr.f32.mxu0 %v13284_v42 }
 0x331   : > { %3179 = vmatmul.mubr.f32.gmra.mrb[94].mxu1 %v13690_v35 }
 0x332   : > { %3248 = vmatprep.mubr.f32.mxu1 %v13248_v59  ;;  %v2690_v59 = vld [vmem:[%s17491_s2 + $0x320] sm:$0xff] }
 0x333   : > { %9999 = vmatmul.mubr.f32.vlgmr.msra.gmra.mrb[128].mxu0 %v13296_v8 }
 0x334   : > { %10001 = vmatprep.mubr.f32.mxu0 %v13320_v43 }
 0x335   : > { %3249 = vmatmul.mubr.f32.vlgmr.msra.gmra.mrb[32].mxu1 %v13232_v51  ;;  %v10501_v51 = vpack.c.bf16 %v2691_v14, %v2690_v59  ;;  %v2700_v59 = vld [vmem:[%s17491_s2 + $0x370] sm:$0xff]  ;;  %v2701_v14 = vld [vmem:[%s17491_s2 + $0x378] sm:$0xff] }
 0x336   : > { %3253 = vmatprep.mubr.f32.mxu1 %v13260_v38  ;;  %10496 = vmatpush1.bf16.msra.mxu1 %v10495_v47  ;;  %v2692_v38 = vld [vmem:[%s17491_s2 + $0x330] sm:$0xff] }
 0x337   : > { %10497 = vmatprep.subr.bf16.mxu1 %v17704_v0  ;;  %10002 = vmatmul.mubr.f32.gmra.mrb[130].mxu0 %v13332_v40  ;;  %v2696_v47 = vld [vmem:[%s17491_s2 + $0x350] sm:$0xff] }
 0x338   : > { %10004 = vmatprep.mubr.f32.mxu0 %v13356_v17 }
 0x339   : > { %3254 = vmatmul.mubr.f32.gmra.mrb[34].mxu1 %v13236_v21  ;;  %v10504_v21 = vpack.c.bf16 %v2693_v27, %v2692_v38  ;;  %v2703_v38 = vld [vmem:[%s17491_s2 + $0x388] sm:$0xff]  ;;  %v2704_v27 = vld [vmem:[%s17491_s2 + $0x390] sm:$0xff] }
 0x33a   : > { %3258 = vmatprep.mubr.f32.mxu1 %v13284_v42  ;;  %10499 = vmatpush1.bf16.msra.mxu1 %v10498_v7  ;;  %v2694_v42 = vld [vmem:[%s17491_s2 + $0x340] sm:$0xff]  ;;  %v2699_v7 = vld [vmem:[%s17491_s2 + $0x368] sm:$0xff] }
 0x33b   : > { %10500 = vmatprep.subr.bf16.mxu1 %v17704_v0  ;;  %10005 = vmatmul.mubr.f32.gmra.mrb[132].mxu0 %v13368_v50 }
 0x33c   : > { %10007 = vmatprep.mubr.f32.mxu0 %v13392_v3 }
 0x33d   : > { %3259 = vmatmul.mubr.f32.gmra.mrb[36].mxu1 %v13268_v54 }
 0x33e   : > { %3263 = vmatprep.mubr.f32.mxu1 %v13296_v8  ;;  %10502 = vmatpush1.bf16.msra.mxu1 %v10501_v51  ;;  %v10507_v8 = vpack.c.bf16 %v2695_v4, %v2694_v42  ;;  %v2702_v51 = vld [vmem:[%s17491_s2 + $0x380] sm:$0xff]  ;;  %v2707_v4 = vld [vmem:[%s17491_s2 + $0x3a8] sm:$0xff] }
 0x33f   : > { %10503 = vmatprep.subr.bf16.mxu1 %v17704_v0  ;;  %10008 = vmatmul.mubr.f32.gmra.mrb[134].mxu0 %v13404_v31  ;;  %v2706_v42 = vld [vmem:[%s17491_s2 + $0x3a0] sm:$0xff] }
 0x340   : > { %10010 = vmatprep.mubr.f32.mxu0 %v13428_v23 }
 0x341   : > { %3264 = vmatmul.mubr.f32.gmra.mrb[38].mxu1 %v13272_v6 }
 0x342   : > { %3268 = vmatprep.mubr.f32.mxu1 %v13320_v43  ;;  %10505 = vmatpush1.bf16.msra.mxu1 %v10504_v21  ;;  %v10510_v43 = vpack.c.bf16 %v2697_v33, %v2696_v47  ;;  %v2705_v21 = vld [vmem:[%s17491_s2 + $0x398] sm:$0xff]  ;;  %v2710_v33 = vld [vmem:[%s17491_s2 + $0x3c0] sm:$0xff] }
 0x343   : > { %10506 = vmatprep.subr.bf16.mxu1 %v17704_v0  ;;  %10011 = vmatmul.mubr.f32.gmra.mrb[136].mxu0 %v13440_v34  ;;  %v2709_v47 = vld [vmem:[%s17491_s2 + $0x3b8] sm:$0xff] }
 0x344   : > { %10013 = vmatprep.mubr.f32.mxu0 %v13464_v37 }
 0x345   : > { %3269 = vmatmul.mubr.f32.gmra.mrb[40].mxu1 %v13304_v12 }
 0x346   : > { %3273 = vmatprep.mubr.f32.mxu1 %v13332_v40  ;;  %10508 = vmatpush1.bf16.msra.mxu1 %v10507_v8  ;;  %v10513_v40 = vpack.c.bf16 %v2699_v7, %v2698_v39  ;;  %v2708_v8 = vld [vmem:[%s17491_s2 + $0x3b0] sm:$0xff]  ;;  %v2713_v7 = vld [vmem:[%s17491_s2 + $0x3d8] sm:$0xff] }
 0x347   : > { %10509 = vmatprep.subr.bf16.mxu1 %v17704_v0  ;;  %10014 = vmatmul.mubr.f32.gmra.mrb[138].mxu0 %v13470_v20  ;;  %v2712_v39 = vld [vmem:[%s17491_s2 + $0x3d0] sm:$0xff] }
 0x348   : > { %10016 = vmatprep.mubr.f32.mxu0 %v13488_v41 }
 0x349   : > { %3274 = vmatmul.mubr.f32.gmra.mrb[42].mxu1 %v13308_v44 }
 0x34a   : > { %3278 = vmatprep.mubr.f32.mxu1 %v13356_v17  ;;  %10511 = vmatpush1.bf16.msra.mxu1 %v10510_v43  ;;  %v10516_v17 = vpack.c.bf16 %v2701_v14, %v2700_v59  ;;  %v2711_v43 = vld [vmem:[%s17491_s2 + $0x3c8] sm:$0xff]  ;;  %v13835_v59 = vld [vmem:[#allocation2 + $0x190] sm:$0x3]  ;;  %v10534_v14 = vpack.c.bf16 %v2713_v7, %v2712_v39  ;;  %v2560_v7 = vrot.slane %v13679_v19, 1 }
 0x34b   : > { %10512 = vmatprep.subr.bf16.mxu1 %v17704_v0  ;;  %10017 = vmatmul.mubr.f32.gmra.mrb[140].mxu0 %v13494_v2 }
 0x34c   : > { %10019 = vmatprep.mubr.f32.mxu0 %v13510_v15 }
 0x34d   : > { %3279 = vmatmul.mubr.f32.gmra.mrb[44].mxu1 %v13340_v58 }
 0x34e   : > { %3283 = vmatprep.mubr.f32.mxu1 %v13368_v50  ;;  %10514 = vmatpush1.bf16.msra.mxu1 %v10513_v40  ;;  %v10519_v50 = vpack.c.bf16 %v2703_v38, %v2702_v51  ;;  %v2567_v40 = vrot.slane %v13679_v19, 2  ;;  %v2714_v51 = vld [vmem:[%s17491_s2 + $0x3e0] sm:$0xff]  ;;  %v2715_v38 = vld [vmem:[%s17491_s2 + $0x3e8] sm:$0xff] }
 0x34f   : > { %10515 = vmatprep.subr.bf16.mxu1 %v17704_v0  ;;  %10020 = vmatmul.mubr.f32.gmra.mrb[142].mxu0 %v13516_v30 }
 0x350   : > { %10022 = vmatprep.mubr.f32.mxu0 %v13532_v57 }
 0x351   : > { %3284 = vmatmul.mubr.f32.gmra.mrb[46].mxu1 %v13344_v32 }
 0x352   : > { %3288 = vmatprep.mubr.f32.mxu1 %v13392_v3  ;;  %10517 = vmatpush1.bf16.msra.mxu1 %v10516_v17  ;;  %v10522_v3 = vpack.c.bf16 %v2705_v21, %v2704_v27  ;;  %v2569_v17 = vrot.slane %v13835_v59, 2  ;;  %v2716_v21 = vld [vmem:[%s17491_s2 + $0x3f0] sm:$0xff] }
 0x353   : > { %10518 = vmatprep.subr.bf16.mxu1 %v17704_v0  ;;  %10023 = vmatmul.mubr.f32.gmra.mrb[144].mxu0 %v13538_v24 }
 0x354   : > { %10025 = vmatprep.mubr.f32.mxu0 %v13554_v29  ;;  %v13854_v27 = vsel %vm671_vm1, %v2567_v40, %v2569_v17 }
 0x355   : > { %3289 = vmatmul.mubr.f32.gmra.mrb[48].mxu1 %v13376_v53 }
 0x356   : > { %3293 = vmatprep.mubr.f32.mxu1 %v13404_v31  ;;  %10520 = vmatpush1.bf16.msra.mxu1 %v10519_v50  ;;  %v10525_v31 = vpack.c.bf16 %v2707_v4, %v2706_v42  ;;  %v10537_v50 = vpack.c.bf16 %v2715_v38, %v2714_v51  ;;  %v17741_v42 = vld [vmem:[#allocation3_spill] sm:$0xff]  ;;  %v17742_v4 = vld [vmem:[#allocation4_spill] sm:$0xff]  ;;  %v2562_v51 = vrot.slane %v13835_v59, 1 }
 0x357   : > { %10521 = vmatprep.subr.bf16.mxu1 %v17704_v0  ;;  %10026 = vmatmul.mubr.f32.gmra.mrb[146].mxu0 %v13565_v18 }
 0x358   : > { %10028 = vmatprep.mubr.f32.mxu0 %v13586_v63 }
 0x359   : > { %3294 = vmatmul.mubr.f32.gmra.mrb[50].mxu1 %v13380_v36 }
 0x35a   : > { %3298 = vmatprep.mubr.f32.mxu1 %v13428_v23  ;;  %10523 = vmatpush1.bf16.msra.mxu1 %v10522_v3  ;;  %v10528_v23 = vpack.c.bf16 %v2709_v47, %v2708_v8  ;;  %v2717_v3 = vld [vmem:[%s17491_s2 + $0x3f8] sm:$0xff] }
 0x35b   : > { %10524 = vmatprep.subr.bf16.mxu1 %v17704_v0  ;;  %10029 = vmatmul.mubr.f32.gmra.mrb[148].mxu0 %v13592_v45  ;;  %v17746_v8 = vld [vmem:[#allocation8_spill] sm:$0xff] }
 0x35c   : > { %10031 = vmatprep.mubr.f32.mxu0 %v13611_v11 }
 0x35d   : > { %3299 = vmatmul.mubr.f32.gmra.mrb[52].mxu1 %v13412_v13 }
 0x35e   : > { %3303 = vmatprep.mubr.f32.mxu1 %v13440_v34  ;;  %10526 = vmatpush1.bf16.msra.mxu1 %v10525_v31  ;;  %v10531_v34 = vpack.c.bf16 %v2711_v43, %v2710_v33  ;;  %v17744_v31 = vld [vmem:[#allocation6_spill] sm:$0xff] }
 0x35f   : > { %10527 = vmatprep.subr.bf16.mxu1 %v17704_v0  ;;  %10032 = vmatmul.mubr.f32.gmra.mrb[150].mxu0 %v13619_v48 }
 0x360   : > { %10034 = vmatprep.mubr.f32.mxu0 %v13645_v28 }
 0x361   : > { %3304 = vmatmul.mubr.f32.gmra.mrb[54].mxu1 %v13416_v9 }
 0x362   : > { %3308 = vmatprep.mubr.f32.mxu1 %v13464_v37  ;;  %10529 = vmatpush1.bf16.msra.mxu1 %v10528_v23  ;;  %v2566_v37 = vrot.slane %v13667_v5, 2 }
 0x363   : > { %10530 = vmatprep.subr.bf16.mxu1 %v17704_v0  ;;  %10035 = vmatmul.mubr.f32.gmra.mrb[152].mxu0 %v13652_v1 }
 0x364   : > { %10037 = vmatprep.mubr.f32.mxu0 %v13675_v55 }
 0x365   : > { %3309 = vmatmul.mubr.f32.gmra.mrb[56].mxu1 %v13448_v26 }
 0x366   : > { %3313 = vmatprep.mubr.f32.mxu1 %v13470_v20  ;;  %10532 = vmatpush1.bf16.msra.mxu1 %v10531_v34  ;;  %v2568_v20 = vsel %vm671_vm1, %v2566_v37, %v2567_v40 }
 0x367   : > { %10533 = vmatprep.subr.bf16.mxu1 %v17704_v0  ;;  %10038 = vmatmul.mubr.f32.gmra.mrb[154].mxu0 %v13690_v35 }
 0x368   : > { %10040 = vmatprep.mubr.f32.mxu0 %v2568_v20 }
 0x369   : > { %3314 = vmatmul.mubr.f32.gmra.mrb[58].mxu1 %v13452_v46 }
 0x36a   : > { %3318 = vmatprep.mubr.f32.mxu1 %v13488_v41  ;;  %10535 = vmatpush1.bf16.msra.mxu1 %v10534_v14  ;;  %v10540_v41 = vpack.c.bf16 %v2717_v3, %v2716_v21  ;;  %v13918_v14 = vld [vmem:[#allocation2 + $0x1a8] sm:$0x3]  ;;  %v4361_v21 = vld [vmem:[%s17492_s3] sm:$0xff] }
 0x36b   : > { %10536 = vmatprep.subr.bf16.mxu1 %v17704_v0  ;;  %10041 = vmatmul.mubr.f32.gmra.mrb[156].mxu0 %v13854_v27  ;;  %v2586_v38 = vrot.slane %v13918_v14, 2  ;;  %v4362_v3 = vld [vmem:[%s17492_s3 + $0x8] sm:$0xff] }
 0x36d   : > { %3319 = vmatmul.mubr.f32.gmra.mrb[60].mxu1 %v13478_v16 }
 0x36e   : > { %3323 = vmatprep.mubr.f32.mxu1 %v13494_v2  ;;  %10538 = vmatpush1.bf16.msra.mxu1 %v10537_v50  ;;  %v17743_v2 = vld [vmem:[#allocation5_spill] sm:$0xff] }
 0x36f   : > { %10539 = vmatprep.subr.bf16.mxu1 %v17704_v0 }
 0x371   : > { %3324 = vmatmul.mubr.f32.gmra.mrb[62].mxu1 %v13482_v10 }
 0x372   : > { %3328 = vmatprep.mubr.f32.mxu1 %v13510_v15  ;;  %10541 = vmatpush1.bf16.msra.mxu1 %v10540_v41  ;;  %v17745_v15 = vld [vmem:[#allocation7_spill] sm:$0xff]  ;;  %v13937_v41 = vsel %vm558_vm0, %v2560_v7, %v2562_v51 }
 0x373   : > { %10574 = vmatprep.subr.bf16.mxu1 %v17704_v0  ;;  %v4367_v51 = vld [vmem:[%s17492_s3 + $0x30] sm:$0xff] }
 0x375   : > { %3329 = vmatmul.mubr.f32.gmra.mrb[64].mxu1 %v17741_v42 }
 0x376   : > { %3333 = vmatprep.mubr.f32.mxu1 %v13516_v30  ;;  %v17747_v30 = vld [vmem:[#allocation9_spill] sm:$0xff] }
 0x379   : > { %3334 = vmatmul.mubr.f32.gmra.mrb[66].mxu1 %v17742_v4 }
 0x37a   : > { %3338 = vmatprep.mubr.f32.mxu1 %v13532_v57 }
 0x37d   : > { %3339 = vmatmul.mubr.f32.gmra.mrb[68].mxu1 %v17743_v2 }
 0x37e   : > { %3343 = vmatprep.mubr.f32.mxu1 %v13538_v24  ;;  %v17748_v24 = vld [vmem:[#allocation10_spill] sm:$0xff] }
 0x381   : > { %3344 = vmatmul.mubr.f32.gmra.mrb[70].mxu1 %v17744_v31 }
 0x382   : > { %3348 = vmatprep.mubr.f32.mxu1 %v13554_v29 }
 0x385   : > { %3349 = vmatmul.mubr.f32.gmra.mrb[72].mxu1 %v17745_v15 }
 0x386   : > { %3353 = vmatprep.mubr.f32.mxu1 %v13565_v18 }
 0x389   : > { %3354 = vmatmul.mubr.f32.gmra.mrb[74].mxu1 %v17746_v8 }
 0x38a   : > { %3358 = vmatprep.mubr.f32.mxu1 %v13586_v63 }
 0x38d   : > { %3359 = vmatmul.mubr.f32.gmra.mrb[76].mxu1 %v17747_v30 }
 0x38e   : > { %3363 = vmatprep.mubr.f32.mxu1 %v13592_v45  ;;  %v13884_v57 = vpop.f32.mrb[68].mxu0 }
 0x38f   : > { %v2812_v47 = vpop.f32.mrb[69].mxu0 }
 0x391   : > { %3364 = vmatmul.mubr.f32.gmra.mrb[78].mxu1 %v17748_v24 }
 0x392   : > { %3368 = vmatprep.mubr.f32.mxu1 %v13611_v11  ;;  %v13888_v29 = vpop.f32.mrb[70].mxu0 }
 0x393   : > { %v2817_v23 = vpop.f32.mrb[71].mxu0 }
 0x394   : > { %v4363_v23 = vld [vmem:[%s17492_s3 + $0x10] sm:$0xff] }
 0x395   : > { %3369 = vmatmul.mubr.f32.gmra.mrb[80].mxu1 %v13599_v60 }
 0x396   : > { %3373 = vmatprep.mubr.f32.mxu1 %v13619_v48  ;;  %v13892_v18 = vpop.f32.mrb[72].mxu0 }
 0x397   : > { %v2822_v63 = vpop.f32.mrb[73].mxu0 }
 0x398   : > { %v4364_v63 = vld [vmem:[%s17492_s3 + $0x18] sm:$0xff] }
 0x399   : > { %3374 = vmatmul.mubr.f32.gmra.mrb[82].mxu1 %v13605_v56 }
 0x39a   : > { %3378 = vmatprep.mubr.f32.mxu1 %v13645_v28  ;;  %v13896_v45 = vpop.f32.mrb[74].mxu0 }
 0x39b   : > { %v2827_v33 = vpop.f32.mrb[75].mxu0 }
 0x39d   : > { %3379 = vmatmul.mubr.f32.gmra.mrb[84].mxu1 %v13630_v22 }
 0x39e   : > { %3383 = vmatprep.mubr.f32.mxu1 %v13652_v1  ;;  %v13900_v11 = vpop.f32.mrb[76].mxu0  ;;  %v2559_v1 = vrot.slane %v13667_v5, 1 }
 0x39f   : > { %v2832_v43 = vpop.f32.mrb[77].mxu0 }
 0x3a0   : > { %v11401_v43 = vld [vmem:[#allocation2 + $0x30] sm:$0xff] }
 0x3a1   : > { %3384 = vmatmul.mubr.f32.gmra.mrb[86].mxu1 %v13642_v25 }
 0x3a2   : > { %3388 = vmatprep.mubr.f32.mxu1 %v13675_v55  ;;  %v13904_v48 = vpop.f32.mrb[78].mxu0  ;;  %v13915_v55 = vld [vmem:[#allocation2] sm:$0xff] }
 0x3a3   : > { %v2837_v34 = vpop.f32.mrb[79].mxu0  ;;  %v2583_v37 = vrot.slane %v13915_v55, 2 }
 0x3a4   : > { %v10578_v34 = vpack.c.bf16 %v4364_v63, %v4363_v23  ;;  %v11404_v63 = vld [vmem:[#allocation2 + $0x50] sm:$0xff] }
 0x3a5   : > { %3389 = vmatmul.mubr.f32.gmra.mrb[88].mxu1 %v13663_v61  ;;  %10043 = vmatprep.mubr.f32.mxu0 %v2583_v37 }
 0x3a6   : > { %3393 = vmatprep.mubr.f32.mxu1 %v13690_v35  ;;  %v13908_v28 = vpop.f32.mrb[80].mxu0  ;;  %v13921_v35 = vsel %vm558_vm0, %v2559_v1, %v2560_v7  ;;  %v4366_v7 = vld [vmem:[%s17492_s3 + $0x28] sm:$0xff] }
 0x3a7   : > { %v2842_v39 = vpop.f32.mrb[81].mxu0 }
 0x3a9   : > { %3394 = vmatmul.mubr.f32.gmra.mrb[90].mxu1 %v13672_v52 }
 0x3aa   : > { %3398 = vmatprep.mubr.f32.mxu1 %v2568_v20  ;;  %v13913_v40 = vpop.f32.mrb[82].mxu0  ;;  %v2587_v20 = vsel %vm671_vm1, %v2583_v37, %v2586_v38  ;;  %v11402_v37 = vld [vmem:[#allocation2 + $0x38] sm:$0xff] }
 0x3ab   : > { %v2847_v17 = vpop.f32.mrb[83].mxu0  ;;  %10044 = vmatmul.mubr.f32.gmra.mrb[158].mxu0 %v2587_v20  ;;  %v4368_v38 = vld [vmem:[%s17492_s3 + $0x38] sm:$0xff] }
 0x3ad   : > { %3399 = vmatmul.mubr.f32.gmra.mrb[92].mxu1 %v13921_v35 }
 0x3ae   : > { %3403 = vmatprep.mubr.f32.mxu1 %v13854_v27  ;;  %v13928_v50 = vpop.f32.mrb[84].mxu0  ;;  %v10575_v27 = vpack.c.bf16 %v4362_v3, %v4361_v21  ;;  %v11403_v21 = vld [vmem:[#allocation2 + $0x48] sm:$0xff] }
 0x3af   : > { %v2852_v59 = vpop.f32.mrb[85].mxu0 }
 0x3b0   : > { %v4369_v59 = vld [vmem:[%s17492_s3 + $0x40] sm:$0xff] }
 0x3b1   : > { %3404 = vmatmul.mubr.f32.gmra.mrb[94].mxu1 %v13937_v41 }
 0x3b2   : > { %3473 = vmatprep.mubr.f32.mxu1 %v13268_v54  ;;  %v13941_v47 = vpop.f32.mrb[86].mxu0  ;;  %v4365_v54 = vld [vmem:[%s17492_s3 + $0x20] sm:$0xff] }
 0x3b3   : > { %v2857_v33 = vpop.f32.mrb[87].mxu0 }
 0x3b5   : > { %3474 = vmatmul.mubr.f32.vlgmr.msra.gmra.mrb[32].mxu1 %v11401_v43  ;;  %v4371_v43 = vld [vmem:[%s17492_s3 + $0x50] sm:$0xff] }
 0x3b6   : > { %3478 = vmatprep.mubr.f32.mxu1 %v13272_v6  ;;  %10576 = vmatpush1.bf16.msra.mxu1 %v10575_v27  ;;  %v13950_v39 = vpop.f32.mrb[88].mxu0  ;;  %v10581_v6 = vpack.c.bf16 %v4366_v7, %v4365_v54  ;;  %v4370_v27 = vld [vmem:[%s17492_s3 + $0x48] sm:$0xff]  ;;  %v4457_v7 = vld [vmem:[%s17492_s3 + $0x300] sm:$0xff] }
 0x3b7   : > { %10577 = vmatprep.subr.bf16.mxu1 %v17704_v0  ;;  %v2862_v1 = vpop.f32.mrb[89].mxu0 }
 0x3b8   : > { %v4459_v1 = vld [vmem:[%s17492_s3 + $0x310] sm:$0xff] }
 0x3b9   : > { %3479 = vmatmul.mubr.f32.gmra.mrb[34].mxu1 %v11402_v37  ;;  %v11405_v37 = vld [vmem:[#allocation2 + $0x60] sm:$0xff] }
 0x3ba   : > { %3483 = vmatprep.mubr.f32.mxu1 %v13304_v12  ;;  %10579 = vmatpush1.bf16.msra.mxu1 %v10578_v34  ;;  %v13960_v17 = vpop.f32.mrb[90].mxu0  ;;  %v10584_v12 = vpack.c.bf16 %v4368_v38, %v4367_v51  ;;  %v4372_v34 = vld [vmem:[%s17492_s3 + $0x58] sm:$0xff] }
 0x3bb   : > { %10580 = vmatprep.subr.bf16.mxu1 %v17704_v0  ;;  %v2867_v20 = vpop.f32.mrb[91].mxu0  ;;  %v4460_v51 = vld [vmem:[%s17492_s3 + $0x318] sm:$0xff]  ;;  %v10590_v38 = vpack.c.bf16 %v4372_v34, %v4371_v43  ;;  %v4375_v34 = vld [vmem:[%s17492_s3 + $0x70] sm:$0xff] }
 0x3bd   : > { %3484 = vmatmul.mubr.f32.gmra.mrb[36].mxu1 %v11403_v21  ;;  %v4373_v21 = vld [vmem:[%s17492_s3 + $0x60] sm:$0xff] }
 0x3be   : > { %3488 = vmatprep.mubr.f32.mxu1 %v13308_v44  ;;  %10582 = vmatpush1.bf16.msra.mxu1 %v10581_v6  ;;  %v13970_v3 = vpop.f32.mrb[92].mxu0  ;;  %v10587_v44 = vpack.c.bf16 %v4370_v27, %v4369_v59  ;;  %v14014_v59 = vpack.c.bf16 %v4460_v51, %v4459_v1  ;;  %v4464_v1 = vld [vmem:[%s17492_s3 + $0x338] sm:$0xff] }
 0x3bf   : > { %10583 = vmatprep.subr.bf16.mxu1 %v17704_v0  ;;  %v2872_v23 = vpop.f32.mrb[93].mxu0 }
 0x3c0   : > { %17750 = vst [vmem:[#allocation16_spill] sm:$0xff] %v14014_v59  ;;  %v4462_v23 = vld [vmem:[%s17492_s3 + $0x328] sm:$0xff] }
 0x3c1   : > { %3489 = vmatmul.mubr.f32.gmra.mrb[38].mxu1 %v11404_v63  ;;  %v11406_v63 = vld [vmem:[#allocation2 + $0x68] sm:$0xff] }
 0x3c2   : > { %3493 = vmatprep.mubr.f32.mxu1 %v13340_v58  ;;  %10585 = vmatpush1.bf16.msra.mxu1 %v10584_v12  ;;  %v13980_v33 = vpop.f32.mrb[94].mxu0  ;;  %v4458_v58 = vld [vmem:[%s17492_s3 + $0x308] sm:$0xff] }
 0x3c3   : > { %10586 = vmatprep.subr.bf16.mxu1 %v17704_v0  ;;  %v2877_v54 = vpop.f32.mrb[95].mxu0  ;;  %v13998_v6 = vpack.c.bf16 %v4458_v58, %v4457_v7  ;;  %v4374_v12 = vld [vmem:[%s17492_s3 + $0x68] sm:$0xff] }
 0x3c4   : > { %v4376_v54 = vld [vmem:[%s17492_s3 + $0x78] sm:$0xff] }
 0x3c5   : > { %3494 = vmatmul.mubr.f32.gmra.mrb[40].mxu1 %v11405_v37  ;;  %17749 = vst [vmem:[#allocation15_spill] sm:$0xff] %v13998_v6  ;;  %10720 = vmatpush1.bf16.msra.mxu0 %v13998_v6  ;;  %v11407_v37 = vld [vmem:[#allocation2 + $0x78] sm:$0xff]  ;;  %v10596_v51 = vpack.c.bf16 %v4376_v54, %v4375_v34  ;;  %v4379_v54 = vld [vmem:[%s17492_s3 + $0x90] sm:$0xff] }
 0x3c6   : > { %3498 = vmatprep.mubr.f32.mxu1 %v13344_v32  ;;  %10588 = vmatpush1.bf16.msra.mxu1 %v10587_v44  ;;  %v14004_v20 = vpop.f32.mrb[96].mxu0  ;;  %v4461_v32 = vld [vmem:[%s17492_s3 + $0x320] sm:$0xff]  ;;  %v10593_v44 = vpack.c.bf16 %v4374_v12, %v4373_v21  ;;  %v4378_v12 = vld [vmem:[%s17492_s3 + $0x88] sm:$0xff]  ;;  %v4396_v6 = vld [vmem:[%s17492_s3 + $0x118] sm:$0xff] }
 0x3c7   : > { %10589 = vmatprep.subr.bf16.mxu1 %v17704_v0  ;;  %v2882_v27 = vpop.f32.mrb[97].mxu0  ;;  %10721 = vmatprep.subr.bf16.mxu0 %v17704_v0  ;;  %v14034_v7 = vpack.c.bf16 %v4462_v23, %v4461_v32  ;;  %v4377_v21 = vld [vmem:[%s17492_s3 + $0x80] sm:$0xff]  ;;  %v4466_v23 = vld [vmem:[%s17492_s3 + $0x348] sm:$0xff] }
 0x3c9   : > { %3499 = vmatmul.mubr.f32.gmra.mrb[42].mxu1 %v11406_v63  ;;  %10723 = vmatpush1.bf16.msra.mxu0 %v14014_v59  ;;  %17751 = vst [vmem:[#allocation17_spill] sm:$0xff] %v14034_v7  ;;  %v11408_v63 = vld [vmem:[#allocation2 + $0x80] sm:$0xff]  ;;  %v4395_v59 = vld [vmem:[%s17492_s3 + $0x110] sm:$0xff] }
 0x3ca   : > { %3503 = vmatprep.mubr.f32.mxu1 %v13376_v53  ;;  %10591 = vmatpush1.bf16.msra.mxu1 %v10590_v38  ;;  %v14024_v43 = vpop.f32.mrb[98].mxu0  ;;  %v4463_v53 = vld [vmem:[%s17492_s3 + $0x330] sm:$0xff] }
 0x3cb   : > { %10592 = vmatprep.subr.bf16.mxu1 %v17704_v0  ;;  %v2887_v58 = vpop.f32.mrb[99].mxu0  ;;  %10724 = vmatprep.subr.bf16.mxu0 %v17704_v0  ;;  %v14054_v27 = vpack.c.bf16 %v4464_v1, %v4463_v53 }
 0x3cc   : > { %v4380_v58 = vld [vmem:[%s17492_s3 + $0x98] sm:$0xff] }
 0x3cd   : > { %3504 = vmatmul.mubr.f32.gmra.mrb[44].mxu1 %v11407_v37  ;;  %10726 = vmatpush1.bf16.msra.mxu0 %v14034_v7  ;;  %17752 = vst [vmem:[#allocation18_spill] sm:$0xff] %v14054_v27  ;;  %v4468_v37 = vld [vmem:[%s17492_s3 + $0x358] sm:$0xff] }
 0x3ce   : > { %3508 = vmatprep.mubr.f32.mxu1 %v13380_v36  ;;  %10594 = vmatpush1.bf16.msra.mxu1 %v10593_v44  ;;  %v14044_v38 = vpop.f32.mrb[100].mxu0  ;;  %v4465_v36 = vld [vmem:[%s17492_s3 + $0x340] sm:$0xff]  ;;  %v10599_v44 = vpack.c.bf16 %v4378_v12, %v4377_v21  ;;  %v10602_v21 = vpack.c.bf16 %v4380_v58, %v4379_v54  ;;  %v11410_v54 = vld [vmem:[#allocation2 + $0x98] sm:$0xff] }
 0x3cf   : > { %10595 = vmatprep.subr.bf16.mxu1 %v17704_v0  ;;  %v2892_v32 = vpop.f32.mrb[101].mxu0  ;;  %10727 = vmatprep.subr.bf16.mxu0 %v17704_v0  ;;  %v14074_v53 = vpack.c.bf16 %v4466_v23, %v4465_v36  ;;  %v4382_v36 = vld [vmem:[%s17492_s3 + $0xa8] sm:$0xff] }
 0x3d0   : > { %v4381_v32 = vld [vmem:[%s17492_s3 + $0xa0] sm:$0xff] }
 0x3d1   : > { %3509 = vmatmul.mubr.f32.gmra.mrb[46].mxu1 %v11408_v63  ;;  %10729 = vmatpush1.bf16.msra.mxu0 %v14054_v27  ;;  %17753 = vst [vmem:[#allocation19_spill] sm:$0xff] %v14074_v53  ;;  %v10605_v58 = vpack.c.bf16 %v4382_v36, %v4381_v32  ;;  %v4385_v36 = vld [vmem:[%s17492_s3 + $0xc0] sm:$0xff] }
 0x3d2   : > { %3513 = vmatprep.mubr.f32.mxu1 %v13412_v13  ;;  %10597 = vmatpush1.bf16.msra.mxu1 %v10596_v51  ;;  %v14064_v34 = vpop.f32.mrb[102].mxu0  ;;  %v4467_v13 = vld [vmem:[%s17492_s3 + $0x350] sm:$0xff] }
 0x3d3   : > { %10598 = vmatprep.subr.bf16.mxu1 %v17704_v0  ;;  %v2897_v1 = vpop.f32.mrb[103].mxu0  ;;  %10730 = vmatprep.subr.bf16.mxu0 %v17704_v0  ;;  %v11409_v51 = vld [vmem:[#allocation2 + $0x90] sm:$0xff]  ;;  %v14094_v23 = vpack.c.bf16 %v4468_v37, %v4467_v13  ;;  %v4384_v37 = vld [vmem:[%s17492_s3 + $0xb8] sm:$0xff] }
 0x3d4   : > { %v4383_v13 = vld [vmem:[%s17492_s3 + $0xb0] sm:$0xff] }
 0x3d5   : > { %3514 = vmatmul.mubr.f32.gmra.mrb[48].mxu1 %v11409_v51  ;;  %10732 = vmatpush1.bf16.msra.mxu0 %v14074_v53  ;;  %17754 = vst [vmem:[#allocation20_spill] sm:$0xff] %v14094_v23 }
 0x3d6   : > { %3518 = vmatprep.mubr.f32.mxu1 %v13416_v9  ;;  %10600 = vmatpush1.bf16.msra.mxu1 %v10599_v44  ;;  %v14084_v12 = vpop.f32.mrb[104].mxu0  ;;  %v4469_v9 = vld [vmem:[%s17492_s3 + $0x360] sm:$0xff]  ;;  %v4470_v44 = vld [vmem:[%s17492_s3 + $0x368] sm:$0xff] }
 0x3d7   : > { %10601 = vmatprep.subr.bf16.mxu1 %v17704_v0  ;;  %v2902_v63 = vpop.f32.mrb[105].mxu0  ;;  %10733 = vmatprep.subr.bf16.mxu0 %v17704_v0  ;;  %v14114_v51 = vpack.c.bf16 %v4470_v44, %v4469_v9  ;;  %v4386_v9 = vld [vmem:[%s17492_s3 + $0xc8] sm:$0xff] }
 0x3d9   : > { %3519 = vmatmul.mubr.f32.gmra.mrb[50].mxu1 %v11410_v54  ;;  %10735 = vmatpush1.bf16.msra.mxu0 %v14094_v23  ;;  %17755 = vst [vmem:[#allocation21_spill] sm:$0xff] %v14114_v51  ;;  %v10611_v54 = vpack.c.bf16 %v4386_v9, %v4385_v36  ;;  %v11414_v9 = vld [vmem:[#allocation2 + $0xc8] sm:$0xff] }
 0x3da   : > { %3523 = vmatprep.mubr.f32.mxu1 %v13448_v26  ;;  %10603 = vmatpush1.bf16.msra.mxu1 %v10602_v21  ;;  %v14104_v1 = vpop.f32.mrb[106].mxu0  ;;  %v11411_v26 = vld [vmem:[#allocation2 + $0xa8] sm:$0xff]  ;;  %v10608_v21 = vpack.c.bf16 %v4384_v37, %v4383_v13  ;;  %v4387_v13 = vld [vmem:[%s17492_s3 + $0xd0] sm:$0xff]  ;;  %v4388_v37 = vld [vmem:[%s17492_s3 + $0xd8] sm:$0xff] }
 0x3db   : > { %10604 = vmatprep.subr.bf16.mxu1 %v17704_v0  ;;  %v2907_v63 = vpop.f32.mrb[107].mxu0  ;;  %10736 = vmatprep.subr.bf16.mxu0 %v17704_v0 }
 0x3dd   : > { %3524 = vmatmul.mubr.f32.gmra.mrb[52].mxu1 %v11411_v26  ;;  %10738 = vmatpush1.bf16.msra.mxu0 %v14114_v51  ;;  %v11413_v26 = vld [vmem:[#allocation2 + $0xc0] sm:$0xff] }
 0x3de   : > { %3528 = vmatprep.mubr.f32.mxu1 %v13452_v46  ;;  %10606 = vmatpush1.bf16.msra.mxu1 %v10605_v58  ;;  %v14118_v32 = vpop.f32.mrb[108].mxu0  ;;  %v11412_v46 = vld [vmem:[#allocation2 + $0xb0] sm:$0xff] }
 0x3df   : > { %10607 = vmatprep.subr.bf16.mxu1 %v17704_v0  ;;  %v2912_v44 = vpop.f32.mrb[109].mxu0  ;;  %10739 = vmatprep.subr.bf16.mxu0 %v17704_v0 }
 0x3e1   : > { %3529 = vmatmul.mubr.f32.gmra.mrb[54].mxu1 %v11412_v46 }
 0x3e2   : > { %3533 = vmatprep.mubr.f32.mxu1 %v13478_v16  ;;  %10609 = vmatpush1.bf16.msra.mxu1 %v10608_v21  ;;  %v14130_v58 = vpop.f32.mrb[110].mxu0  ;;  %v10614_v16 = vpack.c.bf16 %v4388_v37, %v4387_v13  ;;  %v11416_v13 = vld [vmem:[#allocation2 + $0xe0] sm:$0xff] }
 0x3e3   : > { %10610 = vmatprep.subr.bf16.mxu1 %v17704_v0  ;;  %v2917_v63 = vpop.f32.mrb[111].mxu0 }
 0x3e4   : > { %v11415_v63 = vld [vmem:[#allocation2 + $0xd8] sm:$0xff] }
 0x3e5   : > { %3534 = vmatmul.mubr.f32.gmra.mrb[56].mxu1 %v11413_v26  ;;  %v11417_v26 = vld [vmem:[#allocation2 + $0xf0] sm:$0xff] }
 0x3e6   : > { %3538 = vmatprep.mubr.f32.mxu1 %v13482_v10  ;;  %10612 = vmatpush1.bf16.msra.mxu1 %v10611_v54  ;;  %v14140_v21 = vpop.f32.mrb[112].mxu0 }
 0x3e7   : > { %10613 = vmatprep.subr.bf16.mxu1 %v17704_v0  ;;  %v2922_v36 = vpop.f32.mrb[113].mxu0 }
 0x3e9   : > { %3539 = vmatmul.mubr.f32.gmra.mrb[58].mxu1 %v11414_v9  ;;  %v11418_v9 = vld [vmem:[#allocation2 + $0xf8] sm:$0xff] }
 0x3ea   : > { %3543 = vmatprep.mubr.f32.mxu1 %v17741_v42  ;;  %10615 = vmatpush1.bf16.msra.mxu1 %v10614_v16  ;;  %v14144_v44 = vpop.f32.mrb[114].mxu0 }
 0x3eb   : > { %17756 = vst [vmem:[#allocation22_spill] sm:$0xff] %v14144_v44  ;;  %10616 = vmatprep.subr.bf16.mxu1 %v17704_v0  ;;  %v2927_v46 = vpop.f32.mrb[115].mxu0 }
 0x3ed   : > { %3544 = vmatmul.mubr.f32.gmra.mrb[60].mxu1 %v11415_v63  ;;  %v11419_v63 = vld [vmem:[#allocation2 + $0x108] sm:$0xff] }
 0x3ee   : > { %3548 = vmatprep.mubr.f32.mxu1 %v17742_v4  ;;  %v14148_v10 = vpop.f32.mrb[116].mxu0 }
 0x3ef   : > { %17757 = vst [vmem:[#allocation23_spill] sm:$0xff] %v14148_v10  ;;  %v2932_v54 = vpop.f32.mrb[117].mxu0 }
 0x3f1   : > { %3549 = vmatmul.mubr.f32.gmra.mrb[62].mxu1 %v11416_v13  ;;  %v11420_v13 = vld [vmem:[#allocation2 + $0x110] sm:$0xff] }
 0x3f2   : > { %3553 = vmatprep.mubr.f32.mxu1 %v17743_v2  ;;  %v14151_v37 = vpop.f32.mrb[118].mxu0 }
 0x3f3   : > { %17758 = vst [vmem:[#allocation24_spill] sm:$0xff] %v14151_v37  ;;  %v2937_v42 = vpop.f32.mrb[119].mxu0  ;;  %v17782_v37 = vld [vmem:[#allocation13_spill] sm:$0xff] }
 0x3f5   : > { %3554 = vmatmul.mubr.f32.gmra.mrb[64].mxu1 %v11417_v26  ;;  %v11421_v26 = vld [vmem:[#allocation2 + $0x120] sm:$0xff] }
 0x3f6   : > { %3558 = vmatprep.mubr.f32.mxu1 %v17744_v31  ;;  %v14154_v16 = vpop.f32.mrb[120].mxu0 }
 0x3f7   : > { %17759 = vst [vmem:[#allocation25_spill] sm:$0xff] %v14154_v16  ;;  %v2942_v36 = vpop.f32.mrb[121].mxu0 }
 0x3f9   : > { %3559 = vmatmul.mubr.f32.gmra.mrb[66].mxu1 %v11418_v9 }
 0x3fa   : > { %3563 = vmatprep.mubr.f32.mxu1 %v17745_v15  ;;  %v14157_v4 = vpop.f32.mrb[122].mxu0  ;;  %v4471_v15 = vld [vmem:[%s17492_s3 + $0x370] sm:$0xff] }
 0x3fb   : > { %17760 = vst [vmem:[#allocation3_spill] sm:$0xff] %v14157_v4  ;;  %v2947_v46 = vpop.f32.mrb[123].mxu0  ;;  %v4403_v4 = vld [vmem:[%s17492_s3 + $0x150] sm:$0xff] }
 0x3fc   : > { %v11422_v46 = vld [vmem:[#allocation2 + $0x128] sm:$0xff] }
 0x3fd   : > { %3564 = vmatmul.mubr.f32.gmra.mrb[68].mxu1 %v11419_v63  ;;  %v4474_v63 = vld [vmem:[%s17492_s3 + $0x388] sm:$0xff] }
 0x3fe   : > { %3568 = vmatprep.mubr.f32.mxu1 %v17746_v8  ;;  %v14160_v2 = vpop.f32.mrb[124].mxu0  ;;  %v4472_v8 = vld [vmem:[%s17492_s3 + $0x378] sm:$0xff] }
 0x3ff   : > { %17761 = vst [vmem:[#allocation4_spill] sm:$0xff] %v14160_v2  ;;  %v2952_v54 = vpop.f32.mrb[125].mxu0  ;;  %v14174_v9 = vpack.c.bf16 %v4472_v8, %v4471_v15  ;;  %v4476_v15 = vld [vmem:[%s17492_s3 + $0x398] sm:$0xff]  ;;  %v4399_v2 = vld [vmem:[%s17492_s3 + $0x130] sm:$0xff] }
 0x401   : > { %3569 = vmatmul.mubr.f32.gmra.mrb[70].mxu1 %v11420_v13  ;;  %17763 = vst [vmem:[#allocation6_spill] sm:$0xff] %v14174_v9  ;;  %10741 = vmatpush1.bf16.msra.mxu0 %v14174_v9  ;;  %v4391_v9 = vld [vmem:[%s17492_s3 + $0xf0] sm:$0xff] }
 0x402   : > { %3573 = vmatprep.mubr.f32.mxu1 %v17747_v30  ;;  %v14163_v31 = vpop.f32.mrb[126].mxu0  ;;  %10742 = vmatprep.subr.bf16.mxu0 %v17704_v0 }
 0x403   : > { %17762 = vst [vmem:[#allocation5_spill] sm:$0xff] %v14163_v31  ;;  %v2957_v42 = vpop.f32.mrb[127].mxu0 }
 0x405   : > { %3574 = vmatmul.mubr.f32.gmra.mrb[72].mxu1 %v11421_v26  ;;  %v11423_v26 = vld [vmem:[#allocation2 + $0x138] sm:$0xff] }
 0x406   : > { %3578 = vmatprep.mubr.f32.mxu1 %v17748_v24  ;;  %v14172_v36 = vpop.f32.mrb[128].mxu0  ;;  %v4473_v24 = vld [vmem:[%s17492_s3 + $0x380] sm:$0xff] }
 0x407   : > { %v14176_v30 = vpop.f32.mrb[129].mxu0  ;;  %v14189_v13 = vpack.c.bf16 %v4474_v63, %v4473_v24  ;;  %v11424_v63 = vld [vmem:[#allocation2 + $0x140] sm:$0xff] }
 0x409   : > { %3579 = vmatmul.mubr.f32.gmra.mrb[74].mxu1 %v11422_v46  ;;  %17764 = vst [vmem:[#allocation7_spill] sm:$0xff] %v14189_v13  ;;  %10744 = vmatpush1.bf16.msra.mxu0 %v14189_v13 }
 0x40a   : > { %3583 = vmatprep.mubr.f32.mxu1 %v13599_v60  ;;  %v14187_v54 = vpop.f32.mrb[130].mxu0  ;;  %10745 = vmatprep.subr.bf16.mxu0 %v17704_v0  ;;  %v4475_v60 = vld [vmem:[%s17492_s3 + $0x390] sm:$0xff] }
 0x40b   : > { %v14191_v42 = vpop.f32.mrb[131].mxu0  ;;  %v14204_v46 = vpack.c.bf16 %v4476_v15, %v4475_v60  ;;  %v4477_v60 = vld [vmem:[%s17492_s3 + $0x3a0] sm:$0xff] }
 0x40d   : > { %3584 = vmatmul.mubr.f32.gmra.mrb[76].mxu1 %v11423_v26  ;;  %17765 = vst [vmem:[#allocation8_spill] sm:$0xff] %v14204_v46  ;;  %10747 = vmatpush1.bf16.msra.mxu0 %v14204_v46  ;;  %v4390_v26 = vld [vmem:[%s17492_s3 + $0xe8] sm:$0xff] }
 0x40e   : > { %3588 = vmatprep.mubr.f32.mxu1 %v13605_v56  ;;  %v14202_v8 = vpop.f32.mrb[132].mxu0  ;;  %v4389_v56 = vld [vmem:[%s17492_s3 + $0xe0] sm:$0xff]  ;;  %10748 = vmatprep.subr.bf16.mxu0 %v17704_v0 }
 0x40f   : > { %v14206_v24 = vpop.f32.mrb[133].mxu0 }
 0x411   : > { %3589 = vmatmul.mubr.f32.gmra.mrb[78].mxu1 %v11424_v63  ;;  %v10617_v63 = vpack.c.bf16 %v4390_v26, %v4389_v56  ;;  %v4392_v56 = vld [vmem:[%s17492_s3 + $0xf8] sm:$0xff]  ;;  %v4479_v26 = vld [vmem:[%s17492_s3 + $0x3b0] sm:$0xff] }
 0x412   : > { %3593 = vmatprep.mubr.f32.mxu1 %v13630_v22  ;;  %v14220_v15 = vpop.f32.mrb[134].mxu0  ;;  %v4478_v22 = vld [vmem:[%s17492_s3 + $0x3a8] sm:$0xff] }
 0x413   : > { %v14225_v46 = vpop.f32.mrb[135].mxu0  ;;  %v14227_v13 = vpack.c.bf16 %v4478_v22, %v4477_v60  ;;  %10618 = vmatpush1.bf16.msra.mxu1 %v10617_v63  ;;  %v17768_v22 = vld [vmem:[#allocation11_spill] sm:$0xff] }
 0x414   : > { %10619 = vmatprep.subr.bf16.mxu1 %v17704_v0 }
 0x415   : > { %17766 = vst [vmem:[#allocation9_spill] sm:$0xff] %v14227_v13  ;;  %3594 = vmatmul.mubr.f32.gmra.mrb[80].mxu1 %v13602_v49  ;;  %v10620_v49 = vpack.c.bf16 %v4392_v56, %v4391_v9  ;;  %10750 = vmatpush1.bf16.msra.mxu0 %v14227_v13  ;;  %v4481_v9 = vld [vmem:[%s17492_s3 + $0x3c0] sm:$0xff]  ;;  %v4482_v56 = vld [vmem:[%s17492_s3 + $0x3c8] sm:$0xff] }
 0x416   : > { %3598 = vmatprep.mubr.f32.mxu1 %v13642_v25  ;;  %v14240_v51 = vpop.f32.mrb[136].mxu0  ;;  %v4480_v25 = vld [vmem:[%s17492_s3 + $0x3b8] sm:$0xff]  ;;  %10751 = vmatprep.subr.bf16.mxu0 %v17704_v0 }
 0x417   : > { %v14247_v60 = vpop.f32.mrb[137].mxu0  ;;  %v14250_v63 = vpack.c.bf16 %v4480_v25, %v4479_v26  ;;  %10621 = vmatpush1.bf16.msra.mxu1 %v10620_v49  ;;  %v14264_v26 = vpack.c.bf16 %v4482_v56, %v4481_v9  ;;  %v4483_v49 = vld [vmem:[%s17492_s3 + $0x3d0] sm:$0xff] }
 0x418   : > { %10622 = vmatprep.subr.bf16.mxu1 %v17704_v0 }
 0x419   : > { %17767 = vst [vmem:[#allocation10_spill] sm:$0xff] %v14250_v63  ;;  %3599 = vmatmul.mubr.f32.gmra.mrb[82].mxu1 %v17768_v22  ;;  %10753 = vmatpush1.bf16.msra.mxu0 %v14250_v63  ;;  %17769 = vst [vmem:[#allocation11_spill] sm:$0xff] %v14264_v26  ;;  %v4484_v22 = vld [vmem:[%s17492_s3 + $0x3d8] sm:$0xff] }
 0x41a   : > { %3603 = vmatprep.mubr.f32.mxu1 %v13663_v61  ;;  %v14260_v13 = vpop.f32.mrb[138].mxu0  ;;  %10754 = vmatprep.subr.bf16.mxu0 %v17704_v0  ;;  %v17770_v61 = vld [vmem:[#allocation12_spill] sm:$0xff]  ;;  %v14280_v9 = vpack.c.bf16 %v4484_v22, %v4483_v49  ;;  %v2576_v49 = vrot.slane %v13915_v55, 1 }
 0x41b   : > { %v14266_v25 = vpop.f32.mrb[139].mxu0 }
 0x41c   : > { %17771 = vst [vmem:[#allocation12_spill] sm:$0xff] %v14280_v9 }
 0x41d   : > { %3604 = vmatmul.mubr.f32.gmra.mrb[84].mxu1 %v17770_v61  ;;  %10756 = vmatpush1.bf16.msra.mxu0 %v14264_v26  ;;  %v4486_v61 = vld [vmem:[%s17492_s3 + $0x3e8] sm:$0xff] }
 0x41e   : > { %3608 = vmatprep.mubr.f32.mxu1 %v13672_v52  ;;  %v14277_v63 = vpop.f32.mrb[140].mxu0  ;;  %10757 = vmatprep.subr.bf16.mxu0 %v17704_v0  ;;  %v4485_v52 = vld [vmem:[%s17492_s3 + $0x3e0] sm:$0xff] }
 0x41f   : > { %v14282_v56 = vpop.f32.mrb[141].mxu0  ;;  %v14297_v22 = vpack.c.bf16 %v4486_v61, %v4485_v52  ;;  %v2579_v52 = vrot.slane %v13918_v14, 1  ;;  %v4001_v14 = vld [vmem:[#allocation2 + $0x10] sm:$0x3] }
 0x421   : > { %3609 = vmatmul.mubr.f32.gmra.mrb[86].mxu1 %v13649_v62  ;;  %10759 = vmatpush1.bf16.msra.mxu0 %v14280_v9  ;;  %17772 = vst [vmem:[#allocation26_spill] sm:$0xff] %v14297_v22  ;;  %v4487_v62 = vld [vmem:[%s17492_s3 + $0x3f0] sm:$0xff] }
 0x422   : > { %3613 = vmatprep.mubr.f32.mxu1 %v13921_v35  ;;  %v14293_v23 = vpop.f32.mrb[142].mxu0  ;;  %10760 = vmatprep.subr.bf16.mxu0 %v17704_v0  ;;  %v4488_v35 = vld [vmem:[%s17492_s3 + $0x3f8] sm:$0xff] }
 0x423   : > { %v14299_v26 = vpop.f32.mrb[143].mxu0  ;;  %v14314_v61 = vpack.c.bf16 %v4488_v35, %v4487_v62  ;;  %v4393_v35 = vld [vmem:[%s17492_s3 + $0x100] sm:$0xff] }
 0x425   : > { %3614 = vmatmul.mubr.f32.gmra.mrb[88].mxu1 %v13667_v5  ;;  %10762 = vmatpush1.bf16.msra.mxu0 %v14297_v22  ;;  %17773 = vst [vmem:[#allocation27_spill] sm:$0xff] %v14314_v61  ;;  %v4106_v22 = vrot.slane %v4001_v14, 1  ;;  %v10626_v14 = vpack.c.bf16 %v4396_v6, %v4395_v59 }
 0x426   : > { %3618 = vmatprep.mubr.f32.mxu1 %v13937_v41  ;;  %v14310_v53 = vpop.f32.mrb[144].mxu0  ;;  %10763 = vmatprep.subr.bf16.mxu0 %v17704_v0  ;;  %v2580_v41 = vsel %vm558_vm0, %v2576_v49, %v2579_v52 }
 0x427   : > { %v14316_v9 = vpop.f32.mrb[145].mxu0 }
 0x429   : > { %3619 = vmatmul.mubr.f32.gmra.mrb[90].mxu1 %v13679_v19  ;;  %10765 = vmatpush1.bf16.msra.mxu0 %v14314_v61  ;;  %v4394_v19 = vld [vmem:[%s17492_s3 + $0x108] sm:$0xff] }
 0x42a   : > { %3623 = vmatprep.mubr.f32.mxu1 %v2576_v49  ;;  %v14320_v5 = vpop.f32.mrb[146].mxu0  ;;  %v10623_v61 = vpack.c.bf16 %v4394_v19, %v4393_v35 }
 0x42b   : > { %v14324_v27 = vpop.f32.mrb[147].mxu0 }
 0x42d   : > { %3624 = vmatmul.mubr.f32.gmra.mrb[92].mxu1 %v13915_v55 }
 0x42e   : > { %3628 = vmatprep.mubr.f32.mxu1 %v2580_v41  ;;  %v14327_v62 = vpop.f32.mrb[148].mxu0  ;;  %v4107_v41 = vsel %vm558_vm0, %v2576_v49, %v4106_v22  ;;  %v4398_v22 = vld [vmem:[%s17492_s3 + $0x128] sm:$0xff] }
 0x42f   : > { %v14335_v52 = vpop.f32.mrb[149].mxu0 }
 0x431   : > { %3629 = vmatmul.mubr.f32.gmra.mrb[94].mxu1 %v13915_v55 }
 0x432   : > { %4569 = vmatprep.mubr.f32.mxu1 %v2576_v49  ;;  %v14338_v7 = vpop.f32.mrb[150].mxu0  ;;  %v4397_v49 = vld [vmem:[%s17492_s3 + $0x120] sm:$0xff] }
 0x433   : > { %v14347_v31 = vpop.f32.mrb[151].mxu0 }
 0x435   : > { %4570 = vmatmul.mubr.f32.vlgmr.msra.gmra.mrb[96].mxu1 %v13915_v55 }
 0x436   : > { %10624 = vmatpush1.bf16.msra.mxu1 %v10623_v61  ;;  %4574 = vmatprep.mubr.f32.mxu1 %v4107_v41  ;;  %v14350_v35 = vpop.f32.mrb[152].mxu0  ;;  %v10629_v61 = vpack.c.bf16 %v4398_v22, %v4397_v49  ;;  %v4401_v22 = vld [vmem:[%s17492_s3 + $0x140] sm:$0xff] }
 0x437   : > { %17774 = vst [vmem:[#allocation28_spill] sm:$0xff] %v14350_v35  ;;  %10625 = vmatprep.subr.bf16.mxu1 %v17704_v0  ;;  %v14359_v19 = vpop.f32.mrb[153].mxu0 }
 0x438   : > { %17775 = vst [vmem:[#allocation29_spill] sm:$0xff] %v14359_v19 }
 0x439   : > { %4575 = vmatmul.mubr.f32.gmra.mrb[98].mxu1 %v13915_v55  ;;  %v4400_v55 = vld [vmem:[%s17492_s3 + $0x138] sm:$0xff] }
 0x43a   : > { %10627 = vmatpush1.bf16.msra.mxu1 %v10626_v14  ;;  %v14362_v41 = vpop.f32.mrb[154].mxu0  ;;  %v10632_v49 = vpack.c.bf16 %v4400_v55, %v4399_v2  ;;  %v4404_v2 = vld [vmem:[%s17492_s3 + $0x158] sm:$0xff] }
 0x43b   : > { %17776 = vst [vmem:[#allocation30_spill] sm:$0xff] %v14362_v41  ;;  %10628 = vmatprep.subr.bf16.mxu1 %v17704_v0  ;;  %v14365_v6 = vpop.f32.mrb[155].mxu0  ;;  %v10638_v55 = vpack.c.bf16 %v4404_v2, %v4403_v4  ;;  %v4490_v4 = vld [vmem:[%s17492_s3 + $0x408] sm:$0xff] }
 0x43c   : > { %17777 = vst [vmem:[#allocation31_spill] sm:$0xff] %v14365_v6 }
 0x43e   : > { %10630 = vmatpush1.bf16.msra.mxu1 %v10629_v61  ;;  %v14367_v59 = vpop.f32.mrb[156].mxu0  ;;  %v4402_v61 = vld [vmem:[%s17492_s3 + $0x148] sm:$0xff] }
 0x43f   : > { %17778 = vst [vmem:[#allocation32_spill] sm:$0xff] %v14367_v59  ;;  %10631 = vmatprep.subr.bf16.mxu1 %v17704_v0  ;;  %v14376_v14 = vpop.f32.mrb[157].mxu0  ;;  %v10635_v59 = vpack.c.bf16 %v4402_v61, %v4401_v22  ;;  %v4489_v61 = vld [vmem:[%s17492_s3 + $0x400] sm:$0xff] }
 0x440   : > { %17779 = vst [vmem:[#allocation33_spill] sm:$0xff] %v14376_v14  ;;  %v14405_v2 = vpack.c.bf16 %v4490_v4, %v4489_v61  ;;  %v4410_v61 = vld [vmem:[%s17492_s3 + $0x188] sm:$0xff]  ;;  %v4411_v14 = vld [vmem:[%s17492_s3 + $0x190] sm:$0xff] }
 0x442   : > { %10633 = vmatpush1.bf16.msra.mxu1 %v10632_v49  ;;  %v4405_v49 = vld [vmem:[%s17492_s3 + $0x160] sm:$0xff]  ;;  %10767 = vmatprep.subr.bf16.mxu0 %v14405_v2 }
 0x443   : > { %10634 = vmatprep.subr.bf16.mxu1 %v17704_v0 }
 0x446   : > { %10636 = vmatpush1.bf16.msra.mxu1 %v10635_v59  ;;  %v4406_v59 = vld [vmem:[%s17492_s3 + $0x168] sm:$0xff] }
 0x447   : > { %10637 = vmatprep.subr.bf16.mxu1 %v17704_v0  ;;  %v10641_v22 = vpack.c.bf16 %v4406_v59, %v4405_v49  ;;  %v4408_v49 = vld [vmem:[%s17492_s3 + $0x178] sm:$0xff] }
 0x44a   : > { %10639 = vmatpush1.bf16.msra.mxu1 %v10638_v55  ;;  %v4407_v55 = vld [vmem:[%s17492_s3 + $0x170] sm:$0xff] }
 0x44b   : > { %10640 = vmatprep.subr.bf16.mxu1 %v17704_v0  ;;  %v10644_v59 = vpack.c.bf16 %v4408_v49, %v4407_v55  ;;  %v4412_v55 = vld [vmem:[%s17492_s3 + $0x198] sm:$0xff] }
 0x44c   : > { %v10650_v49 = vpack.c.bf16 %v4412_v55, %v4411_v14  ;;  %v4416_v14 = vld [vmem:[%s17492_s3 + $0x1b8] sm:$0xff] }
 0x44e   : > { %10642 = vmatpush1.bf16.msra.mxu1 %v10641_v22  ;;  %v4409_v22 = vld [vmem:[%s17492_s3 + $0x180] sm:$0xff] }
 0x44f   : > { %10643 = vmatprep.subr.bf16.mxu1 %v17704_v0  ;;  %v10647_v4 = vpack.c.bf16 %v4410_v61, %v4409_v22  ;;  %v4414_v22 = vld [vmem:[%s17492_s3 + $0x1a8] sm:$0xff] }
 0x452   : > { %10645 = vmatpush1.bf16.msra.mxu1 %v10644_v59  ;;  %v4413_v59 = vld [vmem:[%s17492_s3 + $0x1a0] sm:$0xff] }
 0x453   : > { %10646 = vmatprep.subr.bf16.mxu1 %v17704_v0  ;;  %v10653_v61 = vpack.c.bf16 %v4414_v22, %v4413_v59  ;;  %v4417_v59 = vld [vmem:[%s17492_s3 + $0x1c0] sm:$0xff]  ;;  %v4418_v22 = vld [vmem:[%s17492_s3 + $0x1c8] sm:$0xff] }
 0x454   : > { %v10659_v41 = vpack.c.bf16 %v4418_v22, %v4417_v59 }
 0x456   : > { %10648 = vmatpush1.bf16.msra.mxu1 %v10647_v4  ;;  %v4415_v4 = vld [vmem:[%s17492_s3 + $0x1b0] sm:$0xff] }
 0x457   : > { %10649 = vmatprep.subr.bf16.mxu1 %v17704_v0  ;;  %v10656_v55 = vpack.c.bf16 %v4416_v14, %v4415_v4  ;;  %v14458_v14 = vld [vmem:[%s17495_s6] ss:$0 sm:$0xff] }
 0x45a   : > { %10651 = vmatpush1.bf16.msra.mxu1 %v10650_v49 }
 0x45b   : > { %10652 = vmatprep.subr.bf16.mxu1 %v17704_v0 }
 0x45e   : > { %10654 = vmatpush1.bf16.msra.mxu1 %v10653_v61 }
 0x45f   : > { %10655 = vmatprep.subr.bf16.mxu1 %v17704_v0 }
 0x462   : > { %10657 = vmatpush1.bf16.msra.mxu1 %v10656_v55 }
 0x463   : > { %10658 = vmatprep.subr.bf16.mxu1 %v17704_v0 }
 0x466   : > { %10660 = vmatpush1.bf16.msra.mxu1 %v10659_v41 }
 0x467   : > { %10661 = vmatprep.subr.bf16.mxu1 %v17704_v0 }
 0x47e   : > { %v14443_v49 = vpop.f32.mrb[158].mxu0 }
 0x47f   : > { %17780 = vst [vmem:[#allocation34_spill] sm:$0xff] %v14443_v49  ;;  %v14446_v16 = vpop.f32.mrb[159].mxu0  ;;  %v14465_v49 = vld [vmem:[%s17496_s7] ss:$0 sm:$0xff] }
 0x480   : > { %17781 = vst [vmem:[#allocation35_spill] sm:$0xff] %v14446_v16 }
 0x488   : > { %v3475_v61 = vpop.f32.mrb[32].mxu1 }
 0x489   : > { %v10830_v6 = vadd.f32 %v3475_v61, %v17782_v37  ;;  %v3477_v4 = vpop.f32.mrb[33].mxu1  ;;  %v17783_v37 = vld [vmem:[#allocation14_spill] sm:$0xff] }
 0x48a   : > { %v4419_v4 = vld [vmem:[%s17492_s3 + $0x1d0] sm:$0xff] }
 0x48b   : > { %v3701_v55 = vadd.f32 %v10830_v6, %v14176_v30  ;;  %v4420_v30 = vld [vmem:[%s17492_s3 + $0x1d8] sm:$0xff] }
 0x48c   : > { %v3480_v16 = vpop.f32.mrb[34].mxu1  ;;  %v10662_v10 = vpack.c.bf16 %v4420_v30, %v4419_v4  ;;  %v4423_v30 = vld [vmem:[%s17492_s3 + $0x1f0] sm:$0xff] }
 0x48d   : > { %v3865_v59 = vmul.f32 %v14458_v14, %v3701_v55  ;;  %v10831_v22 = vadd.f32 %v3480_v16, %v17783_v37  ;;  %v3482_v61 = vpop.f32.mrb[35].mxu1  ;;  %v4421_v55 = vld [vmem:[%s17492_s3 + $0x1e0] sm:$0xff]  ;;  %v4422_v16 = vld [vmem:[%s17492_s3 + $0x1e8] sm:$0xff] }
 0x48e   : > { %10663 = vmatpush1.bf16.msra.mxu1 %v10662_v10 }
 0x48f   : > { %v3903_v41 = vadd.f32 %v14465_v49, %v3865_v59  ;;  %v3706_v6 = vadd.f32 %v10831_v22, %v14172_v36  ;;  %v10665_v59 = vpack.c.bf16 %v4422_v16, %v4421_v55  ;;  %10664 = vmatprep.subr.bf16.mxu1 %v17704_v0 }
 0x490   : > { %v3485_v37 = vpop.f32.mrb[36].mxu1 }
 0x491   : > { %v3935_v61 = vmax.f32 %v3903_v41, 0.0  ;;  %v3866_v35 = vmul.f32 %v14458_v14, %v3706_v6  ;;  %v10832_v44 = vadd.f32 %v3485_v37, %v13884_v57  ;;  %v3487_v19 = vpop.f32.mrb[37].mxu1  ;;  %v4424_v41 = vld [vmem:[%s17492_s3 + $0x1f8] sm:$0xff] }
 0x492   : > { %10666 = vmatpush1.bf16.msra.mxu1 %v10665_v59  ;;  %v10668_v55 = vpack.c.bf16 %v4424_v41, %v4423_v30 }
 0x493   : > { %3967 = vst [vmem:[#allocation2 + $0x19] sm:$0xff] %v3935_v61  ;;  %v3904_v36 = vadd.f32 %v14465_v49, %v3866_v35  ;;  %v3711_v22 = vadd.f32 %v10832_v44, %v14191_v42  ;;  %10667 = vmatprep.subr.bf16.mxu1 %v17704_v0 }
 0x494   : > { %v3490_v4 = vpop.f32.mrb[38].mxu1 }
 0x495   : > { %v3936_v57 = vmax.f32 %v3904_v36, 0.0  ;;  %v3867_v10 = vmul.f32 %v14458_v14, %v3711_v22  ;;  %v10833_v19 = vadd.f32 %v3490_v4, %v13888_v29  ;;  %v3492_v6 = vpop.f32.mrb[39].mxu1 }
 0x496   : > { %10669 = vmatpush1.bf16.msra.mxu1 %v10668_v55 }
 0x497   : > { %3968 = vst [vmem:[#allocation2 + $0x21] sm:$0xff] %v3936_v57  ;;  %v3905_v44 = vadd.f32 %v14465_v49, %v3867_v10  ;;  %v3716_v42 = vadd.f32 %v10833_v19, %v14187_v54  ;;  %10670 = vmatprep.subr.bf16.mxu1 %v17704_v0 }
 0x498   : > { %v3495_v35 = vpop.f32.mrb[40].mxu1 }
 0x499   : > { %v3937_v16 = vmax.f32 %v3905_v44, 0.0  ;;  %v3868_v37 = vmul.f32 %v14458_v14, %v3716_v42  ;;  %v10834_v61 = vadd.f32 %v3495_v35, %v13892_v18  ;;  %v3497_v36 = vpop.f32.mrb[41].mxu1 }
 0x49a   : > { %v4002_v22 = vld [vmem:[#allocation2 + $0x18] sm:$0xff] }
 0x49b   : > { %3969 = vst [vmem:[#allocation2 + $0x31] sm:$0xff] %v3937_v16  ;;  %v3906_v29 = vadd.f32 %v14465_v49, %v3868_v37  ;;  %v3721_v59 = vadd.f32 %v10834_v61, %v14206_v24  ;;  %v4108_v19 = vrot.slane %v4002_v22, 1 }
 0x49c   : > { %v3500_v4 = vpop.f32.mrb[42].mxu1 }
 0x49d   : > { %v3938_v30 = vmax.f32 %v3906_v29, 0.0  ;;  %v3869_v54 = vmul.f32 %v14458_v14, %v3721_v59  ;;  %v10835_v41 = vadd.f32 %v3500_v4, %v13896_v45  ;;  %v3502_v57 = vpop.f32.mrb[43].mxu1 }
 0x49e   : > { %v4003_v10 = vld [vmem:[#allocation2 + $0x20] sm:$0xff]  ;;  %v4004_v18 = vld [vmem:[#allocation2 + $0x28] sm:$0x3] }
 0x49f   : > { %3970 = vst [vmem:[#allocation2 + $0x39] sm:$0xff] %v3938_v30  ;;  %v3907_v6 = vadd.f32 %v14465_v49, %v3869_v54  ;;  %v3726_v55 = vadd.f32 %v10835_v41, %v14202_v8  ;;  %v4109_v44 = vrot.slane %v4003_v10, 1  ;;  %v4111_v42 = vrot.slane %v4004_v18, 1 }
 0x4a0   : > { %v3505_v35 = vpop.f32.mrb[44].mxu1 }
 0x4a1   : > { %v3939_v24 = vmax.f32 %v3907_v6, 0.0  ;;  %v3870_v16 = vmul.f32 %v14458_v14, %v3726_v55  ;;  %v10836_v37 = vadd.f32 %v3505_v35, %v13900_v11  ;;  %v3507_v61 = vpop.f32.mrb[45].mxu1  ;;  %v14511_v45 = vsel %vm558_vm0, %v4108_v19, %v4109_v44 }
 0x4a2   : > { %17784 = vst [vmem:[#allocation13_spill] sm:$0xff] %v14511_v45  ;;  %4579 = vmatprep.mubr.f32.mxu1 %v14511_v45  ;;  %v14517_v8 = vsel %vm558_vm0, %v4109_v44, %v4111_v42  ;;  %v14519_v59 = vld [vmem:[#allocation2 + $0x30] sm:$0xff]  ;;  %v4492_v44 = vld [vmem:[%s17492_s3 + $0x418] sm:$0xff] }
 0x4a3   : > { %3971 = vst [vmem:[#allocation2 + $0x49] sm:$0xff] %v3939_v24  ;;  %v3908_v36 = vadd.f32 %v14465_v49, %v3870_v16  ;;  %v3731_v29 = vadd.f32 %v10836_v37, %v14225_v46  ;;  %4580 = vmatmul.mubr.f32.gmra.mrb[100].mxu1 %v4002_v22  ;;  %17785 = vst [vmem:[#allocation14_spill] sm:$0xff] %v14517_v8  ;;  %v4113_v19 = vrot.slane %v14519_v59, 1 }
 0x4a4   : > { %v3510_v4 = vpop.f32.mrb[46].mxu1  ;;  %4584 = vmatprep.mubr.f32.mxu1 %v14517_v8  ;;  %v11432_v8 = vld [vmem:[#allocation2 + $0x28] sm:$0x3] }
 0x4a5   : > { %v3940_v11 = vmax.f32 %v3908_v36, 0.0  ;;  %v3871_v30 = vmul.f32 %v14458_v14, %v3731_v29  ;;  %v10837_v54 = vadd.f32 %v3510_v4, %v13904_v48  ;;  %v3512_v41 = vpop.f32.mrb[47].mxu1  ;;  %v4491_v48 = vld [vmem:[%s17492_s3 + $0x410] sm:$0xff] }
 0x4a6   : > { %v14524_v57 = vld [vmem:[#allocation2 + $0x38] sm:$0xff]  ;;  %v14527_v46 = vld [vmem:[#allocation2 + $0x40] sm:$0x3]  ;;  %v10770_v37 = vpack.c.bf16 %v4492_v44, %v4491_v48 }
 0x4a7   : > { %3972 = vst [vmem:[#allocation2 + $0x51] sm:$0xff] %v3940_v11  ;;  %v3909_v22 = vadd.f32 %v14465_v49, %v3871_v30  ;;  %v3736_v18 = vadd.f32 %v10837_v54, %v14220_v15  ;;  %4585 = vmatmul.mubr.f32.gmra.mrb[102].mxu1 %v4003_v10  ;;  %v4114_v6 = vrot.slane %v14524_v57, 1  ;;  %v4116_v55 = vrot.slane %v14527_v46, 1  ;;  %v4493_v41 = vld [vmem:[%s17492_s3 + $0x420] sm:$0xff] }
 0x4a8   : > { %v3515_v42 = vpop.f32.mrb[48].mxu1 }
 0x4a9   : > { %v3941_v35 = vmax.f32 %v3909_v22, 0.0  ;;  %v3872_v24 = vmul.f32 %v14458_v14, %v3736_v18  ;;  %v10838_v16 = vadd.f32 %v3515_v42, %v13908_v28  ;;  %v3517_v15 = vpop.f32.mrb[49].mxu1  ;;  %v14542_v10 = vsel %vm558_vm0, %v4113_v19, %v4114_v6  ;;  %v4494_v19 = vld [vmem:[%s17492_s3 + $0x428] sm:$0xff] }
 0x4aa   : > { %17786 = vst [vmem:[#allocation36_spill] sm:$0xff] %v14542_v10  ;;  %4589 = vmatprep.mubr.f32.mxu1 %v14542_v10  ;;  %5244 = vmatprep.mubr.f32.mxu0 %v14542_v10  ;;  %v14551_v28 = vsel %vm558_vm0, %v4114_v6, %v4116_v55  ;;  %v14553_v29 = vld [vmem:[#allocation2 + $0x48] sm:$0xff]  ;;  %v10774_v42 = vpack.c.bf16 %v4494_v19, %v4493_v41 }
 0x4ab   : > { %3973 = vst [vmem:[#allocation2 + $0x61] sm:$0xff] %v3941_v35  ;;  %v3910_v61 = vadd.f32 %v14465_v49, %v3872_v24  ;;  %v3741_v36 = vadd.f32 %v10838_v16, %v14247_v60  ;;  %4590 = vmatmul.mubr.f32.gmra.mrb[104].mxu1 %v14519_v59  ;;  %5245 = vmatmul.mubr.f32.vlgmr.msra.gmra.mrb[160].mxu0 %v14519_v59  ;;  %17787 = vst [vmem:[#allocation37_spill] sm:$0xff] %v14551_v28  ;;  %v4118_v18 = vrot.slane %v14553_v29, 1 }
 0x4ac   : > { %v3520_v4 = vpop.f32.mrb[50].mxu1  ;;  %4594 = vmatprep.mubr.f32.mxu1 %v14551_v28  ;;  %5249 = vmatprep.mubr.f32.mxu0 %v14551_v28 }
 0x4ad   : > { %v3942_v11 = vmax.f32 %v3910_v61, 0.0  ;;  %v3873_v30 = vmul.f32 %v14458_v14, %v3741_v36  ;;  %v10839_v54 = vadd.f32 %v3520_v4, %v13913_v40  ;;  %v3522_v60 = vpop.f32.mrb[51].mxu1  ;;  %10769 = vmatpush3.bf16.msra.mxu0 %v14405_v2  ;;  %v4496_v36 = vld [vmem:[%s17492_s3 + $0x438] sm:$0xff] }
 0x4ae   : > { %v14566_v22 = vld [vmem:[#allocation2 + $0x50] sm:$0xff]  ;;  %v14569_v6 = vld [vmem:[#allocation2 + $0x58] sm:$0x3]  ;;  %10771 = vmatprep.subr.bf16.mxu0 %v10770_v37 }
 0x4af   : > { %3974 = vst [vmem:[#allocation2 + $0x69] sm:$0xff] %v3942_v11  ;;  %v3911_v40 = vadd.f32 %v14465_v49, %v3873_v30  ;;  %v3746_v2 = vadd.f32 %v10839_v54, %v14240_v51  ;;  %4595 = vmatmul.mubr.f32.gmra.mrb[106].mxu1 %v14524_v57  ;;  %5250 = vmatmul.mubr.f32.gmra.mrb[162].mxu0 %v14524_v57  ;;  %v4119_v55 = vrot.slane %v14566_v22, 1  ;;  %v4121_v48 = vrot.slane %v14569_v6, 1  ;;  %v4495_v51 = vld [vmem:[%s17492_s3 + $0x430] sm:$0xff] }
 0x4b0   : > { %v3525_v44 = vpop.f32.mrb[52].mxu1  ;;  %v10778_v54 = vpack.c.bf16 %v4496_v36, %v4495_v51 }
 0x4b1   : > { %v3943_v35 = vmax.f32 %v3911_v40, 0.0  ;;  %v3874_v24 = vmul.f32 %v14458_v14, %v3746_v2  ;;  %v10840_v16 = vadd.f32 %v3525_v44, %v13928_v50  ;;  %v3527_v15 = vpop.f32.mrb[53].mxu1  ;;  %v14580_v61 = vsel %vm558_vm0, %v4118_v18, %v4119_v55  ;;  %10773 = vmatpush3.bf16.msra.mxu0 %v10770_v37 }
 0x4b2   : > { %17788 = vst [vmem:[#allocation38_spill] sm:$0xff] %v14580_v61  ;;  %4599 = vmatprep.mubr.f32.mxu1 %v14580_v61  ;;  %5254 = vmatprep.mubr.f32.mxu0 %v14580_v61  ;;  %v14595_v37 = vsel %vm558_vm0, %v4119_v55, %v4121_v48  ;;  %v14597_v11 = vld [vmem:[#allocation2 + $0x60] sm:$0xff] }
 0x4b3   : > { %3975 = vst [vmem:[#allocation2 + $0x79] sm:$0xff] %v3943_v35  ;;  %v3912_v50 = vadd.f32 %v14465_v49, %v3874_v24  ;;  %v3751_v4 = vadd.f32 %v10840_v16, %v14266_v25  ;;  %4600 = vmatmul.mubr.f32.gmra.mrb[108].mxu1 %v14553_v29  ;;  %5255 = vmatmul.mubr.f32.gmra.mrb[164].mxu0 %v14553_v29  ;;  %17789 = vst [vmem:[#allocation39_spill] sm:$0xff] %v14595_v37  ;;  %v4123_v40 = vrot.slane %v14597_v11, 1  ;;  %v4497_v35 = vld [vmem:[%s17492_s3 + $0x440] sm:$0xff] }
 0x4b4   : > { %v3530_v30 = vpop.f32.mrb[54].mxu1  ;;  %4604 = vmatprep.mubr.f32.mxu1 %v14595_v37  ;;  %5259 = vmatprep.mubr.f32.mxu0 %v14595_v37  ;;  %v4428_v37 = vld [vmem:[%s17492_s3 + $0x218] sm:$0xff] }
 0x4b5   : > { %v3944_v60 = vmax.f32 %v3912_v50, 0.0  ;;  %v3875_v41 = vmul.f32 %v14458_v14, %v3751_v4  ;;  %v10841_v25 = vadd.f32 %v3530_v30, %v13941_v47  ;;  %v3532_v19 = vpop.f32.mrb[55].mxu1  ;;  %10775 = vmatprep.subr.bf16.mxu0 %v10774_v42 }
 0x4b6   : > { %v14603_v18 = vld [vmem:[#allocation2 + $0x68] sm:$0xff]  ;;  %v14606_v2 = vld [vmem:[#allocation2 + $0x70] sm:$0x3]  ;;  %10777 = vmatpush3.bf16.msra.mxu0 %v10774_v42 }
 0x4b7   : > { %3976 = vst [vmem:[#allocation2 + $0x81] sm:$0xff] %v3944_v60  ;;  %v3913_v55 = vadd.f32 %v14465_v49, %v3875_v41  ;;  %v3756_v48 = vadd.f32 %v10841_v25, %v14260_v13  ;;  %4605 = vmatmul.mubr.f32.gmra.mrb[110].mxu1 %v14566_v22  ;;  %5260 = vmatmul.mubr.f32.gmra.mrb[166].mxu0 %v14566_v22  ;;  %v4124_v47 = vrot.slane %v14603_v18, 1  ;;  %v4126_v44 = vrot.slane %v14606_v2, 1  ;;  %v4498_v42 = vld [vmem:[%s17492_s3 + $0x448] sm:$0xff] }
 0x4b8   : > { %v3535_v24 = vpop.f32.mrb[56].mxu1  ;;  %10779 = vmatprep.subr.bf16.mxu0 %v10778_v54  ;;  %v10782_v50 = vpack.c.bf16 %v4498_v42, %v4497_v35 }
 0x4b9   : > { %v3945_v16 = vmax.f32 %v3913_v55, 0.0  ;;  %v3876_v13 = vmul.f32 %v14458_v14, %v3756_v48  ;;  %v10842_v15 = vadd.f32 %v3535_v24, %v13950_v39  ;;  %v3537_v51 = vpop.f32.mrb[57].mxu1  ;;  %v14623_v36 = vsel %vm558_vm0, %v4123_v40, %v4124_v47  ;;  %v4499_v55 = vld [vmem:[%s17492_s3 + $0x450] sm:$0xff]  ;;  %v4500_v48 = vld [vmem:[%s17492_s3 + $0x458] sm:$0xff] }
 0x4ba   : > { %17790 = vst [vmem:[#allocation40_spill] sm:$0xff] %v14623_v36  ;;  %4609 = vmatprep.mubr.f32.mxu1 %v14623_v36  ;;  %5264 = vmatprep.mubr.f32.mxu0 %v14623_v36  ;;  %v14632_v39 = vsel %vm558_vm0, %v4124_v47, %v4126_v44  ;;  %v14634_v60 = vld [vmem:[#allocation2 + $0x78] sm:$0xff] }
 0x4bb   : > { %3977 = vst [vmem:[#allocation2 + $0x91] sm:$0xff] %v3945_v16  ;;  %v3914_v4 = vadd.f32 %v14465_v49, %v3876_v13  ;;  %v3761_v30 = vadd.f32 %v10842_v15, %v14282_v56  ;;  %4610 = vmatmul.mubr.f32.gmra.mrb[112].mxu1 %v14597_v11  ;;  %5265 = vmatmul.mubr.f32.gmra.mrb[168].mxu0 %v14597_v11  ;;  %17791 = vst [vmem:[#allocation41_spill] sm:$0xff] %v14632_v39  ;;  %v4128_v44 = vrot.slane %v14634_v60, 1 }
 0x4bc   : > { %v3540_v41 = vpop.f32.mrb[58].mxu1  ;;  %4614 = vmatprep.mubr.f32.mxu1 %v14632_v39  ;;  %5269 = vmatprep.mubr.f32.mxu0 %v14632_v39  ;;  %v10786_v13 = vpack.c.bf16 %v4500_v48, %v4499_v55  ;;  %v11429_v39 = vld [vmem:[#allocation2 + $0x10] sm:$0x3] }
 0x4bd   : > { %v3946_v25 = vmax.f32 %v3914_v4, 0.0  ;;  %v3877_v19 = vmul.f32 %v14458_v14, %v3761_v30  ;;  %v10843_v40 = vadd.f32 %v3540_v41, %v13960_v17  ;;  %v3542_v56 = vpop.f32.mrb[59].mxu1  ;;  %10781 = vmatpush3.bf16.msra.mxu0 %v10778_v54  ;;  %v4218_v36 = vrot.slane %v11429_v39, 2 }
 0x4be   : > { %v14646_v47 = vld [vmem:[#allocation2 + $0x80] sm:$0xff]  ;;  %v14649_v35 = vld [vmem:[#allocation2 + $0x88] sm:$0x3]  ;;  %10783 = vmatprep.subr.bf16.mxu0 %v10782_v50 }
 0x4bf   : > { %3978 = vst [vmem:[#allocation2 + $0x99] sm:$0xff] %v3946_v25  ;;  %v3915_v17 = vadd.f32 %v14465_v49, %v3877_v19  ;;  %v3766_v54 = vadd.f32 %v10843_v40, %v14277_v63  ;;  %4615 = vmatmul.mubr.f32.gmra.mrb[114].mxu1 %v14603_v18  ;;  %5270 = vmatmul.mubr.f32.gmra.mrb[170].mxu0 %v14603_v18  ;;  %v4129_v42 = vrot.slane %v14646_v47, 1  ;;  %v4131_v24 = vrot.slane %v14649_v35, 1  ;;  %v4501_v63 = vld [vmem:[%s17492_s3 + $0x460] sm:$0xff]  ;;  %v4502_v25 = vld [vmem:[%s17492_s3 + $0x468] sm:$0xff] }
 0x4c0   : > { %v3545_v16 = vpop.f32.mrb[60].mxu1  ;;  %v10790_v55 = vpack.c.bf16 %v4502_v25, %v4501_v63 }
 0x4c1   : > { %v3947_v15 = vmax.f32 %v3915_v17, 0.0  ;;  %v3878_v51 = vmul.f32 %v14458_v14, %v3766_v54  ;;  %v10844_v4 = vadd.f32 %v3545_v16, %v13970_v3  ;;  %v3547_v30 = vpop.f32.mrb[61].mxu1  ;;  %v14660_v41 = vsel %vm558_vm0, %v4128_v44, %v4129_v42  ;;  %10785 = vmatpush3.bf16.msra.mxu0 %v10782_v50 }
 0x4c2   : > { %17792 = vst [vmem:[#allocation42_spill] sm:$0xff] %v14660_v41  ;;  %4619 = vmatprep.mubr.f32.mxu1 %v14660_v41  ;;  %5274 = vmatprep.mubr.f32.mxu0 %v14660_v41  ;;  %v14675_v50 = vsel %vm558_vm0, %v4129_v42, %v4131_v24  ;;  %v14677_v40 = vld [vmem:[#allocation2 + $0x90] sm:$0xff] }
 0x4c3   : > { %3979 = vst [vmem:[#allocation2 + $0xa9] sm:$0xff] %v3947_v15  ;;  %v3916_v3 = vadd.f32 %v14465_v49, %v3878_v51  ;;  %v3771_v19 = vadd.f32 %v10844_v4, %v14299_v26  ;;  %4620 = vmatmul.mubr.f32.gmra.mrb[116].mxu1 %v14634_v60  ;;  %5275 = vmatmul.mubr.f32.gmra.mrb[172].mxu0 %v14634_v60  ;;  %17793 = vst [vmem:[#allocation43_spill] sm:$0xff] %v14675_v50  ;;  %v4133_v42 = vrot.slane %v14677_v40, 1  ;;  %v4503_v4 = vld [vmem:[%s17492_s3 + $0x470] sm:$0xff] }
 0x4c4   : > { %v3550_v56 = vpop.f32.mrb[62].mxu1  ;;  %4624 = vmatprep.mubr.f32.mxu1 %v14675_v50  ;;  %5279 = vmatprep.mubr.f32.mxu0 %v14675_v50 }
 0x4c5   : > { %v3948_v48 = vmax.f32 %v3916_v3, 0.0  ;;  %v3879_v44 = vmul.f32 %v14458_v14, %v3771_v19  ;;  %v10845_v26 = vadd.f32 %v3550_v56, %v13980_v33  ;;  %v3552_v17 = vpop.f32.mrb[63].mxu1  ;;  %10787 = vmatprep.subr.bf16.mxu0 %v10786_v13 }
 0x4c6   : > { %v14683_v54 = vld [vmem:[#allocation2 + $0x98] sm:$0xff]  ;;  %v14686_v24 = vld [vmem:[#allocation2 + $0xa0] sm:$0x3]  ;;  %10789 = vmatpush3.bf16.msra.mxu0 %v10786_v13 }
 0x4c7   : > { %3980 = vst [vmem:[#allocation2 + $0xb1] sm:$0xff] %v3948_v48  ;;  %v3917_v16 = vadd.f32 %v14465_v49, %v3879_v44  ;;  %v3776_v15 = vadd.f32 %v10845_v26, %v14293_v23  ;;  %4625 = vmatmul.mubr.f32.gmra.mrb[118].mxu1 %v14646_v47  ;;  %5280 = vmatmul.mubr.f32.gmra.mrb[174].mxu0 %v14646_v47  ;;  %v4134_v33 = vrot.slane %v14683_v54, 1  ;;  %v4136_v51 = vrot.slane %v14686_v24, 1  ;;  %v4504_v13 = vld [vmem:[%s17492_s3 + $0x478] sm:$0xff] }
 0x4c8   : > { %v3555_v30 = vpop.f32.mrb[64].mxu1  ;;  %10791 = vmatprep.subr.bf16.mxu0 %v10790_v55  ;;  %v10794_v56 = vpack.c.bf16 %v4504_v13, %v4503_v4 }
 0x4c9   : > { %v3949_v63 = vmax.f32 %v3917_v16, 0.0  ;;  %v3880_v23 = vmul.f32 %v14458_v14, %v3776_v15  ;;  %v10846_v25 = vadd.f32 %v3555_v30, %v14004_v20  ;;  %v3557_v3 = vpop.f32.mrb[65].mxu1  ;;  %v14703_v19 = vsel %vm558_vm0, %v4133_v42, %v4134_v33 }
 0x4ca   : > { %17794 = vst [vmem:[#allocation44_spill] sm:$0xff] %v14703_v19  ;;  %4629 = vmatprep.mubr.f32.mxu1 %v14703_v19  ;;  %5284 = vmatprep.mubr.f32.mxu0 %v14703_v19  ;;  %v14712_v20 = vsel %vm558_vm0, %v4134_v33, %v4136_v51  ;;  %v14714_v26 = vld [vmem:[#allocation2 + $0xa8] sm:$0xff] }
 0x4cb   : > { %3981 = vst [vmem:[#allocation2 + $0xc1] sm:$0xff] %v3949_v63  ;;  %v3918_v48 = vadd.f32 %v14465_v49, %v3880_v23  ;;  %v3781_v44 = vadd.f32 %v10846_v25, %v14316_v9  ;;  %4630 = vmatmul.mubr.f32.gmra.mrb[120].mxu1 %v14677_v40  ;;  %5285 = vmatmul.mubr.f32.gmra.mrb[176].mxu0 %v14677_v40  ;;  %17795 = vst [vmem:[#allocation45_spill] sm:$0xff] %v14712_v20  ;;  %v4138_v13 = vrot.slane %v14714_v26, 1 }
 0x4cc   : > { %v3560_v17 = vpop.f32.mrb[66].mxu1  ;;  %4634 = vmatprep.mubr.f32.mxu1 %v14712_v20  ;;  %5289 = vmatprep.mubr.f32.mxu0 %v14712_v20 }
 0x4cd   : > { %v3950_v42 = vmax.f32 %v3918_v48, 0.0  ;;  %v3881_v16 = vmul.f32 %v14458_v14, %v3781_v44  ;;  %v10847_v15 = vadd.f32 %v3560_v17, %v14024_v43  ;;  %v3562_v9 = vpop.f32.mrb[67].mxu1  ;;  %10793 = vmatpush3.bf16.msra.mxu0 %v10790_v55 }
 0x4ce   : > { %v14720_v4 = vld [vmem:[#allocation2 + $0xb0] sm:$0xff]  ;;  %v14723_v33 = vld [vmem:[#allocation2 + $0xb8] sm:$0x3]  ;;  %10795 = vmatprep.subr.bf16.mxu0 %v10794_v56 }
 0x4cf   : > { %3982 = vst [vmem:[#allocation2 + $0xc9] sm:$0xff] %v3950_v42  ;;  %v3919_v51 = vadd.f32 %v14465_v49, %v3881_v16  ;;  %v3786_v30 = vadd.f32 %v10847_v15, %v14310_v53  ;;  %4635 = vmatmul.mubr.f32.gmra.mrb[122].mxu1 %v14683_v54  ;;  %5290 = vmatmul.mubr.f32.gmra.mrb[178].mxu0 %v14683_v54  ;;  %v4139_v43 = vrot.slane %v14720_v4, 1  ;;  %v4141_v55 = vrot.slane %v14723_v33, 1 }
 0x4d0   : > { %v3565_v63 = vpop.f32.mrb[68].mxu1 }
 0x4d1   : > { %v3951_v23 = vmax.f32 %v3919_v51, 0.0  ;;  %v3882_v25 = vmul.f32 %v14458_v14, %v3786_v30  ;;  %v10848_v3 = vadd.f32 %v3565_v63, %v14044_v38  ;;  %v3567_v48 = vpop.f32.mrb[69].mxu1  ;;  %v14734_v44 = vsel %vm558_vm0, %v4138_v13, %v4139_v43  ;;  %10797 = vmatpush3.bf16.msra.mxu0 %v10794_v56 }
 0x4d2   : > { %17796 = vst [vmem:[#allocation46_spill] sm:$0xff] %v14734_v44  ;;  %4639 = vmatprep.mubr.f32.mxu1 %v14734_v44  ;;  %5294 = vmatprep.mubr.f32.mxu0 %v14734_v44  ;;  %v14743_v38 = vsel %vm558_vm0, %v4139_v43, %v4141_v55  ;;  %v14745_v42 = vld [vmem:[#allocation2 + $0xc0] sm:$0xff] }
 0x4d3   : > { %3983 = vst [vmem:[#allocation2 + $0xd9] sm:$0xff] %v3951_v23  ;;  %v3920_v53 = vadd.f32 %v14465_v49, %v3882_v25  ;;  %v3791_v17 = vadd.f32 %v10848_v3, %v14324_v27  ;;  %4640 = vmatmul.mubr.f32.gmra.mrb[124].mxu1 %v14714_v26  ;;  %5295 = vmatmul.mubr.f32.gmra.mrb[180].mxu0 %v14714_v26  ;;  %17797 = vst [vmem:[#allocation47_spill] sm:$0xff] %v14743_v38  ;;  %v4143_v51 = vrot.slane %v14745_v42, 1 }
 0x4d4   : > { %v3570_v16 = vpop.f32.mrb[70].mxu1  ;;  %4644 = vmatprep.mubr.f32.mxu1 %v14743_v38  ;;  %5299 = vmatprep.mubr.f32.mxu0 %v14743_v38 }
 0x4d5   : > { %v3952_v56 = vmax.f32 %v3920_v53, 0.0  ;;  %v3883_v15 = vmul.f32 %v14458_v14, %v3791_v17  ;;  %v10849_v9 = vadd.f32 %v3570_v16, %v14064_v34  ;;  %v3572_v27 = vpop.f32.mrb[71].mxu1 }
 0x4d6   : > { %v14751_v13 = vld [vmem:[#allocation2 + $0xc8] sm:$0xff]  ;;  %v14754_v30 = vld [vmem:[#allocation2 + $0xd0] sm:$0x3] }
 0x4d7   : > { %3984 = vst [vmem:[#allocation2 + $0xe1] sm:$0xff] %v3952_v56  ;;  %v3921_v43 = vadd.f32 %v14465_v49, %v3883_v15  ;;  %v3796_v55 = vadd.f32 %v10849_v9, %v14320_v5  ;;  %4645 = vmatmul.mubr.f32.gmra.mrb[126].mxu1 %v14720_v4  ;;  %5300 = vmatmul.mubr.f32.gmra.mrb[182].mxu0 %v14720_v4  ;;  %v4144_v63 = vrot.slane %v14751_v13, 1  ;;  %v4146_v34 = vrot.slane %v14754_v30, 1 }
 0x4d8   : > { %v3575_v23 = vpop.f32.mrb[72].mxu1 }
 0x4d9   : > { %v3953_v25 = vmax.f32 %v3921_v43, 0.0  ;;  %v3884_v3 = vmul.f32 %v14458_v14, %v3796_v55  ;;  %v10850_v48 = vadd.f32 %v3575_v23, %v14084_v12  ;;  %v3577_v53 = vpop.f32.mrb[73].mxu1  ;;  %v14765_v17 = vsel %vm558_vm0, %v4143_v51, %v4144_v63 }
 0x4da   : > { %17798 = vst [vmem:[#allocation48_spill] sm:$0xff] %v14765_v17  ;;  %4649 = vmatprep.mubr.f32.mxu1 %v14765_v17  ;;  %5304 = vmatprep.mubr.f32.mxu0 %v14765_v17  ;;  %v14774_v56 = vsel %vm558_vm0, %v4144_v63, %v4146_v34  ;;  %v14776_v12 = vld [vmem:[#allocation2 + $0xd8] sm:$0xff] }
 0x4db   : > { %3985 = vst [vmem:[#allocation2 + $0xf1] sm:$0xff] %v3953_v25  ;;  %v3922_v5 = vadd.f32 %v14465_v49, %v3884_v3  ;;  %v3801_v16 = vadd.f32 %v10850_v48, %v14335_v52  ;;  %4650 = vmatmul.mubr.f32.gmra.mrb[128].mxu1 %v14745_v42  ;;  %5305 = vmatmul.mubr.f32.gmra.mrb[184].mxu0 %v14745_v42  ;;  %17799 = vst [vmem:[#allocation49_spill] sm:$0xff] %v14774_v56  ;;  %v4148_v55 = vrot.slane %v14776_v12, 1 }
 0x4dc   : > { %v3580_v15 = vpop.f32.mrb[74].mxu1  ;;  %4654 = vmatprep.mubr.f32.mxu1 %v14774_v56  ;;  %5309 = vmatprep.mubr.f32.mxu0 %v14774_v56 }
 0x4dd   : > { %v3954_v9 = vmax.f32 %v3922_v5, 0.0  ;;  %v3885_v27 = vmul.f32 %v14458_v14, %v3801_v16  ;;  %v10851_v51 = vadd.f32 %v3580_v15, %v14104_v1  ;;  %v3582_v52 = vpop.f32.mrb[75].mxu1 }
 0x4de   : > { %v14782_v43 = vld [vmem:[#allocation2 + $0xe0] sm:$0xff]  ;;  %v14785_v23 = vld [vmem:[#allocation2 + $0xe8] sm:$0x3] }
 0x4df   : > { %3986 = vst [vmem:[#allocation2 + $0xf9] sm:$0xff] %v3954_v9  ;;  %v3923_v63 = vadd.f32 %v14465_v49, %v3885_v27  ;;  %v3806_v34 = vadd.f32 %v10851_v51, %v14327_v62  ;;  %4655 = vmatmul.mubr.f32.gmra.mrb[130].mxu1 %v14751_v13  ;;  %5310 = vmatmul.mubr.f32.gmra.mrb[186].mxu0 %v14751_v13  ;;  %v4149_v25 = vrot.slane %v14782_v43, 1  ;;  %v4151_v1 = vrot.slane %v14785_v23, 1 }
 0x4e0   : > { %v3585_v3 = vpop.f32.mrb[76].mxu1 }
 0x4e1   : > { %v3955_v48 = vmax.f32 %v3923_v63, 0.0  ;;  %v3886_v53 = vmul.f32 %v14458_v14, %v3806_v34  ;;  %v10852_v5 = vadd.f32 %v3585_v3, %v14118_v32  ;;  %v3587_v16 = vpop.f32.mrb[77].mxu1  ;;  %v14796_v15 = vsel %vm558_vm0, %v4148_v55, %v4149_v25 }
 0x4e2   : > { %17800 = vst [vmem:[#allocation50_spill] sm:$0xff] %v14796_v15  ;;  %4659 = vmatprep.mubr.f32.mxu1 %v14796_v15  ;;  %5314 = vmatprep.mubr.f32.mxu0 %v14796_v15  ;;  %v14805_v27 = vsel %vm558_vm0, %v4149_v25, %v4151_v1  ;;  %v14807_v32 = vld [vmem:[#allocation2 + $0xf0] sm:$0xff] }
 0x4e3   : > { %3987 = vst [vmem:[#allocation2 + $0x109] sm:$0xff] %v3955_v48  ;;  %v3924_v62 = vadd.f32 %v14465_v49, %v3886_v53  ;;  %v3811_v9 = vadd.f32 %v10852_v5, %v14347_v31  ;;  %4660 = vmatmul.mubr.f32.gmra.mrb[132].mxu1 %v14776_v12  ;;  %5315 = vmatmul.mubr.f32.gmra.mrb[188].mxu0 %v14776_v12  ;;  %17801 = vst [vmem:[#allocation51_spill] sm:$0xff] %v14805_v27  ;;  %v4153_v3 = vrot.slane %v14807_v32, 1 }
 0x4e4   : > { %v3590_v51 = vpop.f32.mrb[78].mxu1  ;;  %4664 = vmatprep.mubr.f32.mxu1 %v14805_v27  ;;  %5319 = vmatprep.mubr.f32.mxu0 %v14805_v27 }
 0x4e5   : > { %v3956_v52 = vmax.f32 %v3924_v62, 0.0  ;;  %v3887_v55 = vmul.f32 %v14458_v14, %v3811_v9  ;;  %v10853_v63 = vadd.f32 %v3590_v51, %v14130_v58  ;;  %v3592_v31 = vpop.f32.mrb[79].mxu1 }
 0x4e6   : > { %v14813_v34 = vld [vmem:[#allocation2 + $0xf8] sm:$0xff]  ;;  %v14816_v48 = vld [vmem:[#allocation2 + $0x100] sm:$0x3] }
 0x4e7   : > { %3988 = vst [vmem:[#allocation2 + $0x111] sm:$0xff] %v3956_v52  ;;  %v3925_v25 = vadd.f32 %v14465_v49, %v3887_v55  ;;  %v3816_v1 = vadd.f32 %v10853_v63, %v14338_v7  ;;  %4665 = vmatmul.mubr.f32.gmra.mrb[134].mxu1 %v14782_v43  ;;  %5320 = vmatmul.mubr.f32.gmra.mrb[190].mxu0 %v14782_v43  ;;  %v4154_v53 = vrot.slane %v14813_v34, 1  ;;  %v4156_v58 = vrot.slane %v14816_v48, 1  ;;  %v17803_v55 = vld [vmem:[#allocation29_spill] sm:$0xff] }
 0x4e8   : > { %v3595_v5 = vpop.f32.mrb[80].mxu1 }
 0x4e9   : > { %v3957_v16 = vmax.f32 %v3925_v25, 0.0  ;;  %v3888_v62 = vmul.f32 %v14458_v14, %v3816_v1  ;;  %v10854_v9 = vadd.f32 %v3595_v5, %v14140_v21  ;;  %v3597_v51 = vpop.f32.mrb[81].mxu1  ;;  %v14827_v52 = vsel %vm558_vm0, %v4153_v3, %v4154_v53  ;;  %v17805_v5 = vld [vmem:[#allocation22_spill] sm:$0xff] }
 0x4ea   : > { %17802 = vst [vmem:[#allocation52_spill] sm:$0xff] %v14827_v52  ;;  %4669 = vmatprep.mubr.f32.mxu1 %v14827_v52  ;;  %5324 = vmatprep.mubr.f32.mxu0 %v14827_v52  ;;  %v14836_v31 = vsel %vm558_vm0, %v4154_v53, %v4156_v58  ;;  %v14838_v21 = vld [vmem:[#allocation2 + $0x108] sm:$0xff]  ;;  %v17806_v58 = vld [vmem:[#allocation28_spill] sm:$0xff] }
 0x4eb   : > { %3989 = vst [vmem:[#allocation2 + $0x121] sm:$0xff] %v3957_v16  ;;  %v3926_v7 = vadd.f32 %v14465_v49, %v3888_v62  ;;  %v3821_v63 = vadd.f32 %v10854_v9, %v17803_v55  ;;  %4670 = vmatmul.mubr.f32.gmra.mrb[136].mxu1 %v14807_v32  ;;  %5325 = vmatmul.mubr.f32.gmra.mrb[192].mxu0 %v14807_v32  ;;  %17804 = vst [vmem:[#allocation29_spill] sm:$0xff] %v14836_v31  ;;  %v4158_v51 = vrot.slane %v14838_v21, 1 }
 0x4ec   : > { %v3600_v3 = vpop.f32.mrb[82].mxu1  ;;  %4674 = vmatprep.mubr.f32.mxu1 %v14836_v31  ;;  %5329 = vmatprep.mubr.f32.mxu0 %v14836_v31  ;;  %v17807_v31 = vld [vmem:[#allocation23_spill] sm:$0xff] }
 0x4ed   : > { %v3958_v25 = vmax.f32 %v3926_v7, 0.0  ;;  %v3889_v1 = vmul.f32 %v14458_v14, %v3821_v63  ;;  %v10855_v16 = vadd.f32 %v3600_v3, %v17805_v5  ;;  %v3602_v62 = vpop.f32.mrb[83].mxu1 }
 0x4ee   : > { %v14844_v9 = vld [vmem:[#allocation2 + $0x110] sm:$0xff]  ;;  %v14847_v55 = vld [vmem:[#allocation2 + $0x118] sm:$0x3] }
 0x4ef   : > { %3990 = vst [vmem:[#allocation2 + $0x129] sm:$0xff] %v3958_v25  ;;  %v3927_v53 = vadd.f32 %v14465_v49, %v3889_v1  ;;  %v3826_v52 = vadd.f32 %v10855_v16, %v17806_v58  ;;  %4675 = vmatmul.mubr.f32.gmra.mrb[138].mxu1 %v14813_v34  ;;  %5330 = vmatmul.mubr.f32.gmra.mrb[194].mxu0 %v14813_v34  ;;  %v4159_v7 = vrot.slane %v14844_v9, 1  ;;  %v4161_v63 = vrot.slane %v14847_v55, 1  ;;  %v17809_v58 = vld [vmem:[#allocation31_spill] sm:$0xff] }
 0x4f0   : > { %v3605_v3 = vpop.f32.mrb[84].mxu1  ;;  %v4226_v1 = vrot.slane %v14524_v57, 2  ;;  %v4225_v57 = vrot.slane %v14519_v59, 2  ;;  %v4271_v41 = vrot.slane %v14844_v9, 2 }
 0x4f1   : > { %v3959_v5 = vmax.f32 %v3927_v53, 0.0  ;;  %v3890_v62 = vmul.f32 %v14458_v14, %v3826_v52  ;;  %v10856_v27 = vadd.f32 %v3605_v3, %v17807_v31  ;;  %v3607_v15 = vpop.f32.mrb[85].mxu1  ;;  %v14858_v25 = vsel %vm558_vm0, %v4158_v51, %v4159_v7 }
 0x4f2   : > { %17808 = vst [vmem:[#allocation22_spill] sm:$0xff] %v14858_v25  ;;  %4679 = vmatprep.mubr.f32.mxu1 %v14858_v25  ;;  %5334 = vmatprep.mubr.f32.mxu0 %v14858_v25  ;;  %v14868_v15 = vsel %vm558_vm0, %v4159_v7, %v4161_v63  ;;  %v14870_v52 = vld [vmem:[#allocation2 + $0x120] sm:$0xff]  ;;  %v14879_v7 = vsel %vm671_vm1, %v4225_v57, %v4226_v1 }
 0x4f3   : > { %3991 = vst [vmem:[#allocation2 + $0x139] sm:$0xff] %v3959_v5  ;;  %v3928_v16 = vadd.f32 %v14465_v49, %v3890_v62  ;;  %v3831_v56 = vadd.f32 %v10856_v27, %v17809_v58  ;;  %4680 = vmatmul.mubr.f32.gmra.mrb[140].mxu1 %v14838_v21  ;;  %5335 = vmatmul.mubr.f32.gmra.mrb[196].mxu0 %v14838_v21  ;;  %17810 = vst [vmem:[#allocation28_spill] sm:$0xff] %v14868_v15  ;;  %v17811_v27 = vld [vmem:[#allocation24_spill] sm:$0xff]  ;;  %v4228_v62 = vrot.slane %v14527_v46, 2 }
 0x4f4   : > { %v3610_v31 = vpop.f32.mrb[86].mxu1  ;;  %4684 = vmatprep.mubr.f32.mxu1 %v14868_v15  ;;  %5339 = vmatprep.mubr.f32.mxu0 %v14868_v15  ;;  %17812 = vst [vmem:[#allocation23_spill] sm:$0xff] %v14879_v7  ;;  %v4163_v58 = vrot.slane %v14870_v52, 1  ;;  %v4231_v15 = vrot.slane %v14566_v22, 2  ;;  %v4233_v22 = vrot.slane %v14569_v6, 2 }
 0x4f5   : > { %v3960_v51 = vmax.f32 %v3928_v16, 0.0  ;;  %v3891_v53 = vmul.f32 %v14458_v14, %v3831_v56  ;;  %v10857_v3 = vadd.f32 %v3610_v31, %v17811_v27  ;;  %v3612_v5 = vpop.f32.mrb[87].mxu1  ;;  %v17813_v56 = vld [vmem:[#allocation30_spill] sm:$0xff]  ;;  %v4230_v27 = vrot.slane %v14553_v29, 2 }
 0x4f6   : > { %v14881_v63 = vld [vmem:[#allocation2 + $0x128] sm:$0xff]  ;;  %v14884_v25 = vld [vmem:[#allocation2 + $0x130] sm:$0x3]  ;;  %v17814_v5 = vld [vmem:[#allocation25_spill] sm:$0xff]  ;;  %v14903_v38 = vsel %vm671_vm1, %v4226_v1, %v4228_v62  ;;  %v4236_v29 = vrot.slane %v14603_v18, 2  ;;  %v4235_v18 = vrot.slane %v14597_v11, 2 }
 0x4f7   : > { %3992 = vst [vmem:[#allocation2 + $0x141] sm:$0xff] %v3960_v51  ;;  %v3929_v59 = vadd.f32 %v14465_v49, %v3891_v53  ;;  %v3836_v16 = vadd.f32 %v10857_v3, %v17813_v56  ;;  %4685 = vmatmul.mubr.f32.gmra.mrb[142].mxu1 %v14844_v9  ;;  %5340 = vmatmul.mubr.f32.gmra.mrb[198].mxu0 %v14844_v9  ;;  %v4164_v46 = vrot.slane %v14881_v63, 1  ;;  %v4166_v31 = vrot.slane %v14884_v25, 1 }
 0x4f8   : > { %v3615_v57 = vpop.f32.mrb[88].mxu1  ;;  %10078 = vmatprep.mubr.f32.mxu0 %v14879_v7  ;;  %v14906_v44 = vsel %vm671_vm1, %v4230_v27, %v4231_v15  ;;  %v4241_v11 = vrot.slane %v14646_v47, 2  ;;  %v4276_v39 = vrot.slane %v14881_v63, 2  ;;  %v4278_v10 = vrot.slane %v14884_v25, 2 }
 0x4f9   : > { %v3961_v51 = vmax.f32 %v3929_v59, 0.0  ;;  %v3892_v53 = vmul.f32 %v14458_v14, %v3836_v16  ;;  %v10858_v3 = vadd.f32 %v3615_v57, %v17814_v5  ;;  %v3617_v56 = vpop.f32.mrb[89].mxu1  ;;  %v14899_v17 = vsel %vm558_vm0, %v4163_v58, %v4164_v46  ;;  %v17816_v59 = vld [vmem:[#allocation33_spill] sm:$0xff] }
 0x4fa   : > { %17815 = vst [vmem:[#allocation31_spill] sm:$0xff] %v14899_v17  ;;  %4689 = vmatprep.mubr.f32.mxu1 %v14899_v17  ;;  %v14914_v58 = vsel %vm558_vm0, %v4164_v46, %v4166_v31  ;;  %v14916_v57 = vld [vmem:[#allocation2 + $0x138] sm:$0xff]  ;;  %v14927_v46 = vsel %vm671_vm1, %v4235_v18, %v4236_v29 }
 0x4fb   : > { %3993 = vst [vmem:[#allocation2 + $0x151] sm:$0xff] %v3961_v51  ;;  %v3930_v6 = vadd.f32 %v14465_v49, %v3892_v53  ;;  %v3841_v16 = vadd.f32 %v10858_v3, %v17816_v59  ;;  %4690 = vmatmul.mubr.f32.gmra.mrb[144].mxu1 %v14870_v52  ;;  %10079 = vmatmul.mubr.f32.vlgmr.msra.gmra.mrb[200].mxu0 %v14903_v38  ;;  %17817 = vst [vmem:[#allocation24_spill] sm:$0xff] %v14914_v58  ;;  %v17818_v51 = vld [vmem:[#allocation3_spill] sm:$0xff]  ;;  %v4168_v56 = vrot.slane %v14916_v57, 1 }
 0x4fc   : > { %v3620_v1 = vpop.f32.mrb[90].mxu1  ;;  %4694 = vmatprep.mubr.f32.mxu1 %v14914_v58  ;;  %10081 = vmatprep.mubr.f32.mxu0 %v14906_v44  ;;  %v14924_v3 = vsel %vm671_vm1, %v4231_v15, %v4233_v22  ;;  %v4238_v59 = vrot.slane %v14606_v2, 2  ;;  %v4240_v2 = vrot.slane %v14634_v60, 2  ;;  %v4246_v60 = vrot.slane %v14683_v54, 2 }
 0x4fd   : > { %v3962_v62 = vmax.f32 %v3930_v6, 0.0  ;;  %v3893_v27 = vmul.f32 %v14458_v14, %v3841_v16  ;;  %v10859_v53 = vadd.f32 %v3620_v1, %v17818_v51  ;;  %v3622_v5 = vpop.f32.mrb[91].mxu1  ;;  %v17819_v16 = vld [vmem:[#allocation32_spill] sm:$0xff]  ;;  %v4243_v51 = vrot.slane %v14649_v35, 2 }
 0x4fe   : > { %v14929_v31 = vld [vmem:[#allocation2 + $0x140] sm:$0xff]  ;;  %v14933_v58 = vld [vmem:[#allocation2 + $0x148] sm:$0x3]  ;;  %v17820_v5 = vld [vmem:[#allocation4_spill] sm:$0xff]  ;;  %v14952_v20 = vsel %vm671_vm1, %v4236_v29, %v4238_v59  ;;  %v14955_v19 = vsel %vm671_vm1, %v4240_v2, %v4241_v11  ;;  %v4245_v59 = vrot.slane %v14677_v40, 2 }
 0x4ff   : > { %3994 = vst [vmem:[#allocation2 + $0x159] sm:$0xff] %v3962_v62  ;;  %v3931_v6 = vadd.f32 %v14465_v49, %v3893_v27  ;;  %v3846_v1 = vadd.f32 %v10859_v53, %v17819_v16  ;;  %4695 = vmatmul.mubr.f32.gmra.mrb[146].mxu1 %v14881_v63  ;;  %10082 = vmatmul.mubr.f32.gmra.mrb[202].mxu0 %v14924_v3  ;;  %v4169_v15 = vrot.slane %v14929_v31, 1  ;;  %v4171_v22 = vrot.slane %v14933_v58, 1 }
 0x500   : > { %v3625_v18 = vpop.f32.mrb[92].mxu1  ;;  %10084 = vmatprep.mubr.f32.mxu0 %v14927_v46  ;;  %v4283_v45 = vrot.slane %v14933_v58, 2  ;;  %v11433_v58 = vld [vmem:[#allocation2 + $0x38] sm:$0xff] }
 0x501   : > { %v3963_v62 = vmax.f32 %v3931_v6, 0.0  ;;  %v3894_v27 = vmul.f32 %v14458_v14, %v3846_v1  ;;  %v10860_v53 = vadd.f32 %v3625_v18, %v17820_v5  ;;  %v3627_v16 = vpop.f32.mrb[93].mxu1  ;;  %v14948_v17 = vsel %vm558_vm0, %v4168_v56, %v4169_v15  ;;  %v17822_v14 = vld [vmem:[#allocation35_spill] sm:$0xff] }
 0x502   : > { %17821 = vst [vmem:[#allocation30_spill] sm:$0xff] %v14948_v17  ;;  %4699 = vmatprep.mubr.f32.mxu1 %v14948_v17  ;;  %v14963_v56 = vsel %vm558_vm0, %v4169_v15, %v4171_v22  ;;  %v14965_v1 = vld [vmem:[#allocation2 + $0x150] sm:$0xff]  ;;  %v14975_v15 = vsel %vm671_vm1, %v4241_v11, %v4243_v51  ;;  %v14978_v22 = vsel %vm671_vm1, %v4245_v59, %v4246_v60  ;;  %v17825_v51 = vld [vmem:[#allocation34_spill] sm:$0xff]  ;;  %v4250_v17 = vrot.slane %v14714_v26, 2 }
 0x503   : > { %3995 = vst [vmem:[#allocation2 + $0x169] sm:$0xff] %v3963_v62  ;;  %v3932_v35 = vadd.f32 %v14465_v49, %v3894_v27  ;;  %v3851_v6 = vadd.f32 %v10860_v53, %v17822_v14  ;;  %4700 = vmatmul.mubr.f32.gmra.mrb[148].mxu1 %v14916_v57  ;;  %10085 = vmatmul.mubr.f32.gmra.mrb[204].mxu0 %v14952_v20  ;;  %17823 = vst [vmem:[#allocation25_spill] sm:$0xff] %v14963_v56  ;;  %v11425_v49 = vld [vmem:[%s17495_s6] ss:$0 sm:$0xff]  ;;  %v4173_v16 = vrot.slane %v14965_v1, 1 }
 0x504   : > { %v3630_v29 = vpop.f32.mrb[94].mxu1  ;;  %4704 = vmatprep.mubr.f32.mxu1 %v14963_v56  ;;  %10087 = vmatprep.mubr.f32.mxu0 %v14955_v19  ;;  %v17824_v62 = vld [vmem:[#allocation5_spill] sm:$0xff]  ;;  %v4251_v56 = vrot.slane %v14720_v4, 2 }
 0x505   : > { %v3964_v18 = vmax.f32 %v3932_v35, 0.0  ;;  %v3895_v2 = vmul.f32 %v11425_v49, %v3851_v6  ;;  %v10861_v27 = vadd.f32 %v3630_v29, %v17824_v62  ;;  %v3632_v5 = vpop.f32.mrb[95].mxu1  ;;  %v4248_v35 = vrot.slane %v14686_v24, 2  ;;  %v11426_v6 = vld [vmem:[%s17496_s7] ss:$0 sm:$0xff] }
 0x506   : > { %v14980_v53 = vld [vmem:[#allocation2 + $0x158] sm:$0xff]  ;;  %v14984_v14 = vld [vmem:[#allocation2 + $0x160] sm:$0x3] }
 0x507   : > { %3996 = vst [vmem:[#allocation2 + $0x171] sm:$0xff] %v3964_v18  ;;  %v3933_v11 = vadd.f32 %v11426_v6, %v3895_v2  ;;  %v3856_v29 = vadd.f32 %v10861_v27, %v17825_v51  ;;  %4705 = vmatmul.mubr.f32.gmra.mrb[150].mxu1 %v14929_v31  ;;  %10088 = vmatmul.mubr.f32.gmra.mrb[206].mxu0 %v14975_v15  ;;  %v4174_v59 = vrot.slane %v14980_v53, 1  ;;  %v4176_v24 = vrot.slane %v14984_v14, 1 }
 0x508   : > { %10090 = vmatprep.mubr.f32.mxu0 %v14978_v22  ;;  %v15002_v2 = vsel %vm671_vm1, %v4246_v60, %v4248_v35  ;;  %v4253_v27 = vrot.slane %v14723_v33, 2  ;;  %v4256_v51 = vrot.slane %v14751_v13, 2  ;;  %v4255_v33 = vrot.slane %v14745_v42, 2 }
 0x509   : > { %v3965_v62 = vmax.f32 %v3933_v11, 0.0  ;;  %v3896_v5 = vmul.f32 %v11425_v49, %v3856_v29  ;;  %v14997_v18 = vsel %vm558_vm0, %v4173_v16, %v4174_v59  ;;  %v15009_v49 = vsel %vm558_vm0, %v4174_v59, %v4176_v24 }
 0x50a   : > { %17826 = vst [vmem:[#allocation33_spill] sm:$0xff] %v14997_v18  ;;  %4709 = vmatprep.mubr.f32.mxu1 %v14997_v18  ;;  %17827 = vst [vmem:[#allocation3_spill] sm:$0xff] %v15009_v49  ;;  %v15012_v16 = vsel %vm671_vm1, %v4250_v17, %v4251_v56  ;;  %v15017_v60 = vld [vmem:[#allocation2 + $0x168] sm:$0xff]  ;;  %v15023_v11 = vsel %vm671_vm1, %v4255_v33, %v4256_v51  ;;  %v4258_v17 = vrot.slane %v14754_v30, 2  ;;  %v4260_v30 = vrot.slane %v14776_v12, 2 }
 0x50b   : > { %3997 = vst [vmem:[#allocation2 + $0x181] sm:$0xff] %v3965_v62  ;;  %v3934_v50 = vadd.f32 %v11426_v6, %v3896_v5  ;;  %4710 = vmatmul.mubr.f32.gmra.mrb[152].mxu1 %v14965_v1  ;;  %10091 = vmatmul.mubr.f32.gmra.mrb[208].mxu0 %v15002_v2  ;;  %v15020_v6 = vsel %vm671_vm1, %v4251_v56, %v4253_v27  ;;  %v4178_v24 = vrot.slane %v15017_v60, 1  ;;  %v4261_v62 = vrot.slane %v14782_v43, 2 }
 0x50c   : > { %4714 = vmatprep.mubr.f32.mxu1 %v15009_v49  ;;  %10093 = vmatprep.mubr.f32.mxu0 %v15012_v16  ;;  %v15043_v27 = vsel %vm671_vm1, %v4256_v51, %v4258_v17  ;;  %v4263_v33 = vrot.slane %v14785_v23, 2  ;;  %v15057_v51 = vld [vmem:[#allocation2] sm:$0xff]  ;;  %v4265_v17 = vrot.slane %v14807_v32, 2 }
 0x50d   : > { %v3966_v35 = vmax.f32 %v3934_v50, 0.0  ;;  %v15052_v49 = vsel %vm671_vm1, %v4260_v30, %v4261_v62  ;;  %17830 = vst [vmem:[#allocation35_spill] sm:$0xff] %v15057_v51  ;;  %v15060_v23 = vrot.slane %v15057_v51, 2 }
 0x50e   : > { %v15025_v29 = vld [vmem:[#allocation2 + $0x170] sm:$0xff]  ;;  %v15028_v59 = vld [vmem:[#allocation2 + $0x178] sm:$0x3]  ;;  %v15070_v30 = vsel %vm671_vm1, %v4261_v62, %v4263_v33  ;;  %v4273_v33 = vrot.slane %v14847_v55, 2 }
 0x50f   : > { %3998 = vst [vmem:[#allocation2 + $0x189] sm:$0xff] %v3966_v35  ;;  %4715 = vmatmul.mubr.f32.gmra.mrb[154].mxu1 %v14980_v53  ;;  %10094 = vmatmul.mubr.f32.gmra.mrb[210].mxu0 %v15020_v6  ;;  %v4179_v50 = vrot.slane %v15025_v29, 1  ;;  %v4181_v56 = vrot.slane %v15028_v59, 1  ;;  %v4219_v55 = vsel %vm671_vm1, %v15060_v23, %v4218_v36  ;;  %v4430_v36 = vld [vmem:[%s17492_s3 + $0x228] sm:$0xff] }
 0x510   : > { %10096 = vmatprep.mubr.f32.mxu0 %v15023_v11  ;;  %v15103_v61 = vsel %vm671_vm1, %v4271_v41, %v4273_v33  ;;  %v4280_v33 = vrot.slane %v14916_v57, 2 }
 0x511   : > { %v15038_v5 = vsel %vm558_vm0, %v4178_v24, %v4179_v50  ;;  %v15049_v35 = vsel %vm558_vm0, %v4179_v50, %v4181_v56  ;;  %v4266_v24 = vrot.slane %v14813_v34, 2  ;;  %v4425_v50 = vld [vmem:[%s17492_s3 + $0x200] sm:$0xff]  ;;  %v4426_v56 = vld [vmem:[%s17492_s3 + $0x208] sm:$0xff] }
 0x512   : > { %17828 = vst [vmem:[#allocation32_spill] sm:$0xff] %v15038_v5  ;;  %4719 = vmatprep.mubr.f32.mxu1 %v15038_v5  ;;  %17829 = vst [vmem:[#allocation4_spill] sm:$0xff] %v15049_v35  ;;  %v11428_v5 = vld [vmem:[#allocation2 + $0x18] sm:$0xff]  ;;  %v10671_v18 = vpack.c.bf16 %v4426_v56, %v4425_v50  ;;  %v4275_v50 = vrot.slane %v14870_v52, 2 }
 0x513   : > { %4720 = vmatmul.mubr.f32.gmra.mrb[156].mxu1 %v15017_v60  ;;  %10097 = vmatmul.mubr.f32.gmra.mrb[212].mxu0 %v15043_v27  ;;  %v15076_v51 = vsel %vm671_vm1, %v4265_v17, %v4266_v24  ;;  %v4427_v17 = vld [vmem:[%s17492_s3 + $0x210] sm:$0xff]  ;;  %v4220_v25 = vrot.slane %v11428_v5, 2 }
 0x514   : > { %4724 = vmatprep.mubr.f32.mxu1 %v15049_v35  ;;  %10099 = vmatprep.mubr.f32.mxu0 %v15052_v49  ;;  %v4268_v35 = vrot.slane %v14816_v48, 2  ;;  %v4270_v48 = vrot.slane %v14838_v21, 2  ;;  %v10674_v56 = vpack.c.bf16 %v4428_v37, %v4427_v17  ;;  %v4281_v37 = vrot.slane %v14929_v31, 2 }
 0x516   : > { %v15081_v62 = vsel %vm671_vm1, %v4266_v24, %v4268_v35  ;;  %v11430_v35 = vld [vmem:[#allocation2 + $0x20] sm:$0xff]  ;;  %v15095_v24 = vsel %vm671_vm1, %v4270_v48, %v4271_v41  ;;  %v15114_v48 = vsel %vm671_vm1, %v4275_v50, %v4276_v39  ;;  %v11431_v41 = vld [vmem:[#allocation2 + $0x30] sm:$0xff]  ;;  %v4223_v50 = vrot.slane %v11432_v8, 2 }
 0x517   : > { %4725 = vmatmul.mubr.f32.gmra.mrb[158].mxu1 %v15025_v29  ;;  %10100 = vmatmul.mubr.f32.gmra.mrb[214].mxu0 %v15070_v30  ;;  %v4221_v28 = vrot.slane %v11430_v35, 2  ;;  %v4286_v8 = vrot.slane %v14980_v53, 2 }
 0x518   : > { %4794 = vmatprep.mubr.f32.mxu1 %v11428_v5  ;;  %10102 = vmatprep.mubr.f32.mxu0 %v15076_v51  ;;  %v4431_v5 = vld [vmem:[%s17492_s3 + $0x230] sm:$0xff] }
 0x51b   : > { %4795 = vmatmul.mubr.f32.vlgmr.msra.gmra.mrb[96].mxu1 %v15060_v23  ;;  %10103 = vmatmul.mubr.f32.gmra.mrb[216].mxu0 %v15081_v62 }
 0x51c   : > { %4799 = vmatprep.mubr.f32.mxu1 %v11430_v35  ;;  %10672 = vmatpush1.bf16.msra.mxu1 %v10671_v18  ;;  %v4429_v18 = vld [vmem:[%s17492_s3 + $0x220] sm:$0xff]  ;;  %v15120_v35 = vsel %vm671_vm1, %v4220_v25, %v4221_v28  ;;  %v4288_v25 = vrot.slane %v14984_v14, 2  ;;  %v11434_v14 = vld [vmem:[#allocation2 + $0x48] sm:$0xff] }
 0x51d   : > { %10105 = vmatprep.mubr.f32.mxu0 %v15095_v24  ;;  %10673 = vmatprep.subr.bf16.mxu1 %v17704_v0  ;;  %v10677_v17 = vpack.c.bf16 %v4430_v36, %v4429_v18  ;;  %17831 = vst [vmem:[#allocation5_spill] sm:$0xff] %v15120_v35  ;;  %v15142_v36 = vsel %vm671_vm1, %v4221_v28, %v4223_v50 }
 0x51e   : > { %17832 = vst [vmem:[#allocation34_spill] sm:$0xff] %v15142_v36 }
 0x51f   : > { %4800 = vmatmul.mubr.f32.gmra.mrb[98].mxu1 %v4219_v55  ;;  %10106 = vmatmul.mubr.f32.gmra.mrb[218].mxu0 %v15103_v61  ;;  %v15123_v55 = vsel %vm671_vm1, %v4276_v39, %v4278_v10  ;;  %v15136_v10 = vsel %vm671_vm1, %v4280_v33, %v4281_v37  ;;  %v4285_v39 = vrot.slane %v14965_v1, 2  ;;  %v4433_v33 = vld [vmem:[%s17492_s3 + $0x240] sm:$0xff] }
 0x520   : > { %4804 = vmatprep.mubr.f32.mxu1 %v11431_v41  ;;  %10108 = vmatprep.mubr.f32.mxu0 %v15114_v48  ;;  %v15145_v41 = vsel %vm671_vm1, %v4281_v37, %v4283_v45  ;;  %v4291_v45 = vrot.slane %v15025_v29, 2  ;;  %v15162_v37 = vld [vmem:[#allocation2 + $0x188] sm:$0xff] }
 0x521   : > { %10675 = vmatpush1.bf16.msra.mxu1 %v10674_v56  ;;  %v4432_v56 = vld [vmem:[%s17492_s3 + $0x238] sm:$0xff]  ;;  %v15158_v28 = vsel %vm671_vm1, %v4285_v39, %v4286_v8  ;;  %v4435_v39 = vld [vmem:[%s17492_s3 + $0x250] sm:$0xff] }
 0x522   : > { %10676 = vmatprep.subr.bf16.mxu1 %v17704_v0  ;;  %v10680_v18 = vpack.c.bf16 %v4432_v56, %v4431_v5  ;;  %v15166_v5 = vsel %vm671_vm1, %v4286_v8, %v4288_v25  ;;  %v4293_v56 = vrot.slane %v15028_v59, 2  ;;  %v4338_v59 = vrot.slane %v15162_v37, 2  ;;  %v11435_v25 = vld [vmem:[#allocation2 + $0x50] sm:$0xff] }
 0x523   : > { %4805 = vmatmul.mubr.f32.gmra.mrb[100].mxu1 %v15120_v35  ;;  %10109 = vmatmul.mubr.f32.gmra.mrb[220].mxu0 %v15123_v55 }
 0x524   : > { %4809 = vmatprep.mubr.f32.mxu1 %v11433_v58  ;;  %10111 = vmatprep.mubr.f32.mxu0 %v15136_v10  ;;  %v4434_v58 = vld [vmem:[%s17492_s3 + $0x248] sm:$0xff]  ;;  %v15189_v35 = vsel %vm671_vm1, %v4291_v45, %v4293_v56 }
 0x525   : > { %10678 = vmatpush1.bf16.msra.mxu1 %v10677_v17  ;;  %v4290_v17 = vrot.slane %v15017_v60, 2  ;;  %v10683_v50 = vpack.c.bf16 %v4434_v58, %v4433_v33 }
 0x526   : > { %10679 = vmatprep.subr.bf16.mxu1 %v17704_v0 }
 0x527   : > { %4810 = vmatmul.mubr.f32.gmra.mrb[102].mxu1 %v15142_v36  ;;  %10112 = vmatmul.mubr.f32.gmra.mrb[222].mxu0 %v15145_v41  ;;  %v15169_v36 = vld [vmem:[#allocation2 + $0x180] sm:$0xff]  ;;  %v15181_v8 = vsel %vm671_vm1, %v4290_v17, %v4291_v45 }
 0x528   : > { %4814 = vmatprep.mubr.f32.mxu1 %v11434_v14  ;;  %10114 = vmatprep.mubr.f32.mxu0 %v15158_v28  ;;  %v4436_v14 = vld [vmem:[%s17492_s3 + $0x258] sm:$0xff]  ;;  %v4337_v33 = vrot.slane %v15169_v36, 2  ;;  %v4437_v17 = vld [vmem:[%s17492_s3 + $0x260] sm:$0xff] }
 0x529   : > { %10681 = vmatpush1.bf16.msra.mxu1 %v10680_v18  ;;  %v15184_v18 = vld [vmem:[#allocation2 + $0x190] sm:$0x3]  ;;  %v10686_v58 = vpack.c.bf16 %v4436_v14, %v4435_v39  ;;  %v11436_v45 = vld [vmem:[#allocation2 + $0x60] sm:$0xff] }
 0x52a   : > { %10682 = vmatprep.subr.bf16.mxu1 %v17704_v0  ;;  %v4439_v14 = vld [vmem:[%s17492_s3 + $0x270] sm:$0xff] }
 0x52b   : > { %4815 = vmatmul.mubr.f32.gmra.mrb[104].mxu1 %v14879_v7  ;;  %10115 = vmatmul.mubr.f32.gmra.mrb[224].mxu0 %v15166_v5  ;;  %v4340_v7 = vrot.slane %v15184_v18, 2 }
 0x52c   : > { %4819 = vmatprep.mubr.f32.mxu1 %v11435_v25  ;;  %10117 = vmatprep.mubr.f32.mxu0 %v15181_v8  ;;  %v4438_v25 = vld [vmem:[%s17492_s3 + $0x268] sm:$0xff] }
 0x52d   : > { %10684 = vmatpush1.bf16.msra.mxu1 %v10683_v50  ;;  %v15202_v50 = vsel %vm671_vm1, %v4337_v33, %v4338_v59  ;;  %v10689_v56 = vpack.c.bf16 %v4438_v25, %v4437_v17  ;;  %v15206_v39 = vsel %vm671_vm1, %v4338_v59, %v4340_v7  ;;  %v4440_v33 = vld [vmem:[%s17492_s3 + $0x278] sm:$0xff]  ;;  %v4441_v59 = vld [vmem:[%s17492_s3 + $0x280] sm:$0xff] }
 0x52e   : > { %10685 = vmatprep.subr.bf16.mxu1 %v17704_v0  ;;  %v10692_v7 = vpack.c.bf16 %v4440_v33, %v4439_v14  ;;  %v11438_v17 = vld [vmem:[#allocation2 + $0x78] sm:$0xff] }
 0x52f   : > { %4820 = vmatmul.mubr.f32.gmra.mrb[106].mxu1 %v14903_v38  ;;  %10118 = vmatmul.mubr.f32.gmra.mrb[226].mxu0 %v15189_v35  ;;  %v4444_v14 = vld [vmem:[%s17492_s3 + $0x298] sm:$0xff] }
 0x530   : > { %4824 = vmatprep.mubr.f32.mxu1 %v11436_v45  ;;  %10120 = vmatprep.mubr.f32.mxu0 %v15202_v50  ;;  %v11437_v45 = vld [vmem:[#allocation2 + $0x68] sm:$0xff] }
 0x531   : > { %10687 = vmatpush1.bf16.msra.mxu1 %v10686_v58  ;;  %v4442_v58 = vld [vmem:[%s17492_s3 + $0x288] sm:$0xff] }
 0x532   : > { %10688 = vmatprep.subr.bf16.mxu1 %v17704_v0  ;;  %v10695_v25 = vpack.c.bf16 %v4442_v58, %v4441_v59  ;;  %v4448_v58 = vld [vmem:[%s17492_s3 + $0x2b8] sm:$0xff] }
 0x533   : > { %4825 = vmatmul.mubr.f32.gmra.mrb[108].mxu1 %v14906_v44  ;;  %10121 = vmatmul.mubr.f32.gmra.mrb[228].mxu0 %v15206_v39 }
 0x534   : > { %4829 = vmatprep.mubr.f32.mxu1 %v11437_v45  ;;  %10123 = vmatprep.mubr.f32.mxu0 %v15060_v23  ;;  %v4445_v45 = vld [vmem:[%s17492_s3 + $0x2a0] sm:$0xff] }
 0x535   : > { %10690 = vmatpush1.bf16.msra.mxu1 %v10689_v56  ;;  %v4443_v56 = vld [vmem:[%s17492_s3 + $0x290] sm:$0xff] }
 0x536   : > { %10691 = vmatprep.subr.bf16.mxu1 %v17704_v0  ;;  %v10698_v33 = vpack.c.bf16 %v4444_v14, %v4443_v56  ;;  %v4452_v14 = vld [vmem:[%s17492_s3 + $0x2d8] sm:$0xff] }
 0x537   : > { %4830 = vmatmul.mubr.f32.gmra.mrb[110].mxu1 %v14924_v3 }
 0x538   : > { %4834 = vmatprep.mubr.f32.mxu1 %v11438_v17 }
 0x539   : > { %10693 = vmatpush1.bf16.msra.mxu1 %v10692_v7  ;;  %v4446_v7 = vld [vmem:[%s17492_s3 + $0x2a8] sm:$0xff] }
 0x53a   : > { %10694 = vmatprep.subr.bf16.mxu1 %v17704_v0  ;;  %v10701_v59 = vpack.c.bf16 %v4446_v7, %v4445_v45  ;;  %v4454_v45 = vld [vmem:[%s17492_s3 + $0x2e8] sm:$0xff] }
 0x53b   : > { %4835 = vmatmul.mubr.f32.gmra.mrb[112].mxu1 %v14927_v46 }
 0x53c   : > { %4839 = vmatprep.mubr.f32.mxu1 %v14646_v47  ;;  %v4447_v47 = vld [vmem:[%s17492_s3 + $0x2b0] sm:$0xff] }
 0x53d   : > { %10696 = vmatpush1.bf16.msra.mxu1 %v10695_v25  ;;  %v10704_v17 = vpack.c.bf16 %v4448_v58, %v4447_v47  ;;  %v4450_v25 = vld [vmem:[%s17492_s3 + $0x2c8] sm:$0xff] }
 0x53e   : > { %10697 = vmatprep.subr.bf16.mxu1 %v17704_v0 }
 0x53f   : > { %4840 = vmatmul.mubr.f32.gmra.mrb[114].mxu1 %v14952_v20 }
 0x540   : > { %4844 = vmatprep.mubr.f32.mxu1 %v14677_v40  ;;  %v4449_v40 = vld [vmem:[%s17492_s3 + $0x2c0] sm:$0xff] }
 0x541   : > { %10699 = vmatpush1.bf16.msra.mxu1 %v10698_v33  ;;  %v10707_v56 = vpack.c.bf16 %v4450_v25, %v4449_v40 }
 0x542   : > { %10700 = vmatprep.subr.bf16.mxu1 %v17704_v0 }
 0x543   : > { %4845 = vmatmul.mubr.f32.gmra.mrb[116].mxu1 %v14955_v19 }
 0x544   : > { %4849 = vmatprep.mubr.f32.mxu1 %v14683_v54  ;;  %v4451_v54 = vld [vmem:[%s17492_s3 + $0x2d0] sm:$0xff] }
 0x545   : > { %10702 = vmatpush1.bf16.msra.mxu1 %v10701_v59  ;;  %v10710_v33 = vpack.c.bf16 %v4452_v14, %v4451_v54  ;;  %v4456_v59 = vld [vmem:[%s17492_s3 + $0x2f8] sm:$0xff]  ;;  %v17834_v14 = vld [vmem:[#allocation13_spill] sm:$0xff] }
 0x546   : > { %10703 = vmatprep.subr.bf16.mxu1 %v17704_v0 }
 0x547   : > { %4850 = vmatmul.mubr.f32.gmra.mrb[118].mxu1 %v14975_v15 }
 0x548   : > { %4854 = vmatprep.mubr.f32.mxu1 %v14714_v26  ;;  %v4453_v26 = vld [vmem:[%s17492_s3 + $0x2e0] sm:$0xff] }
 0x549   : > { %10705 = vmatpush1.bf16.msra.mxu1 %v10704_v17  ;;  %v10713_v7 = vpack.c.bf16 %v4454_v45, %v4453_v26  ;;  %v17835_v26 = vld [vmem:[#allocation34_spill] sm:$0xff]  ;;  %v17836_v45 = vld [vmem:[#allocation15_spill] sm:$0xff] }
 0x54a   : > { %10706 = vmatprep.subr.bf16.mxu1 %v17704_v0 }
 0x54b   : > { %4855 = vmatmul.mubr.f32.gmra.mrb[120].mxu1 %v14978_v22 }
 0x54c   : > { %4859 = vmatprep.mubr.f32.mxu1 %v14720_v4  ;;  %v4455_v4 = vld [vmem:[%s17492_s3 + $0x2f0] sm:$0xff] }
 0x54d   : > { %10708 = vmatpush1.bf16.msra.mxu1 %v10707_v56  ;;  %v10716_v47 = vpack.c.bf16 %v4456_v59, %v4455_v4  ;;  %v17833_v56 = vld [vmem:[#allocation5_spill] sm:$0xff]  ;;  %v17838_v4 = vld [vmem:[#allocation14_spill] sm:$0xff] }
 0x54e   : > { %10709 = vmatprep.subr.bf16.mxu1 %v17704_v0 }
 0x54f   : > { %4860 = vmatmul.mubr.f32.gmra.mrb[122].mxu1 %v15002_v2 }
 0x550   : > { %4864 = vmatprep.mubr.f32.mxu1 %v14745_v42 }
 0x551   : > { %10711 = vmatpush1.bf16.msra.mxu1 %v10710_v33 }
 0x552   : > { %10712 = vmatprep.subr.bf16.mxu1 %v17704_v0 }
 0x553   : > { %4865 = vmatmul.mubr.f32.gmra.mrb[124].mxu1 %v15012_v16 }
 0x554   : > { %4869 = vmatprep.mubr.f32.mxu1 %v14751_v13 }
 0x555   : > { %10714 = vmatpush1.bf16.msra.mxu1 %v10713_v7 }
 0x556   : > { %10715 = vmatprep.subr.bf16.mxu1 %v17704_v0 }
 0x557   : > { %4870 = vmatmul.mubr.f32.gmra.mrb[126].mxu1 %v15020_v6 }
 0x558   : > { %4874 = vmatprep.mubr.f32.mxu1 %v14776_v12 }
 0x559   : > { %10717 = vmatpush1.bf16.msra.mxu1 %v10716_v47  ;;  %v17839_v47 = vld [vmem:[#allocation23_spill] sm:$0xff] }
 0x55a   : > { %10798 = vmatprep.subr.bf16.mxu1 %v17704_v0 }
 0x55b   : > { %4875 = vmatmul.mubr.f32.gmra.mrb[128].mxu1 %v15023_v11 }
 0x55c   : > { %4879 = vmatprep.mubr.f32.mxu1 %v14782_v43 }
 0x55f   : > { %4880 = vmatmul.mubr.f32.gmra.mrb[130].mxu1 %v15043_v27 }
 0x560   : > { %4884 = vmatprep.mubr.f32.mxu1 %v14807_v32 }
 0x563   : > { %4885 = vmatmul.mubr.f32.gmra.mrb[132].mxu1 %v15052_v49 }
 0x564   : > { %4889 = vmatprep.mubr.f32.mxu1 %v14813_v34 }
 0x567   : > { %4890 = vmatmul.mubr.f32.gmra.mrb[134].mxu1 %v15070_v30 }
 0x568   : > { %4894 = vmatprep.mubr.f32.mxu1 %v14838_v21 }
 0x56b   : > { %4895 = vmatmul.mubr.f32.gmra.mrb[136].mxu1 %v15076_v51 }
 0x56c   : > { %4899 = vmatprep.mubr.f32.mxu1 %v14844_v9 }
 0x56f   : > { %4900 = vmatmul.mubr.f32.gmra.mrb[138].mxu1 %v15081_v62 }
 0x570   : > { %4904 = vmatprep.mubr.f32.mxu1 %v14870_v52 }
 0x573   : > { %4905 = vmatmul.mubr.f32.gmra.mrb[140].mxu1 %v15095_v24 }
 0x574   : > { %4909 = vmatprep.mubr.f32.mxu1 %v14881_v63 }
 0x577   : > { %4910 = vmatmul.mubr.f32.gmra.mrb[142].mxu1 %v15103_v61 }
 0x578   : > { %4914 = vmatprep.mubr.f32.mxu1 %v14916_v57 }
 0x57b   : > { %4915 = vmatmul.mubr.f32.gmra.mrb[144].mxu1 %v15114_v48 }
 0x57c   : > { %4919 = vmatprep.mubr.f32.mxu1 %v14929_v31 }
 0x57e   : > { %v15311_v42 = vpop.f32.mrb[160].mxu0 }
 0x57f   : > { %4920 = vmatmul.mubr.f32.gmra.mrb[146].mxu1 %v15123_v55  ;;  %v5248_v13 = vpop.f32.mrb[161].mxu0 }
 0x580   : > { %4924 = vmatprep.mubr.f32.mxu1 %v14965_v1  ;;  %v17840_v13 = vld [vmem:[#allocation16_spill] sm:$0xff] }
 0x582   : > { %v15315_v12 = vpop.f32.mrb[162].mxu0 }
 0x583   : > { %4925 = vmatmul.mubr.f32.gmra.mrb[148].mxu1 %v15136_v10  ;;  %v5253_v43 = vpop.f32.mrb[163].mxu0 }
 0x584   : > { %4929 = vmatprep.mubr.f32.mxu1 %v14980_v53 }
 0x586   : > { %v15319_v32 = vpop.f32.mrb[164].mxu0 }
 0x587   : > { %4930 = vmatmul.mubr.f32.gmra.mrb[150].mxu1 %v15145_v41  ;;  %v5258_v34 = vpop.f32.mrb[165].mxu0 }
 0x588   : > { %4934 = vmatprep.mubr.f32.mxu1 %v15017_v60  ;;  %v17842_v34 = vld [vmem:[#allocation36_spill] sm:$0xff] }
 0x58a   : > { %v15323_v21 = vpop.f32.mrb[166].mxu0 }
 0x58b   : > { %4935 = vmatmul.mubr.f32.gmra.mrb[152].mxu1 %v15158_v28  ;;  %v5263_v9 = vpop.f32.mrb[167].mxu0 }
 0x58c   : > { %4939 = vmatprep.mubr.f32.mxu1 %v15025_v29 }
 0x58e   : > { %v15327_v52 = vpop.f32.mrb[168].mxu0 }
 0x58f   : > { %4940 = vmatmul.mubr.f32.gmra.mrb[154].mxu1 %v15166_v5  ;;  %v5268_v63 = vpop.f32.mrb[169].mxu0 }
 0x590   : > { %4944 = vmatprep.mubr.f32.mxu1 %v15169_v36  ;;  %v17843_v63 = vld [vmem:[#allocation17_spill] sm:$0xff] }
 0x592   : > { %v15331_v58 = vpop.f32.mrb[170].mxu0 }
 0x593   : > { %4945 = vmatmul.mubr.f32.gmra.mrb[156].mxu1 %v15181_v8  ;;  %v5273_v17 = vpop.f32.mrb[171].mxu0 }
 0x594   : > { %4949 = vmatprep.mubr.f32.mxu1 %v15162_v37 }
 0x596   : > { %v15335_v40 = vpop.f32.mrb[172].mxu0 }
 0x597   : > { %4950 = vmatmul.mubr.f32.gmra.mrb[158].mxu1 %v15189_v35  ;;  %v5278_v25 = vpop.f32.mrb[173].mxu0 }
 0x598   : > { %5019 = vmatprep.mubr.f32.mxu1 %v17833_v56  ;;  %v17845_v25 = vld [vmem:[#allocation37_spill] sm:$0xff] }
 0x59a   : > { %v15339_v54 = vpop.f32.mrb[174].mxu0 }
 0x59b   : > { %5020 = vmatmul.mubr.f32.vlgmr.msra.gmra.mrb[96].mxu1 %v17834_v14  ;;  %v5283_v33 = vpop.f32.mrb[175].mxu0  ;;  %v17846_v14 = vld [vmem:[#allocation18_spill] sm:$0xff] }
 0x59c   : > { %5024 = vmatprep.mubr.f32.mxu1 %v17835_v26  ;;  %10814 = vmatpush1.bf16.msra.mxu1 %v17836_v45  ;;  %v17848_v26 = vld [vmem:[#allocation38_spill] sm:$0xff]  ;;  %v17849_v45 = vld [vmem:[#allocation19_spill] sm:$0xff] }
 0x59d   : > { %10799 = vmatprep.subr.bf16.mxu1 %v17704_v0 }
 0x59e   : > { %v15345_v7 = vpop.f32.mrb[176].mxu0 }
 0x59f   : > { %17837 = vst [vmem:[#allocation5_spill] sm:$0xff] %v15345_v7  ;;  %5025 = vmatmul.mubr.f32.gmra.mrb[98].mxu1 %v17838_v4  ;;  %v5288_v59 = vpop.f32.mrb[177].mxu0 }
 0x5a0   : > { %5029 = vmatprep.mubr.f32.mxu1 %v17839_v47  ;;  %10815 = vmatpush1.bf16.msra.mxu1 %v17840_v13  ;;  %v17851_v59 = vld [vmem:[#allocation39_spill] sm:$0xff]  ;;  %v17852_v47 = vld [vmem:[#allocation20_spill] sm:$0xff] }
 0x5a1   : > { %10800 = vmatprep.subr.bf16.mxu1 %v17704_v0 }
 0x5a2   : > { %v15351_v43 = vpop.f32.mrb[178].mxu0 }
 0x5a3   : > { %17841 = vst [vmem:[#allocation13_spill] sm:$0xff] %v15351_v43  ;;  %5030 = vmatmul.mubr.f32.gmra.mrb[100].mxu1 %v17842_v34  ;;  %v5293_v9 = vpop.f32.mrb[179].mxu0  ;;  %v17854_v34 = vld [vmem:[#allocation40_spill] sm:$0xff] }
 0x5a4   : > { %5034 = vmatprep.mubr.f32.mxu1 %v14903_v38  ;;  %10816 = vmatpush1.bf16.msra.mxu1 %v17843_v63  ;;  %v17855_v9 = vld [vmem:[#allocation21_spill] sm:$0xff] }
 0x5a5   : > { %10801 = vmatprep.subr.bf16.mxu1 %v17704_v0 }
 0x5a6   : > { %v15357_v17 = vpop.f32.mrb[180].mxu0 }
 0x5a7   : > { %17844 = vst [vmem:[#allocation34_spill] sm:$0xff] %v15357_v17  ;;  %5035 = vmatmul.mubr.f32.gmra.mrb[102].mxu1 %v17845_v25  ;;  %v5298_v56 = vpop.f32.mrb[181].mxu0  ;;  %v17857_v25 = vld [vmem:[#allocation41_spill] sm:$0xff] }
 0x5a8   : > { %5039 = vmatprep.mubr.f32.mxu1 %v14906_v44  ;;  %10817 = vmatpush1.bf16.msra.mxu1 %v17846_v14  ;;  %v17858_v56 = vld [vmem:[#allocation6_spill] sm:$0xff]  ;;  %v15700_v17 = vld [vmem:[%s17497_s8] ss:$0 sm:$0xff] }
 0x5a9   : > { %10802 = vmatprep.subr.bf16.mxu1 %v17704_v0 }
 0x5aa   : > { %v15363_v33 = vpop.f32.mrb[182].mxu0 }
 0x5ab   : > { %17847 = vst [vmem:[#allocation15_spill] sm:$0xff] %v15363_v33  ;;  %5040 = vmatmul.mubr.f32.gmra.mrb[104].mxu1 %v17848_v26  ;;  %v5303_v38 = vpop.f32.mrb[183].mxu0  ;;  %v17860_v26 = vld [vmem:[#allocation42_spill] sm:$0xff] }
 0x5ac   : > { %5044 = vmatprep.mubr.f32.mxu1 %v14924_v3  ;;  %10818 = vmatpush1.bf16.msra.mxu1 %v17849_v45  ;;  %v17861_v38 = vld [vmem:[#allocation7_spill] sm:$0xff] }
 0x5ad   : > { %10803 = vmatprep.subr.bf16.mxu1 %v17704_v0 }
 0x5ae   : > { %v15369_v4 = vpop.f32.mrb[184].mxu0 }
 0x5af   : > { %17850 = vst [vmem:[#allocation14_spill] sm:$0xff] %v15369_v4  ;;  %5045 = vmatmul.mubr.f32.gmra.mrb[106].mxu1 %v17851_v59  ;;  %v5308_v44 = vpop.f32.mrb[185].mxu0  ;;  %v15395_v59 = vld [vmem:[#allocation2 + $0x1a8] sm:$0x3] }
 0x5b0   : > { %5049 = vmatprep.mubr.f32.mxu1 %v14927_v46  ;;  %10819 = vmatpush1.bf16.msra.mxu1 %v17852_v47  ;;  %v4357_v47 = vrot.slane %v15395_v59, 2 }
 0x5b1   : > { %10804 = vmatprep.subr.bf16.mxu1 %v17704_v0 }
 0x5b2   : > { %v15375_v13 = vpop.f32.mrb[186].mxu0 }
 0x5b3   : > { %17853 = vst [vmem:[#allocation23_spill] sm:$0xff] %v15375_v13  ;;  %5050 = vmatmul.mubr.f32.gmra.mrb[108].mxu1 %v17854_v34  ;;  %v5313_v3 = vpop.f32.mrb[187].mxu0  ;;  %v17864_v34 = vld [vmem:[#allocation8_spill] sm:$0xff] }
 0x5b4   : > { %5054 = vmatprep.mubr.f32.mxu1 %v14952_v20  ;;  %10820 = vmatpush1.bf16.msra.mxu1 %v17855_v9  ;;  %v17866_v9 = vld [vmem:[#allocation44_spill] sm:$0xff] }
 0x5b5   : > { %10805 = vmatprep.subr.bf16.mxu1 %v17704_v0 }
 0x5b6   : > { %v15381_v63 = vpop.f32.mrb[188].mxu0 }
 0x5b7   : > { %17856 = vst [vmem:[#allocation16_spill] sm:$0xff] %v15381_v63  ;;  %5055 = vmatmul.mubr.f32.gmra.mrb[110].mxu1 %v17857_v25  ;;  %v5318_v46 = vpop.f32.mrb[189].mxu0 }
 0x5b8   : > { %5059 = vmatprep.mubr.f32.mxu1 %v14955_v19  ;;  %10821 = vmatpush1.bf16.msra.mxu1 %v17858_v56  ;;  %v17863_v19 = vld [vmem:[#allocation43_spill] sm:$0xff]  ;;  %v17867_v46 = vld [vmem:[#allocation9_spill] sm:$0xff] }
 0x5b9   : > { %10806 = vmatprep.subr.bf16.mxu1 %v17704_v0  ;;  %v17869_v56 = vld [vmem:[#allocation45_spill] sm:$0xff] }
 0x5ba   : > { %v15387_v14 = vpop.f32.mrb[190].mxu0 }
 0x5bb   : > { %17859 = vst [vmem:[#allocation36_spill] sm:$0xff] %v15387_v14  ;;  %5060 = vmatmul.mubr.f32.gmra.mrb[112].mxu1 %v17860_v26  ;;  %v5323_v20 = vpop.f32.mrb[191].mxu0 }
 0x5bc   : > { %5064 = vmatprep.mubr.f32.mxu1 %v14975_v15  ;;  %10822 = vmatpush1.bf16.msra.mxu1 %v17861_v38  ;;  %v4358_v15 = vsel %vm671_vm1, %v15060_v23, %v4357_v47  ;;  %v17870_v23 = vld [vmem:[#allocation10_spill] sm:$0xff]  ;;  %v17874_v47 = vld [vmem:[#allocation47_spill] sm:$0xff] }
 0x5bd   : > { %10807 = vmatprep.subr.bf16.mxu1 %v17704_v0  ;;  %10124 = vmatmul.mubr.f32.gmra.mrb[230].mxu0 %v4358_v15  ;;  %v17872_v38 = vld [vmem:[#allocation46_spill] sm:$0xff] }
 0x5be   : > { %v15393_v45 = vpop.f32.mrb[192].mxu0 }
 0x5bf   : > { %17862 = vst [vmem:[#allocation17_spill] sm:$0xff] %v15393_v45  ;;  %5065 = vmatmul.mubr.f32.gmra.mrb[114].mxu1 %v17863_v19  ;;  %v5328_v44 = vpop.f32.mrb[193].mxu0  ;;  %v17873_v19 = vld [vmem:[#allocation11_spill] sm:$0xff] }
 0x5c0   : > { %5069 = vmatprep.mubr.f32.mxu1 %v14978_v22  ;;  %10823 = vmatpush1.bf16.msra.mxu1 %v17864_v34  ;;  %v17875_v34 = vld [vmem:[#allocation12_spill] sm:$0xff] }
 0x5c1   : > { %10808 = vmatprep.subr.bf16.mxu1 %v17704_v0 }
 0x5c2   : > { %v15404_v3 = vpop.f32.mrb[194].mxu0 }
 0x5c3   : > { %17865 = vst [vmem:[#allocation37_spill] sm:$0xff] %v15404_v3  ;;  %5070 = vmatmul.mubr.f32.gmra.mrb[116].mxu1 %v17866_v9  ;;  %v5333_v25 = vpop.f32.mrb[195].mxu0  ;;  %v17876_v9 = vld [vmem:[#allocation48_spill] sm:$0xff] }
 0x5c4   : > { %5074 = vmatprep.mubr.f32.mxu1 %v15002_v2  ;;  %10824 = vmatpush1.bf16.msra.mxu1 %v17867_v46  ;;  %v17877_v25 = vld [vmem:[#allocation26_spill] sm:$0xff] }
 0x5c5   : > { %10809 = vmatprep.subr.bf16.mxu1 %v17704_v0 }
 0x5c6   : > { %v15410_v22 = vpop.f32.mrb[196].mxu0 }
 0x5c7   : > { %17868 = vst [vmem:[#allocation18_spill] sm:$0xff] %v15410_v22  ;;  %5075 = vmatmul.mubr.f32.gmra.mrb[118].mxu1 %v17869_v56  ;;  %v5338_v26 = vpop.f32.mrb[197].mxu0  ;;  %v17878_v56 = vld [vmem:[#allocation49_spill] sm:$0xff]  ;;  %v17904_v22 = vld [vmem:[#allocation30_spill] sm:$0xff] }
 0x5c8   : > { %5079 = vmatprep.mubr.f32.mxu1 %v15012_v16  ;;  %10825 = vmatpush1.bf16.msra.mxu1 %v17870_v23  ;;  %v17879_v26 = vld [vmem:[#allocation27_spill] sm:$0xff] }
 0x5c9   : > { %10810 = vmatprep.subr.bf16.mxu1 %v17704_v0 }
 0x5ca   : > { %v15416_v20 = vpop.f32.mrb[198].mxu0 }
 0x5cb   : > { %17871 = vst [vmem:[#allocation38_spill] sm:$0xff] %v15416_v20  ;;  %5080 = vmatmul.mubr.f32.gmra.mrb[120].mxu1 %v17872_v38  ;;  %v5343_v2 = vpop.f32.mrb[199].mxu0  ;;  %v17881_v38 = vld [vmem:[#allocation50_spill] sm:$0xff]  ;;  %v17901_v20 = vld [vmem:[#allocation24_spill] sm:$0xff] }
 0x5cc   : > { %5084 = vmatprep.mubr.f32.mxu1 %v15020_v6  ;;  %10826 = vmatpush1.bf16.msra.mxu1 %v17873_v19 }
 0x5cd   : > { %10811 = vmatprep.subr.bf16.mxu1 %v17704_v0 }
 0x5ce   : > { %v15422_v44 = vpop.f32.mrb[200].mxu0 }
 0x5cf   : > { %5085 = vmatmul.mubr.f32.gmra.mrb[122].mxu1 %v17874_v47  ;;  %v15425_v16 = vpop.f32.mrb[201].mxu0 }
 0x5d0   : > { %5089 = vmatprep.mubr.f32.mxu1 %v15023_v11  ;;  %10827 = vmatpush1.bf16.msra.mxu1 %v17875_v34 }
 0x5d1   : > { %10812 = vmatprep.subr.bf16.mxu1 %v17704_v0 }
 0x5d2   : > { %v15430_v15 = vpop.f32.mrb[202].mxu0 }
 0x5d3   : > { %5090 = vmatmul.mubr.f32.gmra.mrb[124].mxu1 %v17876_v9  ;;  %v15433_v6 = vpop.f32.mrb[203].mxu0 }
 0x5d4   : > { %5094 = vmatprep.mubr.f32.mxu1 %v15043_v27  ;;  %10828 = vmatpush1.bf16.msra.mxu1 %v17877_v25  ;;  %v17889_v25 = vld [vmem:[#allocation29_spill] sm:$0xff] }
 0x5d5   : > { %10813 = vmatprep.subr.bf16.mxu1 %v17704_v0  ;;  %v17883_v0 = vld [vmem:[#allocation51_spill] sm:$0xff] }
 0x5d6   : > { %v15438_v46 = vpop.f32.mrb[204].mxu0 }
 0x5d7   : > { %5095 = vmatmul.mubr.f32.gmra.mrb[126].mxu1 %v17878_v56  ;;  %v15441_v11 = vpop.f32.mrb[205].mxu0 }
 0x5d8   : > { %5099 = vmatprep.mubr.f32.mxu1 %v15052_v49  ;;  %10829 = vmatpush1.bf16.msra.mxu1 %v17879_v26  ;;  %v17886_v49 = vld [vmem:[#allocation52_spill] sm:$0xff]  ;;  %v17892_v26 = vld [vmem:[#allocation22_spill] sm:$0xff] }
 0x5da   : > { %v15445_v23 = vpop.f32.mrb[206].mxu0 }
 0x5db   : > { %17880 = vst [vmem:[#allocation19_spill] sm:$0xff] %v15445_v23  ;;  %5100 = vmatmul.mubr.f32.gmra.mrb[128].mxu1 %v17881_v38  ;;  %v15448_v2 = vpop.f32.mrb[207].mxu0 }
 0x5dc   : > { %5104 = vmatprep.mubr.f32.mxu1 %v15070_v30 }
 0x5de   : > { %v15451_v27 = vpop.f32.mrb[208].mxu0 }
 0x5df   : > { %17882 = vst [vmem:[#allocation39_spill] sm:$0xff] %v15451_v27  ;;  %5105 = vmatmul.mubr.f32.gmra.mrb[130].mxu1 %v17883_v0  ;;  %v15454_v19 = vpop.f32.mrb[209].mxu0  ;;  %v17895_v0 = vld [vmem:[#allocation28_spill] sm:$0xff] }
 0x5e0   : > { %17884 = vst [vmem:[#allocation20_spill] sm:$0xff] %v15454_v19  ;;  %5109 = vmatprep.mubr.f32.mxu1 %v15076_v51 }
 0x5e2   : > { %v15457_v47 = vpop.f32.mrb[210].mxu0 }
 0x5e3   : > { %17885 = vst [vmem:[#allocation40_spill] sm:$0xff] %v15457_v47  ;;  %5110 = vmatmul.mubr.f32.gmra.mrb[132].mxu1 %v17886_v49  ;;  %v15460_v34 = vpop.f32.mrb[211].mxu0 }
 0x5e4   : > { %17887 = vst [vmem:[#allocation21_spill] sm:$0xff] %v15460_v34  ;;  %5114 = vmatprep.mubr.f32.mxu1 %v15081_v62 }
 0x5e6   : > { %v15463_v9 = vpop.f32.mrb[212].mxu0 }
 0x5e7   : > { %17888 = vst [vmem:[#allocation41_spill] sm:$0xff] %v15463_v9  ;;  %5115 = vmatmul.mubr.f32.gmra.mrb[134].mxu1 %v17889_v25  ;;  %v15466_v30 = vpop.f32.mrb[213].mxu0  ;;  %v17898_v25 = vld [vmem:[#allocation31_spill] sm:$0xff] }
 0x5e8   : > { %17890 = vst [vmem:[#allocation6_spill] sm:$0xff] %v15466_v30  ;;  %5119 = vmatprep.mubr.f32.mxu1 %v15095_v24 }
 0x5ea   : > { %v15469_v56 = vpop.f32.mrb[214].mxu0 }
 0x5eb   : > { %17891 = vst [vmem:[#allocation42_spill] sm:$0xff] %v15469_v56  ;;  %5120 = vmatmul.mubr.f32.gmra.mrb[136].mxu1 %v17892_v26  ;;  %v15472_v51 = vpop.f32.mrb[215].mxu0 }
 0x5ec   : > { %17893 = vst [vmem:[#allocation7_spill] sm:$0xff] %v15472_v51  ;;  %5124 = vmatprep.mubr.f32.mxu1 %v15103_v61 }
 0x5ee   : > { %v15475_v38 = vpop.f32.mrb[216].mxu0 }
 0x5ef   : > { %17894 = vst [vmem:[#allocation43_spill] sm:$0xff] %v15475_v38  ;;  %5125 = vmatmul.mubr.f32.gmra.mrb[138].mxu1 %v17895_v0  ;;  %v15478_v62 = vpop.f32.mrb[217].mxu0 }
 0x5f0   : > { %17896 = vst [vmem:[#allocation8_spill] sm:$0xff] %v15478_v62  ;;  %5129 = vmatprep.mubr.f32.mxu1 %v15114_v48 }
 0x5f2   : > { %v15481_v49 = vpop.f32.mrb[218].mxu0 }
 0x5f3   : > { %17897 = vst [vmem:[#allocation44_spill] sm:$0xff] %v15481_v49  ;;  %5130 = vmatmul.mubr.f32.gmra.mrb[140].mxu1 %v17898_v25  ;;  %v15484_v24 = vpop.f32.mrb[219].mxu0 }
 0x5f4   : > { %17899 = vst [vmem:[#allocation9_spill] sm:$0xff] %v15484_v24  ;;  %5134 = vmatprep.mubr.f32.mxu1 %v15123_v55  ;;  %v17907_v24 = vld [vmem:[#allocation25_spill] sm:$0xff] }
 0x5f6   : > { %v15487_v26 = vpop.f32.mrb[220].mxu0 }
 0x5f7   : > { %17900 = vst [vmem:[#allocation45_spill] sm:$0xff] %v15487_v26  ;;  %5135 = vmatmul.mubr.f32.gmra.mrb[142].mxu1 %v17901_v20  ;;  %v15490_v61 = vpop.f32.mrb[221].mxu0 }
 0x5f8   : > { %17902 = vst [vmem:[#allocation10_spill] sm:$0xff] %v15490_v61  ;;  %5139 = vmatprep.mubr.f32.mxu1 %v15136_v10  ;;  %v17910_v61 = vld [vmem:[#allocation33_spill] sm:$0xff] }
 0x5fa   : > { %v15493_v0 = vpop.f32.mrb[222].mxu0 }
 0x5fb   : > { %17903 = vst [vmem:[#allocation46_spill] sm:$0xff] %v15493_v0  ;;  %5140 = vmatmul.mubr.f32.gmra.mrb[144].mxu1 %v17904_v22  ;;  %v15496_v48 = vpop.f32.mrb[223].mxu0 }
 0x5fc   : > { %17905 = vst [vmem:[#allocation11_spill] sm:$0xff] %v15496_v48  ;;  %5144 = vmatprep.mubr.f32.mxu1 %v15145_v41  ;;  %v17913_v48 = vld [vmem:[#allocation3_spill] sm:$0xff] }
 0x5fe   : > { %v15499_v49 = vpop.f32.mrb[224].mxu0 }
 0x5ff   : > { %17906 = vst [vmem:[#allocation47_spill] sm:$0xff] %v15499_v49  ;;  %5145 = vmatmul.mubr.f32.gmra.mrb[146].mxu1 %v17907_v24  ;;  %v15502_v55 = vpop.f32.mrb[225].mxu0  ;;  %v17915_v49 = vld [vmem:[#allocation32_spill] sm:$0xff] }
 0x600   : > { %17908 = vst [vmem:[#allocation12_spill] sm:$0xff] %v15502_v55  ;;  %5149 = vmatprep.mubr.f32.mxu1 %v15158_v28  ;;  %v4331_v28 = vrot.slane %v15162_v37, 1 }
 0x602   : > { %v15505_v26 = vpop.f32.mrb[226].mxu0 }
 0x603   : > { %17909 = vst [vmem:[#allocation48_spill] sm:$0xff] %v15505_v26  ;;  %5150 = vmatmul.mubr.f32.gmra.mrb[148].mxu1 %v17910_v61  ;;  %v15508_v10 = vpop.f32.mrb[227].mxu0  ;;  %v17916_v26 = vld [vmem:[#allocation4_spill] sm:$0xff] }
 0x604   : > { %17911 = vst [vmem:[#allocation26_spill] sm:$0xff] %v15508_v10  ;;  %5154 = vmatprep.mubr.f32.mxu1 %v15166_v5  ;;  %v4330_v5 = vrot.slane %v15169_v36, 1  ;;  %v4333_v10 = vrot.slane %v15184_v18, 1 }
 0x606   : > { %v15511_v0 = vpop.f32.mrb[228].mxu0 }
 0x607   : > { %17912 = vst [vmem:[#allocation49_spill] sm:$0xff] %v15511_v0  ;;  %5155 = vmatmul.mubr.f32.gmra.mrb[150].mxu1 %v17913_v48  ;;  %v15514_v41 = vpop.f32.mrb[229].mxu0  ;;  %v4332_v0 = vsel %vm558_vm0, %v4330_v5, %v4331_v28 }
 0x608   : > { %17914 = vst [vmem:[#allocation27_spill] sm:$0xff] %v15514_v41  ;;  %5159 = vmatprep.mubr.f32.mxu1 %v15181_v8  ;;  %v4334_v8 = vsel %vm558_vm0, %v4331_v28, %v4333_v10  ;;  %v11440_v41 = vld [vmem:[#allocation2 + $0x128] sm:$0xff] }
 0x60b   : > { %5160 = vmatmul.mubr.f32.gmra.mrb[152].mxu1 %v17915_v49 }
 0x60c   : > { %5164 = vmatprep.mubr.f32.mxu1 %v15189_v35  ;;  %v11439_v35 = vld [vmem:[#allocation2 + $0x120] sm:$0xff] }
 0x60f   : > { %5165 = vmatmul.mubr.f32.gmra.mrb[154].mxu1 %v17916_v26 }
 0x610   : > { %5169 = vmatprep.mubr.f32.mxu1 %v15202_v50 }
 0x613   : > { %5170 = vmatmul.mubr.f32.gmra.mrb[156].mxu1 %v4332_v0 }
 0x614   : > { %5174 = vmatprep.mubr.f32.mxu1 %v15206_v39  ;;  %v11458_v39 = vmov 842150450  }
 0x617   : > { %5175 = vmatmul.mubr.f32.gmra.mrb[158].mxu1 %v4334_v8 }
 0x618   : > { %5344 = vmatprep.mubr.f32.mxu1 %v17898_v25 }
 0x61b   : > { %5345 = vmatmul.mubr.f32.vlgmr.msra.gmra.mrb[136].mxu1 %v11439_v35 }
 0x61c   : > { %5349 = vmatprep.mubr.f32.mxu1 %v17901_v20 }
 0x61f   : > { %5350 = vmatmul.mubr.f32.gmra.mrb[138].mxu1 %v11440_v41 }
 0x620   : > { %5354 = vmatprep.mubr.f32.mxu1 %v17904_v22  ;;  %v6740_v22 = vunpack.c.l.s4 %v11458_v39 }
 0x623   : > { %5355 = vmatmul.mubr.f32.gmra.mrb[140].mxu1 %v14916_v57  ;;  %v17917_v57 = vld [vmem:[#allocation35_spill] sm:$0xff] }
 0x624   : > { %5359 = vmatprep.mubr.f32.mxu1 %v17907_v24  ;;  %v4347_v18 = vrot.slane %v17917_v57, 1  ;;  %v6741_v24 = vunpack.c.0.s8 %v6740_v22 }
 0x627   : > { %5360 = vmatmul.mubr.f32.gmra.mrb[142].mxu1 %v14929_v31  ;;  %v4350_v31 = vrot.slane %v15395_v59, 1 }
 0x628   : > { %5364 = vmatprep.mubr.f32.mxu1 %v17910_v61  ;;  %v11461_v61 = vmov 1983009808  }
 0x62b   : > { %5365 = vmatmul.mubr.f32.gmra.mrb[144].mxu1 %v14965_v1  ;;  %v4351_v1 = vsel %vm558_vm0, %v4347_v18, %v4350_v31 }
 0x62c   : > { %5369 = vmatprep.mubr.f32.mxu1 %v17913_v48 }
 0x62f   : > { %5370 = vmatmul.mubr.f32.gmra.mrb[146].mxu1 %v14980_v53  ;;  %v5774_v53 = vlaneseq }
 0x630   : > { %5374 = vmatprep.mubr.f32.mxu1 %v17915_v49 }
 0x633   : > { %5375 = vmatmul.mubr.f32.gmra.mrb[148].mxu1 %v15017_v60  ;;  %v5775_v60 = vshrl.u32 %v5774_v53, 7 }
 0x634   : > { %5379 = vmatprep.mubr.f32.mxu1 %v17916_v26 }
 0x635   : > { %v15548_v49 = vmul.u32 2, %v5775_v60  ;;  %v15553_v28 = vsub.s32 %v6741_v24, %v5775_v60  ;;  %v15637_v14 = vsub.s32 1, %v5775_v60 }
 0x637   : > { %5380 = vmatmul.mubr.f32.gmra.mrb[150].mxu1 %v15025_v29  ;;  %v11457_v29 = vmov 269488144   ;;  %17918 = vst [vmem:[#allocation50_spill] sm:$0xff] %v15548_v49  ;;  %v6452_v48 = vadd.s32 1, %v15548_v49  ;;  %17920 = vst [vmem:[#allocation52_spill] sm:$0xff] %v15553_v28  ;;  %v6445_v53 = vadd.s32 32, %v15548_v49 }
 0x638   : > { %5384 = vmatprep.mubr.f32.mxu1 %v4332_v0  ;;  %v6733_v50 = vunpack.c.l.s4 %v11457_v29  ;;  %v5772_v0 = vunpack.c.l.s4 %v11461_v61  ;;  %v15573_v29 = vrot.slane %v15548_v49, %v15553_v28  ;;  %v6446_v45 = vadd.s32 64, %v15548_v49 }
 0x639   : > { %v15564_v31 = vrot.slane %v6452_v48, %v15553_v28  ;;  %v6461_v38 = vadd.s32 16, %v6445_v53  ;;  %v15643_v13 = vrot.slane %v6445_v53, %v15553_v28 }
 0x63a   : > { %v6734_v59 = vunpack.c.0.s8 %v6733_v50  ;;  %v5773_v35 = vunpack.c.0.s8 %v5772_v0  ;;  %v6453_v0 = vadd.s32 1, %v6445_v53  ;;  %v6454_v47 = vadd.s32 1, %v6446_v45 }
 0x63b   : > { %5385 = vmatmul.mubr.f32.gmra.mrb[152].mxu1 %v15169_v36  ;;  %v11459_v36 = vmov 1414812756   ;;  %v6469_v63 = vadd.s32 1, %v6461_v38  ;;  %v15665_v33 = vrot.slane %v6461_v38, %v15553_v28  ;;  %v15689_v7 = vadd.s32 16, %v6446_v45 }
 0x63c   : > { %5389 = vmatprep.mubr.f32.mxu1 %v4334_v8  ;;  %v6747_v20 = vunpack.c.l.s4 %v11459_v36  ;;  %v15551_v10 = vsub.s32 %v6734_v59, %v5775_v60  ;;  %v6460_v8 = vadd.s32 16, %v15548_v49  ;;  %v15578_v22 = vsub.s32 %v5773_v35, %v5775_v60 }
 0x63d   : > { %17925 = vst [vmem:[#allocation24_spill] sm:$0xff] %v15665_v33 }
 0x63e   : > { %v6748_v26 = vunpack.c.0.s8 %v6747_v20  ;;  %17919 = vst [vmem:[#allocation51_spill] sm:$0xff] %v15551_v10  ;;  %v6468_v39 = vadd.s32 1, %v6460_v8  ;;  %v15598_v61 = vrot.slane %v6460_v8, %v15553_v28  ;;  %v15626_v51 = vrot.slane %v6453_v0, %v15551_v10 }
 0x63f   : > { %5390 = vmatmul.mubr.f32.gmra.mrb[154].mxu1 %v15162_v37  ;;  %v11460_v37 = vmov 1987475062   ;;  %v15662_v4 = vrot.slane %v6461_v38, %v15551_v10 }
 0x640   : > { %5394 = vmatprep.mubr.f32.mxu1 %v4347_v18  ;;  %v6754_v25 = vunpack.c.l.s4 %v11460_v37  ;;  %v15555_v5 = vsub.s32 %v6748_v26, %v5775_v60  ;;  %v15603_v35 = vrot.slane %v6468_v39, %v15551_v10  ;;  %v15606_v20 = vrot.slane %v6468_v39, %v15553_v28 }
 0x642   : > { %v6755_v41 = vunpack.c.0.s8 %v6754_v25  ;;  %17921 = vst [vmem:[#allocation29_spill] sm:$0xff] %v15555_v5  ;;  %v15576_v50 = vrot.slane %v6452_v48, %v15555_v5  ;;  %v15582_v36 = vrot.slane %v15548_v49, %v15555_v5  ;;  %v15593_v25 = vrot.slane %v6460_v8, %v15551_v10 }
 0x643   : > { %5395 = vmatmul.mubr.f32.gmra.mrb[156].mxu1 %v17917_v57  ;;  %v15610_v24 = vrot.slane %v6460_v8, %v15555_v5  ;;  %v15619_v62 = vrot.slane %v6468_v39, %v15555_v5  ;;  %v15646_v3 = vrot.slane %v6453_v0, %v15555_v5  ;;  %v15684_v43 = vrot.slane %v6469_v63, %v15555_v5 }
 0x644   : > { %5399 = vmatprep.mubr.f32.mxu1 %v4351_v1  ;;  %v15561_v18 = vsub.s32 %v6755_v41, %v5775_v60  ;;  %v15568_v1 = vrot.slane %v15548_v49, %v15551_v10  ;;  %v15649_v41 = vrot.slane %v6445_v53, %v15555_v5  ;;  %v15671_v60 = vrot.slane %v6469_v63, %v15553_v28 }
 0x645   : > { %17923 = vst [vmem:[#allocation28_spill] sm:$0xff] %v15646_v3  ;;  %17930 = vst [vmem:[#allocation32_spill] sm:$0xff] %v15684_v43  ;;  %v15753_v43 = vrot.slane %v15689_v7, %v15553_v28 }
 0x646   : > { %17922 = vst [vmem:[#allocation22_spill] sm:$0xff] %v15561_v18  ;;  %v15586_v59 = vrot.slane %v6452_v48, %v15561_v18  ;;  %v15590_v37 = vrot.slane %v15548_v49, %v15561_v18  ;;  %v15613_v26 = vrot.slane %v6460_v8, %v15561_v18  ;;  %v15623_v55 = vrot.slane %v6468_v39, %v15561_v18 }
 0x647   : > { %5400 = vmatmul.mubr.f32.gmra.mrb[158].mxu1 %v17917_v57  ;;  %v15559_v57 = vrot.slane %v6452_v48, %v15551_v10  ;;  %v15629_v8 = vrot.slane %v6445_v53, %v15551_v10  ;;  %v15634_v48 = vrot.slane %v6453_v0, %v15553_v28  ;;  %v15655_v56 = vrot.slane %v6453_v0, %v15561_v18 }
 0x648   : > { %v15659_v30 = vrot.slane %v6445_v53, %v15561_v18  ;;  %v15668_v49 = vrot.slane %v6469_v63, %v15551_v10  ;;  %17927 = vst [vmem:[#allocation25_spill] sm:$0xff] %v15671_v60  ;;  %v15674_v0 = vrot.slane %v6461_v38, %v15555_v5  ;;  %v15680_v34 = vrot.slane %v6461_v38, %v15561_v18 }
 0x649   : > { %17924 = vst [vmem:[#allocation31_spill] sm:$0xff] %v15655_v56  ;;  %v15687_v19 = vrot.slane %v6469_v63, %v15561_v18  ;;  %v15695_v38 = vrot.slane %v6454_v47, %v15551_v10  ;;  %v15709_v39 = vrot.slane %v6454_v47, %v15553_v28  ;;  %v15712_v53 = vrot.slane %v6446_v45, %v15551_v10  ;;  %v15717_v63 = vld [vmem:[%s17498_s9] ss:$0 sm:$0xff] }
 0x64a   : > { %17926 = vst [vmem:[#allocation30_spill] sm:$0xff] %v15668_v49  ;;  %17928 = vst [vmem:[#allocation33_spill] sm:$0xff] %v15674_v0  ;;  %v15731_v49 = vrot.slane %v6454_v47, %v15555_v5  ;;  %v15734_v3 = vrot.slane %v6454_v47, %v15561_v18 }
 0x64b   : > { %17929 = vst [vmem:[#allocation3_spill] sm:$0xff] %v15680_v34  ;;  %17931 = vst [vmem:[#allocation4_spill] sm:$0xff] %v15687_v19  ;;  %v15740_v19 = vrot.slane %v6446_v45, %v15561_v18 }
 0x64c   : > { %17932 = vst [vmem:[#allocation35_spill] sm:$0xff] %v15695_v38  ;;  %17933 = vst [vmem:[#allocation53_spill] sm:$0xff] %v15709_v39  ;;  %v15778_v39 = vrot.slane %v15689_v7, %v15555_v5 }
 0x64d   : > { %17934 = vst [vmem:[#allocation54_spill] sm:$0xff] %v15712_v53  ;;  %17937 = vst [vmem:[#allocation57_spill] sm:$0xff] %v15731_v49 }
 0x64e   : > { %17938 = vst [vmem:[#allocation58_spill] sm:$0xff] %v15734_v3  ;;  %17939 = vst [vmem:[#allocation59_spill] sm:$0xff] %v15740_v19 }
 0x64f   : > { %17941 = vst [vmem:[#allocation61_spill] sm:$0xff] %v15753_v43  ;;  %17944 = vst [vmem:[#allocation64_spill] sm:$0xff] %v15778_v39 }
 0x66e   : > { %v5021_v27 = vpop.f32.mrb[96].mxu1 }
 0x66f   : > { %v10862_v9 = vadd.f32 %v15311_v42, %v5021_v27  ;;  %v5023_v23 = vpop.f32.mrb[97].mxu1  ;;  %v15737_v42 = vrot.slane %v6446_v45, %v15555_v5 }
 0x671   : > { %v5472_v23 = vadd.f32 %v10862_v9, %v15425_v16  ;;  %v15722_v16 = vrot.slane %v6446_v45, %v15553_v28  ;;  %v15725_v9 = vadd.s32 1, %v15689_v7 }
 0x672   : > { %v5026_v56 = vpop.f32.mrb[98].mxu1 }
 0x673   : > { %17935 = vst [vmem:[#allocation55_spill] sm:$0xff] %v15722_v16  ;;  %17936 = vst [vmem:[#allocation56_spill] sm:$0xff] %v15725_v9  ;;  %v5636_v27 = vmul.f32 %v15700_v17, %v5472_v23  ;;  %v10863_v34 = vadd.f32 %v15315_v12, %v5026_v56  ;;  %v5028_v0 = vpop.f32.mrb[99].mxu1  ;;  %v15744_v23 = vrot.slane %v15689_v7, %v15551_v10 }
 0x674   : > { %v15757_v45 = vrot.slane %v15725_v9, %v15551_v10 }
 0x675   : > { %17940 = vst [vmem:[#allocation60_spill] sm:$0xff] %v15744_v23  ;;  %v5674_v12 = vadd.f32 %v15717_v63, %v5636_v27  ;;  %v5477_v56 = vadd.f32 %v10863_v34, %v15422_v44  ;;  %v15761_v27 = vrot.slane %v15725_v9, %v15553_v28 }
 0x676   : > { %v5031_v47 = vpop.f32.mrb[100].mxu1  ;;  %17942 = vst [vmem:[#allocation62_spill] sm:$0xff] %v15757_v45 }
 0x677   : > { %17943 = vst [vmem:[#allocation63_spill] sm:$0xff] %v15761_v27  ;;  %v5706_v44 = vmax.f32 %v5674_v12, 0.0  ;;  %v5637_v34 = vmul.f32 %v15700_v17, %v5477_v56  ;;  %v10864_v0 = vadd.f32 %v15319_v32, %v5031_v47  ;;  %v5033_v60 = vpop.f32.mrb[101].mxu1 }
 0x679   : > { %v5770_v33 = vcombine.high %v5706_v44, %v5706_v44  ;;  %v5777_v28 = vrot.slane %v5706_v44, %v15578_v22  ;;  %v5675_v12 = vadd.f32 %v15717_v63, %v5637_v34  ;;  %v5482_v56 = vadd.f32 %v10864_v0, %v15433_v6 }
 0x67a   : > { %v5036_v9 = vpop.f32.mrb[102].mxu1  ;;  %v15785_v0 = vrot.slane %v15689_v7, %v15561_v18  ;;  %v17948_v18 = vrot.slane %v15564_v31, 7 }
 0x67b   : > { %v5784_v10 = vrot.slane %v5770_v33, %v15578_v22  ;;  %v5785_v53 = vcombine.high %v5777_v28, %v5777_v28  ;;  %v6476_v38 = vrot.slane %v5777_v28, 7  ;;  %v5707_v44 = vmax.f32 %v5675_v12, 0.0  ;;  %v5038_v16 = vpop.f32.mrb[103].mxu1 }
 0x67c   : > { %v5638_v34 = vmul.f32 %v15700_v17, %v5482_v56  ;;  %v10865_v6 = vadd.f32 %v15323_v21, %v5036_v9  ;;  %v17945_v33 = vrot.slane %v15568_v1, 7  ;;  %v17946_v12 = vrot.slane %v15559_v57, 7 }
 0x67d   : > { %v5786_v60 = vcombine.high %v5784_v10, %v5784_v10  ;;  %v6477_v32 = vrot.slane %v5785_v53, 7  ;;  %v6478_v27 = vrot.slane %v5784_v10, 7  ;;  %vm6604_vm2 = vcmp.gt.f32.partialorder %v5777_v28, %v6476_v38 }
 0x67e   : > { %v6668_v45 = vsel %vm6604_vm2, %v5777_v28, %v6476_v38  ;;  %v15792_v16 = vsel %vm6604_vm2, %v17946_v12, %v17945_v33  ;;  %v5787_v56 = vcombine.high %v5707_v44, %v5707_v44  ;;  %v5794_v21 = vrot.slane %v5707_v44, %v15578_v22  ;;  %v5041_v9 = vpop.f32.mrb[104].mxu1 }
 0x67f   : > { %v6479_v43 = vrot.slane %v5786_v60, 7  ;;  %vm6605_vm3 = vcmp.gt.f32.partialorder %v5785_v53, %v6477_v32  ;;  %vm6606_vm4 = vcmp.gt.f32.partialorder %v5784_v10, %v6478_v27  ;;  %v7372_v7 = vrot.slane %v6668_v45, 7  ;;  %v5043_v47 = vpop.f32.mrb[105].mxu1 }
 0x680   : > { %v6669_v39 = vsel %vm6605_vm3, %v5785_v53, %v6477_v32  ;;  %v6670_v23 = vsel %vm6606_vm4, %v5784_v10, %v6478_v27  ;;  %v7245_v28 = vsel %vm6605_vm3, %v15559_v57, %v15568_v1  ;;  %v17947_v38 = vrot.slane %v15573_v29, 7 }
 0x681   : > { %vm6607_vm5 = vcmp.gt.f32.partialorder %v5786_v60, %v6479_v43  ;;  %v15803_v12 = vrot.slane %v7372_v7, 2  ;;  %v7374_v44 = vrot.slane %v6669_v39, 7  ;;  %v7376_v5 = vrot.slane %v6670_v23, 7 }
 0x682   : > { %v15801_v33 = vsel %vm6606_vm4, %v17948_v18, %v17947_v38  ;;  %v6671_v3 = vsel %vm6607_vm5, %v5786_v60, %v6479_v43  ;;  %v7247_v45 = vsel %vm6607_vm5, %v15564_v31, %v15573_v29  ;;  %v15808_v53 = vrot.slane %v7245_v28, 9  ;;  %v5046_v57 = vpop.f32.mrb[106].mxu1 }
 0x683   : > { %v15810_v1 = vrot.slane %v7374_v44, 2  ;;  %v15812_v27 = vrot.slane %v7376_v5, 2  ;;  %v7378_v18 = vrot.slane %v6671_v3, 7  ;;  %v5048_v47 = vpop.f32.mrb[107].mxu1  ;;  %v15815_v7 = vrot.slane %v7247_v45, 9 }
 0x684   : > { %v5801_v43 = vrot.slane %v5787_v56, %v15578_v22  ;;  %v5802_v39 = vcombine.high %v5794_v21, %v5794_v21  ;;  %v6480_v23 = vrot.slane %v5794_v21, 7  ;;  %v5676_v29 = vadd.f32 %v15717_v63, %v5638_v34 }
 0x685   : > { %v15818_v31 = vrot.slane %v7378_v18, 2  ;;  %v5487_v60 = vadd.f32 %v10865_v6, %v15430_v15  ;;  %v10866_v28 = vadd.f32 %v15327_v52, %v5041_v9  ;;  %v17949_v45 = vrot.slane %v15582_v36, 7 }
 0x686   : > { %v5803_v5 = vcombine.high %v5801_v43, %v5801_v43  ;;  %v6481_v38 = vrot.slane %v5802_v39, 7  ;;  %v6482_v3 = vrot.slane %v5801_v43, 7  ;;  %vm6608_vm6 = vcmp.gt.f32.partialorder %v5794_v21, %v6480_v23  ;;  %v5051_v44 = vpop.f32.mrb[108].mxu1 }
 0x687   : > { %v6672_v47 = vsel %vm6608_vm6, %v5794_v21, %v6480_v23  ;;  %v17950_v56 = vrot.slane %v15576_v50, 7  ;;  %v5708_v18 = vmax.f32 %v5676_v29, 0.0  ;;  %v5639_v10 = vmul.f32 %v15700_v17, %v5487_v60  ;;  %v5053_v34 = vpop.f32.mrb[109].mxu1 }
 0x688   : > { %v6483_v19 = vrot.slane %v5803_v5, 7  ;;  %vm6609_vm7 = vcmp.gt.f32.partialorder %v5802_v39, %v6481_v38  ;;  %vm6610_vm8 = vcmp.gt.f32.partialorder %v5801_v43, %v6482_v3  ;;  %v7380_v52 = vrot.slane %v6672_v47, 7 }
 0x689   : > { %v15827_v32 = vsel %vm6608_vm6, %v17950_v56, %v17949_v45  ;;  %v6673_v15 = vsel %vm6609_vm7, %v5802_v39, %v6481_v38  ;;  %v6674_v6 = vsel %vm6610_vm8, %v5801_v43, %v6482_v3  ;;  %v7249_v9 = vsel %vm6609_vm7, %v15576_v50, %v15582_v36 }
 0x68a   : > { %v17951_v21 = vrot.slane %v15590_v37, 7  ;;  %v17952_v23 = vrot.slane %v15586_v59, 7  ;;  %vm6611_vm9 = vcmp.gt.f32.partialorder %v5803_v5, %v6483_v19  ;;  %v15838_v29 = vrot.slane %v7380_v52, 2  ;;  %v15840_v56 = vpop.f32.mrb[110].mxu1 }
 0x68b   : > { %v7382_v60 = vrot.slane %v6673_v15, 7  ;;  %v7384_v45 = vrot.slane %v6674_v6, 7  ;;  %v6675_v34 = vsel %vm6611_vm9, %v5803_v5, %v6483_v19  ;;  %v7251_v43 = vsel %vm6611_vm9, %v15586_v59, %v15590_v37  ;;  %v5058_v36 = vpop.f32.mrb[111].mxu1 }
 0x68c   : > { %v15836_v49 = vsel %vm6610_vm8, %v17952_v23, %v17951_v21  ;;  %v9678_v39 = vrot.slane %v15827_v32, 9  ;;  %v15845_v50 = vrot.slane %v7249_v9, 9  ;;  %v7386_v47 = vrot.slane %v6675_v34, 7 }
 0x68d   : > { %v15847_v38 = vrot.slane %v7382_v60, 2  ;;  %v15849_v3 = vrot.slane %v7384_v45, 2  ;;  %v15852_v15 = vrot.slane %v7251_v43, 9  ;;  %v5804_v6 = vcombine.high %v5708_v18, %v5708_v18 }
 0x68e   : > { %v5811_v19 = vrot.slane %v5708_v18, %v15578_v22  ;;  %v5677_v5 = vadd.f32 %v15717_v63, %v5639_v10  ;;  %v15856_v59 = vrot.slane %v7386_v47, 2  ;;  %v5492_v37 = vadd.f32 %v10866_v28, %v15441_v11  ;;  %v15863_v23 = vpop.f32.mrb[112].mxu1 }
 0x68f   : > { %v10867_v9 = vadd.f32 %v15331_v58, %v5046_v57  ;;  %v15861_v21 = vadd.f32 %v15335_v40, %v5051_v44  ;;  %v5818_v60 = vrot.slane %v5804_v6, %v15578_v22  ;;  %v5063_v34 = vpop.f32.mrb[113].mxu1  ;;  %v17953_v43 = vrot.slane %v15792_v16, 9 }
 0x690   : > { %v5819_v45 = vcombine.high %v5811_v19, %v5811_v19  ;;  %vm7564_vm10 = vcmp.gt.f32.partialorder %v5811_v19, %v15803_v12  ;;  %v5709_v18 = vmax.f32 %v5677_v5, 0.0  ;;  %v5640_v58 = vmul.f32 %v15700_v17, %v5492_v37 }
 0x691   : > { %v7628_v10 = vsel %vm7564_vm10, %v5811_v19, %v15803_v12  ;;  %v8076_v11 = vsel %vm7564_vm10, %v15593_v25, %v17953_v43  ;;  %v5497_v40 = vadd.f32 %v10867_v9, %v15438_v46  ;;  %v5820_v57 = vcombine.high %v5818_v60, %v5818_v60 }
 0x692   : > { %vm7565_vm13 = vcmp.gt.f32.partialorder %v5819_v45, %v15810_v1  ;;  %vm7566_vm14 = vcmp.gt.f32.partialorder %v5818_v60, %v15812_v27  ;;  %v8204_v28 = vrot.slane %v7628_v10, 7  ;;  %v17954_v16 = vrot.slane %v15593_v25, 1  ;;  %v15883_v46 = vpop.f32.mrb[114].mxu1 }
 0x693   : > { %v7629_v44 = vsel %vm7565_vm13, %v5819_v45, %v15810_v1  ;;  %v7630_v12 = vsel %vm7566_vm14, %v5818_v60, %v15812_v27  ;;  %v17955_v47 = vrot.slane %v15801_v33, 9  ;;  %vm7567_vm0 = vcmp.gt.f32.partialorder %v5820_v57, %v15818_v31  ;;  %v5068_v1 = vpop.f32.mrb[115].mxu1 }
 0x694   : > { %v8077_v36 = vsel %vm7565_vm13, %v17954_v16, %v15808_v53  ;;  %v8205_v5 = vrot.slane %v7629_v44, 7  ;;  %v8206_v37 = vrot.slane %v7630_v12, 7  ;;  %vm15886_vm1 = vcmp.gt.f32.partialorder %v5811_v19, %v8204_v28 }
 0x695   : > { %v8078_v6 = vsel %vm7566_vm14, %v15598_v61, %v17955_v47  ;;  %v7631_v27 = vsel %vm7567_vm0, %v5820_v57, %v15818_v31  ;;  %v17958_v25 = vrot.slane %v15598_v61, 1  ;;  %v8396_v33 = vsel %vm15886_vm1, %v5811_v19, %v8204_v28 }
 0x696   : > { %v8716_v34 = vrot.slane %v8076_v11, 7  ;;  %v8207_v10 = vrot.slane %v7631_v27, 7  ;;  %vm8333_vm2 = vcmp.gt.f32.partialorder %v5819_v45, %v8205_v5  ;;  %vm8334_vm3 = vcmp.gt.f32.partialorder %v5818_v60, %v8206_v37  ;;  %v15896_v52 = vpop.f32.mrb[116].mxu1 }
 0x697   : > { %v8079_v53 = vsel %vm7567_vm0, %v17958_v25, %v15815_v7  ;;  %v8717_v43 = vrot.slane %v8077_v36, 7  ;;  %v8397_v44 = vsel %vm8333_vm2, %v5819_v45, %v8205_v5  ;;  %v8398_v12 = vsel %vm8334_vm3, %v5818_v60, %v8206_v37  ;;  %v5073_v11 = vpop.f32.mrb[117].mxu1 }
 0x698   : > { %v8718_v16 = vrot.slane %v8078_v6, 7  ;;  %v8719_v47 = vrot.slane %v8079_v53, 7  ;;  %vm8335_vm4 = vcmp.gt.f32.partialorder %v5820_v57, %v8207_v10  ;;  %v17959_v31 = vrot.slane %v15603_v35, 7 }
 0x699   : > { %v8781_v7 = vsel %vm8333_vm2, %v15603_v35, %v8717_v43  ;;  %v8911_v19 = vrot.slane %v8396_v33, %v15637_v14  ;;  %v8399_v28 = vsel %vm8335_vm4, %v5820_v57, %v8207_v10  ;;  %v17960_v36 = vrot.slane %v15606_v20, 7 }
 0x69a   : > { %v8780_v61 = vsel %vm15886_vm1, %v17959_v31, %v8716_v34  ;;  %v8783_v60 = vsel %vm8335_vm4, %v15606_v20, %v8719_v47  ;;  %v8915_v6 = vrot.slane %v8397_v44, %v15637_v14  ;;  %v8919_v5 = vrot.slane %v8398_v12, %v15637_v14  ;;  %v15915_v53 = vpop.f32.mrb[118].mxu1 }
 0x69b   : > { %v8782_v45 = vsel %vm8334_vm3, %v17960_v36, %v8718_v16  ;;  %v8923_v37 = vrot.slane %v8399_v28, %v15637_v14  ;;  %v9253_v9 = vrot.slane %v8780_v61, %v15637_v14  ;;  %v9257_v1 = vrot.slane %v8781_v7, %v15637_v14  ;;  %v5078_v43 = vpop.f32.mrb[119].mxu1 }
 0x69c   : > { %v9165_v35 = vsel %vm9164_vm11, %v8915_v6, %v8911_v19  ;;  %v9261_v27 = vrot.slane %v8782_v45, %v15637_v14  ;;  %v9265_v57 = vrot.slane %v8783_v60, %v15637_v14  ;;  %v5821_v25 = vcombine.high %v5709_v18, %v5709_v18 }
 0x69d   : > { %v9167_v20 = vsel %vm9166_vm12, %v8919_v5, %v9165_v35  ;;  %v9506_v33 = vsel %vm9164_vm11, %v9257_v1, %v9253_v9  ;;  %v5828_v34 = vrot.slane %v5709_v18, %v15578_v22  ;;  %v5678_v10 = vadd.f32 %v15717_v63, %v5640_v58 }
 0x69e   : > { %v9507_v44 = vsel %vm9166_vm12, %v9261_v27, %v9506_v33  ;;  %v5835_v12 = vrot.slane %v5821_v25, %v15578_v22  ;;  %v9169_v16 = vsel %vm9168_vm15, %v8923_v37, %v9167_v20  ;;  %vm9170_vm5 = vcmask 1045509  }
 0x69f   : > { %v15925_v47 = vmul.f32 %v15700_v17, %v5497_v40  ;;  %v5836_v31 = vcombine.high %v5828_v34, %v5828_v34  ;;  %vm7568_vm6 = vcmp.gt.f32.partialorder %v5828_v34, %v15838_v29  ;;  %vm9172_vm7 = vcmask 1046534   ;;  %v15936_v40 = vpop.f32.mrb[120].mxu1 }
 0x6a0   : > { %v9508_v61 = vsel %vm9168_vm15, %v9265_v57, %v9507_v44  ;;  %v15929_v18 = vmax.f32 %v5678_v10, 0.0  ;;  %v5837_v58 = vcombine.high %v5835_v12, %v5835_v12  ;;  %vm7570_vm8 = vcmp.gt.f32.partialorder %v5835_v12, %v15849_v3  ;;  %v5083_v60 = vpop.f32.mrb[121].mxu1 }
 0x6a1   : > { %v7632_v7 = vsel %vm7568_vm6, %v5828_v34, %v15838_v29  ;;  %v8080_v19 = vsel %vm7568_vm6, %v15610_v24, %v9678_v39  ;;  %vm9174_vm9 = vcmask 1047559   ;;  %vm7569_vm10 = vcmp.gt.f32.partialorder %v5836_v31, %v15847_v38 }
 0x6a2   : > { %v7634_v11 = vsel %vm7570_vm8, %v5835_v12, %v15849_v3  ;;  %v17961_v28 = vrot.slane %v15836_v49, 9  ;;  %v8208_v45 = vrot.slane %v7632_v7, 7  ;;  %vm7571_vm13 = vcmp.gt.f32.partialorder %v5837_v58, %v15856_v59  ;;  %v15957_v27 = vpop.f32.mrb[122].mxu1 }
 0x6a3   : > { %v7633_v32 = vsel %vm7569_vm10, %v5836_v31, %v15847_v38  ;;  %v17962_v29 = vrot.slane %v15610_v24, 1  ;;  %v8210_v6 = vrot.slane %v7634_v11, 7  ;;  %v7635_v5 = vsel %vm7571_vm13, %v5837_v58, %v15856_v59 }
 0x6a4   : > { %v8082_v36 = vsel %vm7570_vm8, %v15613_v26, %v17961_v28  ;;  %v17963_v3 = vrot.slane %v15613_v26, 1  ;;  %v8209_v49 = vrot.slane %v7633_v32, 7  ;;  %vm8336_vm14 = vcmp.gt.f32.partialorder %v5828_v34, %v8208_v45  ;;  %v5088_v26 = vpop.f32.mrb[123].mxu1 }
 0x6a5   : > { %v8081_v39 = vsel %vm7569_vm10, %v17962_v29, %v15845_v50  ;;  %v8211_v9 = vrot.slane %v7635_v5, 7  ;;  %vm15953_vm0 = vcmp.gt.f32.partialorder %v5835_v12, %v8210_v6  ;;  %v8400_v38 = vsel %vm8336_vm14, %v5828_v34, %v8208_v45 }
 0x6a6   : > { %v8083_v37 = vsel %vm7571_vm13, %v17963_v3, %v15852_v15  ;;  %v8720_v35 = vrot.slane %v8080_v19, 7  ;;  %vm8337_vm1 = vcmp.gt.f32.partialorder %v5836_v31, %v8209_v49  ;;  %v8402_v24 = vsel %vm15953_vm0, %v5835_v12, %v8210_v6  ;;  %v15978_v11 = vpop.f32.mrb[124].mxu1 }
 0x6a7   : > { %v8721_v50 = vrot.slane %v8081_v39, 7  ;;  %v8722_v59 = vrot.slane %v8082_v36, 7  ;;  %vm8339_vm2 = vcmp.gt.f32.partialorder %v5837_v58, %v8211_v9  ;;  %v8401_v15 = vsel %vm8337_vm1, %v5836_v31, %v8209_v49  ;;  %v5093_v36 = vpop.f32.mrb[125].mxu1 }
 0x6a8   : > { %v8723_v57 = vrot.slane %v8083_v37, 7  ;;  %v17966_v25 = vrot.slane %v15619_v62, 7  ;;  %v8403_v33 = vsel %vm8339_vm2, %v5837_v58, %v8211_v9  ;;  %v17967_v10 = vrot.slane %v15623_v55, 7 }
 0x6a9   : > { %v8785_v34 = vsel %vm8337_vm1, %v15619_v62, %v8721_v50  ;;  %v8927_v44 = vrot.slane %v8400_v38, %v15637_v14  ;;  %v8931_v31 = vrot.slane %v8401_v15, %v15637_v14  ;;  %v8935_v7 = vrot.slane %v8402_v24, %v15637_v14 }
 0x6aa   : > { %v8784_v20 = vsel %vm8336_vm14, %v17966_v25, %v8720_v35  ;;  %v8786_v43 = vsel %vm15953_vm0, %v17967_v10, %v8722_v59  ;;  %v8787_v12 = vsel %vm8339_vm2, %v15623_v55, %v8723_v57  ;;  %v8939_v19 = vrot.slane %v8403_v33, %v15637_v14 }
 0x6ab   : > { %v9171_v62 = vsel %vm9170_vm5, %v8927_v44, %v9169_v16  ;;  %v9269_v58 = vrot.slane %v8784_v20, %v15637_v14  ;;  %v9273_v55 = vrot.slane %v8785_v34, %v15637_v14  ;;  %v9277_v28 = vrot.slane %v8786_v43, %v15637_v14 }
 0x6ac   : > { %v9173_v45 = vsel %vm9172_vm7, %v8931_v31, %v9171_v62  ;;  %9235 = vst [vmem:[%s15966_s13 + $0x7] sm:$0x1] %v8939_v19  ;;  %v9281_v60 = vrot.slane %v8787_v12, %v15637_v14  ;;  %v5838_v32 = vcombine.high %v15929_v18, %v15929_v18  ;;  %v5845_v29 = vrot.slane %v15929_v18, %v15578_v22  ;;  %v16006_v18 = vpop.f32.mrb[126].mxu1 }
 0x6ad   : > { %v9175_v16 = vsel %vm9174_vm9, %v8935_v7, %v9173_v45  ;;  %v9509_v39 = vsel %vm9170_vm5, %v9269_v58, %v9508_v61  ;;  %v5679_v6 = vadd.f32 %v15717_v63, %v15925_v47  ;;  %v5502_v5 = vadd.f32 %v15861_v21, %v15448_v2  ;;  %v5098_v35 = vpop.f32.mrb[127].mxu1 }
 0x6ae   : > { %9234 = vst [vmem:[%s15966_s13 - $0x1] sm:$0xfe] %v9175_v16  ;;  %v9510_v3 = vsel %vm9172_vm7, %v9273_v55, %v9509_v39  ;;  %9555 = vst [vmem:[%s15983_s19 + $0x7] sm:$0x1] %v9281_v60  ;;  %v5852_v37 = vrot.slane %v5838_v32, %v15578_v22  ;;  %v5853_v49 = vcombine.high %v5845_v29, %v5845_v29  ;;  %v6484_v9 = vrot.slane %v5845_v29, 7  ;;  %v16036_v31 = vpop.f32.mrb[128].mxu1 }
 0x6af   : > { %v9511_v1 = vsel %vm9174_vm9, %v9277_v28, %v9510_v3  ;;  %v5711_v38 = vmax.f32 %v5679_v6, 0.0  ;;  %v5642_v61 = vmul.f32 %v15700_v17, %v5502_v5  ;;  %v10869_v47 = vadd.f32 %v15339_v54, %v15840_v56  ;;  %v5103_v58 = vpop.f32.mrb[129].mxu1 }
 0x6b0   : > { %9554 = vst [vmem:[%s15983_s19 - $0x1] sm:$0xfe] %v9511_v1  ;;  %v5854_v2 = vcombine.high %v5852_v37, %v5852_v37  ;;  %v6485_v21 = vrot.slane %v5853_v49, 7  ;;  %v6486_v24 = vrot.slane %v5852_v37, 7  ;;  %vm6612_vm3 = vcmp.gt.f32.partialorder %v5845_v29, %v6484_v9 }
 0x6b1   : > { %v6676_v50 = vsel %vm6612_vm3, %v5845_v29, %v6484_v9  ;;  %v17968_v59 = vrot.slane %v15629_v8, 7  ;;  %v17969_v26 = vrot.slane %v15626_v51, 7  ;;  %v5855_v57 = vcombine.high %v5711_v38, %v5711_v38 }
 0x6b2   : > { %v5862_v25 = vrot.slane %v5711_v38, %v15578_v22  ;;  %v6487_v20 = vrot.slane %v5854_v2, 7  ;;  %vm16020_vm4 = vcmp.gt.f32.partialorder %v5853_v49, %v6485_v21  ;;  %vm6614_vm6 = vcmp.gt.f32.partialorder %v5852_v37, %v6486_v24 }
 0x6b3   : > { %v16017_v15 = vsel %vm6612_vm3, %v17969_v26, %v17968_v59  ;;  %v7388_v54 = vrot.slane %v6676_v50, 7  ;;  %v6677_v56 = vsel %vm16020_vm4, %v5853_v49, %v6485_v21  ;;  %v6678_v34 = vsel %vm6614_vm6, %v5852_v37, %v6486_v24  ;;  %v17975_v37 = vld [vmem:[#allocation5_spill] sm:$0xff]  ;;  %v17977_v21 = vld [vmem:[#allocation28_spill] sm:$0xff] }
 0x6b4   : > { %v7253_v10 = vsel %vm16020_vm4, %v15626_v51, %v15629_v8  ;;  %v17972_v43 = vrot.slane %v15643_v13, 7  ;;  %v17973_v44 = vrot.slane %v15634_v48, 7  ;;  %vm6615_vm8 = vcmp.gt.f32.partialorder %v5854_v2, %v6487_v20 }
 0x6b5   : > { %v16038_v7 = vrot.slane %v7388_v54, 2  ;;  %v7390_v19 = vrot.slane %v6677_v56, 7  ;;  %v7392_v62 = vrot.slane %v6678_v34, 7  ;;  %v6679_v55 = vsel %vm6615_vm8, %v5854_v2, %v6487_v20  ;;  %v17980_v20 = vld [vmem:[#allocation31_spill] sm:$0xff] }
 0x6b6   : > { %v16034_v12 = vsel %vm6614_vm6, %v17973_v44, %v17972_v43  ;;  %v7255_v28 = vsel %vm6615_vm8, %v15634_v48, %v15643_v13  ;;  %v9682_v51 = vrot.slane %v16017_v15, 9  ;;  %v16043_v8 = vrot.slane %v7253_v10, 9  ;;  %v17974_v48 = vld [vmem:[#allocation19_spill] sm:$0xff] }
 0x6b7   : > { %v16045_v36 = vrot.slane %v7390_v19, 2  ;;  %v16047_v45 = vrot.slane %v7392_v62, 2  ;;  %v7394_v60 = vrot.slane %v6679_v55, 7  ;;  %v9684_v32 = vrot.slane %v16034_v12, 9 }
 0x6b8   : > { %v16050_v29 = vrot.slane %v7255_v28, 9  ;;  %v5869_v16 = vrot.slane %v5855_v57, %v15578_v22  ;;  %v5870_v39 = vcombine.high %v5862_v25, %v5862_v25  ;;  %v6488_v6 = vrot.slane %v5862_v25, 7 }
 0x6b9   : > { %v16053_v5 = vrot.slane %v7394_v60, 2  ;;  %v5680_v13 = vadd.f32 %v15717_v63, %v5642_v61  ;;  %v5507_v3 = vadd.f32 %v10869_v47, %v17974_v48  ;;  %v10870_v49 = vadd.f32 %v17975_v37, %v15863_v23  ;;  %v16086_v60 = vpop.f32.mrb[130].mxu1 }
 0x6ba   : > { %v5871_v9 = vcombine.high %v5869_v16, %v5869_v16  ;;  %v6489_v1 = vrot.slane %v5870_v39, 7  ;;  %v6490_v38 = vrot.slane %v5869_v16, 7  ;;  %vm6616_vm10 = vcmp.gt.f32.partialorder %v5862_v25, %v6488_v6 }
 0x6bb   : > { %v6680_v35 = vsel %vm6616_vm10, %v5862_v25, %v6488_v6  ;;  %v17976_v2 = vrot.slane %v15649_v41, 7  ;;  %v17978_v24 = vrot.slane %v17977_v21, 7  ;;  %v5712_v59 = vmax.f32 %v5680_v13, 0.0  ;;  %v5108_v13 = vpop.f32.mrb[131].mxu1 }
 0x6bc   : > { %v5643_v26 = vmul.f32 %v15700_v17, %v5507_v3  ;;  %v6491_v61 = vrot.slane %v5871_v9, 7  ;;  %vm6617_vm13 = vcmp.gt.f32.partialorder %v5870_v39, %v6489_v1  ;;  %vm6618_vm14 = vcmp.gt.f32.partialorder %v5869_v16, %v6490_v38  ;;  %v17982_v3 = vld [vmem:[#allocation20_spill] sm:$0xff] }
 0x6bd   : > { %v16063_v50 = vsel %vm6616_vm10, %v17978_v24, %v17976_v2  ;;  %v7396_v47 = vrot.slane %v6680_v35, 7  ;;  %v6681_v15 = vsel %vm6617_vm13, %v5870_v39, %v6489_v1  ;;  %v6682_v23 = vsel %vm6618_vm14, %v5869_v16, %v6490_v38  ;;  %v17984_v38 = vld [vmem:[#allocation34_spill] sm:$0xff] }
 0x6be   : > { %v7257_v57 = vsel %vm6617_vm13, %v17977_v21, %v15649_v41  ;;  %v17979_v25 = vrot.slane %v15659_v30, 7  ;;  %v17981_v33 = vrot.slane %v17980_v20, 7  ;;  %vm6619_vm0 = vcmp.gt.f32.partialorder %v5871_v9, %v6491_v61 }
 0x6bf   : > { %v16074_v56 = vrot.slane %v7396_v47, 2  ;;  %v7398_v34 = vrot.slane %v6681_v15, 7  ;;  %v7400_v10 = vrot.slane %v6682_v23, 7  ;;  %v6683_v43 = vsel %vm6619_vm0, %v5871_v9, %v6491_v61  ;;  %v17983_v9 = vld [vmem:[#allocation13_spill] sm:$0xff] }
 0x6c0   : > { %v16072_v54 = vsel %vm6618_vm14, %v17981_v33, %v17979_v25  ;;  %v7259_v44 = vsel %vm6619_vm0, %v17980_v20, %v15659_v30  ;;  %v9686_v19 = vrot.slane %v16063_v50, 9  ;;  %v16079_v62 = vrot.slane %v7257_v57, 9 }
 0x6c1   : > { %v16081_v41 = vrot.slane %v7398_v34, 2  ;;  %v16083_v58 = vrot.slane %v7400_v10, 2  ;;  %v7402_v55 = vrot.slane %v6683_v43, 7  ;;  %v9688_v28 = vrot.slane %v16072_v54, 9 }
 0x6c2   : > { %v16088_v16 = vrot.slane %v7259_v44, 9  ;;  %v5872_v39 = vcombine.high %v5712_v59, %v5712_v59  ;;  %v5879_v6 = vrot.slane %v5712_v59, %v15578_v22  ;;  %v5681_v30 = vadd.f32 %v15717_v63, %v5643_v26 }
 0x6c3   : > { %v16092_v48 = vrot.slane %v7402_v55, 2  ;;  %v5512_v37 = vadd.f32 %v10870_v49, %v17982_v3  ;;  %v10871_v1 = vadd.f32 %v17983_v9, %v15883_v46  ;;  %v16099_v35 = vadd.f32 %v17984_v38, %v15896_v52  ;;  %v17985_v49 = vld [vmem:[#allocation39_spill] sm:$0xff] }
 0x6c4   : > { %v5886_v2 = vrot.slane %v5872_v39, %v15578_v22  ;;  %v5887_v21 = vcombine.high %v5879_v6, %v5879_v6  ;;  %vm7572_vm1 = vcmp.gt.f32.partialorder %v5879_v6, %v16038_v7  ;;  %v5713_v24 = vmax.f32 %v5681_v30, 0.0  ;;  %v17989_v39 = vld [vmem:[#allocation30_spill] sm:$0xff] }
 0x6c5   : > { %v7636_v59 = vsel %vm7572_vm1, %v5879_v6, %v16038_v7  ;;  %v8084_v26 = vsel %vm7572_vm1, %v15662_v4, %v9682_v51  ;;  %v5644_v61 = vmul.f32 %v15700_v17, %v5512_v37  ;;  %v5517_v47 = vadd.f32 %v10871_v1, %v17985_v49  ;;  %v17987_v51 = vld [vmem:[#allocation24_spill] sm:$0xff] }
 0x6c6   : > { %v5888_v15 = vcombine.high %v5886_v2, %v5886_v2  ;;  %vm7573_vm2 = vcmp.gt.f32.partialorder %v5887_v21, %v16045_v36  ;;  %vm7574_vm3 = vcmp.gt.f32.partialorder %v5886_v2, %v16047_v45  ;;  %v8212_v52 = vrot.slane %v7636_v59, 7 }
 0x6c7   : > { %v7637_v46 = vsel %vm7573_vm2, %v5887_v21, %v16045_v36  ;;  %v7638_v23 = vsel %vm7574_vm3, %v5886_v2, %v16047_v45  ;;  %v17986_v57 = vrot.slane %v15662_v4, 1  ;;  %v8086_v25 = vsel %vm7574_vm3, %v17987_v51, %v9684_v32 }
 0x6c8   : > { %vm7575_vm4 = vcmp.gt.f32.partialorder %v5888_v15, %v16053_v5  ;;  %v8213_v20 = vrot.slane %v7637_v46, 7  ;;  %v8214_v33 = vrot.slane %v7638_v23, 7  ;;  %vm8340_vm6 = vcmp.gt.f32.partialorder %v5879_v6, %v8212_v52 }
 0x6c9   : > { %v8085_v7 = vsel %vm7573_vm2, %v17986_v57, %v16043_v8  ;;  %v7639_v34 = vsel %vm7575_vm4, %v5888_v15, %v16053_v5  ;;  %v17988_v36 = vrot.slane %v17987_v51, 1  ;;  %v8404_v45 = vsel %vm8340_vm6, %v5879_v6, %v8212_v52 }
 0x6ca   : > { %v8724_v43 = vrot.slane %v8084_v26, 7  ;;  %v8215_v44 = vrot.slane %v7639_v34, 7  ;;  %vm8341_vm8 = vcmp.gt.f32.partialorder %v5887_v21, %v8213_v20  ;;  %vm8342_vm10 = vcmp.gt.f32.partialorder %v5886_v2, %v8214_v33 }
 0x6cb   : > { %v8087_v10 = vsel %vm7575_vm4, %v17988_v36, %v16050_v29  ;;  %v8725_v4 = vrot.slane %v8085_v7, 7  ;;  %v8405_v12 = vsel %vm8341_vm8, %v5887_v21, %v8213_v20  ;;  %v8406_v8 = vsel %vm8342_vm10, %v5886_v2, %v8214_v33  ;;  %v17991_v29 = vld [vmem:[#allocation25_spill] sm:$0xff] }
 0x6cc   : > { %v8726_v32 = vrot.slane %v8086_v25, 7  ;;  %v8727_v55 = vrot.slane %v8087_v10, 7  ;;  %vm8343_vm13 = vcmp.gt.f32.partialorder %v5888_v15, %v8215_v44  ;;  %v17990_v30 = vrot.slane %v17989_v39, 7 }
 0x6cd   : > { %v8789_v5 = vsel %vm8341_vm8, %v17989_v39, %v8725_v4  ;;  %v8943_v3 = vrot.slane %v8404_v45, %v15637_v14  ;;  %v8407_v37 = vsel %vm8343_vm13, %v5888_v15, %v8215_v44  ;;  %v17992_v6 = vrot.slane %v17991_v29, 7 }
 0x6ce   : > { %v8788_v13 = vsel %vm8340_vm6, %v17990_v30, %v8724_v43  ;;  %v8791_v1 = vsel %vm8343_vm13, %v17991_v29, %v8727_v55  ;;  %v8947_v38 = vrot.slane %v8405_v12, %v15637_v14  ;;  %v8951_v2 = vrot.slane %v8406_v8, %v15637_v14 }
 0x6cf   : > { %v8790_v9 = vsel %vm8342_vm10, %v17992_v6, %v8726_v32  ;;  %v8955_v21 = vrot.slane %v8407_v37, %v15637_v14  ;;  %v9285_v59 = vrot.slane %v8788_v13, %v15637_v14  ;;  %v9289_v26 = vrot.slane %v8789_v5, %v15637_v14  ;;  %v16157_v32 = vpop.f32.mrb[132].mxu1 }
 0x6d0   : > { %v9176_v49 = vsel %vm9164_vm11, %v8947_v38, %v8943_v3  ;;  %v9293_v52 = vrot.slane %v8790_v9, %v15637_v14  ;;  %v9297_v15 = vrot.slane %v8791_v1, %v15637_v14  ;;  %v5889_v46 = vcombine.high %v5713_v24, %v5713_v24  ;;  %v5113_v39 = vpop.f32.mrb[133].mxu1  ;;  %v17997_v9 = vld [vmem:[#allocation32_spill] sm:$0xff] }
 0x6d1   : > { %v9177_v23 = vsel %vm9166_vm12, %v8951_v2, %v9176_v49  ;;  %v9512_v57 = vsel %vm9164_vm11, %v9289_v26, %v9285_v59  ;;  %v5896_v7 = vrot.slane %v5713_v24, %v15578_v22  ;;  %v5682_v51 = vadd.f32 %v15717_v63, %v5644_v61  ;;  %v17993_v61 = vld [vmem:[#allocation33_spill] sm:$0xff]  ;;  %v17999_v2 = vld [vmem:[#allocation4_spill] sm:$0xff] }
 0x6d2   : > { %v9513_v25 = vsel %vm9166_vm12, %v9293_v52, %v9512_v57  ;;  %v5903_v20 = vrot.slane %v5889_v46, %v15578_v22  ;;  %v9178_v33 = vsel %vm9168_vm15, %v8955_v21, %v9177_v23  ;;  %v5645_v34 = vmul.f32 %v15700_v17, %v5517_v47  ;;  %v17994_v47 = vld [vmem:[#allocation3_spill] sm:$0xff] }
 0x6d3   : > { %v5904_v36 = vcombine.high %v5896_v7, %v5896_v7  ;;  %vm7576_vm14 = vcmp.gt.f32.partialorder %v5896_v7, %v16074_v56  ;;  %v9514_v10 = vsel %vm9168_vm15, %v9297_v15, %v9513_v25  ;;  %v5714_v45 = vmax.f32 %v5682_v51, 0.0 }
 0x6d4   : > { %v5905_v43 = vcombine.high %v5903_v20, %v5903_v20  ;;  %vm7578_vm0 = vcmp.gt.f32.partialorder %v5903_v20, %v16083_v58  ;;  %v7640_v24 = vsel %vm7576_vm14, %v5896_v7, %v16074_v56  ;;  %v8088_v44 = vsel %vm7576_vm14, %v17993_v61, %v9686_v19 }
 0x6d5   : > { %vm7577_vm1 = vcmp.gt.f32.partialorder %v5904_v36, %v16081_v41  ;;  %v7642_v4 = vsel %vm7578_vm0, %v5903_v20, %v16083_v58  ;;  %v8090_v12 = vsel %vm7578_vm0, %v17994_v47, %v9688_v28  ;;  %v8216_v8 = vrot.slane %v7640_v24, 7 }
 0x6d6   : > { %vm7579_vm2 = vcmp.gt.f32.partialorder %v5905_v43, %v16092_v48  ;;  %v7641_v55 = vsel %vm7577_vm1, %v5904_v36, %v16081_v41  ;;  %v17995_v50 = vrot.slane %v17993_v61, 1  ;;  %v8218_v19 = vrot.slane %v7642_v4, 7 }
 0x6d7   : > { %v7643_v30 = vsel %vm7579_vm2, %v5905_v43, %v16092_v48  ;;  %v17996_v54 = vrot.slane %v17994_v47, 1  ;;  %v8217_v28 = vrot.slane %v7641_v55, 7  ;;  %vm8344_vm3 = vcmp.gt.f32.partialorder %v5896_v7, %v8216_v8  ;;  %v16191_v47 = vpop.f32.mrb[134].mxu1 }
 0x6d8   : > { %v8089_v56 = vsel %vm7577_vm1, %v17995_v50, %v16079_v62  ;;  %v8219_v13 = vrot.slane %v7643_v30, 7  ;;  %vm8346_vm4 = vcmp.gt.f32.partialorder %v5903_v20, %v8218_v19  ;;  %v8408_v5 = vsel %vm8344_vm3, %v5896_v7, %v8216_v8  ;;  %v5118_v50 = vpop.f32.mrb[135].mxu1 }
 0x6d9   : > { %v8091_v58 = vsel %vm7579_vm2, %v17996_v54, %v16088_v16  ;;  %v8728_v3 = vrot.slane %v8088_v44, 7  ;;  %vm8345_vm6 = vcmp.gt.f32.partialorder %v5904_v36, %v8217_v28  ;;  %v8410_v41 = vsel %vm8346_vm4, %v5903_v20, %v8218_v19  ;;  %v18001_v44 = vld [vmem:[#allocation21_spill] sm:$0xff] }
 0x6da   : > { %v8729_v37 = vrot.slane %v8089_v56, 7  ;;  %v8730_v29 = vrot.slane %v8090_v12, 7  ;;  %vm8347_vm8 = vcmp.gt.f32.partialorder %v5905_v43, %v8219_v13  ;;  %v8409_v62 = vsel %vm8345_vm6, %v5904_v36, %v8217_v28  ;;  %v18003_v28 = vld [vmem:[#allocation54_spill] sm:$0xff] }
 0x6db   : > { %v8731_v6 = vrot.slane %v8091_v58, 7  ;;  %v17998_v48 = vrot.slane %v17997_v9, 7  ;;  %v8411_v38 = vsel %vm8347_vm8, %v5905_v43, %v8219_v13  ;;  %v18000_v21 = vrot.slane %v17999_v2, 7 }
 0x6dc   : > { %v8793_v16 = vsel %vm8345_vm6, %v17997_v9, %v8729_v37  ;;  %v8959_v26 = vrot.slane %v8408_v5, %v15637_v14  ;;  %v8963_v52 = vrot.slane %v8409_v62, %v15637_v14  ;;  %v8967_v15 = vrot.slane %v8410_v41, %v15637_v14  ;;  %v18005_v5 = vld [vmem:[#allocation35_spill] sm:$0xff] }
 0x6dd   : > { %v8792_v1 = vsel %vm8344_vm3, %v17998_v48, %v8728_v3  ;;  %v8794_v59 = vsel %vm8346_vm4, %v18000_v21, %v8730_v29  ;;  %v8795_v49 = vsel %vm8347_vm8, %v17999_v2, %v8731_v6  ;;  %v8971_v46 = vrot.slane %v8411_v38, %v15637_v14  ;;  %v18007_v48 = vld [vmem:[#allocation55_spill] sm:$0xff]  ;;  %v18009_v38 = vld [vmem:[#allocation53_spill] sm:$0xff] }
 0x6de   : > { %v9179_v23 = vsel %vm9170_vm5, %v8959_v26, %v9178_v33  ;;  %v9301_v57 = vrot.slane %v8792_v1, %v15637_v14  ;;  %v9305_v7 = vrot.slane %v8793_v16, %v15637_v14  ;;  %v9309_v51 = vrot.slane %v8794_v59, %v15637_v14 }
 0x6df   : > { %v9180_v25 = vsel %vm9172_vm7, %v8963_v52, %v9179_v23  ;;  %9237 = vst [vmem:[%s15966_s13 + $0xf] sm:$0x1] %v8971_v46  ;;  %v9313_v20 = vrot.slane %v8795_v49, %v15637_v14  ;;  %v5906_v36 = vcombine.high %v5714_v45, %v5714_v45  ;;  %v5913_v43 = vrot.slane %v5714_v45, %v15578_v22 }
 0x6e0   : > { %v9181_v24 = vsel %vm9174_vm9, %v8967_v15, %v9180_v25  ;;  %v9515_v33 = vsel %vm9170_vm5, %v9301_v57, %v9514_v10  ;;  %v5683_v61 = vadd.f32 %v15717_v63, %v5645_v34  ;;  %v5522_v4 = vadd.f32 %v16099_v35, %v18001_v44  ;;  %v18002_v34 = vld [vmem:[#allocation15_spill] sm:$0xff] }
 0x6e1   : > { %9236 = vst [vmem:[%s15966_s13 + $0x7] sm:$0xfe] %v9181_v24  ;;  %v9516_v12 = vsel %vm9172_vm7, %v9305_v7, %v9515_v33  ;;  %9557 = vst [vmem:[%s15983_s19 + $0xf] sm:$0x1] %v9313_v20  ;;  %v5920_v8 = vrot.slane %v5906_v36, %v15578_v22  ;;  %v5921_v55 = vcombine.high %v5913_v43, %v5913_v43  ;;  %v6492_v45 = vrot.slane %v5913_v43, 7 }
 0x6e2   : > { %v9517_v56 = vsel %vm9174_vm9, %v9309_v51, %v9516_v12  ;;  %v5715_v19 = vmax.f32 %v5683_v61, 0.0  ;;  %v5646_v10 = vmul.f32 %v15700_v17, %v5522_v4  ;;  %v10873_v39 = vadd.f32 %v18002_v34, %v15915_v53  ;;  %v18011_v61 = vld [vmem:[#allocation40_spill] sm:$0xff] }
 0x6e3   : > { %9556 = vst [vmem:[%s15983_s19 + $0x7] sm:$0xfe] %v9517_v56  ;;  %v5922_v35 = vcombine.high %v5920_v8, %v5920_v8  ;;  %v6493_v30 = vrot.slane %v5921_v55, 7  ;;  %v6494_v54 = vrot.slane %v5920_v8, 7  ;;  %vm6620_vm10 = vcmp.gt.f32.partialorder %v5913_v43, %v6492_v45  ;;  %v18013_v56 = vld [vmem:[#allocation57_spill] sm:$0xff] }
 0x6e4   : > { %v6684_v58 = vsel %vm6620_vm10, %v5913_v43, %v6492_v45  ;;  %v18004_v13 = vrot.slane %v18003_v28, 7  ;;  %v18006_v3 = vrot.slane %v18005_v5, 7  ;;  %v5923_v37 = vcombine.high %v5715_v19, %v5715_v19 }
 0x6e5   : > { %v5930_v29 = vrot.slane %v5715_v19, %v15578_v22  ;;  %v6495_v62 = vrot.slane %v5922_v35, 7  ;;  %vm6621_vm13 = vcmp.gt.f32.partialorder %v5921_v55, %v6493_v30  ;;  %vm6622_vm14 = vcmp.gt.f32.partialorder %v5920_v8, %v6494_v54 }
 0x6e6   : > { %v16206_v41 = vsel %vm6620_vm10, %v18006_v3, %v18004_v13  ;;  %v7404_v17 = vrot.slane %v6684_v58, 7  ;;  %v6685_v53 = vsel %vm6621_vm13, %v5921_v55, %v6493_v30  ;;  %v6686_v6 = vsel %vm6622_vm14, %v5920_v8, %v6494_v54  ;;  %v18015_v13 = vld [vmem:[#allocation59_spill] sm:$0xff]  ;;  %v18017_v3 = vld [vmem:[#allocation58_spill] sm:$0xff] }
 0x6e7   : > { %v7261_v9 = vsel %vm6621_vm13, %v18005_v5, %v18003_v28  ;;  %v18008_v1 = vrot.slane %v18007_v48, 7  ;;  %v18010_v16 = vrot.slane %v18009_v38, 7  ;;  %vm6623_vm0 = vcmp.gt.f32.partialorder %v5922_v35, %v6495_v62 }
 0x6e8   : > { %v16217_v21 = vrot.slane %v7404_v17, 2  ;;  %v7406_v59 = vrot.slane %v6685_v53, 7  ;;  %v7408_v26 = vrot.slane %v6686_v6, 7  ;;  %v6687_v49 = vsel %vm6623_vm0, %v5922_v35, %v6495_v62 }
 0x6e9   : > { %v16215_v2 = vsel %vm6622_vm14, %v18010_v16, %v18008_v1  ;;  %v7263_v52 = vsel %vm6623_vm0, %v18009_v38, %v18007_v48  ;;  %v9690_v15 = vrot.slane %v16206_v41, 9  ;;  %v16222_v46 = vrot.slane %v7261_v9, 9 }
 0x6ea   : > { %v16224_v23 = vrot.slane %v7406_v59, 2  ;;  %v16226_v57 = vrot.slane %v7408_v26, 2  ;;  %v7410_v7 = vrot.slane %v6687_v49, 7  ;;  %v9692_v51 = vrot.slane %v16215_v2, 9 }
 0x6eb   : > { %v16229_v25 = vrot.slane %v7263_v52, 9  ;;  %v5937_v20 = vrot.slane %v5923_v37, %v15578_v22  ;;  %v5938_v36 = vcombine.high %v5930_v29, %v5930_v29  ;;  %v6496_v43 = vrot.slane %v5930_v29, 7  ;;  %v16275_v52 = vld [vmem:[%s17498_s9] ss:$0 sm:$0xff] }
 0x6ec   : > { %v16232_v24 = vrot.slane %v7410_v7, 2  ;;  %v5684_v33 = vadd.f32 %v15717_v63, %v5646_v10  ;;  %v5527_v44 = vadd.f32 %v10873_v39, %v18011_v61  ;;  %v7927_v4 = vrot.slane %v15785_v0, 1  ;;  %v16246_v63 = vld [vmem:[%s17497_s8] ss:$0 sm:$0xff]  ;;  %v18021_v61 = vld [vmem:[#allocation22_spill] sm:$0xff] }
 0x6ed   : > { %v5939_v12 = vcombine.high %v5937_v20, %v5937_v20  ;;  %v6497_v8 = vrot.slane %v5938_v36, 7  ;;  %v6498_v55 = vrot.slane %v5937_v20, 7  ;;  %vm6624_vm1 = vcmp.gt.f32.partialorder %v5930_v29, %v6496_v43 }
 0x6ee   : > { %v6688_v45 = vsel %vm6624_vm1, %v5930_v29, %v6496_v43  ;;  %v18012_v50 = vrot.slane %v15737_v42, 7  ;;  %v18014_v19 = vrot.slane %v18013_v56, 7  ;;  %v5716_v35 = vmax.f32 %v5684_v33, 0.0  ;;  %v18020_v43 = vld [vmem:[#allocation56_spill] sm:$0xff] }
 0x6ef   : > { %v5647_v10 = vmul.f32 %v16246_v63, %v5527_v44  ;;  %v6499_v39 = vrot.slane %v5939_v12, 7  ;;  %vm6625_vm2 = vcmp.gt.f32.partialorder %v5938_v36, %v6497_v8  ;;  %vm6626_vm3 = vcmp.gt.f32.partialorder %v5937_v20, %v6498_v55 }
 0x6f0   : > { %v16241_v34 = vsel %vm6624_vm1, %v18014_v19, %v18012_v50  ;;  %v7412_v30 = vrot.slane %v6688_v45, 7  ;;  %v6689_v54 = vsel %vm6625_vm2, %v5938_v36, %v6497_v8  ;;  %v6690_v58 = vsel %vm6626_vm3, %v5937_v20, %v6498_v55  ;;  %v18019_v36 = vld [vmem:[#allocation29_spill] sm:$0xff]  ;;  %v18023_v19 = vld [vmem:[#allocation60_spill] sm:$0xff] }
 0x6f1   : > { %v7265_v28 = vsel %vm6625_vm2, %v18013_v56, %v15737_v42  ;;  %v18016_v5 = vrot.slane %v18015_v13, 7  ;;  %v18018_v41 = vrot.slane %v18017_v3, 7  ;;  %vm6627_vm4 = vcmp.gt.f32.partialorder %v5939_v12, %v6499_v39 }
 0x6f2   : > { %v16257_v29 = vrot.slane %v7412_v30, 2  ;;  %v7414_v62 = vrot.slane %v6689_v54, 7  ;;  %v7416_v17 = vrot.slane %v6690_v58, 7  ;;  %v6691_v53 = vsel %vm6627_vm4, %v5939_v12, %v6499_v39  ;;  %v18022_v12 = vld [vmem:[#allocation14_spill] sm:$0xff] }
 0x6f3   : > { %v16255_v37 = vsel %vm6626_vm3, %v18018_v41, %v18016_v5  ;;  %v7267_v6 = vsel %vm6627_vm4, %v18017_v3, %v18015_v13  ;;  %v9694_v9 = vrot.slane %v16241_v34, 9  ;;  %v16262_v48 = vrot.slane %v7265_v28, 9 }
 0x6f4   : > { %v16264_v42 = vrot.slane %v7414_v62, 2  ;;  %v16266_v1 = vrot.slane %v7416_v17, 2  ;;  %v7418_v38 = vrot.slane %v6691_v53, 7  ;;  %v9696_v16 = vrot.slane %v16255_v37, 9 }
 0x6f5   : > { %v16269_v59 = vrot.slane %v7267_v6, 9  ;;  %v5940_v26 = vcombine.high %v5716_v35, %v5716_v35  ;;  %v5947_v49 = vrot.slane %v5716_v35, %v15578_v22  ;;  %v5685_v7 = vadd.f32 %v16275_v52, %v5647_v10 }
 0x6f6   : > { %v16278_v20 = vrot.slane %v7418_v38, 2  ;;  %v16282_v33 = vrot.slane %v18020_v43, %v18019_v36  ;;  %v16286_v44 = vrot.slane %v18020_v43, %v18021_v61  ;;  %v10874_v8 = vadd.f32 %v18022_v12, %v15936_v40 }
 0x6f7   : > { %v5954_v55 = vrot.slane %v5940_v26, %v15578_v22  ;;  %v5955_v45 = vcombine.high %v5947_v49, %v5947_v49  ;;  %vm7580_vm6 = vcmp.gt.f32.partialorder %v5947_v49, %v16217_v21  ;;  %v5717_v50 = vmax.f32 %v5685_v7, 0.0  ;;  %v18027_v26 = vld [vmem:[#allocation62_spill] sm:$0xff] }
 0x6f8   : > { %v7644_v56 = vsel %vm7580_vm6, %v5947_v49, %v16217_v21  ;;  %v8092_v35 = vsel %vm7580_vm6, %v18023_v19, %v9690_v15  ;;  %v8694_v10 = vrot.slane %v16282_v33, 7  ;;  %v8695_v39 = vrot.slane %v16286_v44, 7  ;;  %v18025_v15 = vld [vmem:[#allocation61_spill] sm:$0xff] }
 0x6f9   : > { %v5956_v30 = vcombine.high %v5954_v55, %v5954_v55  ;;  %vm7581_vm8 = vcmp.gt.f32.partialorder %v5955_v45, %v16224_v23  ;;  %vm7582_vm10 = vcmp.gt.f32.partialorder %v5954_v55, %v16226_v57  ;;  %v8220_v40 = vrot.slane %v7644_v56, 7 }
 0x6fa   : > { %v7645_v54 = vsel %vm7581_vm8, %v5955_v45, %v16224_v23  ;;  %v7646_v58 = vsel %vm7582_vm10, %v5954_v55, %v16226_v57  ;;  %v18024_v28 = vrot.slane %v18023_v19, 1  ;;  %v8094_v13 = vsel %vm7582_vm10, %v18025_v15, %v9692_v51 }
 0x6fb   : > { %vm7583_vm13 = vcmp.gt.f32.partialorder %v5956_v30, %v16232_v24  ;;  %v8221_v5 = vrot.slane %v7645_v54, 7  ;;  %v8222_v3 = vrot.slane %v7646_v58, 7  ;;  %vm8348_vm14 = vcmp.gt.f32.partialorder %v5947_v49, %v8220_v40 }
 0x6fc   : > { %v8093_v21 = vsel %vm7581_vm8, %v18024_v28, %v16222_v46  ;;  %v7647_v41 = vsel %vm7583_vm13, %v5956_v30, %v16232_v24  ;;  %v18026_v23 = vrot.slane %v18025_v15, 1  ;;  %v8412_v57 = vsel %vm8348_vm14, %v5947_v49, %v8220_v40 }
 0x6fd   : > { %v8732_v17 = vrot.slane %v8092_v35, 7  ;;  %v8223_v53 = vrot.slane %v7647_v41, 7  ;;  %vm8349_vm0 = vcmp.gt.f32.partialorder %v5955_v45, %v8221_v5  ;;  %vm8350_vm1 = vcmp.gt.f32.partialorder %v5954_v55, %v8222_v3  ;;  %v18031_v41 = vld [vmem:[#allocation6_spill] sm:$0xff] }
 0x6fe   : > { %v8095_v62 = vsel %vm7583_vm13, %v18026_v23, %v16229_v25  ;;  %v8733_v46 = vrot.slane %v8093_v21, 7  ;;  %v8413_v2 = vsel %vm8349_vm0, %v5955_v45, %v8221_v5  ;;  %v8414_v6 = vsel %vm8350_vm1, %v5954_v55, %v8222_v3  ;;  %v18029_v25 = vld [vmem:[#allocation63_spill] sm:$0xff] }
 0x6ff   : > { %v8734_v51 = vrot.slane %v8094_v13, 7  ;;  %v8735_v38 = vrot.slane %v8095_v62, 7  ;;  %vm8351_vm2 = vcmp.gt.f32.partialorder %v5956_v30, %v8223_v53  ;;  %v18028_v7 = vrot.slane %v18027_v26, 7  ;;  %v16330_v62 = vpop.f32.mrb[136].mxu1 }
 0x700   : > { %v8797_v24 = vsel %vm8349_vm0, %v18027_v26, %v8733_v46  ;;  %v8975_v12 = vrot.slane %v8412_v57, %v15637_v14  ;;  %v8415_v56 = vsel %vm8351_vm2, %v5956_v30, %v8223_v53  ;;  %v18030_v49 = vrot.slane %v18029_v25, 7  ;;  %v18032_v46 = vld [vmem:[#allocation50_spill] sm:$0xff] }
 0x701   : > { %v8796_v43 = vsel %vm8348_vm14, %v18028_v7, %v8732_v17  ;;  %v8799_v35 = vsel %vm8351_vm2, %v18029_v25, %v8735_v38  ;;  %v8979_v40 = vrot.slane %v8413_v2, %v15637_v14  ;;  %v8983_v55 = vrot.slane %v8414_v6, %v15637_v14  ;;  %v5348_v6 = vpop.f32.mrb[137].mxu1  ;;  %v18033_v7 = vld [vmem:[#allocation64_spill] sm:$0xff] }
 0x702   : > { %v8798_v19 = vsel %vm8350_vm1, %v18030_v49, %v8734_v51  ;;  %v8987_v45 = vrot.slane %v8415_v56, %v15637_v14  ;;  %v9317_v54 = vrot.slane %v8796_v43, %v15637_v14  ;;  %v9321_v58 = vrot.slane %v8797_v24, %v15637_v14 }
 0x703   : > { %v9182_v28 = vsel %vm9164_vm11, %v8979_v40, %v8975_v12  ;;  %v9325_v21 = vrot.slane %v8798_v19, %v15637_v14  ;;  %v9329_v30 = vrot.slane %v8799_v35, %v15637_v14  ;;  %v5957_v15 = vcombine.high %v5717_v50, %v5717_v50 }
 0x704   : > { %v9183_v13 = vsel %vm9166_vm12, %v8983_v55, %v9182_v28  ;;  %v9518_v5 = vsel %vm9164_vm11, %v9321_v58, %v9317_v54  ;;  %v5964_v3 = vrot.slane %v5717_v50, %v15578_v22  ;;  %v5532_v23 = vadd.f32 %v10874_v8, %v18031_v41 }
 0x705   : > { %v9519_v57 = vsel %vm9166_vm12, %v9325_v21, %v9518_v5  ;;  %v5971_v17 = vrot.slane %v5957_v15, %v15578_v22  ;;  %v9184_v53 = vsel %vm9168_vm15, %v8987_v45, %v9183_v13  ;;  %v16336_v2 = vadd.s32 96, %v18032_v46 }
 0x706   : > { %v5972_v51 = vcombine.high %v5964_v3, %v5964_v3  ;;  %vm7584_vm3 = vcmp.gt.f32.partialorder %v5964_v3, %v16257_v29  ;;  %v9520_v38 = vsel %vm9168_vm15, %v9329_v30, %v9519_v57  ;;  %v5648_v50 = vmul.f32 %v16246_v63, %v5532_v23  ;;  %v18035_v57 = vld [vmem:[#allocation51_spill] sm:$0xff] }
 0x707   : > { %v5973_v8 = vcombine.high %v5971_v17, %v5971_v17  ;;  %vm7586_vm4 = vcmp.gt.f32.partialorder %v5971_v17, %v16266_v1  ;;  %v7648_v26 = vsel %vm7584_vm3, %v5964_v3, %v16257_v29  ;;  %v8096_v43 = vsel %vm7584_vm3, %v18033_v7, %v9694_v9 }
 0x708   : > { %vm7585_vm6 = vcmp.gt.f32.partialorder %v5972_v51, %v16264_v42  ;;  %v7650_v24 = vsel %vm7586_vm4, %v5971_v17, %v16266_v1  ;;  %v8098_v12 = vsel %vm7586_vm4, %v15785_v0, %v9696_v16  ;;  %v8224_v56 = vrot.slane %v7648_v26, 7 }
 0x709   : > { %vm7587_vm8 = vcmp.gt.f32.partialorder %v5973_v8, %v16278_v20  ;;  %v7649_v25 = vsel %vm7585_vm6, %v5972_v51, %v16264_v42  ;;  %v18034_v29 = vrot.slane %v18033_v7, 1  ;;  %v8226_v34 = vrot.slane %v7650_v24, 7 }
 0x70a   : > { %v7651_v9 = vsel %vm7587_vm8, %v5973_v8, %v16278_v20  ;;  %v8099_v1 = vsel %vm7587_vm8, %v7927_v4, %v16269_v59  ;;  %v8225_v19 = vrot.slane %v7649_v25, 7  ;;  %vm8352_vm10 = vcmp.gt.f32.partialorder %v5964_v3, %v8224_v56 }
 0x70b   : > { %v8097_v49 = vsel %vm7585_vm6, %v18034_v29, %v16262_v48  ;;  %v8227_v37 = vrot.slane %v7651_v9, 7  ;;  %vm8354_vm13 = vcmp.gt.f32.partialorder %v5971_v17, %v8226_v34  ;;  %v8416_v16 = vsel %vm8352_vm10, %v5964_v3, %v8224_v56  ;;  %v18037_v56 = vld [vmem:[#allocation23_spill] sm:$0xff] }
 0x70c   : > { %v8736_v35 = vrot.slane %v8096_v43, 7  ;;  %vm8353_vm14 = vcmp.gt.f32.partialorder %v5972_v51, %v8225_v19  ;;  %v8418_v40 = vsel %vm8354_vm13, %v5971_v17, %v8226_v34  ;;  %v8737_v42 = vrot.slane %v8097_v49, 7 }
 0x70d   : > { %v8738_v55 = vrot.slane %v8098_v12, 7  ;;  %vm8355_vm0 = vcmp.gt.f32.partialorder %v5973_v8, %v8227_v37  ;;  %v8417_v45 = vsel %vm8353_vm14, %v5972_v51, %v8225_v19  ;;  %v8739_v48 = vrot.slane %v8099_v1, 7  ;;  %v16385_v51 = vpop.f32.mrb[138].mxu1  ;;  %v18038_v1 = vld [vmem:[#allocation41_spill] sm:$0xff] }
 0x70e   : > { %v8800_v20 = vsel %vm8352_vm10, %v8694_v10, %v8736_v35  ;;  %v8419_v54 = vsel %vm8355_vm0, %v5973_v8, %v8227_v37  ;;  %v8801_v0 = vsel %vm8353_vm14, %v16282_v33, %v8737_v42  ;;  %v8991_v59 = vrot.slane %v8416_v16, %v15637_v14  ;;  %v5353_v43 = vpop.f32.mrb[139].mxu1 }
 0x70f   : > { %v8802_v4 = vsel %vm8354_vm13, %v8695_v39, %v8738_v55  ;;  %v8803_v58 = vsel %vm8355_vm0, %v16286_v44, %v8739_v48  ;;  %v8995_v28 = vrot.slane %v8417_v45, %v15637_v14  ;;  %v8999_v21 = vrot.slane %v8418_v40, %v15637_v14 }
 0x710   : > { %v9003_v30 = vrot.slane %v8419_v54, %v15637_v14  ;;  %v9185_v15 = vsel %vm9170_vm5, %v8991_v59, %v9184_v53  ;;  %v9333_v10 = vrot.slane %v8800_v20, %v15637_v14  ;;  %v9337_v33 = vrot.slane %v8801_v0, %v15637_v14  ;;  %v18036_v53 = vld [vmem:[#allocation52_spill] sm:$0xff] }
 0x711   : > { %v9341_v39 = vrot.slane %v8802_v4, %v15637_v14  ;;  %v9186_v13 = vsel %vm9172_vm7, %v8995_v28, %v9185_v15  ;;  %v9345_v44 = vrot.slane %v8803_v58, %v15637_v14  ;;  %v5686_v5 = vadd.f32 %v16275_v52, %v5648_v50 }
 0x712   : > { %9239 = vst [vmem:[%s15966_s13 + $0x17] sm:$0x1] %v9003_v30  ;;  %v6455_v3 = vadd.s32 1, %v16336_v2  ;;  %v9187_v41 = vsel %vm9174_vm9, %v8999_v21, %v9186_v13  ;;  %v9521_v23 = vsel %vm9170_vm5, %v9333_v10, %v9520_v38  ;;  %v7078_v17 = vrot.slane %v16336_v2, %v18035_v57 }
 0x713   : > { %v7085_v6 = vrot.slane %v16336_v2, %v18036_v53  ;;  %9238 = vst [vmem:[%s15966_s13 + $0xf] sm:$0xfe] %v9187_v41  ;;  %v9522_v8 = vsel %vm9172_vm7, %v9337_v33, %v9521_v23  ;;  %9559 = vst [vmem:[%s15983_s19 + $0x17] sm:$0x1] %v9345_v44  ;;  %v5718_v50 = vmax.f32 %v5686_v5, 0.0  ;;  %v10875_v25 = vadd.f32 %v18037_v56, %v15957_v27 }
 0x714   : > { %v6822_v26 = vrot.slane %v6455_v3, %v18035_v57  ;;  %v6829_v7 = vrot.slane %v6455_v3, %v18036_v53  ;;  %v9523_v38 = vsel %vm9174_vm9, %v9341_v39, %v9522_v8  ;;  %v7224_v24 = vrot.slane %v7078_v17, 7  ;;  %v16425_v39 = vpop.f32.mrb[140].mxu1 }
 0x715   : > { %v7225_v12 = vrot.slane %v7085_v6, 7  ;;  %9558 = vst [vmem:[%s15983_s19 + $0xf] sm:$0xfe] %v9523_v38  ;;  %v5974_v29 = vcombine.high %v5718_v50, %v5718_v50  ;;  %v5981_v49 = vrot.slane %v5718_v50, %v15578_v22  ;;  %v5537_v19 = vadd.f32 %v10875_v25, %v18038_v1  ;;  %v5358_v41 = vpop.f32.mrb[141].mxu1 }
 0x716   : > { %v6968_v34 = vrot.slane %v6822_v26, 7  ;;  %v6969_v9 = vrot.slane %v6829_v7, 7  ;;  %v16399_v37 = vrot.slane %v6455_v3, %v18019_v36  ;;  %v16402_v16 = vrot.slane %v6455_v3, %v18021_v61 }
 0x717   : > { %v16406_v35 = vrot.slane %v16336_v2, %v18019_v36  ;;  %v5988_v27 = vrot.slane %v5974_v29, %v15578_v22  ;;  %v5989_v40 = vcombine.high %v5981_v49, %v5981_v49  ;;  %v6500_v42 = vrot.slane %v5981_v49, 7 }
 0x718   : > { %v16411_v55 = vrot.slane %v16336_v2, %v18021_v61  ;;  %v5649_v45 = vmul.f32 %v16246_v63, %v5537_v19  ;;  %v6970_v48 = vrot.slane %v16399_v37, 7  ;;  %v6971_v20 = vrot.slane %v16402_v16, 7 }
 0x719   : > { %v7226_v54 = vrot.slane %v16406_v35, 7  ;;  %v5990_v0 = vcombine.high %v5988_v27, %v5988_v27  ;;  %v6501_v4 = vrot.slane %v5989_v40, 7  ;;  %v6502_v59 = vrot.slane %v5988_v27, 7 }
 0x71a   : > { %vm6628_vm1 = vcmp.gt.f32.partialorder %v5981_v49, %v6500_v42  ;;  %v5687_v21 = vadd.f32 %v16275_v52, %v5649_v45  ;;  %v7227_v30 = vrot.slane %v16411_v55, 7  ;;  %v6463_v1 = vadd.s32 16, %v16336_v2 }
 0x71b   : > { %v6692_v58 = vsel %vm6628_vm1, %v5981_v49, %v6500_v42  ;;  %v16417_v28 = vsel %vm6628_vm1, %v6968_v34, %v7224_v24  ;;  %v6503_v15 = vrot.slane %v5990_v0, 7  ;;  %vm16421_vm2 = vcmp.gt.f32.partialorder %v5989_v40, %v6501_v4  ;;  %v18041_v34 = vld [vmem:[#allocation16_spill] sm:$0xff] }
 0x71c   : > { %vm6630_vm3 = vcmp.gt.f32.partialorder %v5988_v27, %v6502_v59  ;;  %v7420_v33 = vrot.slane %v6692_v58, 7  ;;  %v6693_v13 = vsel %vm16421_vm2, %v5989_v40, %v6501_v4  ;;  %v7269_v5 = vsel %vm16421_vm2, %v6822_v26, %v7078_v17  ;;  %v18044_v4 = vld [vmem:[#allocation7_spill] sm:$0xff] }
 0x71d   : > { %v6694_v44 = vsel %vm6630_vm3, %v5988_v27, %v6502_v59  ;;  %v16431_v3 = vsel %vm6630_vm3, %v6969_v9, %v7225_v12  ;;  %vm6631_vm4 = vcmp.gt.f32.partialorder %v5990_v0, %v6503_v15  ;;  %v7422_v8 = vrot.slane %v6693_v13, 7  ;;  %v18043_v27 = vld [vmem:[#allocation17_spill] sm:$0xff] }
 0x71e   : > { %v16433_v23 = vrot.slane %v7420_v33, 2  ;;  %v7424_v50 = vrot.slane %v6694_v44, 7  ;;  %v6695_v43 = vsel %vm6631_vm4, %v5990_v0, %v6503_v15  ;;  %v7271_v38 = vsel %vm6631_vm4, %v6829_v7, %v7085_v6  ;;  %v18042_v7 = vld [vmem:[#allocation36_spill] sm:$0xff] }
 0x71f   : > { %v9698_v24 = vrot.slane %v16417_v28, 9  ;;  %v16436_v56 = vrot.slane %v7269_v5, 9  ;;  %v16438_v25 = vrot.slane %v7422_v8, 2  ;;  %v7426_v49 = vrot.slane %v6695_v43, 7 }
 0x720   : > { %v16440_v29 = vrot.slane %v7424_v50, 2  ;;  %v9700_v17 = vrot.slane %v16431_v3, 9  ;;  %v16443_v26 = vrot.slane %v7271_v38, 9  ;;  %v5719_v12 = vmax.f32 %v5687_v21, 0.0  ;;  %v18045_v21 = vld [vmem:[#allocation42_spill] sm:$0xff] }
 0x721   : > { %v10876_v9 = vadd.f32 %v18041_v34, %v15978_v11  ;;  %v16448_v6 = vrot.slane %v7426_v49, 2  ;;  %v10877_v19 = vadd.f32 %v18042_v7, %v16006_v18  ;;  %v10878_v40 = vadd.f32 %v18043_v27, %v16036_v31 }
 0x722   : > { %v16455_v42 = vadd.s32 128, %v18032_v46  ;;  %v5991_v45 = vcombine.high %v5719_v12, %v5719_v12  ;;  %v5998_v0 = vrot.slane %v5719_v12, %v15578_v22  ;;  %v6471_v58 = vadd.s32 1, %v6463_v1 }
 0x723   : > { %v5542_v59 = vadd.f32 %v10876_v9, %v18044_v4  ;;  %v16460_v11 = vrot.slane %v6463_v1, %v18035_v57  ;;  %v16463_v2 = vrot.slane %v6463_v1, %v18036_v53  ;;  %v5547_v18 = vadd.f32 %v10877_v19, %v18045_v21  ;;  %v16495_v21 = vpop.f32.mrb[142].mxu1 }
 0x724   : > { %v16467_v15 = vrot.slane %v6463_v1, %v18019_v36  ;;  %v6005_v31 = vrot.slane %v5991_v45, %v15578_v22  ;;  %v6006_v10 = vcombine.high %v5998_v0, %v5998_v0  ;;  %v6504_v33 = vrot.slane %v5998_v0, 7 }
 0x725   : > { %v5650_v13 = vmul.f32 %v16246_v63, %v5542_v59  ;;  %v7928_v44 = vrot.slane %v16460_v11, 1  ;;  %v7929_v5 = vrot.slane %v16463_v2, 1  ;;  %v16474_v41 = vrot.slane %v6471_v58, %v18035_v57 }
 0x726   : > { %v16477_v8 = vrot.slane %v6471_v58, %v18036_v53  ;;  %v6007_v50 = vcombine.high %v6005_v31, %v6005_v31  ;;  %v6505_v43 = vrot.slane %v6006_v10, 7  ;;  %v6506_v38 = vrot.slane %v6005_v31, 7 }
 0x727   : > { %vm6632_vm6 = vcmp.gt.f32.partialorder %v5998_v0, %v6504_v33  ;;  %v5688_v34 = vadd.f32 %v16275_v52, %v5650_v13  ;;  %v8696_v9 = vrot.slane %v16474_v41, 7 }
 0x728   : > { %v6696_v49 = vsel %vm6632_vm6, %v5998_v0, %v6504_v33  ;;  %v16481_v12 = vsel %vm6632_vm6, %v6970_v48, %v7226_v54  ;;  %v6507_v7 = vrot.slane %v6007_v50, 7  ;;  %vm6633_vm8 = vcmp.gt.f32.partialorder %v6006_v10, %v6505_v43 }
 0x729   : > { %vm6634_vm10 = vcmp.gt.f32.partialorder %v6005_v31, %v6506_v38  ;;  %v7428_v19 = vrot.slane %v6696_v49, 7  ;;  %v6697_v27 = vsel %vm6633_vm8, %v6006_v10, %v6505_v43  ;;  %v7273_v4 = vsel %vm6633_vm8, %v16399_v37, %v16406_v35  ;;  %v5363_v35 = vpop.f32.mrb[143].mxu1 }
 0x72a   : > { %v6698_v45 = vsel %vm6634_vm10, %v6005_v31, %v6506_v38  ;;  %v16491_v0 = vsel %vm6634_vm10, %v6971_v20, %v7227_v30  ;;  %vm6635_vm13 = vcmp.gt.f32.partialorder %v6007_v50, %v6507_v7  ;;  %v7430_v54 = vrot.slane %v6697_v27, 7  ;;  %v16531_v35 = vpop.f32.mrb[144].mxu1 }
 0x72b   : > { %v16493_v48 = vrot.slane %v7428_v19, 2  ;;  %v7432_v59 = vrot.slane %v6698_v45, 7  ;;  %v6699_v33 = vsel %vm6635_vm13, %v6007_v50, %v6507_v7  ;;  %v7275_v31 = vsel %vm6635_vm13, %v16402_v16, %v16411_v55 }
 0x72c   : > { %v9702_v10 = vrot.slane %v16481_v12, 9  ;;  %v16500_v37 = vrot.slane %v7273_v4, 9  ;;  %v16502_v13 = vrot.slane %v7430_v54, 2  ;;  %v7434_v30 = vrot.slane %v6699_v33, 7  ;;  %v18046_v33 = vld [vmem:[#allocation8_spill] sm:$0xff] }
 0x72d   : > { %v16504_v20 = vrot.slane %v7432_v59, 2  ;;  %v16507_v38 = vrot.slane %v7275_v31, 9  ;;  %v5720_v49 = vmax.f32 %v5688_v34, 0.0  ;;  %v8697_v50 = vrot.slane %v16477_v8, 7 }
 0x72e   : > { %v5651_v7 = vmul.f32 %v16246_v63, %v5547_v18  ;;  %v16511_v16 = vrot.slane %v7434_v30, 2  ;;  %v16514_v55 = vrot.slane %v6463_v1, %v18021_v61  ;;  %v16518_v27 = vrot.slane %v6471_v58, %v18019_v36 }
 0x72f   : > { %v6008_v45 = vcombine.high %v5720_v49, %v5720_v49  ;;  %v6015_v4 = vrot.slane %v5720_v49, %v15578_v22  ;;  %v16523_v34 = vrot.slane %v6471_v58, %v18021_v61  ;;  %v5552_v1 = vadd.f32 %v10878_v40, %v18046_v33 }
 0x730   : > { %v5689_v54 = vadd.f32 %v16275_v52, %v5651_v7  ;;  %v16529_v31 = vadd.s32 1, %v16455_v42  ;;  %v5368_v7 = vpop.f32.mrb[145].mxu1 }
 0x731   : > { %v6022_v30 = vrot.slane %v6008_v45, %v15578_v22  ;;  %v6023_v19 = vcombine.high %v6015_v4, %v6015_v4  ;;  %vm7588_vm14 = vcmp.gt.f32.partialorder %v6015_v4, %v16433_v23  ;;  %v5652_v33 = vmul.f32 %v16246_v63, %v5552_v1 }
 0x732   : > { %v5721_v49 = vmax.f32 %v5689_v54, 0.0  ;;  %v7652_v58 = vsel %vm7588_vm14, %v6015_v4, %v16433_v23  ;;  %v8100_v59 = vsel %vm7588_vm14, %v16460_v11, %v9698_v24 }
 0x733   : > { %v6024_v18 = vcombine.high %v6022_v30, %v6022_v30  ;;  %vm7589_vm0 = vcmp.gt.f32.partialorder %v6023_v19, %v16438_v25  ;;  %vm7590_vm1 = vcmp.gt.f32.partialorder %v6022_v30, %v16440_v29  ;;  %v8228_v45 = vrot.slane %v7652_v58, 7 }
 0x734   : > { %v7653_v43 = vsel %vm7589_vm0, %v6023_v19, %v16438_v25  ;;  %v7654_v54 = vsel %vm7590_vm1, %v6022_v30, %v16440_v29  ;;  %v8101_v28 = vsel %vm7589_vm0, %v7928_v44, %v16436_v56  ;;  %v8102_v23 = vsel %vm7590_vm1, %v16463_v2, %v9700_v17 }
 0x735   : > { %vm7591_vm2 = vcmp.gt.f32.partialorder %v6024_v18, %v16448_v6  ;;  %v8229_v24 = vrot.slane %v7653_v43, 7  ;;  %v8230_v1 = vrot.slane %v7654_v54, 7  ;;  %vm8356_vm3 = vcmp.gt.f32.partialorder %v6015_v4, %v8228_v45 }
 0x736   : > { %v7655_v7 = vsel %vm7591_vm2, %v6024_v18, %v16448_v6  ;;  %v8103_v25 = vsel %vm7591_vm2, %v7929_v5, %v16443_v26  ;;  %v8420_v29 = vsel %vm8356_vm3, %v6015_v4, %v8228_v45  ;;  %v8740_v58 = vrot.slane %v8100_v59, 7  ;;  %v16562_v59 = vpop.f32.mrb[146].mxu1 }
 0x737   : > { %v8231_v40 = vrot.slane %v7655_v7, 7  ;;  %vm8357_vm4 = vcmp.gt.f32.partialorder %v6023_v19, %v8229_v24  ;;  %vm8358_vm6 = vcmp.gt.f32.partialorder %v6022_v30, %v8230_v1  ;;  %v8741_v56 = vrot.slane %v8101_v28, 7  ;;  %v5373_v28 = vpop.f32.mrb[147].mxu1 }
 0x738   : > { %v8421_v3 = vsel %vm8357_vm4, %v6023_v19, %v8229_v24  ;;  %v8422_v11 = vsel %vm8358_vm6, %v6022_v30, %v8230_v1  ;;  %v8742_v17 = vrot.slane %v8102_v23, 7  ;;  %v8743_v44 = vrot.slane %v8103_v25, 7  ;;  %v16603_v28 = vpop.f32.mrb[148].mxu1 }
 0x739   : > { %vm8359_vm8 = vcmp.gt.f32.partialorder %v6024_v18, %v8231_v40  ;;  %v8804_v43 = vsel %vm8356_vm3, %v8696_v9, %v8740_v58  ;;  %v8805_v6 = vsel %vm8357_vm4, %v16474_v41, %v8741_v56  ;;  %v9007_v54 = vrot.slane %v8420_v29, %v15637_v14 }
 0x73a   : > { %v8423_v2 = vsel %vm8359_vm8, %v6024_v18, %v8231_v40  ;;  %v8806_v26 = vsel %vm8358_vm6, %v8697_v50, %v8742_v17  ;;  %v8807_v5 = vsel %vm8359_vm8, %v16477_v8, %v8743_v44  ;;  %v9011_v4 = vrot.slane %v8421_v3, %v15637_v14 }
 0x73b   : > { %v9015_v19 = vrot.slane %v8422_v11, %v15637_v14  ;;  %v9019_v30 = vrot.slane %v8423_v2, %v15637_v14  ;;  %v9349_v45 = vrot.slane %v8804_v43, %v15637_v14  ;;  %v9353_v9 = vrot.slane %v8805_v6, %v15637_v14 }
 0x73c   : > { %v9188_v41 = vsel %vm9164_vm11, %v9011_v4, %v9007_v54  ;;  %v9357_v18 = vrot.slane %v8806_v26, %v15637_v14  ;;  %v9361_v50 = vrot.slane %v8807_v5, %v15637_v14  ;;  %v6025_v8 = vcombine.high %v5721_v49, %v5721_v49 }
 0x73d   : > { %v9189_v40 = vsel %vm9166_vm12, %v9015_v19, %v9188_v41  ;;  %v9524_v23 = vsel %vm9164_vm11, %v9353_v9, %v9349_v45  ;;  %v6032_v24 = vrot.slane %v5721_v49, %v15578_v22  ;;  %v5690_v1 = vadd.f32 %v16275_v52, %v5652_v33 }
 0x73e   : > { %v9525_v7 = vsel %vm9166_vm12, %v9357_v18, %v9524_v23  ;;  %v6039_v25 = vrot.slane %v6025_v8, %v15578_v22  ;;  %v9190_v29 = vsel %vm9168_vm15, %v9019_v30, %v9189_v40  ;;  %v16580_v58 = vrot.slane %v16529_v31, %v18035_v57 }
 0x73f   : > { %v6040_v56 = vcombine.high %v6032_v24, %v6032_v24  ;;  %vm7592_vm10 = vcmp.gt.f32.partialorder %v6032_v24, %v16493_v48  ;;  %v9526_v3 = vsel %vm9168_vm15, %v9361_v50, %v9525_v7  ;;  %v5722_v11 = vmax.f32 %v5690_v1, 0.0 }
 0x740   : > { %v6041_v17 = vcombine.high %v6039_v25, %v6039_v25  ;;  %vm7594_vm13 = vcmp.gt.f32.partialorder %v6039_v25, %v16504_v20  ;;  %v7656_v49 = vsel %vm7592_vm10, %v6032_v24, %v16493_v48  ;;  %v8104_v33 = vsel %vm7592_vm10, %v16467_v15, %v9702_v10 }
 0x741   : > { %vm7593_vm14 = vcmp.gt.f32.partialorder %v6040_v56, %v16502_v13  ;;  %v7658_v44 = vsel %vm7594_vm13, %v6039_v25, %v16504_v20  ;;  %v18047_v43 = vrot.slane %v16491_v0, 9  ;;  %v8232_v54 = vrot.slane %v7656_v49, 7 }
 0x742   : > { %vm7595_vm0 = vcmp.gt.f32.partialorder %v6041_v17, %v16511_v16  ;;  %v7657_v2 = vsel %vm7593_vm14, %v6040_v56, %v16502_v13  ;;  %v18048_v48 = vrot.slane %v16467_v15, 1  ;;  %v8234_v12 = vrot.slane %v7658_v44, 7 }
 0x743   : > { %v8106_v6 = vsel %vm7594_vm13, %v16514_v55, %v18047_v43  ;;  %v7659_v10 = vsel %vm7595_vm0, %v6041_v17, %v16511_v16  ;;  %v18049_v5 = vrot.slane %v16514_v55, 1  ;;  %v8233_v4 = vrot.slane %v7657_v2, 7 }
 0x744   : > { %v8105_v26 = vsel %vm7593_vm14, %v18048_v48, %v16500_v37  ;;  %vm8360_vm1 = vcmp.gt.f32.partialorder %v6032_v24, %v8232_v54  ;;  %v8235_v0 = vrot.slane %v7659_v10, 7  ;;  %vm8362_vm2 = vcmp.gt.f32.partialorder %v6039_v25, %v8234_v12 }
 0x745   : > { %v8107_v20 = vsel %vm7595_vm0, %v18049_v5, %v16507_v38  ;;  %v8424_v19 = vsel %vm8360_vm1, %v6032_v24, %v8232_v54  ;;  %v8744_v30 = vrot.slane %v8104_v33, 7  ;;  %vm8361_vm3 = vcmp.gt.f32.partialorder %v6040_v56, %v8233_v4  ;;  %v5378_v38 = vpop.f32.mrb[149].mxu1 }
 0x746   : > { %v8426_v45 = vsel %vm8362_vm2, %v6039_v25, %v8234_v12  ;;  %v8745_v13 = vrot.slane %v8105_v26, 7  ;;  %v8746_v9 = vrot.slane %v8106_v6, 7  ;;  %vm8363_vm4 = vcmp.gt.f32.partialorder %v6041_v17, %v8235_v0 }
 0x747   : > { %v8425_v15 = vsel %vm8361_vm3, %v6040_v56, %v8233_v4  ;;  %v8747_v37 = vrot.slane %v8107_v20, 7  ;;  %v18050_v16 = vrot.slane %v16518_v27, 7  ;;  %v8427_v41 = vsel %vm8363_vm4, %v6041_v17, %v8235_v0 }
 0x748   : > { %v8809_v18 = vsel %vm8361_vm3, %v16518_v27, %v8745_v13  ;;  %v18051_v50 = vrot.slane %v16523_v34, 7  ;;  %v9023_v40 = vrot.slane %v8424_v19, %v15637_v14  ;;  %v9027_v24 = vrot.slane %v8425_v15, %v15637_v14  ;;  %v18052_v13 = vld [vmem:[#allocation37_spill] sm:$0xff] }
 0x749   : > { %v8808_v55 = vsel %vm8360_vm1, %v18050_v16, %v8744_v30  ;;  %v8811_v23 = vsel %vm8363_vm4, %v16523_v34, %v8747_v37  ;;  %v9031_v1 = vrot.slane %v8426_v45, %v15637_v14  ;;  %v9035_v7 = vrot.slane %v8427_v41, %v15637_v14 }
 0x74a   : > { %v8810_v8 = vsel %vm8362_vm2, %v18051_v50, %v8746_v9  ;;  %v9191_v25 = vsel %vm9170_vm5, %v9023_v40, %v9190_v29  ;;  %v9365_v56 = vrot.slane %v8808_v55, %v15637_v14  ;;  %v9369_v27 = vrot.slane %v8809_v18, %v15637_v14  ;;  %v16651_v50 = vpop.f32.mrb[150].mxu1 }
 0x74b   : > { %v9373_v17 = vrot.slane %v8810_v8, %v15637_v14  ;;  %v9192_v49 = vsel %vm9172_vm7, %v9027_v24, %v9191_v25  ;;  %9241 = vst [vmem:[%s15966_s13 + $0x1f] sm:$0x1] %v9035_v7  ;;  %v9377_v34 = vrot.slane %v8811_v23, %v15637_v14  ;;  %v6042_v33 = vcombine.high %v5722_v11, %v5722_v11  ;;  %v5383_v23 = vpop.f32.mrb[151].mxu1 }
 0x74c   : > { %v6049_v44 = vrot.slane %v5722_v11, %v15578_v22  ;;  %v9193_v43 = vsel %vm9174_vm9, %v9031_v1, %v9192_v49  ;;  %v9527_v6 = vsel %vm9170_vm5, %v9365_v56, %v9526_v3  ;;  %v6857_v29 = vrot.slane %v16529_v31, %v18036_v53 }
 0x74d   : > { %v6972_v54 = vrot.slane %v16580_v58, 7  ;;  %9240 = vst [vmem:[%s15966_s13 + $0x17] sm:$0xfe] %v9193_v43  ;;  %v9528_v2 = vsel %vm9172_vm7, %v9369_v27, %v9527_v6  ;;  %9561 = vst [vmem:[%s15983_s19 + $0x1f] sm:$0x1] %v9377_v34  ;;  %v6056_v48 = vrot.slane %v6042_v33, %v15578_v22  ;;  %v7106_v5 = vrot.slane %v16455_v42, %v18035_v57  ;;  %v18055_v33 = vld [vmem:[#allocation43_spill] sm:$0xff] }
 0x74e   : > { %v6057_v26 = vcombine.high %v6049_v44, %v6049_v44  ;;  %v6508_v12 = vrot.slane %v6049_v44, 7  ;;  %v9529_v10 = vsel %vm9174_vm9, %v9373_v17, %v9528_v2  ;;  %v6973_v11 = vrot.slane %v6857_v29, 7 }
 0x74f   : > { %v7113_v3 = vrot.slane %v16455_v42, %v18036_v53  ;;  %9560 = vst [vmem:[%s15983_s19 + $0x17] sm:$0xfe] %v9529_v10  ;;  %v6058_v20 = vcombine.high %v6056_v48, %v6056_v48  ;;  %v6510_v0 = vrot.slane %v6056_v48, 7  ;;  %v7228_v30 = vrot.slane %v7106_v5, 7 }
 0x750   : > { %v6509_v4 = vrot.slane %v6057_v26, 7  ;;  %vm6636_vm6 = vcmp.gt.f32.partialorder %v6049_v44, %v6508_v12  ;;  %v10879_v9 = vadd.f32 %v18052_v13, %v16086_v60  ;;  %v16670_v43 = vrot.slane %v16529_v31, %v18019_v36 }
 0x751   : > { %v6700_v19 = vsel %vm6636_vm6, %v6049_v44, %v6508_v12  ;;  %v7229_v45 = vrot.slane %v7113_v3, 7  ;;  %v6511_v15 = vrot.slane %v6058_v20, 7  ;;  %vm6638_vm10 = vcmp.gt.f32.partialorder %v6056_v48, %v6510_v0  ;;  %v18056_v12 = vld [vmem:[#allocation18_spill] sm:$0xff] }
 0x752   : > { %vm16640_vm8 = vcmp.gt.f32.partialorder %v6057_v26, %v6509_v4  ;;  %v7436_v16 = vrot.slane %v6700_v19, 7  ;;  %v6702_v38 = vsel %vm6638_vm10, %v6056_v48, %v6510_v0  ;;  %v16646_v41 = vsel %vm6636_vm6, %v6972_v54, %v7228_v30  ;;  %v18058_v19 = vld [vmem:[#allocation9_spill] sm:$0xff] }
 0x753   : > { %v6701_v55 = vsel %vm16640_vm8, %v6057_v26, %v6509_v4  ;;  %v7277_v18 = vsel %vm16640_vm8, %v16580_v58, %v7106_v5  ;;  %vm6639_vm13 = vcmp.gt.f32.partialorder %v6058_v20, %v6511_v15  ;;  %v16653_v60 = vsel %vm6638_vm10, %v6973_v11, %v7229_v45 }
 0x754   : > { %v16655_v8 = vrot.slane %v7436_v16, 2  ;;  %v7438_v40 = vrot.slane %v6701_v55, 7  ;;  %v6703_v24 = vsel %vm6639_vm13, %v6058_v20, %v6511_v15  ;;  %v7279_v1 = vsel %vm6639_vm13, %v6857_v29, %v7113_v3  ;;  %v18057_v20 = vld [vmem:[#allocation38_spill] sm:$0xff] }
 0x755   : > { %v7440_v7 = vrot.slane %v6702_v38, 7  ;;  %v9706_v25 = vrot.slane %v16646_v41, 9  ;;  %v7442_v27 = vrot.slane %v6703_v24, 7  ;;  %v16660_v17 = vrot.slane %v7277_v18, 9 }
 0x756   : > { %v16658_v56 = vrot.slane %v7438_v40, 2  ;;  %v9708_v58 = vrot.slane %v16653_v60, 9  ;;  %v16665_v34 = vrot.slane %v7279_v1, 9  ;;  %v5557_v44 = vadd.f32 %v10879_v9, %v18055_v33 }
 0x757   : > { %v16663_v49 = vrot.slane %v7440_v7, 2  ;;  %v16672_v6 = vrot.slane %v7442_v27, 2  ;;  %v16676_v29 = vrot.slane %v16529_v31, %v18021_v61  ;;  %v16680_v54 = vrot.slane %v16455_v42, %v18019_v36 }
 0x758   : > { %v16684_v2 = vrot.slane %v16455_v42, %v18021_v61  ;;  %v5653_v48 = vmul.f32 %v16246_v63, %v5557_v44  ;;  %v6974_v26 = vrot.slane %v16670_v43, 7  ;;  %v10880_v10 = vadd.f32 %v18056_v12, %v16157_v32 }
 0x759   : > { %v6464_v11 = vadd.s32 16, %v16455_v42  ;;  %v6975_v31 = vrot.slane %v16676_v29, 7  ;;  %v7230_v5 = vrot.slane %v16680_v54, 7  ;;  %v10881_v4 = vadd.f32 %v18057_v20, %v16191_v47  ;;  %v18059_v42 = vld [vmem:[#allocation44_spill] sm:$0xff] }
 0x75a   : > { %v7231_v3 = vrot.slane %v16684_v2, 7  ;;  %v5691_v0 = vadd.f32 %v16275_v52, %v5653_v48  ;;  %v5562_v30 = vadd.f32 %v10880_v10, %v18058_v19 }
 0x75b   : > { %v6472_v45 = vadd.s32 1, %v6464_v11  ;;  %v16699_v13 = vrot.slane %v6464_v11, %v18035_v57  ;;  %v16702_v32 = vrot.slane %v6464_v11, %v18036_v53  ;;  %v5567_v9 = vadd.f32 %v10881_v4, %v18059_v42  ;;  %v18060_v42 = vld [vmem:[#allocation10_spill] sm:$0xff] }
 0x75c   : > { %v16706_v15 = vrot.slane %v6464_v11, %v18019_v36  ;;  %v16709_v37 = vrot.slane %v6464_v11, %v18021_v61  ;;  %v5723_v47 = vmax.f32 %v5691_v0, 0.0  ;;  %v5654_v16 = vmul.f32 %v16246_v63, %v5562_v30 }
 0x75d   : > { %v7932_v55 = vrot.slane %v16699_v13, 1  ;;  %v16714_v38 = vrot.slane %v6472_v45, %v18035_v57  ;;  %v16718_v40 = vrot.slane %v6472_v45, %v18036_v53  ;;  %v5655_v23 = vmul.f32 %v16246_v63, %v5567_v9  ;;  %v16742_v9 = vpop.f32.mrb[152].mxu1 }
 0x75e   : > { %v6059_v1 = vcombine.high %v5723_v47, %v5723_v47  ;;  %v6066_v7 = vrot.slane %v5723_v47, %v15578_v22  ;;  %v5692_v27 = vadd.f32 %v16275_v52, %v5654_v16  ;;  %v16729_v10 = vrot.slane %v6472_v45, %v18019_v36 }
 0x75f   : > { %v5693_v48 = vadd.f32 %v16275_v52, %v5655_v23  ;;  %v16735_v19 = vrot.slane %v6472_v45, %v18021_v61  ;;  %v16740_v52 = vadd.f32 %v18060_v42, %v16330_v62 }
 0x760   : > { %v6073_v63 = vrot.slane %v6059_v1, %v15578_v22  ;;  %v6074_v11 = vcombine.high %v6066_v7, %v6066_v7  ;;  %v6512_v20 = vrot.slane %v6066_v7, 7  ;;  %v5724_v4 = vmax.f32 %v5692_v27, 0.0  ;;  %v5388_v1 = vpop.f32.mrb[153].mxu1 }
 0x761   : > { %v16732_v0 = vmax.f32 %v5693_v48, 0.0 }
 0x762   : > { %v6075_v47 = vcombine.high %v6073_v63, %v6073_v63  ;;  %v6513_v16 = vrot.slane %v6074_v11, 7  ;;  %v6514_v23 = vrot.slane %v6073_v63, 7  ;;  %vm6640_vm14 = vcmp.gt.f32.partialorder %v6066_v7, %v6512_v20 }
 0x763   : > { %v6704_v12 = vsel %vm6640_vm14, %v6066_v7, %v6512_v20  ;;  %v16744_v27 = vsel %vm6640_vm14, %v6974_v26, %v7230_v5  ;;  %v6076_v48 = vcombine.high %v5724_v4, %v5724_v4  ;;  %v6083_v45 = vrot.slane %v5724_v4, %v15578_v22 }
 0x764   : > { %v6515_v24 = vrot.slane %v6075_v47, 7  ;;  %vm6641_vm0 = vcmp.gt.f32.partialorder %v6074_v11, %v6513_v16  ;;  %vm6642_vm1 = vcmp.gt.f32.partialorder %v6073_v63, %v6514_v23  ;;  %v7444_v30 = vrot.slane %v6704_v12, 7 }
 0x765   : > { %v6705_v44 = vsel %vm6641_vm0, %v6074_v11, %v6513_v16  ;;  %v6706_v62 = vsel %vm6642_vm1, %v6073_v63, %v6514_v23  ;;  %v7281_v42 = vsel %vm6641_vm0, %v16670_v43, %v16680_v54  ;;  %v16749_v33 = vsel %vm6642_vm1, %v6975_v31, %v7231_v3 }
 0x766   : > { %vm6643_vm2 = vcmp.gt.f32.partialorder %v6075_v47, %v6515_v24  ;;  %v16751_v18 = vrot.slane %v7444_v30, 2  ;;  %v7446_v7 = vrot.slane %v6705_v44, 7  ;;  %v7448_v26 = vrot.slane %v6706_v62, 7 }
 0x767   : > { %v6707_v5 = vsel %vm6643_vm2, %v6075_v47, %v6515_v24  ;;  %v7283_v20 = vsel %vm6643_vm2, %v16676_v29, %v16684_v2  ;;  %v9710_v4 = vrot.slane %v16744_v27, 9  ;;  %v16756_v1 = vrot.slane %v7281_v42, 9 }
 0x768   : > { %v16758_v12 = vrot.slane %v7446_v7, 2  ;;  %v16760_v63 = vrot.slane %v7448_v26, 2  ;;  %v7450_v43 = vrot.slane %v6707_v5, 7  ;;  %v9712_v54 = vrot.slane %v16749_v33, 9 }
 0x769   : > { %v16763_v31 = vrot.slane %v7283_v20, 9  ;;  %v6090_v3 = vrot.slane %v6076_v48, %v15578_v22  ;;  %v6091_v44 = vcombine.high %v6083_v45, %v6083_v45  ;;  %vm7596_vm3 = vcmp.gt.f32.partialorder %v6083_v45, %v16655_v8 }
 0x76a   : > { %v16767_v24 = vrot.slane %v7450_v43, 2  ;;  %v7660_v29 = vsel %vm7596_vm3, %v6083_v45, %v16655_v8  ;;  %v8108_v2 = vsel %vm7596_vm3, %v16699_v13, %v9706_v25  ;;  %v6093_v11 = vcombine.high %v16732_v0, %v16732_v0 }
 0x76b   : > { %v6092_v30 = vcombine.high %v6090_v3, %v6090_v3  ;;  %vm7597_vm4 = vcmp.gt.f32.partialorder %v6091_v44, %v16658_v56  ;;  %vm7598_vm6 = vcmp.gt.f32.partialorder %v6090_v3, %v16663_v49  ;;  %v8236_v47 = vrot.slane %v7660_v29, 7 }
 0x76c   : > { %v7661_v16 = vsel %vm7597_vm4, %v6091_v44, %v16658_v56  ;;  %v7662_v23 = vsel %vm7598_vm6, %v6090_v3, %v16663_v49  ;;  %v8109_v8 = vsel %vm7597_vm4, %v7932_v55, %v16660_v17  ;;  %v8110_v41 = vsel %vm7598_vm6, %v16702_v32, %v9708_v58 }
 0x76d   : > { %vm7599_vm8 = vcmp.gt.f32.partialorder %v6092_v30, %v16672_v6  ;;  %v8237_v25 = vrot.slane %v7661_v16, 7  ;;  %v8238_v48 = vrot.slane %v7662_v23, 7  ;;  %vm8364_vm10 = vcmp.gt.f32.partialorder %v6083_v45, %v8236_v47 }
 0x76e   : > { %v7663_v62 = vsel %vm7599_vm8, %v6092_v30, %v16672_v6  ;;  %v18061_v56 = vrot.slane %v16702_v32, 1  ;;  %v8428_v49 = vsel %vm8364_vm10, %v6083_v45, %v8236_v47  ;;  %v8748_v7 = vrot.slane %v8108_v2, 7 }
 0x76f   : > { %v8239_v26 = vrot.slane %v7663_v62, 7  ;;  %vm8365_vm13 = vcmp.gt.f32.partialorder %v6091_v44, %v8237_v25  ;;  %vm8366_vm14 = vcmp.gt.f32.partialorder %v6090_v3, %v8238_v48  ;;  %v8749_v17 = vrot.slane %v8109_v8, 7 }
 0x770   : > { %v8111_v42 = vsel %vm7599_vm8, %v18061_v56, %v16665_v34  ;;  %v8429_v60 = vsel %vm8365_vm13, %v6091_v44, %v8237_v25  ;;  %v8430_v13 = vsel %vm8366_vm14, %v6090_v3, %v8238_v48  ;;  %v8750_v58 = vrot.slane %v8110_v41, 7  ;;  %v16800_v3 = vpop.f32.mrb[154].mxu1 }
 0x771   : > { %v8751_v55 = vrot.slane %v8111_v42, 7  ;;  %vm8367_vm0 = vcmp.gt.f32.partialorder %v6092_v30, %v8239_v26  ;;  %v18062_v5 = vrot.slane %v16714_v38, 7  ;;  %v8813_v6 = vsel %vm8365_vm13, %v16714_v38, %v8749_v17  ;;  %v5393_v23 = vpop.f32.mrb[155].mxu1 }
 0x772   : > { %v9039_v43 = vrot.slane %v8428_v49, %v15637_v14  ;;  %v8431_v32 = vsel %vm8367_vm0, %v6092_v30, %v8239_v26  ;;  %v18063_v34 = vrot.slane %v16718_v40, 7  ;;  %v9043_v44 = vrot.slane %v8429_v60, %v15637_v14 }
 0x773   : > { %v8812_v20 = vsel %vm8364_vm10, %v18062_v5, %v8748_v7  ;;  %v16797_v29 = vsel %vm8367_vm0, %v16718_v40, %v8751_v55  ;;  %v9047_v2 = vrot.slane %v8430_v13, %v15637_v14  ;;  %v9051_v47 = vrot.slane %v8431_v32, %v15637_v14  ;;  %v16834_v5 = vpop.f32.mrb[230].mxu0  ;;  %v16842_v32 = vpop.f32.mrb[156].mxu1 }
 0x774   : > { %v8814_v45 = vsel %vm8366_vm14, %v18063_v34, %v8750_v58  ;;  %v9381_v16 = vrot.slane %v8812_v20, %v15637_v14  ;;  %v9385_v38 = vrot.slane %v8813_v6, %v15637_v14  ;;  %v9194_v30 = vsel %vm9164_vm11, %v9043_v44, %v9039_v43 }
 0x775   : > { %v9389_v8 = vrot.slane %v8814_v45, %v15637_v14  ;;  %v9393_v40 = vrot.slane %v16797_v29, %v15637_v14  ;;  %v6100_v41 = vrot.slane %v16732_v0, %v15578_v22  ;;  %v9195_v25 = vsel %vm9166_vm12, %v9047_v2, %v9194_v30  ;;  %v5398_v45 = vpop.f32.mrb[157].mxu1 }
 0x776   : > { %v9530_v48 = vsel %vm9164_vm11, %v9385_v38, %v9381_v16  ;;  %v6107_v62 = vrot.slane %v6093_v11, %v15578_v22  ;;  %v8703_v56 = vrot.slane %v16735_v19, 7  ;;  %v9196_v7 = vsel %vm9168_vm15, %v9051_v47, %v9195_v25 }
 0x777   : > { %v9531_v42 = vsel %vm9166_vm12, %v9389_v8, %v9530_v48  ;;  %v6108_v49 = vcombine.high %v6100_v41, %v6100_v41  ;;  %vm7600_vm1 = vcmp.gt.f32.partialorder %v6100_v41, %v16751_v18 }
 0x778   : > { %v6109_v26 = vcombine.high %v6107_v62, %v6107_v62  ;;  %vm7602_vm2 = vcmp.gt.f32.partialorder %v6107_v62, %v16760_v63  ;;  %v7664_v0 = vsel %vm7600_vm1, %v6100_v41, %v16751_v18  ;;  %v8112_v17 = vsel %vm7600_vm1, %v16706_v15, %v9710_v4 }
 0x779   : > { %vm7601_vm3 = vcmp.gt.f32.partialorder %v6108_v49, %v16758_v12  ;;  %v7666_v11 = vsel %vm7602_vm2, %v6107_v62, %v16760_v63  ;;  %v8114_v60 = vsel %vm7602_vm2, %v16709_v37, %v9712_v54  ;;  %v8240_v13 = vrot.slane %v7664_v0, 7  ;;  %v16840_v54 = vpop.f32.mrb[231].mxu0 }
 0x77a   : > { %vm7603_vm4 = vcmp.gt.f32.partialorder %v6109_v26, %v16767_v24  ;;  %v7665_v58 = vsel %vm7601_vm3, %v6108_v49, %v16758_v12  ;;  %v18064_v18 = vrot.slane %v16706_v15, 1  ;;  %v8242_v27 = vrot.slane %v7666_v11, 7  ;;  %v18067_v11 = vld [vmem:[#allocation45_spill] sm:$0xff] }
 0x77b   : > { %v7667_v4 = vsel %vm7603_vm4, %v6109_v26, %v16767_v24  ;;  %v18065_v63 = vrot.slane %v16709_v37, 1  ;;  %v8241_v20 = vrot.slane %v7665_v58, 7  ;;  %vm8368_vm6 = vcmp.gt.f32.partialorder %v6100_v41, %v8240_v13 }
 0x77c   : > { %v8113_v55 = vsel %vm7601_vm3, %v18064_v18, %v16756_v1  ;;  %v8243_v6 = vrot.slane %v7667_v4, 7  ;;  %vm8370_vm8 = vcmp.gt.f32.partialorder %v6107_v62, %v8242_v27  ;;  %v8432_v12 = vsel %vm8368_vm6, %v6100_v41, %v8240_v13  ;;  %v18068_v13 = vld [vmem:[#allocation11_spill] sm:$0xff]  ;;  %v18069_v18 = vld [vmem:[#allocation46_spill] sm:$0xff] }
 0x77d   : > { %v8115_v33 = vsel %vm7603_vm4, %v18065_v63, %v16763_v31  ;;  %v8752_v43 = vrot.slane %v8112_v17, 7  ;;  %vm8369_vm10 = vcmp.gt.f32.partialorder %v6108_v49, %v8241_v20  ;;  %v8434_v15 = vsel %vm8370_vm8, %v6107_v62, %v8242_v27 }
 0x77e   : > { %v8753_v1 = vrot.slane %v8113_v55, 7  ;;  %v8754_v34 = vrot.slane %v8114_v60, 7  ;;  %vm8371_vm13 = vcmp.gt.f32.partialorder %v6109_v26, %v8243_v6  ;;  %v8433_v24 = vsel %vm8369_vm10, %v6108_v49, %v8241_v20  ;;  %v16863_v49 = vld [vmem:[%s17497_s8] ss:$0 sm:$0xff] }
 0x77f   : > { %v8755_v37 = vrot.slane %v8115_v33, 7  ;;  %v18066_v31 = vrot.slane %v16729_v10, 7  ;;  %v8435_v44 = vsel %vm8371_vm13, %v6109_v26, %v8243_v6  ;;  %v9055_v16 = vrot.slane %v8432_v12, %v15637_v14 }
 0x780   : > { %v8817_v2 = vsel %vm8369_vm10, %v16729_v10, %v8753_v1  ;;  %v8818_v47 = vsel %vm8370_vm8, %v8703_v56, %v8754_v34  ;;  %v9059_v23 = vrot.slane %v8433_v24, %v15637_v14  ;;  %v9063_v30 = vrot.slane %v8434_v15, %v15637_v14 }
 0x781   : > { %v8816_v29 = vsel %vm8368_vm6, %v18066_v31, %v8752_v43  ;;  %v8819_v38 = vsel %vm8371_vm13, %v16735_v19, %v8755_v37  ;;  %v9067_v8 = vrot.slane %v8435_v44, %v15637_v14  ;;  %v9197_v41 = vsel %vm9170_vm5, %v9055_v16, %v9196_v7 }
 0x782   : > { %v9397_v25 = vrot.slane %v8816_v29, %v15637_v14  ;;  %v9401_v48 = vrot.slane %v8817_v2, %v15637_v14  ;;  %v9405_v10 = vrot.slane %v8818_v47, %v15637_v14  ;;  %v9198_v62 = vsel %vm9172_vm7, %v9059_v23, %v9197_v41 }
 0x783   : > { %9243 = vst [vmem:[%s15966_s13 + $0x27] sm:$0x1] %v9067_v8  ;;  %v9409_v19 = vrot.slane %v8819_v38, %v15637_v14  ;;  %v9532_v56 = vsel %vm9168_vm15, %v9393_v40, %v9531_v42  ;;  %v5656_v7 = vmul.f32 %v16863_v49, %v16740_v52  ;;  %v9199_v26 = vsel %vm9174_vm9, %v9063_v30, %v9198_v62  ;;  %v16880_v42 = vld [vmem:[%s17498_s9] ss:$0 sm:$0xff]  ;;  %v16921_v62 = vpop.f32.mrb[158].mxu1 }
 0x784   : > { %v9533_v0 = vsel %vm9170_vm5, %v9397_v25, %v9532_v56  ;;  %v16870_v17 = vadd.s32 160, %v18032_v46  ;;  %v5577_v60 = vadd.f32 %v18067_v11, %v16385_v51  ;;  %9242 = vst [vmem:[%s15966_s13 + $0x1f] sm:$0xfe] %v9199_v26  ;;  %v5582_v58 = vadd.f32 %v18068_v13, %v16425_v39 }
 0x785   : > { %v9534_v40 = vsel %vm9172_vm7, %v9401_v48, %v9533_v0  ;;  %9563 = vst [vmem:[%s15983_s19 + $0x27] sm:$0x1] %v9409_v19  ;;  %v5694_v52 = vadd.f32 %v16880_v42, %v5656_v7  ;;  %v16887_v55 = vadd.f32 %v18069_v18, %v16495_v21  ;;  %v5403_v0 = vpop.f32.mrb[159].mxu1 }
 0x786   : > { %v9535_v51 = vsel %vm9174_vm9, %v9405_v10, %v9534_v40  ;;  %v6457_v27 = vadd.s32 1, %v16870_v17  ;;  %v7134_v4 = vrot.slane %v16870_v17, %v18035_v57  ;;  %v7141_v63 = vrot.slane %v16870_v17, %v18036_v53 }
 0x787   : > { %9562 = vst [vmem:[%s15983_s19 + $0x1f] sm:$0xfe] %v9535_v51  ;;  %v5726_v33 = vmax.f32 %v5694_v52, 0.0  ;;  %v5657_v20 = vmul.f32 %v16863_v49, %v5577_v60  ;;  %v16899_v39 = vrot.slane %v16870_v17, %v18019_v36  ;;  %v16903_v21 = vrot.slane %v16870_v17, %v18021_v61 }
 0x788   : > { %v6878_v6 = vrot.slane %v6457_v27, %v18035_v57  ;;  %v6885_v12 = vrot.slane %v6457_v27, %v18036_v53  ;;  %v7232_v43 = vrot.slane %v7134_v4, 7  ;;  %v7233_v15 = vrot.slane %v7141_v63, 7 }
 0x789   : > { %v6110_v1 = vcombine.high %v5726_v33, %v5726_v33  ;;  %v6117_v34 = vrot.slane %v5726_v33, %v15578_v22  ;;  %v5695_v45 = vadd.f32 %v16880_v42, %v5657_v20  ;;  %v16910_v24 = vrot.slane %v6457_v27, %v18019_v36 }
 0x78a   : > { %v6976_v37 = vrot.slane %v6878_v6, 7  ;;  %v6977_v31 = vrot.slane %v6885_v12, 7  ;;  %v16913_v29 = vrot.slane %v6457_v27, %v18021_v61  ;;  %v7234_v44 = vrot.slane %v16899_v39, 7 }
 0x78b   : > { %v6124_v2 = vrot.slane %v6110_v1, %v15578_v22  ;;  %v6125_v47 = vcombine.high %v6117_v34, %v6117_v34  ;;  %v6516_v16 = vrot.slane %v6117_v34, 7  ;;  %v5727_v38 = vmax.f32 %v5695_v45, 0.0 }
 0x78c   : > { %v6978_v23 = vrot.slane %v16910_v24, 7  ;;  %v6979_v30 = vrot.slane %v16913_v29, 7  ;;  %v7235_v8 = vrot.slane %v16903_v21, 7  ;;  %v5658_v41 = vmul.f32 %v16863_v49, %v5582_v58 }
 0x78d   : > { %v6126_v25 = vcombine.high %v6124_v2, %v6124_v2  ;;  %v6517_v48 = vrot.slane %v6125_v47, 7  ;;  %v6518_v10 = vrot.slane %v6124_v2, 7  ;;  %vm6644_vm14 = vcmp.gt.f32.partialorder %v6117_v34, %v6516_v16 }
 0x78e   : > { %v6708_v19 = vsel %vm6644_vm14, %v6117_v34, %v6516_v16  ;;  %v16923_v56 = vsel %vm6644_vm14, %v6976_v37, %v7232_v43  ;;  %v6127_v7 = vcombine.high %v5727_v38, %v5727_v38  ;;  %v6134_v26 = vrot.slane %v5727_v38, %v15578_v22 }
 0x78f   : > { %v6519_v11 = vrot.slane %v6126_v25, 7  ;;  %vm6645_vm0 = vcmp.gt.f32.partialorder %v6125_v47, %v6517_v48  ;;  %vm6646_vm1 = vcmp.gt.f32.partialorder %v6124_v2, %v6518_v10  ;;  %v7452_v60 = vrot.slane %v6708_v19, 7 }
 0x790   : > { %v6709_v40 = vsel %vm6645_vm0, %v6125_v47, %v6517_v48  ;;  %v6710_v52 = vsel %vm6646_vm1, %v6124_v2, %v6518_v10  ;;  %v7285_v13 = vsel %vm6645_vm0, %v6878_v6, %v7134_v4  ;;  %v16926_v58 = vsel %vm6646_vm1, %v6977_v31, %v7233_v15 }
 0x791   : > { %vm6647_vm2 = vcmp.gt.f32.partialorder %v6126_v25, %v6519_v11  ;;  %v16928_v18 = vrot.slane %v7452_v60, 2  ;;  %v7454_v51 = vrot.slane %v6709_v40, 7  ;;  %v7456_v27 = vrot.slane %v6710_v52, 7 }
 0x792   : > { %v6711_v33 = vsel %vm6647_vm2, %v6126_v25, %v6519_v11  ;;  %v7287_v20 = vsel %vm6647_vm2, %v6885_v12, %v7141_v63  ;;  %v9714_v43 = vrot.slane %v16923_v56, 9  ;;  %v16931_v1 = vrot.slane %v7285_v13, 9 }
 0x793   : > { %v16933_v34 = vrot.slane %v7454_v51, 2  ;;  %v16935_v45 = vrot.slane %v7456_v27, 2  ;;  %v7458_v37 = vrot.slane %v6711_v33, 7  ;;  %v9716_v4 = vrot.slane %v16926_v58, 9 }
 0x794   : > { %v16938_v6 = vrot.slane %v7287_v20, 9  ;;  %v6141_v15 = vrot.slane %v6127_v7, %v15578_v22  ;;  %v6142_v31 = vcombine.high %v6134_v26, %v6134_v26  ;;  %v6520_v2 = vrot.slane %v6134_v26, 7 }
 0x795   : > { %v16941_v47 = vrot.slane %v7458_v37, 2  ;;  %v5696_v63 = vadd.f32 %v16880_v42, %v5658_v41  ;;  %v16945_v12 = vadd.s32 16, %v16870_v17  ;;  %v16949_v16 = vmul.f32 %v16863_v49, %v16887_v55 }
 0x796   : > { %v6143_v38 = vcombine.high %v6141_v15, %v6141_v15  ;;  %v6521_v25 = vrot.slane %v6142_v31, 7  ;;  %v6522_v48 = vrot.slane %v6141_v15, 7  ;;  %vm6648_vm3 = vcmp.gt.f32.partialorder %v6134_v26, %v6520_v2 }
 0x797   : > { %v6712_v10 = vsel %vm6648_vm3, %v6134_v26, %v6520_v2  ;;  %v16951_v19 = vsel %vm6648_vm3, %v6978_v23, %v7234_v44  ;;  %v5728_v56 = vmax.f32 %v5696_v63, 0.0  ;;  %v16954_v7 = vadd.s32 1, %v16945_v12 }
 0x798   : > { %v6523_v0 = vrot.slane %v6143_v38, 7  ;;  %vm6649_vm4 = vcmp.gt.f32.partialorder %v6142_v31, %v6521_v25  ;;  %vm6650_vm6 = vcmp.gt.f32.partialorder %v6141_v15, %v6522_v48  ;;  %v7460_v17 = vrot.slane %v6712_v10, 7 }
 0x799   : > { %v6713_v41 = vsel %vm6649_vm4, %v6142_v31, %v6521_v25  ;;  %v6714_v11 = vsel %vm6650_vm6, %v6141_v15, %v6522_v48  ;;  %v7289_v55 = vsel %vm6649_vm4, %v16910_v24, %v16899_v39  ;;  %v16958_v60 = vsel %vm6650_vm6, %v6979_v30, %v7235_v8 }
 0x79a   : > { %vm6651_vm8 = vcmp.gt.f32.partialorder %v6143_v38, %v6523_v0  ;;  %v16960_v40 = vrot.slane %v7460_v17, 2  ;;  %v7462_v44 = vrot.slane %v6713_v41, 7  ;;  %v7464_v23 = vrot.slane %v6714_v11, 7 }
 0x79b   : > { %v6715_v26 = vsel %vm6651_vm8, %v6143_v38, %v6523_v0  ;;  %v7291_v52 = vsel %vm6651_vm8, %v16913_v29, %v16903_v21  ;;  %v9718_v13 = vrot.slane %v16951_v19, 9  ;;  %v16965_v58 = vrot.slane %v7289_v55, 9 }
 0x79c   : > { %v16967_v51 = vrot.slane %v7462_v44, 2  ;;  %v16969_v27 = vrot.slane %v7464_v23, 2  ;;  %v7466_v39 = vrot.slane %v6715_v26, 7  ;;  %v9720_v24 = vrot.slane %v16958_v60, 9 }
 0x79d   : > { %v16972_v30 = vrot.slane %v7291_v52, 9  ;;  %v6144_v8 = vcombine.high %v5728_v56, %v5728_v56  ;;  %v6151_v33 = vrot.slane %v5728_v56, %v15578_v22  ;;  %v7838_v20 = vrot.slane %v16945_v12, %v18035_v57 }
 0x79e   : > { %v16977_v21 = vrot.slane %v7466_v39, 2  ;;  %v7845_v29 = vrot.slane %v16945_v12, %v18036_v53  ;;  %v8606_v37 = vrot.slane %v16954_v7, %v18035_v57  ;;  %v8613_v15 = vrot.slane %v16954_v7, %v18036_v53 }
 0x79f   : > { %v6158_v31 = vrot.slane %v6144_v8, %v15578_v22  ;;  %v6159_v2 = vcombine.high %v6151_v33, %v6151_v33  ;;  %vm7604_vm10 = vcmp.gt.f32.partialorder %v6151_v33, %v16928_v18  ;;  %v7936_v63 = vrot.slane %v7838_v20, 1 }
 0x7a0   : > { %v7668_v38 = vsel %vm7604_vm10, %v6151_v33, %v16928_v18  ;;  %v7937_v25 = vrot.slane %v7845_v29, 1  ;;  %v8116_v48 = vsel %vm7604_vm10, %v7838_v20, %v9714_v43  ;;  %v8704_v10 = vrot.slane %v8606_v37, 7 }
 0x7a1   : > { %v6160_v56 = vcombine.high %v6158_v31, %v6158_v31  ;;  %vm7605_vm13 = vcmp.gt.f32.partialorder %v6159_v2, %v16933_v34  ;;  %vm7606_vm14 = vcmp.gt.f32.partialorder %v6158_v31, %v16935_v45  ;;  %v8244_v0 = vrot.slane %v7668_v38, 7 }
 0x7a2   : > { %v7669_v17 = vsel %vm7605_vm13, %v6159_v2, %v16933_v34  ;;  %v7670_v41 = vsel %vm7606_vm14, %v6158_v31, %v16935_v45  ;;  %v8117_v11 = vsel %vm7605_vm13, %v7936_v63, %v16931_v1  ;;  %v8118_v55 = vsel %vm7606_vm14, %v7845_v29, %v9716_v4 }
 0x7a3   : > { %vm7607_vm0 = vcmp.gt.f32.partialorder %v6160_v56, %v16941_v47  ;;  %v8245_v44 = vrot.slane %v7669_v17, 7  ;;  %v8246_v18 = vrot.slane %v7670_v41, 7  ;;  %vm8372_vm1 = vcmp.gt.f32.partialorder %v6151_v33, %v8244_v0 }
 0x7a4   : > { %v7671_v43 = vsel %vm7607_vm0, %v6160_v56, %v16941_v47  ;;  %v8119_v23 = vsel %vm7607_vm0, %v7937_v25, %v16938_v6  ;;  %v8436_v26 = vsel %vm8372_vm1, %v6151_v33, %v8244_v0  ;;  %v8705_v52 = vrot.slane %v8613_v15, 7 }
 0x7a5   : > { %v8247_v39 = vrot.slane %v7671_v43, 7  ;;  %vm8373_vm2 = vcmp.gt.f32.partialorder %v6159_v2, %v8245_v44  ;;  %vm8374_vm3 = vcmp.gt.f32.partialorder %v6158_v31, %v8246_v18  ;;  %v8756_v34 = vrot.slane %v8116_v48, 7 }
 0x7a6   : > { %v8437_v8 = vsel %vm8373_vm2, %v6159_v2, %v8245_v44  ;;  %v8438_v45 = vsel %vm8374_vm3, %v6158_v31, %v8246_v18  ;;  %v8757_v20 = vrot.slane %v8117_v11, 7  ;;  %v8758_v1 = vrot.slane %v8118_v55, 7 }
 0x7a7   : > { %vm8375_vm4 = vcmp.gt.f32.partialorder %v6160_v56, %v8247_v39  ;;  %v8759_v4 = vrot.slane %v8119_v23, 7  ;;  %v8820_v29 = vsel %vm8372_vm1, %v8704_v10, %v8756_v34  ;;  %v9071_v63 = vrot.slane %v8436_v26, %v15637_v14 }
 0x7a8   : > { %v8439_v38 = vsel %vm8375_vm4, %v6160_v56, %v8247_v39  ;;  %v8821_v17 = vsel %vm8373_vm2, %v8606_v37, %v8757_v20  ;;  %v8822_v47 = vsel %vm8374_vm3, %v8705_v52, %v8758_v1  ;;  %v9075_v6 = vrot.slane %v8437_v8, %v15637_v14 }
 0x7a9   : > { %v8823_v33 = vsel %vm8375_vm4, %v8613_v15, %v8759_v4  ;;  %v9079_v25 = vrot.slane %v8438_v45, %v15637_v14  ;;  %v9083_v0 = vrot.slane %v8439_v38, %v15637_v14  ;;  %v9413_v2 = vrot.slane %v8820_v29, %v15637_v14  ;;  %v18072_v38 = vld [vmem:[#allocation26_spill] sm:$0xff] }
 0x7aa   : > { %v9200_v31 = vsel %vm9164_vm11, %v9075_v6, %v9071_v63  ;;  %v9417_v48 = vrot.slane %v8821_v17, %v15637_v14  ;;  %v9421_v10 = vrot.slane %v8822_v47, %v15637_v14  ;;  %v9425_v41 = vrot.slane %v8823_v33, %v15637_v14  ;;  %v18073_v47 = vld [vmem:[#allocation48_spill] sm:$0xff] }
 0x7ab   : > { %v9201_v37 = vsel %vm9166_vm12, %v9079_v25, %v9200_v31  ;;  %v5697_v56 = vadd.f32 %v16880_v42, %v16949_v16  ;;  %v7852_v15 = vrot.slane %v16945_v12, %v18019_v36  ;;  %v7859_v11 = vrot.slane %v16945_v12, %v18021_v61  ;;  %v18070_v12 = vld [vmem:[#allocation12_spill] sm:$0xff] }
 0x7ac   : > { %v9536_v55 = vsel %vm9164_vm11, %v9417_v48, %v9413_v2  ;;  %v8620_v44 = vrot.slane %v16954_v7, %v18019_v36  ;;  %v8627_v18 = vrot.slane %v16954_v7, %v18021_v61  ;;  %v9202_v43 = vsel %vm9168_vm15, %v9083_v0, %v9201_v37  ;;  %v18071_v7 = vld [vmem:[#allocation47_spill] sm:$0xff] }
 0x7ad   : > { %v9537_v23 = vsel %vm9166_vm12, %v9421_v10, %v9536_v55  ;;  %v5729_v26 = vmax.f32 %v5697_v56, 0.0  ;;  %v7938_v16 = vrot.slane %v7852_v15, 1  ;;  %v7939_v52 = vrot.slane %v7859_v11, 1 }
 0x7ae   : > { %v8706_v39 = vrot.slane %v8620_v44, 7  ;;  %v8707_v34 = vrot.slane %v8627_v18, 7  ;;  %v9538_v8 = vsel %vm9168_vm15, %v9425_v41, %v9537_v23  ;;  %v5592_v45 = vadd.f32 %v18070_v12, %v16531_v35  ;;  %v18074_v35 = vld [vmem:[#allocation27_spill] sm:$0xff] }
 0x7af   : > { %v6161_v20 = vcombine.high %v5729_v26, %v5729_v26  ;;  %v6168_v1 = vrot.slane %v5729_v26, %v15578_v22  ;;  %v17024_v4 = vadd.s32 192, %v18032_v46  ;;  %v17028_v29 = vadd.f32 %v18071_v7, %v16562_v59 }
 0x7b0   : > { %v5660_v63 = vmul.f32 %v16863_v49, %v5592_v45  ;;  %v17033_v17 = vadd.f32 %v18072_v38, %v16603_v28  ;;  %v17037_v6 = vadd.f32 %v18073_v47, %v16651_v50  ;;  %v17041_v33 = vadd.f32 %v18074_v35, %v16742_v9 }
 0x7b1   : > { %v6175_v25 = vrot.slane %v6161_v20, %v15578_v22  ;;  %v6176_v0 = vcombine.high %v6168_v1, %v6168_v1  ;;  %vm7608_vm6 = vcmp.gt.f32.partialorder %v6168_v1, %v16960_v40  ;;  %v17046_v59 = vadd.s32 1, %v17024_v4 }
 0x7b2   : > { %v7672_v2 = vsel %vm7608_vm6, %v6168_v1, %v16960_v40  ;;  %v8120_v28 = vsel %vm7608_vm6, %v7852_v15, %v9718_v13  ;;  %v5698_v50 = vadd.f32 %v16880_v42, %v5660_v63  ;;  %v17054_v31 = vrot.slane %v17024_v4, %v18035_v57 }
 0x7b3   : > { %v6177_v9 = vcombine.high %v6175_v25, %v6175_v25  ;;  %vm7609_vm8 = vcmp.gt.f32.partialorder %v6176_v0, %v16967_v51  ;;  %vm7610_vm10 = vcmp.gt.f32.partialorder %v6175_v25, %v16969_v27  ;;  %v8248_v48 = vrot.slane %v7672_v2, 7 }
 0x7b4   : > { %v7673_v10 = vsel %vm7609_vm8, %v6176_v0, %v16967_v51  ;;  %v7674_v41 = vsel %vm7610_vm10, %v6175_v25, %v16969_v27  ;;  %v8121_v40 = vsel %vm7609_vm8, %v7938_v16, %v16965_v58  ;;  %v8122_v19 = vsel %vm7610_vm10, %v7859_v11, %v9720_v24 }
 0x7b5   : > { %vm7611_vm13 = vcmp.gt.f32.partialorder %v6177_v9, %v16977_v21  ;;  %v8249_v13 = vrot.slane %v7673_v10, 7  ;;  %v8250_v37 = vrot.slane %v7674_v41, 7  ;;  %vm8376_vm14 = vcmp.gt.f32.partialorder %v6168_v1, %v8248_v48 }
 0x7b6   : > { %v7675_v56 = vsel %vm7611_vm13, %v6177_v9, %v16977_v21  ;;  %v8123_v15 = vsel %vm7611_vm13, %v7939_v52, %v16972_v30  ;;  %v8440_v55 = vsel %vm8376_vm14, %v6168_v1, %v8248_v48  ;;  %v8760_v23 = vrot.slane %v8120_v28, 7 }
 0x7b7   : > { %v8251_v26 = vrot.slane %v7675_v56, 7  ;;  %vm8377_vm0 = vcmp.gt.f32.partialorder %v6176_v0, %v8249_v13  ;;  %vm8378_vm1 = vcmp.gt.f32.partialorder %v6175_v25, %v8250_v37  ;;  %v8761_v51 = vrot.slane %v8121_v40, 7 }
 0x7b8   : > { %v8441_v27 = vsel %vm8377_vm0, %v6176_v0, %v8249_v13  ;;  %v8442_v58 = vsel %vm8378_vm1, %v6175_v25, %v8250_v37  ;;  %v8762_v16 = vrot.slane %v8122_v19, 7  ;;  %v8763_v60 = vrot.slane %v8123_v15, 7 }
 0x7b9   : > { %vm8379_vm2 = vcmp.gt.f32.partialorder %v6177_v9, %v8251_v26  ;;  %v8824_v24 = vsel %vm8376_vm14, %v8706_v39, %v8760_v23  ;;  %v8825_v11 = vsel %vm8377_vm0, %v8620_v44, %v8761_v51  ;;  %v9087_v12 = vrot.slane %v8440_v55, %v15637_v14 }
 0x7ba   : > { %v8443_v45 = vsel %vm8379_vm2, %v6177_v9, %v8251_v26  ;;  %v8826_v21 = vsel %vm8378_vm1, %v8707_v34, %v8762_v16  ;;  %v8827_v30 = vsel %vm8379_vm2, %v8627_v18, %v8763_v60  ;;  %v9091_v52 = vrot.slane %v8441_v27, %v15637_v14 }
 0x7bb   : > { %v9095_v20 = vrot.slane %v8442_v58, %v15637_v14  ;;  %v9099_v1 = vrot.slane %v8443_v45, %v15637_v14  ;;  %v9203_v7 = vsel %vm9170_vm5, %v9087_v12, %v9202_v43  ;;  %v9429_v63 = vrot.slane %v8824_v24, %v15637_v14 }
 0x7bc   : > { %v9204_v39 = vsel %vm9172_vm7, %v9091_v52, %v9203_v7  ;;  %v9433_v44 = vrot.slane %v8825_v11, %v15637_v14  ;;  %v9437_v38 = vrot.slane %v8826_v21, %v15637_v14  ;;  %v9441_v34 = vrot.slane %v8827_v30, %v15637_v14 }
 0x7bd   : > { %v9205_v18 = vsel %vm9174_vm9, %v9095_v20, %v9204_v39  ;;  %9245 = vst [vmem:[%s15966_s13 + $0x2f] sm:$0x1] %v9099_v1  ;;  %v9539_v47 = vsel %vm9170_vm5, %v9429_v63, %v9538_v8  ;;  %v5730_v35 = vmax.f32 %v5698_v50, 0.0  ;;  %v6906_v43 = vrot.slane %v17046_v59, %v18035_v57 }
 0x7be   : > { %9244 = vst [vmem:[%s15966_s13 + $0x27] sm:$0xfe] %v9205_v18  ;;  %v9540_v25 = vsel %vm9172_vm7, %v9433_v44, %v9539_v47  ;;  %9565 = vst [vmem:[%s15983_s19 + $0x2f] sm:$0x1] %v9441_v34  ;;  %v6913_v0 = vrot.slane %v17046_v59, %v18036_v53  ;;  %v7169_v2 = vrot.slane %v17024_v4, %v18036_v53  ;;  %v7236_v28 = vrot.slane %v17054_v31, 7 }
 0x7bf   : > { %v9541_v9 = vsel %vm9174_vm9, %v9437_v38, %v9540_v25  ;;  %v6178_v48 = vcombine.high %v5730_v35, %v5730_v35  ;;  %v6185_v8 = vrot.slane %v5730_v35, %v15578_v22  ;;  %v6980_v50 = vrot.slane %v6906_v43, 7 }
 0x7c0   : > { %9564 = vst [vmem:[%s15983_s19 + $0x27] sm:$0xfe] %v9541_v9  ;;  %v6981_v10 = vrot.slane %v6913_v0, 7  ;;  %v7237_v41 = vrot.slane %v7169_v2, 7  ;;  %v5661_v40 = vmul.f32 %v16863_v49, %v17028_v29  ;;  %v17096_v19 = vrot.slane %v17046_v59, %v18019_v36 }
 0x7c1   : > { %v6192_v13 = vrot.slane %v6178_v48, %v15578_v22  ;;  %v6193_v37 = vcombine.high %v6185_v8, %v6185_v8  ;;  %v6524_v56 = vrot.slane %v6185_v8, 7  ;;  %v17101_v15 = vrot.slane %v17046_v59, %v18021_v61 }
 0x7c2   : > { %v5699_v55 = vadd.f32 %v16880_v42, %v5661_v40  ;;  %v6982_v23 = vrot.slane %v17096_v19, 7  ;;  %v17107_v26 = vrot.slane %v17024_v4, %v18019_v36  ;;  %v17111_v29 = vrot.slane %v17024_v4, %v18021_v61 }
 0x7c3   : > { %v6194_v51 = vcombine.high %v6192_v13, %v6192_v13  ;;  %v6525_v27 = vrot.slane %v6193_v37, 7  ;;  %v6526_v58 = vrot.slane %v6192_v13, 7  ;;  %vm6652_vm3 = vcmp.gt.f32.partialorder %v6185_v8, %v6524_v56 }
 0x7c4   : > { %v6716_v16 = vsel %vm6652_vm3, %v6185_v8, %v6524_v56  ;;  %v17113_v60 = vsel %vm6652_vm3, %v6980_v50, %v7236_v28  ;;  %v5731_v59 = vmax.f32 %v5699_v55, 0.0  ;;  %v6983_v24 = vrot.slane %v17101_v15, 7 }
 0x7c5   : > { %v6527_v11 = vrot.slane %v6194_v51, 7  ;;  %vm6653_vm4 = vcmp.gt.f32.partialorder %v6193_v37, %v6525_v27  ;;  %vm6654_vm6 = vcmp.gt.f32.partialorder %v6192_v13, %v6526_v58  ;;  %v7468_v12 = vrot.slane %v6716_v16, 7 }
 0x7c6   : > { %v6717_v45 = vsel %vm6653_vm4, %v6193_v37, %v6525_v27  ;;  %v6718_v21 = vsel %vm6654_vm6, %v6192_v13, %v6526_v58  ;;  %v7293_v30 = vsel %vm6653_vm4, %v6906_v43, %v17054_v31  ;;  %v17117_v52 = vsel %vm6654_vm6, %v6981_v10, %v7237_v41 }
 0x7c7   : > { %vm6655_vm8 = vcmp.gt.f32.partialorder %v6194_v51, %v6527_v11  ;;  %v17119_v20 = vrot.slane %v7468_v12, 2  ;;  %v7470_v1 = vrot.slane %v6717_v45, 7  ;;  %v7472_v7 = vrot.slane %v6718_v21, 7 }
 0x7c8   : > { %v6719_v63 = vsel %vm6655_vm8, %v6194_v51, %v6527_v11  ;;  %v7295_v39 = vsel %vm6655_vm8, %v6913_v0, %v7169_v2  ;;  %v9722_v44 = vrot.slane %v17113_v60, 9  ;;  %v17122_v38 = vrot.slane %v7293_v30, 9 }
 0x7c9   : > { %v17124_v34 = vrot.slane %v7470_v1, 2  ;;  %v17126_v18 = vrot.slane %v7472_v7, 2  ;;  %v7474_v47 = vrot.slane %v6719_v63, 7  ;;  %v9724_v31 = vrot.slane %v17117_v52, 9 }
 0x7ca   : > { %v17129_v35 = vrot.slane %v7295_v39, 9  ;;  %v6195_v43 = vcombine.high %v5731_v59, %v5731_v59  ;;  %v6202_v25 = vrot.slane %v5731_v59, %v15578_v22  ;;  %v7238_v28 = vrot.slane %v17107_v26, 7 }
 0x7cb   : > { %v17133_v9 = vrot.slane %v7474_v47, 2  ;;  %v7239_v0 = vrot.slane %v17111_v29, 7  ;;  %v5662_v2 = vmul.f32 %v16863_v49, %v17033_v17  ;;  %v17139_v48 = vadd.s32 16, %v17024_v4 }
 0x7cc   : > { %v6209_v8 = vrot.slane %v6195_v43, %v15578_v22  ;;  %v6210_v50 = vcombine.high %v6202_v25, %v6202_v25  ;;  %v6528_v10 = vrot.slane %v6202_v25, 7  ;;  %v5663_v41 = vmul.f32 %v16863_v49, %v17037_v6 }
 0x7cd   : > { %v5700_v40 = vadd.f32 %v16880_v42, %v5662_v2  ;;  %v17146_v13 = vadd.s32 1, %v17139_v48  ;;  %v7866_v37 = vrot.slane %v17139_v48, %v18035_v57  ;;  %v7873_v17 = vrot.slane %v17139_v48, %v18036_v53 }
 0x7ce   : > { %v6211_v4 = vcombine.high %v6209_v8, %v6209_v8  ;;  %v6529_v56 = vrot.slane %v6210_v50, 7  ;;  %v6530_v55 = vrot.slane %v6209_v8, 7  ;;  %vm6656_vm10 = vcmp.gt.f32.partialorder %v6202_v25, %v6528_v10 }
 0x7cf   : > { %v6720_v51 = vsel %vm6656_vm10, %v6202_v25, %v6528_v10  ;;  %v17152_v27 = vsel %vm6656_vm10, %v6982_v23, %v7238_v28  ;;  %v5732_v58 = vmax.f32 %v5700_v40, 0.0  ;;  %v7940_v6 = vrot.slane %v7866_v37, 1 }
 0x7d0   : > { %v6531_v16 = vrot.slane %v6211_v4, 7  ;;  %vm6657_vm13 = vcmp.gt.f32.partialorder %v6210_v50, %v6529_v56  ;;  %vm6658_vm14 = vcmp.gt.f32.partialorder %v6209_v8, %v6530_v55  ;;  %v7476_v59 = vrot.slane %v6720_v51, 7 }
 0x7d1   : > { %v6721_v11 = vsel %vm6657_vm13, %v6210_v50, %v6529_v56  ;;  %v6722_v12 = vsel %vm6658_vm14, %v6209_v8, %v6530_v55  ;;  %v7297_v45 = vsel %vm6657_vm13, %v17096_v19, %v17107_v26  ;;  %v17156_v21 = vsel %vm6658_vm14, %v6983_v24, %v7239_v0 }
 0x7d2   : > { %vm6659_vm0 = vcmp.gt.f32.partialorder %v6211_v4, %v6531_v16  ;;  %v17158_v30 = vrot.slane %v7476_v59, 2  ;;  %v7478_v1 = vrot.slane %v6721_v11, 7  ;;  %v7480_v7 = vrot.slane %v6722_v12, 7 }
 0x7d3   : > { %v6723_v23 = vsel %vm6659_vm0, %v6211_v4, %v6531_v16  ;;  %v7299_v63 = vsel %vm6659_vm0, %v17101_v15, %v17111_v29  ;;  %v9726_v39 = vrot.slane %v17152_v27, 9  ;;  %v17163_v47 = vrot.slane %v7297_v45, 9 }
 0x7d4   : > { %v17165_v43 = vrot.slane %v7478_v1, 2  ;;  %v17167_v25 = vrot.slane %v7480_v7, 2  ;;  %v7482_v19 = vrot.slane %v6723_v23, 7  ;;  %v9728_v26 = vrot.slane %v17156_v21, 9 }
 0x7d5   : > { %v17170_v24 = vrot.slane %v7299_v63, 9  ;;  %v6212_v28 = vcombine.high %v5732_v58, %v5732_v58  ;;  %v6219_v0 = vrot.slane %v5732_v58, %v15578_v22  ;;  %v7941_v2 = vrot.slane %v7873_v17, 1 }
 0x7d6   : > { %v17173_v8 = vrot.slane %v7482_v19, 2  ;;  %v8634_v15 = vrot.slane %v17146_v13, %v18035_v57  ;;  %v8641_v29 = vrot.slane %v17146_v13, %v18036_v53  ;;  %v5701_v50 = vadd.f32 %v16880_v42, %v5663_v41 }
 0x7d7   : > { %v6226_v10 = vrot.slane %v6212_v28, %v15578_v22  ;;  %v6227_v40 = vcombine.high %v6219_v0, %v6219_v0  ;;  %vm7612_vm1 = vcmp.gt.f32.partialorder %v6219_v0, %v17119_v20  ;;  %v17184_v4 = vrot.slane %v17139_v48, %v18019_v36 }
 0x7d8   : > { %v7676_v56 = vsel %vm7612_vm1, %v6219_v0, %v17119_v20  ;;  %v8124_v55 = vsel %vm7612_vm1, %v7866_v37, %v9722_v44  ;;  %v8708_v51 = vrot.slane %v8634_v15, 7  ;;  %v8709_v58 = vrot.slane %v8641_v29, 7 }
 0x7d9   : > { %v6228_v16 = vcombine.high %v6226_v10, %v6226_v10  ;;  %vm7613_vm2 = vcmp.gt.f32.partialorder %v6227_v40, %v17124_v34  ;;  %vm7614_vm3 = vcmp.gt.f32.partialorder %v6226_v10, %v17126_v18  ;;  %v8252_v41 = vrot.slane %v7676_v56, 7 }
 0x7da   : > { %v7677_v59 = vsel %vm7613_vm2, %v6227_v40, %v17124_v34  ;;  %v7678_v11 = vsel %vm7614_vm3, %v6226_v10, %v17126_v18  ;;  %v8125_v12 = vsel %vm7613_vm2, %v7940_v6, %v17122_v38  ;;  %v8126_v20 = vsel %vm7614_vm3, %v7873_v17, %v9724_v31 }
 0x7db   : > { %vm7615_vm4 = vcmp.gt.f32.partialorder %v6228_v16, %v17133_v9  ;;  %v8253_v60 = vrot.slane %v7677_v59, 7  ;;  %v8254_v44 = vrot.slane %v7678_v11, 7  ;;  %vm8380_vm6 = vcmp.gt.f32.partialorder %v6219_v0, %v8252_v41 }
 0x7dc   : > { %v7679_v37 = vsel %vm7615_vm4, %v6228_v16, %v17133_v9  ;;  %v8127_v45 = vsel %vm7615_vm4, %v7941_v2, %v17129_v35  ;;  %v8444_v1 = vsel %vm8380_vm6, %v6219_v0, %v8252_v41  ;;  %v8764_v7 = vrot.slane %v8124_v55, 7 }
 0x7dd   : > { %v8255_v23 = vrot.slane %v7679_v37, 7  ;;  %vm8381_vm8 = vcmp.gt.f32.partialorder %v6227_v40, %v8253_v60  ;;  %vm8382_vm10 = vcmp.gt.f32.partialorder %v6226_v10, %v8254_v44  ;;  %v8765_v34 = vrot.slane %v8125_v12, 7 }
 0x7de   : > { %v8445_v18 = vsel %vm8381_vm8, %v6227_v40, %v8253_v60  ;;  %v8446_v38 = vsel %vm8382_vm10, %v6226_v10, %v8254_v44  ;;  %v8766_v6 = vrot.slane %v8126_v20, 7  ;;  %v8767_v52 = vrot.slane %v8127_v45, 7 }
 0x7df   : > { %vm8383_vm13 = vcmp.gt.f32.partialorder %v6228_v16, %v8255_v23  ;;  %v8828_v31 = vsel %vm8380_vm6, %v8708_v51, %v8764_v7  ;;  %v8829_v17 = vsel %vm8381_vm8, %v8634_v15, %v8765_v34  ;;  %v9103_v63 = vrot.slane %v8444_v1, %v15637_v14 }
 0x7e0   : > { %v8447_v19 = vsel %vm8383_vm13, %v6228_v16, %v8255_v23  ;;  %v8830_v28 = vsel %vm8382_vm10, %v8709_v58, %v8766_v6  ;;  %v8831_v9 = vsel %vm8383_vm13, %v8641_v29, %v8767_v52  ;;  %v9107_v35 = vrot.slane %v8445_v18, %v15637_v14 }
 0x7e1   : > { %v9111_v0 = vrot.slane %v8446_v38, %v15637_v14  ;;  %v9115_v2 = vrot.slane %v8447_v19, %v15637_v14  ;;  %v9445_v56 = vrot.slane %v8828_v31, %v15637_v14  ;;  %v9449_v10 = vrot.slane %v8829_v17, %v15637_v14 }
 0x7e2   : > { %v9206_v40 = vsel %vm9164_vm11, %v9107_v35, %v9103_v63  ;;  %v9453_v55 = vrot.slane %v8830_v28, %v15637_v14  ;;  %v9457_v15 = vrot.slane %v8831_v9, %v15637_v14  ;;  %v5733_v51 = vmax.f32 %v5701_v50, 0.0 }
 0x7e3   : > { %v9207_v58 = vsel %vm9166_vm12, %v9111_v0, %v9206_v40  ;;  %v9542_v29 = vsel %vm9164_vm11, %v9449_v10, %v9445_v56  ;;  %v7887_v16 = vrot.slane %v17139_v48, %v18021_v61  ;;  %v7942_v41 = vrot.slane %v17184_v4, 1 }
 0x7e4   : > { %v9543_v59 = vsel %vm9166_vm12, %v9453_v55, %v9542_v29  ;;  %v6229_v11 = vcombine.high %v5733_v51, %v5733_v51  ;;  %v6236_v12 = vrot.slane %v5733_v51, %v15578_v22  ;;  %v8648_v20 = vrot.slane %v17146_v13, %v18019_v36 }
 0x7e5   : > { %v7943_v60 = vrot.slane %v7887_v16, 1  ;;  %v8655_v50 = vrot.slane %v17146_v13, %v18021_v61  ;;  %v9208_v44 = vsel %vm9168_vm15, %v9115_v2, %v9207_v58  ;;  %v9544_v37 = vsel %vm9168_vm15, %v9457_v15, %v9543_v59 }
 0x7e6   : > { %v6243_v48 = vrot.slane %v6229_v11, %v15578_v22  ;;  %v6244_v45 = vcombine.high %v6236_v12, %v6236_v12  ;;  %vm7616_vm14 = vcmp.gt.f32.partialorder %v6236_v12, %v17158_v30  ;;  %v8710_v1 = vrot.slane %v8648_v20, 7 }
 0x7e7   : > { %v7680_v7 = vsel %vm7616_vm14, %v6236_v12, %v17158_v30  ;;  %v8128_v23 = vsel %vm7616_vm14, %v17184_v4, %v9726_v39  ;;  %v8711_v34 = vrot.slane %v8655_v50, 7  ;;  %v5664_v13 = vmul.f32 %v16863_v49, %v17041_v33 }
 0x7e8   : > { %v6245_v18 = vcombine.high %v6243_v48, %v6243_v48  ;;  %vm7617_vm0 = vcmp.gt.f32.partialorder %v6244_v45, %v17165_v43  ;;  %vm7618_vm1 = vcmp.gt.f32.partialorder %v6243_v48, %v17167_v25  ;;  %v8256_v38 = vrot.slane %v7680_v7, 7 }
 0x7e9   : > { %v7681_v6 = vsel %vm7617_vm0, %v6244_v45, %v17165_v43  ;;  %v7682_v52 = vsel %vm7618_vm1, %v6243_v48, %v17167_v25  ;;  %v8129_v30 = vsel %vm7617_vm0, %v7942_v41, %v17163_v47  ;;  %v8130_v27 = vsel %vm7618_vm1, %v7887_v16, %v9728_v26 }
 0x7ea   : > { %vm7619_vm2 = vcmp.gt.f32.partialorder %v6245_v18, %v17173_v8  ;;  %v8257_v39 = vrot.slane %v7681_v6, 7  ;;  %v8258_v4 = vrot.slane %v7682_v52, 7  ;;  %vm8384_vm3 = vcmp.gt.f32.partialorder %v6236_v12, %v8256_v38 }
 0x7eb   : > { %v7683_v33 = vsel %vm7619_vm2, %v6245_v18, %v17173_v8  ;;  %v8131_v31 = vsel %vm7619_vm2, %v7943_v60, %v17170_v24  ;;  %v8448_v17 = vsel %vm8384_vm3, %v6236_v12, %v8256_v38  ;;  %v8768_v63 = vrot.slane %v8128_v23, 7 }
 0x7ec   : > { %v8259_v19 = vrot.slane %v7683_v33, 7  ;;  %vm8385_vm4 = vcmp.gt.f32.partialorder %v6244_v45, %v8257_v39  ;;  %vm8386_vm6 = vcmp.gt.f32.partialorder %v6243_v48, %v8258_v4  ;;  %v8769_v43 = vrot.slane %v8129_v30, 7 }
 0x7ed   : > { %v8449_v25 = vsel %vm8385_vm4, %v6244_v45, %v8257_v39  ;;  %v8450_v47 = vsel %vm8386_vm6, %v6243_v48, %v8258_v4  ;;  %v8770_v28 = vrot.slane %v8130_v27, 7  ;;  %v8771_v21 = vrot.slane %v8131_v31, 7 }
 0x7ee   : > { %vm8387_vm8 = vcmp.gt.f32.partialorder %v6245_v18, %v8259_v19  ;;  %v8832_v26 = vsel %vm8384_vm3, %v8710_v1, %v8768_v63  ;;  %v8833_v9 = vsel %vm8385_vm4, %v8648_v20, %v8769_v43  ;;  %v9119_v35 = vrot.slane %v8448_v17, %v15637_v14  ;;  %v18075_v20 = vld [vmem:[#allocation49_spill] sm:$0xff] }
 0x7ef   : > { %v8451_v0 = vsel %vm8387_vm8, %v6245_v18, %v8259_v19  ;;  %v8834_v8 = vsel %vm8386_vm6, %v8711_v34, %v8770_v28  ;;  %v8835_v24 = vsel %vm8387_vm8, %v8655_v50, %v8771_v21  ;;  %v9123_v2 = vrot.slane %v8449_v25, %v15637_v14 }
 0x7f0   : > { %v9127_v56 = vrot.slane %v8450_v47, %v15637_v14  ;;  %v9131_v10 = vrot.slane %v8451_v0, %v15637_v14  ;;  %v9209_v40 = vsel %vm9170_vm5, %v9119_v35, %v9208_v44  ;;  %v9461_v55 = vrot.slane %v8832_v26, %v15637_v14  ;;  %v11446_v47 = vld [vmem:[%s17498_s9] ss:$0 sm:$0xff] }
 0x7f1   : > { %v9210_v15 = vsel %vm9172_vm7, %v9123_v2, %v9209_v40  ;;  %v9465_v51 = vrot.slane %v8833_v9, %v15637_v14  ;;  %v9469_v58 = vrot.slane %v8834_v8, %v15637_v14  ;;  %v9473_v29 = vrot.slane %v8835_v24, %v15637_v14 }
 0x7f2   : > { %v9211_v16 = vsel %vm9174_vm9, %v9127_v56, %v9210_v15  ;;  %9247 = vst [vmem:[%s15966_s13 + $0x37] sm:$0x1] %v9131_v10  ;;  %v9545_v41 = vsel %vm9170_vm5, %v9461_v55, %v9544_v37  ;;  %v5702_v59 = vadd.f32 %v16880_v42, %v5664_v13  ;;  %v17254_v11 = vadd.s32 224, %v18032_v46 }
 0x7f3   : > { %9246 = vst [vmem:[%s15966_s13 + $0x2f] sm:$0xfe] %v9211_v16  ;;  %v9546_v12 = vsel %vm9172_vm7, %v9465_v51, %v9545_v41  ;;  %9567 = vst [vmem:[%s15983_s19 + $0x37] sm:$0x1] %v9473_v29  ;;  %v5617_v60 = vadd.f32 %v18075_v20, %v16800_v3  ;;  %v17263_v50 = vadd.f32 %v16840_v54, %v16842_v32 }
 0x7f4   : > { %v17267_v44 = vadd.f32 %v16834_v5, %v16921_v62  ;;  %v9547_v37 = vsel %vm9174_vm9, %v9469_v58, %v9546_v12  ;;  %v5734_v48 = vmax.f32 %v5702_v59, 0.0  ;;  %v6459_v46 = vadd.s32 1, %v17254_v11 }
 0x7f5   : > { %v7190_v45 = vrot.slane %v17254_v11, %v18035_v57  ;;  %9566 = vst [vmem:[%s15983_s19 + $0x2f] sm:$0xfe] %v9547_v37  ;;  %v7197_v3 = vrot.slane %v17254_v11, %v18036_v53  ;;  %v5665_v1 = vmul.f32 %v16863_v49, %v5617_v60  ;;  %v17279_v54 = vrot.slane %v17254_v11, %v18019_v36 }
 0x7f6   : > { %v6246_v5 = vcombine.high %v5734_v48, %v5734_v48  ;;  %v6253_v32 = vrot.slane %v5734_v48, %v15578_v22  ;;  %v6934_v62 = vrot.slane %v6459_v46, %v18035_v57  ;;  %v6941_v7 = vrot.slane %v6459_v46, %v18036_v53 }
 0x7f7   : > { %v7240_v23 = vrot.slane %v7190_v45, 7  ;;  %v5703_v34 = vadd.f32 %v16880_v42, %v5665_v1  ;;  %v17286_v13 = vrot.slane %v6459_v46, %v18019_v36  ;;  %v17290_v49 = vrot.slane %v17254_v11, %v18021_v61 }
 0x7f8   : > { %v6260_v18 = vrot.slane %v6246_v5, %v15578_v22  ;;  %v6261_v38 = vcombine.high %v6253_v32, %v6253_v32  ;;  %v6532_v6 = vrot.slane %v6253_v32, 7  ;;  %v6984_v52 = vrot.slane %v6934_v62, 7 }
 0x7f9   : > { %v6985_v30 = vrot.slane %v6941_v7, 7  ;;  %v7241_v27 = vrot.slane %v7197_v3, 7  ;;  %v5735_v39 = vmax.f32 %v5703_v34, 0.0  ;;  %v17294_v4 = vrot.slane %v6459_v46, %v18021_v61 }
 0x7fa   : > { %v6262_v33 = vcombine.high %v6260_v18, %v6260_v18  ;;  %v6533_v42 = vrot.slane %v6261_v38, 7  ;;  %v6534_v31 = vrot.slane %v6260_v18, 7  ;;  %vm6660_vm10 = vcmp.gt.f32.partialorder %v6253_v32, %v6532_v6 }
 0x7fb   : > { %v6724_v17 = vsel %vm6660_vm10, %v6253_v32, %v6532_v6  ;;  %v17296_v63 = vsel %vm6660_vm10, %v6984_v52, %v7240_v23  ;;  %v6263_v19 = vcombine.high %v5735_v39, %v5735_v39  ;;  %v6986_v43 = vrot.slane %v17286_v13, 7 }
 0x7fc   : > { %v6535_v25 = vrot.slane %v6262_v33, 7  ;;  %vm17299_vm13 = vcmp.gt.f32.partialorder %v6261_v38, %v6533_v42  ;;  %vm6662_vm14 = vcmp.gt.f32.partialorder %v6260_v18, %v6534_v31  ;;  %v7484_v28 = vrot.slane %v6724_v17, 7 }
 0x7fd   : > { %v6725_v21 = vsel %vm17299_vm13, %v6261_v38, %v6533_v42  ;;  %v6726_v26 = vsel %vm6662_vm14, %v6260_v18, %v6534_v31  ;;  %v7301_v9 = vsel %vm17299_vm13, %v6934_v62, %v7190_v45  ;;  %v6270_v35 = vrot.slane %v5735_v39, %v15578_v22  ;;  %v11445_v62 = vld [vmem:[%s17497_s8] ss:$0 sm:$0xff] }
 0x7fe   : > { %vm17308_vm0 = vcmp.gt.f32.partialorder %v6262_v33, %v6535_v25  ;;  %v17312_v8 = vsel %vm6662_vm14, %v6985_v30, %v7241_v27  ;;  %v7486_v24 = vrot.slane %v6725_v21, 7  ;;  %v7488_v2 = vrot.slane %v6726_v26, 7 }
 0x7ff   : > { %v6727_v56 = vsel %vm17308_vm0, %v6262_v33, %v6535_v25  ;;  %v7303_v10 = vsel %vm17308_vm0, %v6941_v7, %v7197_v3  ;;  %v17318_v40 = vrot.slane %v7484_v28, 2  ;;  %v9730_v55 = vrot.slane %v17296_v63, 9 }
 0x800   : > { %v17321_v15 = vrot.slane %v7486_v24, 2  ;;  %v17323_v51 = vrot.slane %v7488_v2, 2  ;;  %v7490_v58 = vrot.slane %v6727_v56, 7  ;;  %v17325_v29 = vrot.slane %v7301_v9, 9 }
 0x801   : > { %v9732_v16 = vrot.slane %v17312_v8, 9  ;;  %v6277_v41 = vrot.slane %v6263_v19, %v15578_v22  ;;  %v6278_v59 = vcombine.high %v6270_v35, %v6270_v35  ;;  %v6536_v12 = vrot.slane %v6270_v35, 7 }
 0x802   : > { %v17329_v20 = vrot.slane %v7303_v10, 9  ;;  %v6987_v60 = vrot.slane %v17294_v4, 7  ;;  %v7242_v37 = vrot.slane %v17279_v54, 7  ;;  %v7243_v48 = vrot.slane %v17290_v49, 7 }
 0x803   : > { %v6279_v46 = vcombine.high %v6277_v41, %v6277_v41  ;;  %v6537_v45 = vrot.slane %v6278_v59, 7  ;;  %v6538_v3 = vrot.slane %v6277_v41, 7  ;;  %vm6664_vm1 = vcmp.gt.f32.partialorder %v6270_v35, %v6536_v12 }
 0x804   : > { %v17334_v1 = vrot.slane %v7490_v58, 2  ;;  %v6728_v5 = vsel %vm6664_vm1, %v6270_v35, %v6536_v12  ;;  %v17336_v32 = vsel %vm6664_vm1, %v6986_v43, %v7242_v37  ;;  %v5666_v7 = vmul.f32 %v11445_v62, %v17263_v50 }
 0x805   : > { %v6539_v23 = vrot.slane %v6279_v46, 7  ;;  %vm17342_vm2 = vcmp.gt.f32.partialorder %v6278_v59, %v6537_v45  ;;  %vm6666_vm3 = vcmp.gt.f32.partialorder %v6277_v41, %v6538_v3  ;;  %v7492_v18 = vrot.slane %v6728_v5, 7 }
 0x806   : > { %v6729_v38 = vsel %vm17342_vm2, %v6278_v59, %v6537_v45  ;;  %v6730_v6 = vsel %vm6666_vm3, %v6277_v41, %v6538_v3  ;;  %v7305_v52 = vsel %vm17342_vm2, %v17286_v13, %v17279_v54  ;;  %v6467_v30 = vadd.s32 16, %v17254_v11 }
 0x807   : > { %vm17353_vm4 = vcmp.gt.f32.partialorder %v6279_v46, %v6539_v23  ;;  %v17357_v27 = vsel %vm6666_vm3, %v6987_v60, %v7243_v48  ;;  %v7494_v39 = vrot.slane %v6729_v38, 7  ;;  %v7496_v33 = vrot.slane %v6730_v6, 7 }
 0x808   : > { %v6731_v42 = vsel %vm17353_vm4, %v6279_v46, %v6539_v23  ;;  %v7307_v31 = vsel %vm17353_vm4, %v17294_v4, %v17290_v49  ;;  %v17365_v17 = vrot.slane %v7492_v18, 2  ;;  %v9734_v11 = vrot.slane %v17336_v32, 9 }
 0x809   : > { %v17368_v54 = vrot.slane %v7494_v39, 2  ;;  %v17370_v13 = vrot.slane %v7496_v33, 2  ;;  %v7498_v19 = vrot.slane %v6731_v42, 7  ;;  %v17372_v43 = vrot.slane %v7305_v52, 9 }
 0x80a   : > { %v9736_v25 = vrot.slane %v17357_v27, 9  ;;  %v5704_v28 = vadd.f32 %v11446_v47, %v5666_v7  ;;  %v6475_v21 = vadd.s32 1, %v6467_v30  ;;  %v7894_v49 = vrot.slane %v6467_v30, %v18035_v57 }
 0x80b   : > { %v17379_v4 = vrot.slane %v7307_v31, 9  ;;  %v7901_v26 = vrot.slane %v6467_v30, %v18036_v53  ;;  %v5667_v9 = vmul.f32 %v11445_v62, %v17267_v44  ;;  %v17384_v35 = vrot.slane %v6467_v30, %v18019_v36 }
 0x80c   : > { %v17386_v0 = vrot.slane %v7498_v19, 2  ;;  %v5736_v24 = vmax.f32 %v5704_v28, 0.0  ;;  %v8662_v2 = vrot.slane %v6475_v21, %v18035_v57  ;;  %v8669_v56 = vrot.slane %v6475_v21, %v18036_v53 }
 0x80d   : > { %v7944_v10 = vrot.slane %v7894_v49, 1  ;;  %v7945_v58 = vrot.slane %v7901_v26, 1  ;;  %v5705_v41 = vadd.f32 %v11446_v47, %v5667_v9  ;;  %v17391_v59 = vrot.slane %v6467_v30, %v18021_v61 }
 0x80e   : > { %v6280_v12 = vcombine.high %v5736_v24, %v5736_v24  ;;  %v6287_v60 = vrot.slane %v5736_v24, %v15578_v22  ;;  %v8712_v44 = vrot.slane %v8662_v2, 7  ;;  %v7946_v37 = vrot.slane %v17384_v35, 1 }
 0x80f   : > { %v8713_v48 = vrot.slane %v8669_v56, 7  ;;  %v5737_v46 = vmax.f32 %v5705_v41, 0.0  ;;  %v7947_v45 = vrot.slane %v17391_v59, 1  ;;  %v17397_v57 = vrot.slane %v6475_v21, %v18019_v36 }
 0x810   : > { %v6294_v53 = vrot.slane %v6280_v12, %v15578_v22  ;;  %v6295_v3 = vcombine.high %v6287_v60, %v6287_v60  ;;  %vm7620_vm6 = vcmp.gt.f32.partialorder %v6287_v60, %v17318_v40  ;;  %v17402_v5 = vrot.slane %v6475_v21, %v18021_v61 }
 0x811   : > { %v7684_v62 = vsel %vm7620_vm6, %v6287_v60, %v17318_v40  ;;  %v8132_v7 = vsel %vm7620_vm6, %v7894_v49, %v9730_v55  ;;  %v6297_v23 = vcombine.high %v5737_v46, %v5737_v46  ;;  %v17408_v34 = vrot.slane %v5737_v46, %v15578_v22 }
 0x812   : > { %v6296_v18 = vcombine.high %v6294_v53, %v6294_v53  ;;  %vm7621_vm8 = vcmp.gt.f32.partialorder %v6295_v3, %v17321_v15  ;;  %vm7622_vm10 = vcmp.gt.f32.partialorder %v6294_v53, %v17323_v51  ;;  %v8260_v36 = vrot.slane %v7684_v62, 7 }
 0x813   : > { %v7685_v38 = vsel %vm7621_vm8, %v6295_v3, %v17321_v15  ;;  %v7686_v61 = vsel %vm7622_vm10, %v6294_v53, %v17323_v51  ;;  %v8133_v6 = vsel %vm7621_vm8, %v7944_v10, %v17325_v29  ;;  %v8134_v63 = vsel %vm7622_vm10, %v7901_v26, %v9732_v16 }
 0x814   : > { %vm7623_vm13 = vcmp.gt.f32.partialorder %v6296_v18, %v17334_v1  ;;  %v8261_v40 = vrot.slane %v7685_v38, 7  ;;  %v8262_v55 = vrot.slane %v7686_v61, 7  ;;  %vm8388_vm14 = vcmp.gt.f32.partialorder %v6287_v60, %v8260_v36 }
 0x815   : > { %v7687_v52 = vsel %vm7623_vm13, %v6296_v18, %v17334_v1  ;;  %v8135_v30 = vsel %vm7623_vm13, %v7945_v58, %v17329_v20  ;;  %v8452_v50 = vsel %vm8388_vm14, %v6287_v60, %v8260_v36  ;;  %v8772_v39 = vrot.slane %v8132_v7, 7 }
 0x816   : > { %v8263_v33 = vrot.slane %v7687_v52, 7  ;;  %vm8389_vm0 = vcmp.gt.f32.partialorder %v6295_v3, %v8261_v40  ;;  %vm8390_vm1 = vcmp.gt.f32.partialorder %v6294_v53, %v8262_v55  ;;  %v8773_v15 = vrot.slane %v8133_v6, 7 }
 0x817   : > { %v8453_v51 = vsel %vm8389_vm0, %v6295_v3, %v8261_v40  ;;  %v8454_v29 = vsel %vm8390_vm1, %v6294_v53, %v8262_v55  ;;  %v8774_v42 = vrot.slane %v8134_v63, 7  ;;  %v8775_v8 = vrot.slane %v8135_v30, 7 }
 0x818   : > { %vm8391_vm2 = vcmp.gt.f32.partialorder %v6296_v18, %v8263_v33  ;;  %v8836_v16 = vsel %vm8388_vm14, %v8712_v44, %v8772_v39  ;;  %v8837_v31 = vsel %vm8389_vm0, %v8662_v2, %v8773_v15  ;;  %v9135_v19 = vrot.slane %v8452_v50, %v15637_v14 }
 0x819   : > { %v8455_v47 = vsel %vm8391_vm2, %v6296_v18, %v8263_v33  ;;  %v8838_v28 = vsel %vm8390_vm1, %v8713_v48, %v8774_v42  ;;  %v17421_v1 = vsel %vm8391_vm2, %v8669_v56, %v8775_v8  ;;  %v9139_v20 = vrot.slane %v8453_v51, %v15637_v14 }
 0x81a   : > { %v9143_v21 = vrot.slane %v8454_v29, %v15637_v14  ;;  %v9147_v49 = vrot.slane %v8455_v47, %v15637_v14  ;;  %v9477_v26 = vrot.slane %v8836_v16, %v15637_v14  ;;  %v9481_v9 = vrot.slane %v8837_v31, %v15637_v14 }
 0x81b   : > { %v9212_v24 = vsel %vm9164_vm11, %v9139_v20, %v9135_v19  ;;  %v9485_v2 = vrot.slane %v8838_v28, %v15637_v14  ;;  %v9489_v10 = vrot.slane %v17421_v1, %v15637_v14  ;;  %v6311_v56 = vrot.slane %v6297_v23, %v15578_v22 }
 0x81c   : > { %v9213_v58 = vsel %vm9166_vm12, %v9143_v21, %v9212_v24  ;;  %v9548_v41 = vsel %vm9164_vm11, %v9481_v9, %v9477_v26  ;;  %v6312_v12 = vcombine.high %v17408_v34, %v17408_v34  ;;  %vm7624_vm3 = vcmp.gt.f32.partialorder %v17408_v34, %v17365_v17 }
 0x81d   : > { %v9549_v60 = vsel %vm9166_vm12, %v9485_v2, %v9548_v41  ;;  %v6313_v44 = vcombine.high %v6311_v56, %v6311_v56  ;;  %vm7626_vm4 = vcmp.gt.f32.partialorder %v6311_v56, %v17370_v13  ;;  %v7688_v48 = vsel %vm7624_vm3, %v17408_v34, %v17365_v17 }
 0x81e   : > { %vm7625_vm6 = vcmp.gt.f32.partialorder %v6312_v12, %v17368_v54  ;;  %v7690_v22 = vsel %vm7626_vm4, %v6311_v56, %v17370_v13  ;;  %v8136_v46 = vsel %vm7624_vm3, %v17384_v35, %v9734_v11  ;;  %v8138_v53 = vsel %vm7626_vm4, %v17391_v59, %v9736_v25 }
 0x81f   : > { %vm7627_vm11 = vcmp.gt.f32.partialorder %v6313_v44, %v17386_v0  ;;  %v7689_v3 = vsel %vm7625_vm6, %v6312_v12, %v17368_v54  ;;  %v8137_v17 = vsel %vm7625_vm6, %v7946_v37, %v17372_v43  ;;  %v8264_v62 = vrot.slane %v7688_v48, 7 }
 0x820   : > { %v7691_v7 = vsel %vm7627_vm11, %v6313_v44, %v17386_v0  ;;  %v8139_v32 = vsel %vm7627_vm11, %v7947_v45, %v17379_v4  ;;  %v8265_v11 = vrot.slane %v7689_v3, 7  ;;  %v8266_v13 = vrot.slane %v7690_v22, 7 }
 0x821   : > { %v8267_v27 = vrot.slane %v7691_v7, 7  ;;  %vm8392_vm12 = vcmp.gt.f32.partialorder %v17408_v34, %v8264_v62  ;;  %v8714_v25 = vrot.slane %v17397_v57, 7  ;;  %v8715_v54 = vrot.slane %v17402_v5, 7 }
 0x822   : > { %vm8393_vm8 = vcmp.gt.f32.partialorder %v6312_v12, %v8265_v11  ;;  %vm8394_vm10 = vcmp.gt.f32.partialorder %v6311_v56, %v8266_v13  ;;  %v8456_v43 = vsel %vm8392_vm12, %v17408_v34, %v8264_v62  ;;  %v8776_v35 = vrot.slane %v8136_v46, 7 }
 0x823   : > { %vm8395_vm13 = vcmp.gt.f32.partialorder %v6313_v44, %v8267_v27  ;;  %v8457_v0 = vsel %vm8393_vm8, %v6312_v12, %v8265_v11  ;;  %v8458_v37 = vsel %vm8394_vm10, %v6311_v56, %v8266_v13  ;;  %v8777_v23 = vrot.slane %v8137_v17, 7 }
 0x824   : > { %v8459_v59 = vsel %vm8395_vm13, %v6313_v44, %v8267_v27  ;;  %v8778_v4 = vrot.slane %v8138_v53, 7  ;;  %v8779_v45 = vrot.slane %v8139_v32, 7  ;;  %v8840_v18 = vsel %vm8392_vm12, %v8714_v25, %v8776_v35 }
 0x825   : > { %v8841_v36 = vsel %vm8393_vm8, %v17397_v57, %v8777_v23  ;;  %v9151_v38 = vrot.slane %v8456_v43, %v15637_v14  ;;  %v9155_v61 = vrot.slane %v8457_v0, %v15637_v14  ;;  %v9159_v6 = vrot.slane %v8458_v37, %v15637_v14 }
 0x826   : > { %v8842_v34 = vsel %vm8394_vm10, %v8715_v54, %v8778_v4  ;;  %v8843_v63 = vsel %vm8395_vm13, %v17402_v5, %v8779_v45  ;;  %v9163_v40 = vrot.slane %v8459_v59, %v15637_v14  ;;  %v9214_v55 = vsel %vm9168_vm15, %v9147_v49, %v9213_v58 }
 0x827   : > { %v9215_v52 = vsel %vm9170_vm5, %v9151_v38, %v9214_v55  ;;  %v9493_v57 = vrot.slane %v8840_v18, %v15637_v14  ;;  %v9497_v30 = vrot.slane %v8841_v36, %v15637_v14  ;;  %v9501_v50 = vrot.slane %v8842_v34, %v15637_v14 }
 0x828   : > { %v9216_v39 = vsel %vm9172_vm7, %v9155_v61, %v9215_v52  ;;  %9249 = vst [vmem:[%s15966_s13 + $0x3f] sm:$0x1] %v9163_v40  ;;  %v9505_v33 = vrot.slane %v8843_v63, %v15637_v14  ;;  %v9550_v5 = vsel %vm9168_vm15, %v9489_v10, %v9549_v60 }
 0x829   : > { %v9217_v15 = vsel %vm9174_vm9, %v9159_v6, %v9216_v39  ;;  %v9551_v51 = vsel %vm9170_vm5, %v9493_v57, %v9550_v5 }
 0x82a   : > { %9248 = vst [vmem:[%s15966_s13 + $0x37] sm:$0xfe] %v9217_v15  ;;  %v9552_v29 = vsel %vm9172_vm7, %v9497_v30, %v9551_v51  ;;  %9569 = vst [vmem:[%s15983_s19 + $0x3f] sm:$0x1] %v9505_v33 }
 0x82b   : > { %v9553_v42 = vsel %vm9174_vm9, %v9501_v50, %v9552_v29 }
 0x82c   : > { %9568 = vst [vmem:[%s15983_s19 + $0x37] sm:$0xfe] %v9553_v42 }
 0x82d PF: > { %s22_s17 = sadd.s32 1, %s11453_s17  }
 0x82e   : > { %p19_p4 = scmp.ge.s32.totalorder %s22_s17, 4  }
 0x830   :  { %21 = sbr.rel (!%p19_p4) target bundleno = 1 (0x1), region = 103 }

</bundles_post_ra>
